<compile_context>
chip_gen: v5e
topology: v5e:2x2
jax: 0.10.0
libtpu: 0.0.40
codegen_flags: <defaults>
</compile_context>

<pallas_src>
import functools

import jax
import jax.numpy as jnp
import numpy as np
from jax.experimental import pallas as pl
from jax.experimental.pallas import tpu as pltpu


def _attention_lbsa_vp_kernel(x_ref, w_ref, b_ref, c_ref, m_ref, p_ref, a_ref):
    # Per-grid-step (BT batch rows):
    #   x_ref: (BT, S, F) bf16    w_ref: (F, F) bf16
    #   b_ref: (1, F) f32         c_ref: (1, 1, F) f32
    #   m_ref: (BT, S) bf16 additive mask bias (0 = valid, -1e30 = masked)
    #   p_ref: (BT, F) f32        a_ref: (BT, S) f32
    BT, S, F = x_ref.shape
    BS = BT * S

    x3 = x_ref[...]                                   # (BT, S, F) bf16
    x2 = x3.reshape(BS, F)                            # leading-dim merge (layout preserving)

    # eij = tanh(x @ W + b) : one big bf16 MXU matmul, f32 accumulate, f32 activations.
    h = jnp.dot(x2, w_ref[...], preferred_element_type=jnp.float32)      # (BS, F) f32
    eij = jnp.tanh(h + b_ref[...])                                        # (BS, F) f32
    eij3 = eij.reshape(BT, S, F)                                          # (BT, S, F)

    # scores[b, s] = sum_f eij[b, s, f] * ctx[f]  — VPU multiply + XLU lane reduce
    scores = jnp.sum(eij3 * c_ref[...], axis=-1)                          # (BT, S) f32
    scores = scores + m_ref[...].astype(jnp.float32)                      # masked -> ~-1e30

    # softmax over steps (lane axis), all f32
    smax = jnp.max(scores, axis=-1, keepdims=True)                        # (BT, 1)
    ex = jnp.exp(scores - smax)
    a = ex / jnp.sum(ex, axis=-1, keepdims=True)                          # (BT, S)
    a_ref[...] = a

    # index = argmax(a) (first occurrence, torch semantics); p[b] = a[b, idx] * x[b, idx, :]
    iota = jax.lax.broadcasted_iota(jnp.int32, (BT, S), 1)
    amax = jnp.max(a, axis=-1, keepdims=True)                             # (BT, 1) == a[b, idx]
    cand = jnp.where(a == amax, iota, jnp.int32(S))
    idx = jnp.min(cand, axis=-1, keepdims=True)                           # (BT, 1)

    # Selection matmul: sel2[b, b*S + idx[b]] = amax[b], 0 elsewhere; p = sel2 @ x2.
    # Keeps the row-gather on the MXU (no lane<->sublane relayout on VPU/XLU).
    lane = jax.lax.broadcasted_iota(jnp.int32, (BT, BS), 1)
    row = jax.lax.broadcasted_iota(jnp.int32, (BT, BS), 0)
    sel2 = jnp.where(lane == row * S + idx, amax, jnp.float32(0.0))       # (BT, BS) f32
    p_ref[...] = jnp.dot(sel2, x2.astype(jnp.float32),
                         preferred_element_type=jnp.float32)              # (BT, F)


@functools.partial(jax.jit, static_argnames=("block_b",))
def attention_lbsa_vp(x, weight, bias, context_vector, mask, *, block_b=32):
    """x: (B, S, F), weight: (F, F), bias: (F,), context_vector: (F, 1), mask: (B, S) bool."""
    B, S, F = x.shape
    if S != F:
        raise ValueError("Attention_LBSA_VP requires step_dim == feature_dim (p buffer shape).")

    BT = min(block_b, B)
    n_blocks = -(-B // BT)            # cdiv
    Bp = n_blocks * BT

    x_b = x.astype(jnp.bfloat16)
    # Additive mask bias: 0 where valid, -1e30 where masked (finite -> no NaN on empty rows).
    m_add = jnp.where(mask, 0.0, -1e30).astype(jnp.bfloat16)
    if Bp != B:
        pad = Bp - B
        x_b = jnp.pad(x_b, ((0, pad), (0, 0), (0, 0)))
        m_add = jnp.pad(m_add, ((0, pad), (0, 0)))     # padded rows valid -> finite garbage, sliced off

    w_b = weight.astype(jnp.bfloat16)
    bias_row = bias.reshape(1, F).astype(jnp.float32)
    ctx_row = context_vector.reshape(1, 1, F).astype(jnp.float32)

    cost = pl.CostEstimate(
        flops=2 * Bp * S * F * F + 4 * Bp * S * F + 2 * Bp * BT * S * F,
        transcendentals=Bp * S * F + Bp * S,
        bytes_accessed=(x_b.size * 2 + w_b.size * 2 + m_add.size * 2
                        + bias_row.size * 4 + ctx_row.size * 4
                        + Bp * F * 4 + Bp * S * 4),
    )

    grid_spec = pltpu.PrefetchScalarGridSpec(
        num_scalar_prefetch=0,
        grid=(n_blocks,),
        in_specs=[
            pl.BlockSpec((BT, S, F), lambda i: (i, 0, 0)),   # x (bf16)
            pl.BlockSpec((F, F), lambda i: (0, 0)),          # weight (bf16, constant index)
            pl.BlockSpec((1, F), lambda i: (0, 0)),          # bias (f32)
            pl.BlockSpec((1, 1, F), lambda i: (0, 0, 0)),    # context vector row (f32)
            pl.BlockSpec((BT, S), lambda i: (i, 0)),         # additive mask bias (bf16)
        ],
        out_specs=[
            pl.BlockSpec((BT, F), lambda i: (i, 0)),         # p
            pl.BlockSpec((BT, S), lambda i: (i, 0)),         # a
        ],
    )

    p, a = pl.pallas_call(
        _attention_lbsa_vp_kernel,
        out_shape=(
            jax.ShapeDtypeStruct((Bp, F), jnp.float32),
            jax.ShapeDtypeStruct((Bp, S), jnp.float32),
        ),
        grid_spec=grid_spec,
        compiler_params=pltpu.CompilerParams(dimension_semantics=("parallel",)),
        cost_estimate=cost,
    )(x_b, w_b, bias_row, ctx_row, m_add)
    return p[:B], a[:B]


def _reference(x, weight, bias, context_vector, mask):
    """Pure-JAX replica of the PyTorch forward.  Mirrors the kernel's precision
    choices (bf16 x/weight into the feature matmul, f32 everywhere else) so the
    comparison tolerance can stay tight."""
    B, S, F = x.shape
    xb = x.astype(jnp.bfloat16)
    x32 = xb.astype(jnp.float32)                      # what the kernel "sees" of x
    eij = jnp.tanh(
        jnp.dot(xb.reshape(-1, F), weight.astype(jnp.bfloat16),
                preferred_element_type=jnp.float32)
        + bias.astype(jnp.float32))
    e = (eij @ context_vector.astype(jnp.float32)).reshape(B, S)
    e = jnp.where(mask, e, -jnp.inf)
    a = jax.nn.softmax(e, axis=1)
    weighted = x32 * a[..., None]
    idx = jnp.argmax(a, axis=1)
    p = jnp.take_along_axis(weighted, idx[:, None, None], axis=1)[:, 0, :]
    return p, a


if __name__ == "__main__":
    B = 64           # batch: 2 grid steps of BT=32 -> both v7x TensorCores get work
    S = 32           # step_dim
    F = 32           # feature_dim (must equal step_dim for the VP variant)

    key = jax.random.PRNGKey(0)
    kx, kw, kc, kl = jax.random.split(key, 4)

    x = jax.random.normal(kx, (B, S, F), dtype=jnp.float32)

    # Deterministic parameter init mirroring nn.init.xavier_uniform_ / zeros.
    bound_w = float(np.sqrt(6.0 / (F + F)))
    weight = jax.random.uniform(kw, (F, F), jnp.float32, -bound_w, bound_w)
    bound_c = float(np.sqrt(6.0 / (F + 1)))
    context_vector = jax.random.uniform(kc, (F, 1), jnp.float32, -bound_c, bound_c)
    bias = jnp.zeros((F,), jnp.float32)   # module inits bias to zeros

    # Valid-length mask (at least one valid step per row, as the torch code assumes).
    lengths = jax.random.randint(kl, (B,), 1, S + 1)
    mask = jnp.arange(S)[None, :] < lengths[:, None]   # (B, S) bool

    p, a = attention_lbsa_vp(x, weight, bias, context_vector, mask)
    jax.block_until_ready((p, a))

    p_ref, a_ref = _reference(x, weight, bias, context_vector, mask)
    np.testing.assert_allclose(np.asarray(a), np.asarray(a_ref), rtol=5e-4, atol=5e-4)
    np.testing.assert_allclose(np.asarray(p), np.asarray(p_ref), rtol=5e-4, atol=5e-4)

    print("KERNEL_OK")
</pallas_src>

<mosaic_0001>
module attributes {stable_mosaic.version = 11 : i64} {
  func.func @_attention_lbsa_vp_kernel(%arg0: i32, %arg1: memref<32x32x32xbf16, #tpu.memory_space<vmem>>, %arg2: memref<32x32xbf16, #tpu.memory_space<vmem>>, %arg3: memref<1x32xf32, #tpu.memory_space<vmem>>, %arg4: memref<1x1x32xf32, #tpu.memory_space<vmem>>, %arg5: memref<32x32xbf16, #tpu.memory_space<vmem>>, %arg6: memref<32x32xf32, #tpu.memory_space<vmem>>, %arg7: memref<32x32xf32, #tpu.memory_space<vmem>>) attributes {dimension_semantics = [#tpu.dimension_semantics<parallel>], iteration_bounds = array<i64: 2>, scalar_prefetch = 0 : i64, scratch_operands = 0 : i64, tpu.core_type = #tpu.core_type<tc>, window_params = [{transform_indices = @transform_0, window_bounds = array<i64: 32, 32, 32>}, {pipeline_mode = #tpu.pipeline_mode<synchronous>, transform_indices = @transform_1, window_bounds = array<i64: 32, 32>}, {pipeline_mode = #tpu.pipeline_mode<synchronous>, transform_indices = @transform_2, window_bounds = array<i64: 1, 32>}, {pipeline_mode = #tpu.pipeline_mode<synchronous>, transform_indices = @transform_3, window_bounds = array<i64: 1, 1, 32>}, {transform_indices = @transform_4, window_bounds = array<i64: 32, 32>}, {transform_indices = @transform_5, window_bounds = array<i64: 32, 32>}, {transform_indices = @transform_6, window_bounds = array<i64: 32, 32>}]} {
    %c0 = arith.constant 0 : index
    %c0_0 = arith.constant 0 : index
    %c0_1 = arith.constant 0 : index
    %0 = vector.load %arg1[%c0, %c0_0, %c0_1] : memref<32x32x32xbf16, #tpu.memory_space<vmem>>, vector<32x32x32xbf16>
    %1 = vector.shape_cast %0 : vector<32x32x32xbf16> to vector<1024x32xbf16>
    %c0_2 = arith.constant 0 : index
    %c0_3 = arith.constant 0 : index
    %2 = vector.load %arg2[%c0_2, %c0_3] : memref<32x32xbf16, #tpu.memory_space<vmem>>, vector<32x32xbf16>
    %cst = arith.constant dense<0.000000e+00> : vector<1024x32xf32>
    %3 = tpu.matmul %1, %2, %cst {dimension_numbers = #tpu.dot_dimension_numbers<[1], [0], [0], [1], [0, 0, 1, 1], [], []>} : vector<1024x32xbf16>, vector<32x32xbf16>, vector<1024x32xf32> -> vector<1024x32xf32>
    %c0_4 = arith.constant 0 : index
    %c0_5 = arith.constant 0 : index
    %4 = vector.load %arg3[%c0_4, %c0_5] : memref<1x32xf32, #tpu.memory_space<vmem>>, vector<1x32xf32>
    %5 = vector.broadcast %4 : vector<1x32xf32> to vector<1024x32xf32>
    %6 = arith.addf %3, %5 : vector<1024x32xf32>
    %7 = math.tanh %6 : vector<1024x32xf32>
    %8 = vector.shape_cast %7 : vector<1024x32xf32> to vector<32x32x32xf32>
    %c0_6 = arith.constant 0 : index
    %c0_7 = arith.constant 0 : index
    %c0_8 = arith.constant 0 : index
    %9 = vector.load %arg4[%c0_6, %c0_7, %c0_8] : memref<1x1x32xf32, #tpu.memory_space<vmem>>, vector<1x1x32xf32>
    %10 = vector.broadcast %9 : vector<1x1x32xf32> to vector<32x32x32xf32>
    %11 = arith.mulf %8, %10 : vector<32x32x32xf32>
    %cst_9 = arith.constant dense<0.000000e+00> : vector<32x32xf32>
    %12 = vector.multi_reduction <add>, %11, %cst_9 [2] : vector<32x32x32xf32> to vector<32x32xf32>
    %c0_10 = arith.constant 0 : index
    %c0_11 = arith.constant 0 : index
    %13 = vector.load %arg5[%c0_10, %c0_11] : memref<32x32xbf16, #tpu.memory_space<vmem>>, vector<32x32xbf16>
    %14 = arith.extf %13 : vector<32x32xbf16> to vector<32x32xf32>
    %15 = arith.addf %12, %14 : vector<32x32xf32>
    %cst_12 = arith.constant dense<0xFF800000> : vector<32xf32>
    %16 = vector.multi_reduction <maximumf>, %15, %cst_12 [1] : vector<32x32xf32> to vector<32xf32>
    %17 = vector.shape_cast %16 : vector<32xf32> to vector<32x1xf32>
    %18 = vector.broadcast %17 : vector<32x1xf32> to vector<32x32xf32>
    %19 = arith.subf %15, %18 : vector<32x32xf32>
    %20 = math.exp %19 : vector<32x32xf32>
    %cst_13 = arith.constant dense<0.000000e+00> : vector<32xf32>
    %21 = vector.multi_reduction <add>, %20, %cst_13 [1] : vector<32x32xf32> to vector<32xf32>
    %22 = vector.shape_cast %21 : vector<32xf32> to vector<32x1xf32>
    %23 = vector.broadcast %22 : vector<32x1xf32> to vector<32x32xf32>
    %24 = arith.divf %20, %23 : vector<32x32xf32>
    %c0_14 = arith.constant 0 : index
    %c0_15 = arith.constant 0 : index
    %25 = vector.load %arg7[%c0_14, %c0_15] : memref<32x32xf32, #tpu.memory_space<vmem>>, vector<32x32xf32>
    tpu.vector_store %arg7[%c0_14, %c0_15], %24 {strides = array<i32>} : memref<32x32xf32, #tpu.memory_space<vmem>>, vector<32x32xf32>,
    %26 = tpu.iota {dimensions = array<i32: 1>} : vector<32x32xi32>
    %cst_16 = arith.constant dense<0xFF800000> : vector<32xf32>
    %27 = vector.multi_reduction <maximumf>, %24, %cst_16 [1] : vector<32x32xf32> to vector<32xf32>
    %28 = vector.shape_cast %27 : vector<32xf32> to vector<32x1xf32>
    %29 = vector.broadcast %28 : vector<32x1xf32> to vector<32x32xf32>
    %30 = arith.cmpf oeq, %24, %29 : vector<32x32xf32>
    %c32_i32 = arith.constant 32 : i32
    %31 = vector.broadcast %c32_i32 : i32 to vector<32x32xi32>
    %32 = arith.select %30, %26, %31 : vector<32x32xi1>, vector<32x32xi32>
    %cst_17 = arith.constant dense<2147483647> : vector<32xi32>
    %33 = vector.multi_reduction <minsi>, %32, %cst_17 [1] : vector<32x32xi32> to vector<32xi32>
    %34 = vector.shape_cast %33 : vector<32xi32> to vector<32x1xi32>
    %35 = tpu.iota {dimensions = array<i32: 1>} : vector<32x1024xi32>
    %36 = tpu.iota {dimensions = array<i32: 0>} : vector<32x1024xi32>
    %c32_i32_18 = arith.constant 32 : i32
    %37 = vector.broadcast %c32_i32_18 : i32 to vector<32x1024xi32>
    %38 = arith.muli %36, %37 : vector<32x1024xi32>
    %39 = vector.broadcast %34 : vector<32x1xi32> to vector<32x1024xi32>
    %40 = arith.addi %38, %39 : vector<32x1024xi32>
    %41 = arith.cmpi eq, %35, %40 : vector<32x1024xi32>
    %cst_19 = arith.constant 0.000000e+00 : f32
    %42 = vector.shape_cast %28 : vector<32x1xf32> to vector<32x1xf32>
    %43 = vector.broadcast %42 : vector<32x1xf32> to vector<32x1024xf32>
    %44 = vector.broadcast %cst_19 : f32 to vector<32x1024xf32>
    %45 = arith.select %41, %43, %44 : vector<32x1024xi1>, vector<32x1024xf32>
    %46 = arith.extf %1 : vector<1024x32xbf16> to vector<1024x32xf32>
    %cst_20 = arith.constant dense<0.000000e+00> : vector<32x32xf32>
    %47 = tpu.matmul %45, %46, %cst_20 {dimension_numbers = #tpu.dot_dimension_numbers<[1], [0], [0], [1], [0, 0, 1, 1], [], []>} : vector<32x1024xf32>, vector<1024x32xf32>, vector<32x32xf32> -> vector<32x32xf32>
    %c0_21 = arith.constant 0 : index
    %c0_22 = arith.constant 0 : index
    %48 = vector.load %arg6[%c0_21, %c0_22] : memref<32x32xf32, #tpu.memory_space<vmem>>, vector<32x32xf32>
    tpu.vector_store %arg6[%c0_21, %c0_22], %47 {strides = array<i32>} : memref<32x32xf32, #tpu.memory_space<vmem>>, vector<32x32xf32>,
    return
  }
  func.func @transform_0(%arg0: i32) -> (i32, i32, i32) {
    %c0_i32 = arith.constant 0 : i32
    %c0_i32_0 = arith.constant 0 : i32
    %c0_i32_1 = arith.constant 0 : i32
    return %arg0, %c0_i32, %c0_i32_0 : i32, i32, i32
  }
  func.func @transform_1(%arg0: i32) -> (i32, i32) {
    %c0_i32 = arith.constant 0 : i32
    %c0_i32_0 = arith.constant 0 : i32
    %c0_i32_1 = arith.constant 0 : i32
    return %c0_i32, %c0_i32_0 : i32, i32
  }
  func.func @transform_2(%arg0: i32) -> (i32, i32) {
    %c0_i32 = arith.constant 0 : i32
    %c0_i32_0 = arith.constant 0 : i32
    %c0_i32_1 = arith.constant 0 : i32
    return %c0_i32, %c0_i32_0 : i32, i32
  }
  func.func @transform_3(%arg0: i32) -> (i32, i32, i32) {
    %c0_i32 = arith.constant 0 : i32
    %c0_i32_0 = arith.constant 0 : i32
    %c0_i32_1 = arith.constant 0 : i32
    %c0_i32_2 = arith.constant 0 : i32
    return %c0_i32, %c0_i32_0, %c0_i32_1 : i32, i32, i32
  }
  func.func @transform_4(%arg0: i32) -> (i32, i32) {
    %c0_i32 = arith.constant 0 : i32
    %c0_i32_0 = arith.constant 0 : i32
    return %arg0, %c0_i32 : i32, i32
  }
  func.func @transform_5(%arg0: i32) -> (i32, i32) {
    %c0_i32 = arith.constant 0 : i32
    %c0_i32_0 = arith.constant 0 : i32
    return %arg0, %c0_i32 : i32, i32
  }
  func.func @transform_6(%arg0: i32) -> (i32, i32) {
    %c0_i32 = arith.constant 0 : i32
    %c0_i32_0 = arith.constant 0 : i32
    return %arg0, %c0_i32 : i32, i32
  }
}

</mosaic_0001>

<bundles_post_ra>
// kernel: attention_lbsa_vp.1
= control target key start
LH: loop header
LB: loop body
LE: loop exit
PB: predicated region body
PF: predicated region fallthrough
CT: control target
= control target key end

     0   :  { %s9524_s21 = smov 0   ;;  %s15832_s0 = inlined_call_operand.vmem [shape: bf16[64,32,32], index: 0, kind: input, shape index: {}]   ;;  %s15833_s1 = inlined_call_operand.vmem [shape: bf16[32,32], index: 1, kind: input, shape index: {}]   ;;  %s15834_s2 = inlined_call_operand.vmem [shape: f32[1,32], index: 2, kind: input, shape index: {}]   ;;  %s15835_s3 = inlined_call_operand.vmem [shape: f32[1,1,32], index: 3, kind: input, shape index: {}]   ;;  %s15836_s4 = inlined_call_operand.vmem [shape: bf16[64,32], index: 4, kind: input, shape index: {}]   ;;  %s15837_s5 = inlined_call_operand.vmem [shape: f32[64,32], index: 5, kind: output, shape index: {0}]   ;;  %s15838_s6 = inlined_call_operand.vmem [shape: f32[64,32], index: 6, kind: output, shape index: {1}]  }
   0x1 LB: > { %s8046_s22 = sadd.s32 4294967295, %s9486_s21   ;;  %p8050_p0 = scmp.ge.s32.totalorder %s9486_s21, 1  ;;  %s9486_s21 = sphi %s9524_s21, %s17_s21  }
   0x2   : > { %p228_p1 = scmp.lt.s32.totalorder %s9486_s21, 3 }
   0x4   : > { %p229_p2 = pnand %p8050_p0, %p228_p1 }
   0x6   : > { %232 = sbr.rel (%p229_p2) target bundleno = 3957 (0xf75), region = 40 }
   0xb   : > { %v8488_v0 = vld [vmem:[%s15833_s1 + $0x8] sm:$0xff]  ;;  %v15839_v1 = vlaneseq  ;;  %s8051_s25 = sshll.u32 %s8046_s22, 5  ;;  %s8054_s26 = sshll.u32 %s8046_s22, 2  ;;  %v8487_v3 = vld [vmem:[%s15833_s1] sm:$0xff]  ;;  %vm16245_vm0 = vcmask 261120   ;;  %vm3514_vm1 = vcmask 130112  }
   0xc   : > { %p270_p3 = scmp.lt.s32.totalorder %s8051_s25, 63  ;;  %p277_p4 = scmp.lt.s32.totalorder %s8054_s26, 7  ;;  %962 = vmatpush.bf16.msra.mxu0 %v8488_v0  ;;  %8499 = vmatpush.bf16.msra.mxu2 %v8488_v0  ;;  %v9678_v56 = vld [vmem:[%s15834_s2] ss:$0 sm:$0xff]  ;;  %vm3518_vm2 = vcmask 195712   ;;  %vm3522_vm3 = vcmask 261312  }
   0xd   : > { %v9536_v2 = vshrl.u32 %v15839_v1, 7  ;;  %8500 = vmatpush.bf16.msra.mxu3 %v8488_v0  ;;  %8498 = vmatpush.bf16.msra.mxu1 %v8488_v0  ;;  %v9690_v0 = vld [vmem:[%s15835_s3] ss:$0 sm:$0xff]  ;;  %vm3741_vm4 = vcmask 1041409   ;;  %vm3743_vm5 = vcmask 1042434   ;;  %vm3745_vm6 = vcmask 1043459  }
   0xe   : > { %s17342_s25 = smov (!%p270_p3, %s8051_s25), 63  ;;  %s17344_s26 = smov (!%p277_p4, %s8054_s26), 7  ;;  %vm3747_vm7 = vcmask 1044484   ;;  %vm3749_vm8 = vcmask 1045509   ;;  %vm3751_vm9 = vcmask 1046534   ;;  %vm3753_vm10 = vcmask 1047559  }
   0xf   : > { %16246 = vst [vmem:[#allocation2_spill] sm:$0xff] %v9536_v2  ;;  %8513 = vset.pattern.permute.xlu2 %v9536_v2  ;;  %v9543_v4 = vadd.s32 16, %v9536_v2  ;;  %8555 = vset.pattern.permute.xlu0 %v9536_v2  ;;  %s8422_s29 = sshll.u32 %s17342_s25, 4  ;;  %s8055_s9 = sshll.u32 %s17344_s26, 2  ;;  %v9581_v14 = vadd.s32 24, %v9536_v2  ;;  %v9584_v15 = vadd.s32 8, %v9536_v2 }
  0x10   : > { %963 = vmatpush.bf16.msra.mxu0 %v8487_v3  ;;  %8502 = vmatpush.bf16.msra.mxu2 %v8487_v3  ;;  %s9551_s8 = scalar_lea.vmem %s15832_s0, %s8422_s29  ;;  %s9561_s12 = scalar_lea.vmem %s15836_s4, %s8055_s9 }
  0x11   : > { %16247 = vst [vmem:[#allocation3_spill] sm:$0xff] %v9543_v4  ;;  %8503 = vmatpush.bf16.msra.mxu3 %v8487_v3  ;;  %8519 = vset.pattern.permute.xlu1 %v9543_v4  ;;  %v8423_v5 = vld [vmem:[%s9551_s8] sm:$0xff]  ;;  %v8458_v6 = vld [vmem:[%s9551_s8 + $0x118] sm:$0xff]  ;;  %v8444_v9 = vld [vmem:[%s9551_s8 + $0xa8] sm:$0xff]  ;;  %s8057_s27 = sshll.u32 %s17344_s26, 3 }
  0x12   : > { %v8470_v7 = vld [vmem:[%s9551_s8 + $0x178] sm:$0xff]  ;;  %8501 = vmatpush.bf16.msra.mxu1 %v8487_v3  ;;  %v9564_v8 = vld [vmem:[%s9561_s12] sm:$0xff]   ;;  %16248 = vst [vmem:[#allocation4_spill] sm:$0xff] %v9581_v14  ;;  %v8424_v17 = vld [vmem:[%s9551_s8 + $0x8] sm:$0xff]  ;;  %s14419_s30 = scalar_lea.vmem %s15838_s6, %s8057_s27  ;;  %s15819_s9 = scalar_lea.vmem %s15837_s5, %s8057_s27 }
  0x13   : > { %8324 = vmatmul.msk.bf16.vlgmr.msra.gmra.mxu0 %vm16245_vm0, %v8423_v5  ;;  %8359 = vmatmul.msk.bf16.vlgmr.msra.gmra.mxu2 %vm16245_vm0, %v8458_v6  ;;  %v9570_v10 = vunpack.c.l.bf16 %v9564_v8  ;;  %16249 = vst [vmem:[#allocation5_spill] sm:$0xff] %v9584_v15  ;;  %v8459_v16 = vld [vmem:[%s9551_s8 + $0x120] sm:$0xff]  ;;  %v8445_v21 = vld [vmem:[%s9551_s8 + $0xb0] sm:$0xff]  ;;  %v8460_v23 = vld [vmem:[%s9551_s8 + $0x128] sm:$0xff]  ;;  %v9648_v45 = vunpack.c.h.bf16 %v9564_v8 }
  0x14   : > { %8371 = vmatmul.msk.bf16.vlgmr.msra.gmra.mxu3 %vm16245_vm0, %v8470_v7  ;;  %v8471_v18 = vld [vmem:[%s9551_s8 + $0x180] sm:$0xff]  ;;  %v8425_v24 = vld [vmem:[%s9551_s8 + $0x10] sm:$0xff]  ;;  %v8472_v25 = vld [vmem:[%s9551_s8 + $0x188] sm:$0xff] }
  0x15   : > { %v1941_v11 = vperm.slane %v9570_v10, 0  ;;  %v1966_v12 = vperm.slane %v9570_v10, 1  ;;  %8345 = vmatmul.msk.bf16.vlgmr.msra.gmra.mxu1 %vm16245_vm0, %v8444_v9  ;;  %v1991_v19 = vperm.slane %v9570_v10, 2  ;;  %v2016_v20 = vperm.slane %v9570_v10, 3  ;;  %v8446_v26 = vld [vmem:[%s9551_s8 + $0xb8] sm:$0xff]  ;;  %v8461_v27 = vld [vmem:[%s9551_s8 + $0x130] sm:$0xff] }
  0x16   : > { %v8426_v28 = vld [vmem:[%s9551_s8 + $0x18] sm:$0xff]  ;;  %v8473_v29 = vld [vmem:[%s9551_s8 + $0x190] sm:$0xff]  ;;  %v2041_v30 = vperm.slane %v9570_v10, 4  ;;  %v2066_v31 = vperm.slane %v9570_v10, 5  ;;  %v8447_v32 = vld [vmem:[%s9551_s8 + $0xc0] sm:$0xff]  ;;  %v2091_v37 = vperm.slane %v9570_v10, 6 }
  0x17   : > { %v9576_v13 = vpack.i.bf16 %v1966_v12, %v1941_v11  ;;  %v8538_v22 = vpack.i.bf16 %v2016_v20, %v1991_v19  ;;  %v8462_v34 = vld [vmem:[%s9551_s8 + $0x138] sm:$0xff]  ;;  %v8427_v35 = vld [vmem:[%s9551_s8 + $0x20] sm:$0xff]  ;;  %v2116_v38 = vperm.slane %v9570_v10, 7  ;;  %v8448_v39 = vld [vmem:[%s9551_s8 + $0xc8] sm:$0xff]  ;;  %v2141_v47 = vperm.slane %v9648_v45, 0 }
  0x18   : > { %v8568_v33 = vpack.i.bf16 %v2066_v31, %v2041_v30  ;;  %v8474_v36 = vld [vmem:[%s9551_s8 + $0x198] sm:$0xff]  ;;  %v8463_v41 = vld [vmem:[%s9551_s8 + $0x140] sm:$0xff]  ;;  %v8428_v43 = vld [vmem:[%s9551_s8 + $0x28] sm:$0xff]  ;;  %v2166_v48 = vperm.slane %v9648_v45, 1 }
  0x19   : > { %8515 = vperm.xlu2 %8513, %v9576_v13   ;;  %8521 = vperm.xlu1 %8519, %v9576_v13   ;;  %v9632_v40 = vpack.i.bf16 %v2116_v38, %v2091_v37  ;;  %v8475_v42 = vld [vmem:[%s9551_s8 + $0x1a0] sm:$0xff]  ;;  %v8449_v44 = vld [vmem:[%s9551_s8 + $0xd0] sm:$0xff]  ;;  %v8464_v46 = vld [vmem:[%s9551_s8 + $0x148] sm:$0xff] }
  0x1a   : > { %8557 = vperm.xlu0 %8555, %v8568_v33   ;;  %v8429_v49 = vld [vmem:[%s9551_s8 + $0x30] sm:$0xff]  ;;  %v8476_v50 = vld [vmem:[%s9551_s8 + $0x1a8] sm:$0xff]  ;;  %v9660_v51 = vpack.i.bf16 %v2166_v48, %v2141_v47  ;;  %v8450_v52 = vld [vmem:[%s9551_s8 + $0xd8] sm:$0xff] }
  0x1b   : > { %v8465_v53 = vld [vmem:[%s9551_s8 + $0x150] sm:$0xff]  ;;  %v8430_v55 = vld [vmem:[%s9551_s8 + $0x38] sm:$0xff]  ;;  %v8451_v60 = vld [vmem:[%s9551_s8 + $0xe0] sm:$0xff] }
  0x1c   : > { %v8477_v54 = vld [vmem:[%s9551_s8 + $0x1b0] sm:$0xff]  ;;  %v8466_v62 = vld [vmem:[%s9551_s8 + $0x158] sm:$0xff] }
  0x21   : > { %8525 = vset.pattern.permute.xlu2 %v9581_v14  ;;  %8537 = vset.pattern.permute.xlu1 %v9584_v15 }
  0x23   : > { %8360 = vmatmul.msk.bf16.gmra.mxu2 %vm16245_vm0, %v8459_v16  ;;  %8325 = vmatmul.msk.bf16.gmra.mxu0 %vm16245_vm0, %v8424_v17  ;;  %v8478_v17 = vld [vmem:[%s9551_s8 + $0x1b8] sm:$0xff] }
  0x24   : > { %8372 = vmatmul.msk.bf16.gmra.mxu3 %vm16245_vm0, %v8471_v18 }
  0x25   : > { %8346 = vmatmul.msk.bf16.gmra.mxu1 %vm16245_vm0, %v8445_v21 }
  0x29   : > { %8527 = vperm.xlu2 %8525, %v9576_v13   ;;  %8539 = vperm.xlu1 %8537, %v8538_v22  }
  0x31   : > { %8531 = vset.pattern.permute.xlu2 %v9536_v2  ;;  %8549 = vset.pattern.permute.xlu1 %v9581_v14 }
  0x33   : > { %8361 = vmatmul.msk.bf16.gmra.mxu2 %vm16245_vm0, %v8460_v23  ;;  %8326 = vmatmul.msk.bf16.gmra.mxu0 %vm16245_vm0, %v8425_v24  ;;  %v8431_v24 = vld [vmem:[%s9551_s8 + $0x40] sm:$0xff] }
  0x34   : > { %8373 = vmatmul.msk.bf16.gmra.mxu3 %vm16245_vm0, %v8472_v25 }
  0x35   : > { %8347 = vmatmul.msk.bf16.gmra.mxu1 %vm16245_vm0, %v8446_v26 }
  0x39   : > { %8533 = vperm.xlu2 %8531, %v8538_v22   ;;  %8551 = vperm.xlu1 %8549, %v8538_v22  }
  0x41   : > { %8543 = vset.pattern.permute.xlu2 %v9543_v4  ;;  %8567 = vset.pattern.permute.xlu1 %v9543_v4 }
  0x43   : > { %8362 = vmatmul.msk.bf16.gmra.mxu2 %vm16245_vm0, %v8461_v27  ;;  %8327 = vmatmul.msk.bf16.gmra.mxu0 %vm16245_vm0, %v8426_v28 }
  0x44   : > { %8374 = vmatmul.msk.bf16.gmra.mxu3 %vm16245_vm0, %v8473_v29 }
  0x45   : > { %8348 = vmatmul.msk.bf16.gmra.mxu1 %vm16245_vm0, %v8447_v32 }
  0x49   : > { %8545 = vperm.xlu2 %8543, %v8538_v22   ;;  %8569 = vperm.xlu1 %8567, %v8568_v33  }
  0x51   : > { %8561 = vset.pattern.permute.xlu2 %v9584_v15  ;;  %8579 = vset.pattern.permute.xlu1 %v9536_v2 }
  0x53   : > { %8363 = vmatmul.msk.bf16.gmra.mxu2 %vm16245_vm0, %v8462_v34  ;;  %8328 = vmatmul.msk.bf16.gmra.mxu0 %vm16245_vm0, %v8427_v35 }
  0x54   : > { %8375 = vmatmul.msk.bf16.gmra.mxu3 %vm16245_vm0, %v8474_v36 }
  0x55   : > { %8349 = vmatmul.msk.bf16.gmra.mxu1 %vm16245_vm0, %v8448_v39 }
  0x59   : > { %8563 = vperm.xlu2 %8561, %v8568_v33   ;;  %8581 = vperm.xlu1 %8579, %v9632_v40  }
  0x61   : > { %8573 = vset.pattern.permute.xlu2 %v9581_v14  ;;  %8591 = vset.pattern.permute.xlu1 %v9581_v14 }
  0x63   : > { %8364 = vmatmul.msk.bf16.gmra.mxu2 %vm16245_vm0, %v8463_v41  ;;  %8329 = vmatmul.msk.bf16.gmra.mxu0 %vm16245_vm0, %v8428_v43  ;;  %v8452_v41 = vld [vmem:[%s9551_s8 + $0xe8] sm:$0xff] }
  0x64   : > { %8376 = vmatmul.msk.bf16.gmra.mxu3 %vm16245_vm0, %v8475_v42 }
  0x65   : > { %8350 = vmatmul.msk.bf16.gmra.mxu1 %vm16245_vm0, %v8449_v44  ;;  %v8467_v44 = vld [vmem:[%s9551_s8 + $0x160] sm:$0xff] }
  0x69   : > { %8575 = vperm.xlu2 %8573, %v8568_v33   ;;  %8593 = vperm.xlu1 %8591, %v9632_v40  }
  0x71   : > { %8585 = vset.pattern.permute.xlu2 %v9543_v4  ;;  %8603 = vset.pattern.permute.xlu1 %v9584_v15 }
  0x73   : > { %8365 = vmatmul.msk.bf16.gmra.mxu2 %vm16245_vm0, %v8464_v46  ;;  %8330 = vmatmul.msk.bf16.gmra.mxu0 %vm16245_vm0, %v8429_v49 }
  0x74   : > { %8377 = vmatmul.msk.bf16.gmra.mxu3 %vm16245_vm0, %v8476_v50 }
  0x75   : > { %8351 = vmatmul.msk.bf16.gmra.mxu1 %vm16245_vm0, %v8450_v52 }
  0x79   : > { %8587 = vperm.xlu2 %8585, %v9632_v40   ;;  %8605 = vperm.xlu1 %8603, %v9660_v51  }
  0x81   : > { %8597 = vset.pattern.permute.xlu2 %v9536_v2  ;;  %8615 = vset.pattern.permute.xlu1 %v9536_v2 }
  0x83   : > { %8366 = vmatmul.msk.bf16.gmra.mxu2 %vm16245_vm0, %v8465_v53  ;;  %8331 = vmatmul.msk.bf16.gmra.mxu0 %vm16245_vm0, %v8430_v55 }
  0x84   : > { %8378 = vmatmul.msk.bf16.gmra.mxu3 %vm16245_vm0, %v8477_v54 }
  0x85   : > { %8352 = vmatmul.msk.bf16.gmra.mxu1 %vm16245_vm0, %v8451_v60 }
  0x89   : > { %8599 = vperm.xlu2 %8597, %v9660_v51  }
  0x90   : > { %v965_v57 = vpop.f32.mrf.mxu0 }
  0x91   : > { %v966_v58 = vadd.f32 %v9678_v56, %v965_v57  ;;  %8609 = vset.pattern.permute.xlu2 %v9581_v14 }
  0x92   : > { %v1070_v59 = vpop.f32.mrf.mxu1 }
  0x93   : > { %8900 = vtanh.f32 %v966_v58  ;;  %v1071_v61 = vadd.f32 %v9678_v56, %v1070_v59  ;;  %8367 = vmatmul.msk.bf16.gmra.mxu2 %vm16245_vm0, %v8466_v62  ;;  %8332 = vmatmul.msk.bf16.gmra.mxu0 %vm16245_vm0, %v8431_v24 }
  0x94   : > { %8379 = vmatmul.msk.bf16.gmra.mxu3 %vm16245_vm0, %v8478_v17 }
  0x95   : > { %8902 = vtanh.f32 %v1071_v61  ;;  %8353 = vmatmul.msk.bf16.gmra.mxu1 %vm16245_vm0, %v8452_v41 }
  0x96   : > { %v1140_v63 = vpop.f32.mrf.mxu2 }
  0x97   : > { %v1141_v3 = vadd.f32 %v9678_v56, %v1140_v63  ;;  %v1200_v5 = vpop.f32.mrf.mxu3 }
  0x98   : > { %v1201_v6 = vadd.f32 %v9678_v56, %v1200_v5  ;;  %v967_v7 = vpop.f32.mrf.mxu0 }
  0x99   : > { %v8901_v8 = vpop.eup %8900  ;;  %8904 = vtanh.f32 %v1141_v3  ;;  %v968_v11 = vadd.f32 %v9678_v56, %v967_v7  ;;  %v8479_v7 = vld [vmem:[%s9551_s8 + $0x1c0] sm:$0xff] }
  0x9a   : > { %v1417_v9 = vmul.f32 %v8901_v8, %v9690_v0  ;;  %8906 = vtanh.f32 %v1201_v6  ;;  %v1072_v16 = vpop.f32.mrf.mxu1  ;;  %v8432_v6 = vld [vmem:[%s9551_s8 + $0x48] sm:$0xff] }
  0x9b   : > { %v8903_v10 = vpop.eup %8902  ;;  %8908 = vtanh.f32 %v968_v11  ;;  %v1073_v26 = vadd.f32 %v9678_v56, %v1072_v16 }
  0x9c   : > { %v1545_v12 = vsel %vm16245_vm0, %v1417_v9, 0.0  ;;  %v1459_v19 = vmul.f32 %v8903_v10, %v9690_v0 }
  0x9d   : > { %1546 = vadd.xlane.f32.xlu0 %v1545_v12 }
  0x9e   : > { %v1142_v18 = vpop.f32.mrf.mxu2  ;;  %v1671_v29 = vsel %vm16245_vm0, %v1459_v19, 0.0 }
  0x9f   : > { %v8905_v20 = vpop.eup %8904  ;;  %v1202_v21 = vpop.f32.mrf.mxu3  ;;  %v1143_v22 = vadd.f32 %v9678_v56, %v1142_v18 }
  0xa0   : > { %v1487_v23 = vmul.f32 %v8905_v20, %v9690_v0  ;;  %v8907_v25 = vpop.eup %8906  ;;  %v970_v27 = vpop.f32.mrf.mxu0  ;;  %v1203_v37 = vadd.f32 %v9678_v56, %v1202_v21 }
  0xa1   : > { %8910 = vtanh.f32 %v1143_v22  ;;  %v1511_v30 = vmul.f32 %v8907_v25, %v9690_v0  ;;  %v8909_v32 = vpop.eup %8908  ;;  %v971_v34 = vadd.f32 %v9678_v56, %v970_v27  ;;  %v8453_v25 = vld [vmem:[%s9551_s8 + $0xf0] sm:$0xff] }
  0xa2   : > { %v1755_v28 = vsel %vm16245_vm0, %v1487_v23, 0.0  ;;  %v1075_v31 = vpop.f32.mrf.mxu1  ;;  %8912 = vtanh.f32 %v1073_v26  ;;  %v1418_v39 = vmul.f32 %v8909_v32, %v9690_v0 }
  0xa3   : > { %1756 = vadd.xlane.f32.xlu1 %v1755_v28  ;;  %v1827_v38 = vsel %vm16245_vm0, %v1511_v30, 0.0  ;;  %8368 = vmatmul.msk.bf16.gmra.mxu2 %vm16245_vm0, %v8467_v44  ;;  %v1076_v52 = vadd.f32 %v9678_v56, %v1075_v31  ;;  %v8468_v30 = vld [vmem:[%s9551_s8 + $0x168] sm:$0xff] }
  0xa4   : > { %v1548_v48 = vsel %vm16245_vm0, %v1418_v39, 0.0  ;;  %8333 = vmatmul.msk.bf16.gmra.mxu0 %vm16245_vm0, %v8432_v6  ;;  %8380 = vmatmul.msk.bf16.gmra.mxu3 %vm16245_vm0, %v8479_v7 }
  0xa5   : > { %1672 = vadd.xlane.f32.xlu0 %v1671_v29  ;;  %8354 = vmatmul.msk.bf16.gmra.mxu1 %vm16245_vm0, %v8453_v25 }
  0xa6   : > { %v1145_v33 = vpop.f32.mrf.mxu2 }
  0xa7   : > { %v1146_v35 = vadd.f32 %v9678_v56, %v1145_v33  ;;  %v1205_v36 = vpop.f32.mrf.mxu3  ;;  %v8911_v43 = vpop.eup %8910 }
  0xa8   : > { %v1206_v42 = vadd.f32 %v9678_v56, %v1205_v36  ;;  %v8913_v46 = vpop.eup %8912  ;;  %v972_v47 = vpop.f32.mrf.mxu0  ;;  %v1488_v49 = vmul.f32 %v8911_v43, %v9690_v0 }
  0xa9   : > { %8914 = vtanh.f32 %v1146_v35  ;;  %v1460_v53 = vmul.f32 %v8913_v46, %v9690_v0  ;;  %v973_v58 = vadd.f32 %v9678_v56, %v972_v47  ;;  %v8480_v47 = vld [vmem:[%s9551_s8 + $0x1c8] sm:$0xff] }
  0xaa   : > { %8916 = vtanh.f32 %v971_v34  ;;  %v1077_v54 = vpop.f32.mrf.mxu1  ;;  %v1758_v61 = vsel %vm16245_vm0, %v1488_v49, 0.0 }
  0xab   : > { %1828 = vadd.xlane.f32.xlu1 %v1827_v38  ;;  %8918 = vtanh.f32 %v1203_v37  ;;  %v1078_v62 = vadd.f32 %v9678_v56, %v1077_v54  ;;  %v1674_v3 = vsel %vm16245_vm0, %v1460_v53, 0.0 }
  0xac   : > { %8920 = vtanh.f32 %v1206_v42 }
  0xad   : > { %1549 = vadd.xlane.f32.xlu0 %v1548_v48  ;;  %8922 = vtanh.f32 %v1076_v52 }
  0xae   : > { %v1147_v50 = vpop.f32.mrf.mxu2  ;;  %8924 = vtanh.f32 %v973_v58 }
  0xaf   : > { %v8915_v55 = vpop.eup %8914  ;;  %v1207_v57 = vpop.f32.mrf.mxu3  ;;  %8926 = vtanh.f32 %v1078_v62  ;;  %v1148_v21 = vadd.f32 %v9678_v56, %v1147_v50 }
  0xb0   : > { %v1489_v59 = vmul.f32 %v8915_v55, %v9690_v0  ;;  %v8917_v60 = vpop.eup %8916  ;;  %v975_v9 = vpop.f32.mrf.mxu0  ;;  %v1208_v39 = vadd.f32 %v9678_v56, %v1207_v57 }
  0xb1   : > { %v8919_v63 = vpop.eup %8918  ;;  %v1419_v10 = vmul.f32 %v8917_v60, %v9690_v0  ;;  %v976_v16 = vadd.f32 %v9678_v56, %v975_v9 }
  0xb2   : > { %1759 = vadd.xlane.f32.xlu2 %v1758_v61  ;;  %v1761_v5 = vsel %vm16245_vm0, %v1489_v59, 0.0  ;;  %v8921_v8 = vpop.eup %8920  ;;  %v1512_v11 = vmul.f32 %v8919_v63, %v9690_v0  ;;  %v1080_v28 = vpop.f32.mrf.mxu1 }
  0xb3   : > { %1675 = vadd.xlane.f32.xlu1 %v1674_v3  ;;  %v1513_v17 = vmul.f32 %v8921_v8, %v9690_v0  ;;  %v8923_v19 = vpop.eup %8922  ;;  %v1551_v20 = vsel %vm16245_vm0, %v1419_v10, 0.0  ;;  %8928 = vtanh.f32 %v976_v16  ;;  %8369 = vmatmul.msk.bf16.gmra.mxu2 %vm16245_vm0, %v8468_v30  ;;  %v1081_v55 = vadd.f32 %v9678_v56, %v1080_v28  ;;  %v8433_v3 = vld [vmem:[%s9551_s8 + $0x50] sm:$0xff] }
  0xb4   : > { %v1830_v22 = vsel %vm16245_vm0, %v1512_v11, 0.0  ;;  %v8925_v23 = vpop.eup %8924  ;;  %v1461_v27 = vmul.f32 %v8923_v19, %v9690_v0  ;;  %8930 = vtanh.f32 %v1148_v21  ;;  %8381 = vmatmul.msk.bf16.gmra.mxu3 %vm16245_vm0, %v8480_v47  ;;  %8334 = vmatmul.msk.bf16.gmra.mxu0 %vm16245_vm0, %v8433_v3 }
  0xb5   : > { %1762 = vadd.xlane.f32.xlu0 %v1761_v5  ;;  %v1833_v24 = vsel %vm16245_vm0, %v1513_v17, 0.0  ;;  %v8927_v26 = vpop.eup %8926  ;;  %v1420_v33 = vmul.f32 %v8925_v23, %v9690_v0  ;;  %v8454_v23 = vld [vmem:[%s9551_s8 + $0xf8] sm:$0xff] }
  0xb6   : > { %v1150_v12 = vpop.f32.mrf.mxu2  ;;  %v1462_v34 = vmul.f32 %v8927_v26, %v9690_v0  ;;  %v1677_v36 = vsel %vm16245_vm0, %v1461_v27, 0.0  ;;  %v8469_v26 = vld [vmem:[%s9551_s8 + $0x170] sm:$0xff]  ;;  %8355 = vmatmul.msk.bf16.gmra.mxu1 %vm16245_vm0, %v8454_v23 }
  0xb7   : > { %v1210_v18 = vpop.f32.mrf.mxu3  ;;  %v1151_v31 = vadd.f32 %v9678_v56, %v1150_v12  ;;  %v1554_v42 = vsel %vm16245_vm0, %v1420_v33, 0.0  ;;  %v8481_v27 = vld [vmem:[%s9551_s8 + $0x1d0] sm:$0xff] }
  0xb8   : > { %v977_v29 = vpop.f32.mrf.mxu0  ;;  %v1680_v43 = vsel %vm16245_vm0, %v1462_v34, 0.0  ;;  %v1211_v49 = vadd.f32 %v9678_v56, %v1210_v18 }
  0xb9   : > { %v8929_v38 = vpop.eup %8928  ;;  %v978_v18 = vadd.f32 %v9678_v56, %v977_v29 }
  0xba   : > { %1831 = vadd.xlane.f32.xlu2 %v1830_v22  ;;  %v8931_v44 = vpop.eup %8930  ;;  %v1421_v46 = vmul.f32 %v8929_v38, %v9690_v0  ;;  %v1082_v48 = vpop.f32.mrf.mxu1 }
  0xbb   : > { %1552 = vadd.xlane.f32.xlu1 %v1551_v20  ;;  %v1490_v50 = vmul.f32 %v8931_v44, %v9690_v0 }
  0xbc   : > { %v1557_v57 = vsel %vm16245_vm0, %v1421_v46, 0.0 }
  0xbd   : > { %1834 = vadd.xlane.f32.xlu0 %v1833_v24  ;;  %v1764_v62 = vsel %vm16245_vm0, %v1490_v50, 0.0 }
  0xbe   : > { %v1152_v32 = vpop.f32.mrf.mxu2 }
  0xbf   : > { %v1153_v35 = vadd.f32 %v9678_v56, %v1152_v32  ;;  %v1212_v37 = vpop.f32.mrf.mxu3 }
  0xc0   : > { %v1213_v41 = vadd.f32 %v9678_v56, %v1212_v37  ;;  %v980_v53 = vpop.f32.mrf.mxu0 }
  0xc1   : > { %8932 = vtanh.f32 %v1153_v35  ;;  %v981_v60 = vadd.f32 %v9678_v56, %v980_v53  ;;  %v1083_v35 = vadd.f32 %v9678_v56, %v1082_v48 }
  0xc2   : > { %8934 = vtanh.f32 %v1151_v31  ;;  %1678 = vadd.xlane.f32.xlu2 %v1677_v36  ;;  %v1085_v11 = vpop.f32.mrf.mxu1 }
  0xc3   : > { %1555 = vadd.xlane.f32.xlu1 %v1554_v42  ;;  %8936 = vtanh.f32 %v1208_v39  ;;  %v1086_v20 = vadd.f32 %v9678_v56, %v1085_v11  ;;  %8370 = vmatmul.msk.bf16.gmra.mxu2 %vm16245_vm0, %v8469_v26  ;;  %v8434_v42 = vld [vmem:[%s9551_s8 + $0x58] sm:$0xff] }
  0xc4   : > { %8938 = vtanh.f32 %v1213_v41  ;;  %8382 = vmatmul.msk.bf16.gmra.mxu3 %vm16245_vm0, %v8481_v27  ;;  %8335 = vmatmul.msk.bf16.gmra.mxu0 %vm16245_vm0, %v8434_v42 }
  0xc5   : > { %1681 = vadd.xlane.f32.xlu0 %v1680_v43  ;;  %8940 = vtanh.f32 %v1211_v49 }
  0xc6   : > { %v1155_v52 = vpop.f32.mrf.mxu2  ;;  %8942 = vtanh.f32 %v1081_v55 }
  0xc7   : > { %v8933_v54 = vpop.eup %8932  ;;  %v1215_v7 = vpop.f32.mrf.mxu3  ;;  %8944 = vtanh.f32 %v981_v60  ;;  %v1156_v12 = vadd.f32 %v9678_v56, %v1155_v52 }
  0xc8   : > { %v8935_v58 = vpop.eup %8934  ;;  %v1492_v59 = vmul.f32 %v8933_v54, %v9690_v0  ;;  %v982_v29 = vpop.f32.mrf.mxu0  ;;  %v1216_v33 = vadd.f32 %v9678_v56, %v1215_v7 }
  0xc9   : > { %v8937_v61 = vpop.eup %8936  ;;  %v1491_v6 = vmul.f32 %v8935_v58, %v9690_v0  ;;  %8946 = vtanh.f32 %v1156_v12  ;;  %v983_v52 = vadd.f32 %v9678_v56, %v982_v29  ;;  %v8455_v12 = vld [vmem:[%s9551_s8 + $0x100] sm:$0xff] }
  0xca   : > { %1558 = vadd.xlane.f32.xlu2 %v1557_v57  ;;  %v1770_v63 = vsel %vm16245_vm0, %v1492_v59, 0.0  ;;  %v8939_v5 = vpop.eup %8938  ;;  %v1514_v8 = vmul.f32 %v8937_v61, %v9690_v0  ;;  %8948 = vtanh.f32 %v978_v18  ;;  %v1087_v44 = vpop.f32.mrf.mxu1  ;;  %8356 = vmatmul.msk.bf16.gmra.mxu1 %vm16245_vm0, %v8455_v12 }
  0xcb   : > { %1765 = vadd.xlane.f32.xlu1 %v1764_v62  ;;  %v1516_v9 = vmul.f32 %v8939_v5, %v9690_v0  ;;  %v1767_v16 = vsel %vm16245_vm0, %v1491_v6, 0.0  ;;  %v8941_v17 = vpop.eup %8940  ;;  %8950 = vtanh.f32 %v1086_v20 }
  0xcc   : > { %v8943_v19 = vpop.eup %8942  ;;  %v1836_v21 = vsel %vm16245_vm0, %v1514_v8, 0.0  ;;  %v1515_v25 = vmul.f32 %v8941_v17, %v9690_v0  ;;  %8952 = vtanh.f32 %v1216_v33 }
  0xcd   : > { %1771 = vadd.xlane.f32.xlu0 %v1770_v63  ;;  %v1842_v22 = vsel %vm16245_vm0, %v1516_v9, 0.0  ;;  %v8945_v24 = vpop.eup %8944  ;;  %v1463_v28 = vmul.f32 %v8943_v19, %v9690_v0  ;;  %8954 = vtanh.f32 %v1083_v35  ;;  %v8482_v63 = vld [vmem:[%s9551_s8 + $0x1d8] sm:$0xff]  ;;  %v1088_v9 = vadd.f32 %v9678_v56, %v1087_v44 }
  0xce   : > { %v1157_v10 = vpop.f32.mrf.mxu2  ;;  %v1423_v30 = vmul.f32 %v8945_v24, %v9690_v0  ;;  %v1839_v34 = vsel %vm16245_vm0, %v1515_v25, 0.0 }
  0xcf   : > { %v1217_v31 = vpop.f32.mrf.mxu3  ;;  %v1683_v36 = vsel %vm16245_vm0, %v1463_v28, 0.0  ;;  %v8947_v37 = vpop.eup %8946  ;;  %v1158_v53 = vadd.f32 %v9678_v56, %v1157_v10 }
  0xd0   : > { %v8949_v39 = vpop.eup %8948  ;;  %v1563_v41 = vsel %vm16245_vm0, %v1423_v30, 0.0  ;;  %v1493_v46 = vmul.f32 %v8947_v37, %v9690_v0  ;;  %v985_v47 = vpop.f32.mrf.mxu0  ;;  %v1218_v10 = vadd.f32 %v9678_v56, %v1217_v31 }
  0xd1   : > { %v8951_v43 = vpop.eup %8950  ;;  %v1422_v48 = vmul.f32 %v8949_v39, %v9690_v0  ;;  %v986_v27 = vadd.f32 %v9678_v56, %v985_v47 }
  0xd2   : > { %1768 = vadd.xlane.f32.xlu2 %v1767_v16  ;;  %v1465_v49 = vmul.f32 %v8951_v43, %v9690_v0  ;;  %v1773_v54 = vsel %vm16245_vm0, %v1493_v46, 0.0  ;;  %v8953_v55 = vpop.eup %8952  ;;  %v1090_v62 = vpop.f32.mrf.mxu1 }
  0xd3   : > { %1837 = vadd.xlane.f32.xlu1 %v1836_v21  ;;  %v1560_v57 = vsel %vm16245_vm0, %v1422_v48, 0.0  ;;  %v8955_v59 = vpop.eup %8954  ;;  %v1517_v3 = vmul.f32 %v8953_v55, %v9690_v0  ;;  %v1091_v43 = vadd.f32 %v9678_v56, %v1090_v62 }
  0xd4   : > { %v1689_v60 = vsel %vm16245_vm0, %v1465_v49, 0.0  ;;  %v1464_v6 = vmul.f32 %v8955_v59, %v9690_v0  ;;  %8383 = vmatmul.msk.bf16.gmra.mxu3 %vm16245_vm0, %v8482_v63 }
  0xd5   : > { %1843 = vadd.xlane.f32.xlu0 %v1842_v22  ;;  %v1845_v11 = vsel %vm16245_vm0, %v1517_v3, 0.0  ;;  %v8435_v22 = vld [vmem:[%s9551_s8 + $0x60] sm:$0xff] }
  0xd6   : > { %v1160_v32 = vpop.f32.mrf.mxu2  ;;  %v1686_v17 = vsel %vm16245_vm0, %v1464_v6, 0.0  ;;  %8336 = vmatmul.msk.bf16.gmra.mxu0 %vm16245_vm0, %v8435_v22 }
  0xd7   : > { %v1161_v38 = vadd.f32 %v9678_v56, %v1160_v32  ;;  %v1220_v50 = vpop.f32.mrf.mxu3 }
  0xd8   : > { %v1221_v58 = vadd.f32 %v9678_v56, %v1220_v50  ;;  %v987_v8 = vpop.f32.mrf.mxu0  ;;  %v8456_v50 = vld [vmem:[%s9551_s8 + $0x108] sm:$0xff] }
  0xd9   : > { %8956 = vtanh.f32 %v1161_v38  ;;  %v988_v18 = vadd.f32 %v9678_v56, %v987_v8 }
  0xda   : > { %1840 = vadd.xlane.f32.xlu2 %v1839_v34  ;;  %8958 = vtanh.f32 %v983_v52  ;;  %v1092_v26 = vpop.f32.mrf.mxu1  ;;  %8357 = vmatmul.msk.bf16.gmra.mxu1 %vm16245_vm0, %v8456_v50 }
  0xdb   : > { %1684 = vadd.xlane.f32.xlu1 %v1683_v36  ;;  %8960 = vtanh.f32 %v1158_v53  ;;  %v1093_v30 = vadd.f32 %v9678_v56, %v1092_v26 }
  0xdc   : > { %8962 = vtanh.f32 %v1221_v58  ;;  %v8436_v58 = vld [vmem:[%s9551_s8 + $0x68] sm:$0xff] }
  0xdd   : > { %1564 = vadd.xlane.f32.xlu0 %v1563_v41  ;;  %8964 = vtanh.f32 %v1088_v9  ;;  %v8483_v41 = vld [vmem:[%s9551_s8 + $0x1e0] sm:$0xff] }
  0xde   : > { %v1162_v5 = vpop.f32.mrf.mxu2  ;;  %8966 = vtanh.f32 %v1218_v10 }
  0xdf   : > { %v8957_v61 = vpop.eup %8956  ;;  %v1222_v19 = vpop.f32.mrf.mxu3  ;;  %8968 = vtanh.f32 %v988_v18  ;;  %v1163_v32 = vadd.f32 %v9678_v56, %v1162_v5 }
  0xe0   : > { %v1495_v7 = vmul.f32 %v8957_v61, %v9690_v0  ;;  %v8959_v16 = vpop.eup %8958  ;;  %8970 = vtanh.f32 %v986_v27  ;;  %v990_v39 = vpop.f32.mrf.mxu0  ;;  %v1223_v49 = vadd.f32 %v9678_v56, %v1222_v19 }
  0xe1   : > { %v8961_v20 = vpop.eup %8960  ;;  %v1424_v28 = vmul.f32 %v8959_v16, %v9690_v0  ;;  %8972 = vtanh.f32 %v1093_v30 }
  0xe2   : > { %1561 = vadd.xlane.f32.xlu2 %v1560_v57  ;;  %v1779_v21 = vsel %vm16245_vm0, %v1495_v7, 0.0  ;;  %v8963_v23 = vpop.eup %8962  ;;  %v1494_v25 = vmul.f32 %v8961_v20, %v9690_v0  ;;  %8974 = vtanh.f32 %v1163_v32  ;;  %v1095_v62 = vpop.f32.mrf.mxu1  ;;  %v991_v7 = vadd.f32 %v9678_v56, %v990_v39 }
  0xe3   : > { %1774 = vadd.xlane.f32.xlu1 %v1773_v54  ;;  %v1519_v29 = vmul.f32 %v8963_v23, %v9690_v0  ;;  %v8965_v31 = vpop.eup %8964  ;;  %v1566_v36 = vsel %vm16245_vm0, %v1424_v28, 0.0  ;;  %8976 = vtanh.f32 %v1091_v43  ;;  %v1096_v27 = vadd.f32 %v9678_v56, %v1095_v62 }
  0xe4   : > { %v1776_v33 = vsel %vm16245_vm0, %v1494_v25, 0.0  ;;  %v8967_v35 = vpop.eup %8966  ;;  %v1466_v44 = vmul.f32 %v8965_v31, %v9690_v0  ;;  %8384 = vmatmul.msk.bf16.gmra.mxu3 %vm16245_vm0, %v8483_v41  ;;  %8978 = vtanh.f32 %v1223_v49 }
  0xe5   : > { %1690 = vadd.xlane.f32.xlu0 %v1689_v60  ;;  %v1851_v37 = vsel %vm16245_vm0, %v1519_v29, 0.0  ;;  %v8969_v38 = vpop.eup %8968  ;;  %v1518_v42 = vmul.f32 %v8967_v35, %v9690_v0  ;;  %v8457_v35 = vld [vmem:[%s9551_s8 + $0x110] sm:$0xff] }
  0xe6   : > { %v1165_v24 = vpop.f32.mrf.mxu2  ;;  %v1426_v46 = vmul.f32 %v8969_v38, %v9690_v0  ;;  %v8971_v48 = vpop.eup %8970  ;;  %v1692_v55 = vsel %vm16245_vm0, %v1466_v44, 0.0  ;;  %8337 = vmatmul.msk.bf16.gmra.mxu0 %vm16245_vm0, %v8436_v58 }
  0xe7   : > { %v9824_v34 = vpop.f32.mrf.mxu3  ;;  %v1848_v52 = vsel %vm16245_vm0, %v1518_v42, 0.0  ;;  %v8973_v54 = vpop.eup %8972  ;;  %v1425_v60 = vmul.f32 %v8971_v48, %v9690_v0  ;;  %v1166_v3 = vadd.f32 %v9678_v56, %v1165_v24 }
  0xe8   : > { %v1572_v57 = vsel %vm16245_vm0, %v1426_v46, 0.0  ;;  %v8975_v59 = vpop.eup %8974  ;;  %v992_v63 = vpop.f32.mrf.mxu0  ;;  %v1468_v6 = vmul.f32 %v8973_v54, %v9690_v0  ;;  %v1226_v23 = vadd.f32 %v9678_v56, %v9824_v34  ;;  %v8437_v34 = vld [vmem:[%s9551_s8 + $0x70] sm:$0xff] }
  0xe9   : > { %v1496_v5 = vmul.f32 %v8975_v59, %v9690_v0  ;;  %v1569_v8 = vsel %vm16245_vm0, %v1425_v60, 0.0  ;;  %v8977_v9 = vpop.eup %8976  ;;  %v993_v49 = vadd.f32 %v9678_v56, %v992_v63  ;;  %v8485_v59 = vld [vmem:[%s9551_s8 + $0x1f0] sm:$0xff] }
  0xea   : > { %1687 = vadd.xlane.f32.xlu2 %v1686_v17  ;;  %v1698_v16 = vsel %vm16245_vm0, %v1468_v6, 0.0  ;;  %v1467_v18 = vmul.f32 %v8977_v9, %v9690_v0  ;;  %v1097_v26 = vpop.f32.mrf.mxu1  ;;  %8358 = vmatmul.msk.bf16.gmra.mxu1 %vm16245_vm0, %v8457_v35  ;;  %v8486_v35 = vld [vmem:[%s9551_s8 + $0x1f8] sm:$0xff] }
  0xeb   : > { %1846 = vadd.xlane.f32.xlu1 %v1845_v11  ;;  %v8979_v11 = vpop.eup %8978  ;;  %v1782_v12 = vsel %vm16245_vm0, %v1496_v5, 0.0  ;;  %v1098_v6 = vadd.f32 %v9678_v56, %v1097_v26 }
  0xec   : > { %v1520_v24 = vmul.f32 %v8979_v11, %v9690_v0  ;;  %v1695_v28 = vsel %vm16245_vm0, %v1467_v18, 0.0 }
  0xed   : > { %1780 = vadd.xlane.f32.xlu0 %v1779_v21  ;;  %v8484_v21 = vld [vmem:[%s9551_s8 + $0x1e8] sm:$0xff] }
  0xee   : > { %v1167_v47 = vpop.f32.mrf.mxu2  ;;  %v1854_v32 = vsel %vm16245_vm0, %v1520_v24, 0.0 }
  0xef   : > { %v1168_v53 = vadd.f32 %v9678_v56, %v1167_v47  ;;  %v1227_v61 = vpop.f32.mrf.mxu3 }
  0xf0   : > { %v1228_v10 = vadd.f32 %v9678_v56, %v1227_v61  ;;  %v995_v22 = vpop.f32.mrf.mxu0 }
  0xf1   : > { %8980 = vtanh.f32 %v1168_v53  ;;  %v996_v31 = vadd.f32 %v9678_v56, %v995_v22 }
  0xf2   : > { %1777 = vadd.xlane.f32.xlu2 %v1776_v33  ;;  %8982 = vtanh.f32 %v1166_v3  ;;  %v1100_v44 = vpop.f32.mrf.mxu1 }
  0xf3   : > { %1567 = vadd.xlane.f32.xlu1 %v1566_v36  ;;  %8984 = vtanh.f32 %v991_v7  ;;  %v1101_v53 = vadd.f32 %v9678_v56, %v1100_v44 }
  0xf4   : > { %8986 = vtanh.f32 %v1228_v10  ;;  %8385 = vmatmul.msk.bf16.gmra.mxu3 %vm16245_vm0, %v8484_v21 }
  0xf5   : > { %1852 = vadd.xlane.f32.xlu0 %v1851_v37  ;;  %8988 = vtanh.f32 %v1226_v23 }
  0xf6   : > { %v1170_v20 = vpop.f32.mrf.mxu2  ;;  %8990 = vtanh.f32 %v1096_v27  ;;  %8338 = vmatmul.msk.bf16.gmra.mxu0 %vm16245_vm0, %v8437_v34 }
  0xf7   : > { %v8981_v17 = vpop.eup %8980  ;;  %v1230_v19 = vpop.f32.mrf.mxu3  ;;  %8992 = vtanh.f32 %v996_v31  ;;  %v1171_v46 = vadd.f32 %v9678_v56, %v1170_v20 }
  0xf8   : > { %v1498_v25 = vmul.f32 %v8981_v17, %v9690_v0  ;;  %v8983_v29 = vpop.eup %8982  ;;  %v997_v41 = vpop.f32.mrf.mxu0  ;;  %v1231_v3 = vadd.f32 %v9678_v56, %v1230_v19 }
  0xf9   : > { %v8985_v30 = vpop.eup %8984  ;;  %v1497_v37 = vmul.f32 %v8983_v29, %v9690_v0  ;;  %8994 = vtanh.f32 %v1171_v46  ;;  %v998_v24 = vadd.f32 %v9678_v56, %v997_v41 }
  0xfa   : > { %1849 = vadd.xlane.f32.xlu2 %v1848_v52  ;;  %v1788_v33 = vsel %vm16245_vm0, %v1498_v25, 0.0  ;;  %v8987_v36 = vpop.eup %8986  ;;  %v1427_v38 = vmul.f32 %v8985_v30, %v9690_v0  ;;  %8996 = vtanh.f32 %v993_v49  ;;  %v1102_v18 = vpop.f32.mrf.mxu1 }
  0xfb   : > { %1693 = vadd.xlane.f32.xlu1 %v1692_v55  ;;  %v1522_v42 = vmul.f32 %v8987_v36, %v9690_v0  ;;  %v1785_v47 = vsel %vm16245_vm0, %v1497_v37, 0.0  ;;  %v8989_v48 = vpop.eup %8988  ;;  %8998 = vtanh.f32 %v1101_v53 }
  0xfc   : > { %v1575_v50 = vsel %vm16245_vm0, %v1427_v38, 0.0  ;;  %v8991_v52 = vpop.eup %8990  ;;  %9000 = vtanh.f32 %v1231_v3 }
  0xfd   : > { %1573 = vadd.xlane.f32.xlu0 %v1572_v57  ;;  %v1860_v54 = vsel %vm16245_vm0, %v1522_v42, 0.0  ;;  %v8993_v55 = vpop.eup %8992  ;;  %v1521_v57 = vmul.f32 %v8989_v48, %v9690_v0  ;;  %v1469_v58 = vmul.f32 %v8991_v52, %v9690_v0  ;;  %9002 = vtanh.f32 %v1098_v6  ;;  %v8439_v52 = vld [vmem:[%s9551_s8 + $0x80] sm:$0xff] }
  0xfe   : > { %v1172_v43 = vpop.f32.mrf.mxu2  ;;  %v1429_v62 = vmul.f32 %v8993_v55, %v9690_v0 }
  0xff   : > { %v9870_v39 = vpop.f32.mrf.mxu3  ;;  %v1857_v5 = vsel %vm16245_vm0, %v1521_v57, 0.0  ;;  %v1701_v7 = vsel %vm16245_vm0, %v1469_v58, 0.0  ;;  %v1173_v22 = vadd.f32 %v9678_v56, %v1172_v43  ;;  %v1103_v43 = vadd.f32 %v9678_v56, %v1102_v18 }
 0x100   : > { %v9882_v60 = vpop.f32.mrf.mxu0  ;;  %v1581_v11 = vsel %vm16245_vm0, %v1429_v62, 0.0  ;;  %v1233_v41 = vadd.f32 %v9678_v56, %v9870_v39 }
 0x101   : > { %v1001_v55 = vadd.f32 %v9678_v56, %v9882_v60 }
 0x102   : > { %1570 = vadd.xlane.f32.xlu2 %v1569_v8  ;;  %v8995_v8 = vpop.eup %8994  ;;  %v1105_v34 = vpop.f32.mrf.mxu1 }
 0x103   : > { %1783 = vadd.xlane.f32.xlu1 %v1782_v12  ;;  %v8997_v10 = vpop.eup %8996  ;;  %v8438_v12 = vld [vmem:[%s9551_s8 + $0x78] sm:$0xff]  ;;  %v1499_v17 = vmul.f32 %v8995_v8, %v9690_v0 }
 0x104   : > { %8386 = vmatmul.msk.bf16.gmra.mxu3 %vm16245_vm0, %v8485_v59  ;;  %v1428_v19 = vmul.f32 %v8997_v10, %v9690_v0 }
 0x105   : > { %1699 = vadd.xlane.f32.xlu0 %v1698_v16  ;;  %v8999_v16 = vpop.eup %8998  ;;  %v1791_v25 = vsel %vm16245_vm0, %v1499_v17, 0.0 }
 0x106   : > { %v1175_v63 = vpop.f32.mrf.mxu2  ;;  %8339 = vmatmul.msk.bf16.gmra.mxu0 %vm16245_vm0, %v8438_v12  ;;  %v1471_v21 = vmul.f32 %v8999_v16, %v9690_v0  ;;  %v9001_v26 = vpop.eup %9000  ;;  %v1578_v27 = vsel %vm16245_vm0, %v1428_v19, 0.0 }
 0x107   : > { %v1235_v61 = vpop.f32.mrf.mxu3  ;;  %v1176_v9 = vadd.f32 %v9678_v56, %v1175_v63  ;;  %v9003_v29 = vpop.eup %9002 }
 0x108   : > { %v1002_v23 = vpop.f32.mrf.mxu0  ;;  %v1707_v30 = vsel %vm16245_vm0, %v1471_v21, 0.0  ;;  %v1470_v36 = vmul.f32 %v9003_v29, %v9690_v0  ;;  %v9947_v29 = vpop.permute.xlu2 %8515 }
 0x109   : > { %9004 = vtanh.f32 %v1176_v9  ;;  %v1003_v48 = vadd.f32 %v9678_v56, %v1002_v23 }
 0x10a   : > { %1696 = vadd.xlane.f32.xlu2 %v1695_v28  ;;  %v1236_v28 = vadd.f32 %v9678_v56, %v1235_v61  ;;  %9006 = vtanh.f32 %v1173_v22  ;;  %v1107_v59 = vpop.f32.mrf.mxu1 }
 0x10b   : > { %1855 = vadd.xlane.f32.xlu1 %v1854_v32  ;;  %9008 = vtanh.f32 %v998_v24  ;;  %v1523_v32 = vmul.f32 %v9001_v26, %v9690_v0 }
 0x10c   : > { %9010 = vtanh.f32 %v1236_v28 }
 0x10d   : > { %1789 = vadd.xlane.f32.xlu0 %v1788_v33  ;;  %v1863_v44 = vsel %vm16245_vm0, %v1523_v32, 0.0  ;;  %9012 = vtanh.f32 %v1233_v41 }
 0x10e   : > { %v1177_v33 = vpop.f32.mrf.mxu2  ;;  %9014 = vtanh.f32 %v1103_v43  ;;  %v9963_v43 = vld [vmem:[%s15834_s2] ss:$0 sm:$0xff] }
 0x10f   : > { %v9896_v20 = vpop.f32.mrf.mxu3  ;;  %v9005_v31 = vpop.eup %9004  ;;  %9016 = vtanh.f32 %v1003_v48  ;;  %v1178_v62 = vadd.f32 %v9678_v56, %v1177_v33 }
 0x110   : > { %v1501_v38 = vmul.f32 %v9005_v31, %v9690_v0  ;;  %v9914_v42 = vpop.f32.mrf.mxu0  ;;  %v9007_v46 = vpop.eup %9006  ;;  %9018 = vtanh.f32 %v1001_v55  ;;  %v1238_v21 = vadd.f32 %v9678_v56, %v9896_v20 }
 0x111   : > { %v9009_v49 = vpop.eup %9008  ;;  %9020 = vtanh.f32 %v1178_v62  ;;  %v9950_v31 = vpop.permute.xlu1 %8521 }
 0x112   : > { %1786 = vadd.xlane.f32.xlu2 %v1785_v47  ;;  %v1704_v47 = vsel %vm16245_vm0, %v1470_v36, 0.0  ;;  %v9011_v53 = vpop.eup %9010  ;;  %v1430_v57 = vmul.f32 %v9009_v49, %v9690_v0  ;;  %v1110_v20 = vpop.f32.mrf.mxu1 }
 0x113   : > { %1576 = vadd.xlane.f32.xlu1 %v1575_v50  ;;  %v1797_v50 = vsel %vm16245_vm0, %v1501_v38, 0.0  ;;  %v1525_v58 = vmul.f32 %v9011_v53, %v9690_v0  ;;  %v9013_v63 = vpop.eup %9012  ;;  %v9970_v49 = vpop.permute.xlu2 %8527 }
 0x114   : > { %8387 = vmatmul.msk.bf16.gmra.mxu3 %vm16245_vm0, %v8486_v35  ;;  %v1584_v60 = vsel %vm16245_vm0, %v1430_v57, 0.0  ;;  %v1524_v10 = vmul.f32 %v9013_v63, %v9690_v0  ;;  %v1006_v35 = vadd.f32 %v9678_v56, %v9914_v42 }
 0x115   : > { %1861 = vadd.xlane.f32.xlu0 %v1860_v54  ;;  %v1500_v54 = vmul.f32 %v9007_v46, %v9690_v0  ;;  %v1869_v8 = vsel %vm16245_vm0, %v1525_v58, 0.0 }
 0x116   : > { %v1180_v39 = vpop.f32.mrf.mxu2  ;;  %8340 = vmatmul.msk.bf16.gmra.mxu0 %vm16245_vm0, %v8439_v52  ;;  %v1866_v22 = vsel %vm16245_vm0, %v1524_v10, 0.0 }
 0x117   : > { %v9908_v37 = vpop.f32.mrf.mxu3  ;;  %v1794_v3 = vsel %vm16245_vm0, %v1500_v54, 0.0  ;;  %v1181_v32 = vadd.f32 %v9678_v56, %v1180_v39  ;;  %v9980_v54 = vld [vmem:[%s15835_s3] ss:$0 sm:$0xff] }
 0x118   : > { %v9931_v6 = vpop.f32.mrf.mxu0  ;;  %v1241_v39 = vadd.f32 %v9963_v43, %v9908_v37 }
 0x119   : > { %v9973_v53 = vpop.permute.xlu1 %8539 }
 0x11a   : > { %1858 = vadd.xlane.f32.xlu2 %v1857_v5  ;;  %v1108_v5 = vadd.f32 %v9678_v56, %v1107_v59  ;;  %v1112_v58 = vpop.f32.mrf.mxu1  ;;  %v9984_v59 = vpop.permute.xlu0 %8557 }
 0x11b   : > { %1702 = vadd.xlane.f32.xlu1 %v1701_v7  ;;  %v9015_v7 = vpop.eup %9014  ;;  %16250 = vst [vmem:[#allocation6_spill] sm:$0xff] %v9984_v59 }
 0x11c   : > { %v9017_v9 = vpop.eup %9016  ;;  %9022 = vtanh.f32 %v1108_v5  ;;  %v1472_v12 = vmul.f32 %v9015_v7, %v9690_v0 }
 0x11d   : > { %1582 = vadd.xlane.f32.xlu0 %v1581_v11  ;;  %v1106_v11 = vadd.f32 %v9678_v56, %v1105_v34  ;;  %v1432_v16 = vmul.f32 %v9017_v9, %v9690_v0  ;;  %v9019_v19 = vpop.eup %9018  ;;  %v9995_v9 = vpop.permute.xlu2 %8533 }
 0x11e   : > { %v1182_v17 = vpop.f32.mrf.mxu2  ;;  %v1710_v26 = vsel %vm16245_vm0, %v1472_v12, 0.0 }
 0x11f   : > { %v1242_v61 = vpop.f32.mrf.mxu3  ;;  %v1183_v23 = vadd.f32 %v9678_v56, %v1182_v17  ;;  %9024 = vtanh.f32 %v1106_v11 }
 0x120   : > { %9026 = vtanh.f32 %v1238_v21 }
 0x121   : > { %v1010_v24 = vpop.f32.mrf.mxu0  ;;  %9028 = vtanh.f32 %v1183_v23  ;;  %v9999_v12 = vpop.permute.xlu1 %8551 }
 0x122   : > { %1579 = vadd.xlane.f32.xlu2 %v1578_v27  ;;  %v1590_v27 = vsel %vm16245_vm0, %v1432_v16, 0.0  ;;  %9030 = vtanh.f32 %v1181_v32 }
 0x123   : > { %1792 = vadd.xlane.f32.xlu1 %v1791_v25  ;;  %v9021_v25 = vpop.eup %9020  ;;  %9032 = vtanh.f32 %v1006_v35 }
 0x124   : > { %v9023_v28 = vpop.eup %9022  ;;  %v1502_v33 = vmul.f32 %v9021_v25, %v9690_v0 }
 0x125   : > { %1708 = vadd.xlane.f32.xlu0 %v1707_v30  ;;  %v1431_v30 = vmul.f32 %v9019_v19, %v9690_v0  ;;  %v1474_v34 = vmul.f32 %v9023_v28, %v9690_v0  ;;  %v9025_v38 = vpop.eup %9024  ;;  %v1115_v19 = vpop.f32.mrf.mxu1 }
 0x126   : > { %v1800_v48 = vsel %vm16245_vm0, %v1502_v33, 0.0  ;;  %v1185_v52 = vpop.f32.mrf.mxu2  ;;  %v10017_v35 = vpop.permute.xlu2 %8545 }
 0x127   : > { %v9939_v18 = vpop.f32.mrf.mxu3  ;;  %v1587_v36 = vsel %vm16245_vm0, %v1431_v30, 0.0  ;;  %v1716_v56 = vsel %vm16245_vm0, %v1474_v34, 0.0  ;;  %v1186_v21 = vadd.f32 %v9963_v43, %v1185_v52  ;;  %v10010_v30 = vpop.xlane.xlu0 %1546  ;;  %16251 = vst [vmem:[#allocation7_spill] sm:$0xff] %v10017_v35 }
 0x129   : > { %v9966_v46 = vpop.f32.mrf.mxu0 }
 0x12a   : > { %1705 = vadd.xlane.f32.xlu2 %v1704_v47  ;;  %v9027_v47 = vpop.eup %9026 }
 0x12b   : > { %1864 = vadd.xlane.f32.xlu1 %v1863_v44  ;;  %v1243_v44 = vadd.f32 %v9963_v43, %v1242_v61  ;;  %v9029_v42 = vpop.eup %9028  ;;  %v1526_v55 = vmul.f32 %v9980_v54, %v9027_v47 }
 0x12c   : > { %v1504_v57 = vmul.f32 %v9980_v54, %v9029_v42  ;;  %v9031_v62 = vpop.eup %9030  ;;  %v1113_v42 = vadd.f32 %v9963_v43, %v1112_v58 }
 0x12d   : > { %1798 = vadd.xlane.f32.xlu0 %v1797_v50  ;;  %v1473_v50 = vmul.f32 %v9025_v38, %v9690_v0  ;;  %9034 = vtanh.f32 %v1243_v44  ;;  %v1111_v0 = vadd.f32 %v9963_v43, %v1110_v20  ;;  %v9033_v37 = vpop.eup %9032  ;;  %v1872_v7 = vsel %vm16245_vm0, %v1526_v55, 0.0  ;;  %v10021_v38 = vpop.permute.xlu1 %8569 }
 0x12e   : > { %9036 = vtanh.f32 %v1241_v39  ;;  %v1503_v10 = vmul.f32 %v9980_v54, %v9031_v62  ;;  %v1433_v11 = vmul.f32 %v9980_v54, %v9033_v37  ;;  %v1187_v17 = vpop.f32.mrf.mxu2  ;;  %v1116_v20 = vadd.f32 %v9963_v43, %v1115_v19  ;;  %v8441_v19 = vld [vmem:[%s9551_s8 + $0x90] sm:$0xff] }
 0x12f   : > { %v9958_v41 = vpop.f32.mrf.mxu3  ;;  %v1713_v61 = vsel %vm16245_vm0, %v1473_v50, 0.0  ;;  %9038 = vtanh.f32 %v1111_v0  ;;  %v10037_v37 = vpop.xlane.xlu0 %1672 }
 0x130   : > { %v1593_v25 = vsel %vm16245_vm0, %v1433_v11, 0.0  ;;  %v1013_v11 = vadd.f32 %v9963_v43, %v9966_v46 }
 0x131   : > { %v9991_v5 = vpop.f32.mrf.mxu0 }
 0x132   : > { %1795 = vadd.xlane.f32.xlu2 %v1794_v3  ;;  %v1011_v3 = vadd.f32 %v9963_v43, %v1010_v24  ;;  %v1008_v24 = vadd.f32 %v9963_v43, %v9931_v6 }
 0x133   : > { %1585 = vadd.xlane.f32.xlu1 %v1584_v60  ;;  %v1806_v60 = vsel %vm16245_vm0, %v1504_v57, 0.0 }
 0x134   : > { %9040 = vtanh.f32 %v1011_v3  ;;  %v1117_v3 = vpop.f32.mrf.mxu1 }
 0x135   : > { %1870 = vadd.xlane.f32.xlu0 %v1869_v8  ;;  %v9035_v8 = vpop.eup %9034  ;;  %9042 = vtanh.f32 %v1186_v21 }
 0x136   : > { %v1528_v16 = vmul.f32 %v9980_v54, %v9035_v8  ;;  %v9037_v23 = vpop.eup %9036  ;;  %9044 = vtanh.f32 %v1008_v24  ;;  %v1190_v47 = vpop.f32.mrf.mxu2 }
 0x137   : > { %v9988_v63 = vpop.f32.mrf.mxu3  ;;  %v9039_v28 = vpop.eup %9038  ;;  %v1527_v6 = vmul.f32 %v9980_v54, %v9037_v23  ;;  %9046 = vtanh.f32 %v1116_v20  ;;  %v1191_v39 = vadd.f32 %v9963_v43, %v1190_v47  ;;  %v1248_v47 = vadd.f32 %v9963_v43, %v9958_v41 }
 0x138   : > { %v1878_v33 = vsel %vm16245_vm0, %v1528_v16, 0.0  ;;  %v1251_v23 = vadd.f32 %v9963_v43, %v9988_v63 }
 0x139   : > { %v10013_v32 = vpop.f32.mrf.mxu0 }
 0x13a   : > { %1867 = vadd.xlane.f32.xlu2 %v1866_v22  ;;  %v1803_v22 = vsel %vm16245_vm0, %v1503_v10, 0.0  ;;  %v9041_v34 = vpop.eup %9040  ;;  %v1188_v10 = vadd.f32 %v9963_v43, %v1187_v17 }
 0x13b   : > { %1711 = vadd.xlane.f32.xlu1 %v1710_v26  ;;  %v1435_v44 = vmul.f32 %v9980_v54, %v9041_v34  ;;  %v9043_v52 = vpop.eup %9042 }
 0x13c   : > { %v9045_v57 = vpop.eup %9044  ;;  %v1505_v58 = vmul.f32 %v9980_v54, %v9043_v52  ;;  %v1018_v52 = vadd.f32 %v9963_v43, %v10013_v32 }
 0x13d   : > { %1591 = vadd.xlane.f32.xlu0 %v1590_v27  ;;  %v8440_v27 = vld [vmem:[%s9551_s8 + $0x88] sm:$0xff]  ;;  %v1599_v0 = vsel %vm16245_vm0, %v1435_v44, 0.0  ;;  %v9047_v62 = vpop.eup %9046 }
 0x13e   : > { %8341 = vmatmul.msk.bf16.gmra.mxu0 %vm16245_vm0, %v8440_v27  ;;  %v1477_v8 = vmul.f32 %v9980_v54, %v9047_v62  ;;  %v1809_v16 = vsel %vm16245_vm0, %v1505_v58, 0.0  ;;  %v1192_v46 = vpop.f32.mrf.mxu2 }
 0x13f   : > { %v10007_v26 = vpop.f32.mrf.mxu3 }
 0x141   : > { %v10030_v55 = vpop.f32.mrf.mxu0 }
 0x142   : > { %1588 = vadd.xlane.f32.xlu2 %v1587_v36  ;;  %v1475_v36 = vmul.f32 %v9980_v54, %v9039_v28 }
 0x143   : > { %1801 = vadd.xlane.f32.xlu1 %v1800_v48  ;;  %v1246_v48 = vadd.f32 %v9963_v43, %v9939_v18  ;;  %v10035_v18 = vpop.permute.xlu2 %8563 }
 0x144   : > { %v1719_v50 = vsel %vm16245_vm0, %v1475_v36, 0.0 }
 0x145   : > { %1717 = vadd.xlane.f32.xlu0 %v1716_v56  ;;  %v1875_v56 = vsel %vm16245_vm0, %v1527_v6, 0.0  ;;  %9048 = vtanh.f32 %v1246_v48  ;;  %v10063_v6 = vpop.xlane.xlu0 %1549  ;;  %v1118_v48 = vadd.f32 %v9963_v43, %v1117_v3 }
 0x146   : > { %9050 = vtanh.f32 %v1113_v42  ;;  %v1195_v41 = vpop.f32.mrf.mxu2 }
 0x147   : > { %9052 = vtanh.f32 %v1191_v39 }
 0x148   : > { %9054 = vtanh.f32 %v1188_v10 }
 0x149   : > { %v10053_v27 = vpop.f32.mrf.mxu0  ;;  %9056 = vtanh.f32 %v1013_v11 }
 0x14a   : > { %1714 = vadd.xlane.f32.xlu2 %v1713_v61  ;;  %v10033_v61 = vpop.f32.mrf.mxu3  ;;  %9058 = vtanh.f32 %v1251_v23 }
 0x14b   : > { %1873 = vadd.xlane.f32.xlu1 %v1872_v7  ;;  %v10040_v7 = vpop.permute.xlu1 %8581  ;;  %v9049_v21 = vpop.eup %9048  ;;  %9060 = vtanh.f32 %v1248_v47 }
 0x14c   : > { %v9051_v24 = vpop.eup %9050  ;;  %v10056_v28 = vpop.permute.xlu2 %8575  ;;  %v1529_v20 = vmul.f32 %v9980_v54, %v9049_v21  ;;  %9062 = vtanh.f32 %v1118_v48  ;;  %v1193_v21 = vadd.f32 %v9963_v43, %v1192_v46 }
 0x14d   : > { %1807 = vadd.xlane.f32.xlu0 %v1806_v60  ;;  %v1434_v60 = vmul.f32 %v9980_v54, %v9045_v57  ;;  %v9053_v17 = vpop.eup %9052  ;;  %16252 = vst [vmem:[#allocation8_spill] sm:$0xff] %v10056_v28  ;;  %v1476_v36 = vmul.f32 %v9980_v54, %v9051_v24  ;;  %9064 = vtanh.f32 %v1018_v52 }
 0x14e   : > { %8342 = vmatmul.msk.bf16.gmra.mxu0 %vm16245_vm0, %v8441_v19  ;;  %v1507_v44 = vmul.f32 %v9980_v54, %v9053_v17  ;;  %v9055_v42 = vpop.eup %9054  ;;  %v10088_v19 = vpop.xlane.xlu0 %1762 }
 0x14f   : > { %v9057_v39 = vpop.eup %9056  ;;  %v1506_v32 = vmul.f32 %v9980_v54, %v9055_v42  ;;  %16253 = vst [vmem:[#allocation9_spill] sm:$0xff] %v10088_v19  ;;  %v1197_v48 = vpop.f32.mrf.mxu2 }
 0x150   : > { %v1815_v57 = vsel %vm16245_vm0, %v1507_v44, 0.0 }
 0x151   : > { %v1812_v24 = vsel %vm16245_vm0, %v1506_v32, 0.0 }
 0x152   : > { %1804 = vadd.xlane.f32.xlu2 %v1803_v22  ;;  %v1596_v22 = vsel %vm16245_vm0, %v1434_v60, 0.0  ;;  %v10059_v34 = vpop.f32.mrf.mxu3  ;;  %v1016_v60 = vadd.f32 %v9963_v43, %v9991_v5 }
 0x153   : > { %1594 = vadd.xlane.f32.xlu1 %v1593_v25  ;;  %v1725_v25 = vsel %vm16245_vm0, %v1477_v8, 0.0  ;;  %v10061_v63 = vpop.permute.xlu1 %8593  ;;  %v10077_v58 = vpop.f32.mrf.mxu0  ;;  %v1436_v8 = vmul.f32 %v9980_v54, %v9057_v39 }
 0x154   : > { %v10075_v62 = vpop.permute.xlu2 %8587  ;;  %9066 = vtanh.f32 %v1016_v60 }
 0x155   : > { %1879 = vadd.xlane.f32.xlu0 %v1878_v33  ;;  %v1120_v33 = vpop.f32.mrf.mxu1  ;;  %v1602_v5 = vsel %vm16245_vm0, %v1436_v8, 0.0  ;;  %9068 = vtanh.f32 %v1193_v21 }
 0x156   : > { %v10111_v60 = vpop.xlane.xlu0 %1834 }
 0x157   : > { %16255 = vst [vmem:[#allocation11_spill] sm:$0xff] %v10111_v60 }
 0x15a   : > { %1876 = vadd.xlane.f32.xlu2 %v1875_v56  ;;  %v1881_v56 = vsel %vm16245_vm0, %v1529_v20, 0.0 }
 0x15b   : > { %1720 = vadd.xlane.f32.xlu1 %v1719_v50  ;;  %v1722_v50 = vsel %vm16245_vm0, %v1476_v36, 0.0  ;;  %v10079_v3 = vpop.permute.xlu1 %8605  ;;  %v10105_v39 = vpop.f32.mrf.mxu0 }
 0x15c   : > { %v10097_v44 = vpop.permute.xlu2 %8599 }
 0x15d   : > { %1600 = vadd.xlane.f32.xlu0 %v1599_v0  ;;  %v9059_v0 = vpop.eup %9058  ;;  %v1122_v11 = vpop.f32.mrf.mxu1 }
 0x15e   : > { %v1531_v10 = vmul.f32 %v9980_v54, %v9059_v0  ;;  %v9061_v23 = vpop.eup %9060  ;;  %v1253_v0 = vadd.f32 %v9963_v43, %v10007_v26 }
 0x15f   : > { %v9063_v17 = vpop.eup %9062  ;;  %v1530_v47 = vmul.f32 %v9980_v54, %v9061_v23 }
 0x160   : > { %v1887_v20 = vsel %vm16245_vm0, %v1531_v10, 0.0  ;;  %v9065_v36 = vpop.eup %9064  ;;  %v1478_v42 = vmul.f32 %v9980_v54, %v9063_v17  ;;  %v1198_v10 = vadd.f32 %v9963_v43, %v1197_v48 }
 0x161   : > { %v1884_v8 = vsel %vm16245_vm0, %v1530_v47, 0.0 }
 0x162   : > { %1597 = vadd.xlane.f32.xlu2 %v1596_v22  ;;  %v8442_v22 = vld [vmem:[%s9551_s8 + $0x98] sm:$0xff] }
 0x163   : > { %1810 = vadd.xlane.f32.xlu1 %v1809_v16  ;;  %v10086_v16 = vpop.f32.mrf.mxu3  ;;  %8343 = vmatmul.msk.bf16.gmra.mxu0 %vm16245_vm0, %v8442_v22  ;;  %v10099_v46 = vpop.xlane.xlu1 %1756 }
 0x164   : > { %16254 = vst [vmem:[#allocation10_spill] sm:$0xff] %v10099_v46  ;;  %v10117_v23 = vpop.xlane.xlu2 %1759 }
 0x165   : > { %1726 = vadd.xlane.f32.xlu0 %v1725_v25  ;;  %v1123_v25 = vadd.f32 %v9963_v43, %v1122_v11  ;;  %v1125_v52 = vpop.f32.mrf.mxu1  ;;  %v1728_v11 = vsel %vm16245_vm0, %v1478_v42, 0.0  ;;  %16256 = vst [vmem:[#allocation12_spill] sm:$0xff] %v10117_v23 }
 0x167   : > { %9070 = vtanh.f32 %v1123_v25 }
 0x16a   : > { %1723 = vadd.xlane.f32.xlu2 %v1722_v50  ;;  %v1438_v50 = vmul.f32 %v9980_v54, %v9065_v36 }
 0x16b   : > { %1882 = vadd.xlane.f32.xlu1 %v1881_v56  ;;  %v1121_v56 = vadd.f32 %v9963_v43, %v1120_v33  ;;  %v10109_v32 = vpop.f32.mrf.mxu3 }
 0x16c   : > { %v1608_v21 = vsel %vm16245_vm0, %v1438_v50, 0.0 }
 0x16d   : > { %1816 = vadd.xlane.f32.xlu0 %v1815_v57  ;;  %v9067_v57 = vpop.eup %9066  ;;  %9072 = vtanh.f32 %v1121_v56  ;;  %v10128_v48 = vpop.f32.mrf.mxu1 }
 0x16e   : > { %v9069_v33 = vpop.eup %9068  ;;  %v1437_v26 = vmul.f32 %v9980_v54, %v9067_v57  ;;  %9074 = vtanh.f32 %v1253_v0  ;;  %v10130_v56 = vpop.f32.mrf.mxu0 }
 0x16f   : > { %v9071_v22 = vpop.eup %9070  ;;  %9076 = vtanh.f32 %v1198_v10  ;;  %v1508_v25 = vmul.f32 %v9980_v54, %v9069_v33  ;;  %v10141_v33 = vpop.xlane.xlu2 %1831 }
 0x170   : > { %v1480_v17 = vmul.f32 %v9980_v54, %v9071_v22  ;;  %v1605_v36 = vsel %vm16245_vm0, %v1437_v26, 0.0  ;;  %16258 = vst [vmem:[#allocation14_spill] sm:$0xff] %v10141_v33  ;;  %v1126_v22 = vadd.f32 %v9963_v43, %v1125_v52 }
 0x172   : > { %1813 = vadd.xlane.f32.xlu2 %v1812_v24  ;;  %v1196_v24 = vadd.f32 %v9963_v43, %v1195_v41  ;;  %v1818_v41 = vsel %vm16245_vm0, %v1508_v25, 0.0  ;;  %v1734_v50 = vsel %vm16245_vm0, %v1480_v17, 0.0  ;;  %v1256_v25 = vadd.f32 %v9963_v43, %v10033_v61 }
 0x173   : > { %1603 = vadd.xlane.f32.xlu1 %v1602_v5  ;;  %v10123_v5 = vpop.xlane.xlu1 %1828  ;;  %v9073_v47 = vpop.eup %9072 }
 0x174   : > { %16257 = vst [vmem:[#allocation13_spill] sm:$0xff] %v10123_v5  ;;  %v9075_v42 = vpop.eup %9074  ;;  %9078 = vtanh.f32 %v1196_v24  ;;  %v10134_v57 = vpop.f32.mrf.mxu3  ;;  %v1479_v10 = vmul.f32 %v9980_v54, %v9073_v47 }
 0x175   : > { %1888 = vadd.xlane.f32.xlu0 %v1887_v20  ;;  %v1021_v20 = vadd.f32 %v9963_v43, %v10030_v55  ;;  %v9077_v0 = vpop.eup %9076  ;;  %v1258_v55 = vadd.f32 %v9963_v43, %v10059_v34 }
 0x176   : > { %v1731_v26 = vsel %vm16245_vm0, %v1479_v10, 0.0  ;;  %v1261_v10 = vadd.f32 %v9963_v43, %v10086_v16 }
 0x177   : > { %9080 = vtanh.f32 %v1021_v20  ;;  %v1026_v20 = vadd.f32 %v9963_v43, %v10077_v58  ;;  %v10163_v58 = vpop.xlane.xlu2 %1678 }
 0x178   : > { %9082 = vtanh.f32 %v1258_v55  ;;  %16261 = vst [vmem:[#allocation17_spill] sm:$0xff] %v10163_v58 }
 0x179   : > { %9084 = vtanh.f32 %v1126_v22 }
 0x17a   : > { %1885 = vadd.xlane.f32.xlu2 %v1884_v8  ;;  %v10136_v8 = vpop.xlane.xlu0 %1681  ;;  %v9079_v24 = vpop.eup %9078  ;;  %9086 = vtanh.f32 %v1256_v25 }
 0x17b   : > { %1729 = vadd.xlane.f32.xlu1 %v1728_v11  ;;  %v1532_v11 = vmul.f32 %v9980_v54, %v9075_v42  ;;  %v10149_v17 = vpop.xlane.xlu1 %1675  ;;  %v1130_v42 = vpop.f32.mrf.mxu1  ;;  %v1509_v52 = vmul.f32 %v9980_v54, %v9079_v24  ;;  %9088 = vtanh.f32 %v1026_v20 }
 0x17c   : > { %16259 = vst [vmem:[#allocation15_spill] sm:$0xff] %v10149_v17  ;;  %v1131_v25 = vadd.f32 %v9963_v43, %v1130_v42  ;;  %9090 = vtanh.f32 %v1261_v10  ;;  %v1128_v10 = vadd.f32 %v9963_v43, %v10128_v48 }
 0x17d   : > { %1609 = vadd.xlane.f32.xlu0 %v1608_v21  ;;  %v1510_v21 = vmul.f32 %v9980_v54, %v9077_v0  ;;  %v9081_v34 = vpop.eup %9080 }
 0x17e   : > { %v1439_v61 = vmul.f32 %v9980_v54, %v9081_v34  ;;  %v9083_v0 = vpop.eup %9082 }
 0x17f   : > { %v1824_v47 = vsel %vm16245_vm0, %v1510_v21, 0.0  ;;  %v1023_v21 = vadd.f32 %v9963_v43, %v10053_v27  ;;  %v9085_v24 = vpop.eup %9084 }
 0x180   : > { %v1611_v22 = vsel %vm16245_vm0, %v1439_v61, 0.0  ;;  %v9087_v34 = vpop.eup %9086 }
 0x181   : > { %v9089_v20 = vpop.eup %9088  ;;  %9092 = vtanh.f32 %v1023_v21  ;;  %v1533_v61 = vmul.f32 %v9980_v54, %v9087_v34  ;;  %v1028_v21 = vadd.f32 %v9963_v43, %v10105_v39 }
 0x182   : > { %1606 = vadd.xlane.f32.xlu2 %v1605_v36  ;;  %v1890_v36 = vsel %vm16245_vm0, %v1532_v11, 0.0  ;;  %v10161_v55 = vpop.xlane.xlu0 %1771  ;;  %v1821_v11 = vsel %vm16245_vm0, %v1509_v52, 0.0  ;;  %9094 = vtanh.f32 %v1131_v25  ;;  %v1441_v42 = vmul.f32 %v9980_v54, %v9089_v20 }
 0x183   : > { %1819 = vadd.xlane.f32.xlu1 %v1818_v41  ;;  %v10155_v41 = vpop.f32.mrf.mxu0  ;;  %16260 = vst [vmem:[#allocation16_spill] sm:$0xff] %v10161_v55  ;;  %v1132_v27 = vpop.f32.mrf.mxu1  ;;  %v1266_v25 = vadd.f32 %v9963_v43, %v10134_v57  ;;  %v1893_v34 = vsel %vm16245_vm0, %v1533_v61, 0.0  ;;  %9096 = vtanh.f32 %v1128_v10 }
 0x184   : > { %9098 = vtanh.f32 %v1028_v21  ;;  %v1133_v10 = vadd.f32 %v9963_v43, %v1132_v27  ;;  %v1031_v27 = vadd.f32 %v9963_v43, %v10130_v56 }
 0x185   : > { %1735 = vadd.xlane.f32.xlu0 %v1734_v50  ;;  %v10159_v50 = vpop.f32.mrf.mxu3  ;;  %9100 = vtanh.f32 %v1266_v25  ;;  %v1033_v25 = vadd.f32 %v9963_v43, %v10155_v41 }
 0x18a   : > { %1732 = vadd.xlane.f32.xlu2 %v1731_v26  ;;  %v1534_v26 = vmul.f32 %v9980_v54, %v9083_v0 }
 0x18b   : > { %1891 = vadd.xlane.f32.xlu1 %v1890_v36  ;;  %v10173_v36 = vpop.xlane.xlu1 %1552  ;;  %v10177_v52 = vpop.f32.mrf.mxu0 }
 0x18c   : > { %v1896_v16 = vsel %vm16245_vm0, %v1534_v26, 0.0  ;;  %v9091_v26 = vpop.eup %9090  ;;  %v1135_v48 = vpop.f32.mrf.mxu1 }
 0x18d   : > { %1825 = vadd.xlane.f32.xlu0 %v1824_v47  ;;  %v1481_v47 = vmul.f32 %v9980_v54, %v9085_v24  ;;  %v10181_v0 = vpop.f32.mrf.mxu3  ;;  %v10190_v24 = vpop.xlane.xlu2 %1558  ;;  %v1535_v39 = vmul.f32 %v9980_v54, %v9091_v26 }
 0x18e   : > { %v9093_v20 = vpop.eup %9092 }
 0x18f   : > { %v9095_v1 = vpop.eup %9094  ;;  %v1899_v21 = vsel %vm16245_vm0, %v1535_v39, 0.0 }
 0x190   : > { %v1483_v57 = vmul.f32 %v9980_v54, %v9095_v1  ;;  %v9097_v26 = vpop.eup %9096 }
 0x192   : > { %1822 = vadd.xlane.f32.xlu2 %v1821_v11  ;;  %v10183_v11 = vpop.xlane.xlu0 %1843  ;;  %v1743_v1 = vsel %vm16245_vm0, %v1483_v57, 0.0 }
 0x193   : > { %1612 = vadd.xlane.f32.xlu1 %v1611_v22  ;;  %16262 = vst [vmem:[#allocation18_spill] sm:$0xff] %v10183_v11  ;;  %v1737_v22 = vsel %vm16245_vm0, %v1481_v47, 0.0  ;;  %v10197_v47 = vpop.xlane.xlu1 %1555  ;;  %v1440_v11 = vmul.f32 %v9980_v54, %v9093_v20  ;;  %v10201_v61 = vpop.f32.mrf.mxu0 }
 0x194   : > { %v1137_v39 = vpop.f32.mrf.mxu1 }
 0x195   : > { %1897 = vadd.xlane.f32.xlu0 %v1896_v16  ;;  %v1617_v16 = vsel %vm16245_vm0, %v1441_v42, 0.0  ;;  %v1263_v42 = vadd.f32 %v9963_v43, %v10109_v32  ;;  %v1614_v20 = vsel %vm16245_vm0, %v1440_v11, 0.0  ;;  %v10213_v55 = vpop.xlane.xlu2 %1768  ;;  %v1482_v32 = vmul.f32 %v9980_v54, %v9097_v26 }
 0x196   : > { %16263 = vst [vmem:[#allocation19_spill] sm:$0xff] %v10213_v55 }
 0x197   : > { %9102 = vtanh.f32 %v1263_v42  ;;  %v1740_v42 = vsel %vm16245_vm0, %v1482_v32, 0.0 }
 0x198   : > { %9104 = vtanh.f32 %v1133_v10  ;;  %v1138_v10 = vadd.f32 %v9963_v43, %v1137_v39  ;;  %v1136_v39 = vadd.f32 %v9963_v43, %v1135_v48 }
 0x199   : > { %9106 = vtanh.f32 %v1033_v25 }
 0x19a   : > { %1894 = vadd.xlane.f32.xlu2 %v1893_v34  ;;  %v10207_v34 = vpop.xlane.xlu0 %1564  ;;  %9108 = vtanh.f32 %v1031_v27 }
 0x19b   : > { %1738 = vadd.xlane.f32.xlu1 %v1737_v22  ;;  %v1272_v22 = vpop.f32.mrf.mxu3  ;;  %v1040_v57 = vpop.f32.mrf.mxu0  ;;  %9110 = vtanh.f32 %v1138_v10 }
 0x19c   : > { %v1273_v33 = vadd.f32 %v9963_v43, %v1272_v22  ;;  %9112 = vtanh.f32 %v1136_v39 }
 0x19d   : > { %1618 = vadd.xlane.f32.xlu0 %v1617_v16  ;;  %v9099_v16 = vpop.eup %9098 }
 0x19e   : > { %v9101_v60 = vpop.eup %9100  ;;  %v1442_v41 = vmul.f32 %v9980_v54, %v9099_v16  ;;  %9114 = vtanh.f32 %v1273_v33 }
 0x19f   : > { %v1537_v11 = vmul.f32 %v9980_v54, %v9101_v60  ;;  %v9103_v19 = vpop.eup %9102 }
 0x1a0   : > { %v1620_v26 = vsel %vm16245_vm0, %v1442_v41, 0.0  ;;  %v1536_v32 = vmul.f32 %v9980_v54, %v9103_v19 }
 0x1a1   : > { %v1905_v56 = vsel %vm16245_vm0, %v1537_v11, 0.0 }
 0x1a2   : > { %1615 = vadd.xlane.f32.xlu2 %v1614_v20  ;;  %v10220_v20 = vpop.xlane.xlu1 %1765  ;;  %v10228_v60 = vpop.xlane.xlu0 %1690  ;;  %v1902_v5 = vsel %vm16245_vm0, %v1536_v32, 0.0 }
 0x1a3   : > { %1900 = vadd.xlane.f32.xlu1 %v1899_v21  ;;  %16264 = vst [vmem:[#allocation20_spill] sm:$0xff] %v10220_v20  ;;  %v9105_v21 = vpop.eup %9104  ;;  %v10226_v25 = vpop.f32.mrf.mxu3 }
 0x1a4   : > { %v9107_v16 = vpop.eup %9106  ;;  %v1484_v27 = vmul.f32 %v9980_v54, %v9105_v21  ;;  %v10242_v19 = vpop.f32.mrf.mxu0 }
 0x1a5   : > { %1744 = vadd.xlane.f32.xlu0 %v1743_v1  ;;  %v10230_v1 = vpop.xlane.xlu2 %1840  ;;  %v1444_v41 = vmul.f32 %v9980_v54, %v9107_v16 }
 0x1a6   : > { %16265 = vst [vmem:[#allocation21_spill] sm:$0xff] %v10230_v1 }
 0x1a7   : > { %v1626_v10 = vsel %vm16245_vm0, %v1444_v41, 0.0 }
 0x1aa   : > { %1741 = vadd.xlane.f32.xlu2 %v1740_v42  ;;  %v9109_v42 = vpop.eup %9108  ;;  %v10236_v11 = vpop.xlane.xlu1 %1837 }
 0x1ab   : > { %1621 = vadd.xlane.f32.xlu1 %v1620_v26  ;;  %16266 = vst [vmem:[#allocation22_spill] sm:$0xff] %v10236_v11  ;;  %v1746_v26 = vsel %vm16245_vm0, %v1484_v27, 0.0  ;;  %v9111_v48 = vpop.eup %9110  ;;  %v1443_v21 = vmul.f32 %v9980_v54, %v9109_v42  ;;  %v10247_v16 = vpop.xlane.xlu0 %1780  ;;  %v1041_v27 = vadd.f32 %v9963_v43, %v1040_v57 }
 0x1ac   : > { %16267 = vst [vmem:[#allocation23_spill] sm:$0xff] %v10247_v16  ;;  %v1486_v22 = vmul.f32 %v9980_v54, %v9111_v48  ;;  %v9113_v39 = vpop.eup %9112  ;;  %v10258_v16 = vpop.f32.mrf.mxu0 }
 0x1ad   : > { %1906 = vadd.xlane.f32.xlu0 %v1905_v56  ;;  %v10245_v56 = vpop.f32.mrf.mxu3  ;;  %v10250_v32 = vpop.xlane.xlu2 %1561  ;;  %v1485_v11 = vmul.f32 %v9980_v54, %v9113_v39  ;;  %9116 = vtanh.f32 %v1041_v27  ;;  %v2191_v39 = vperm.slane %v9648_v45, 2  ;;  %v2216_v27 = vperm.slane %v9648_v45, 3 }
 0x1ae   : > { %v1752_v41 = vsel %vm16245_vm0, %v1486_v22, 0.0 }
 0x1b2   : > { %1903 = vadd.xlane.f32.xlu2 %v1902_v5  ;;  %v1623_v5 = vsel %vm16245_vm0, %v1443_v21, 0.0  ;;  %v10255_v42 = vpop.xlane.xlu1 %1684  ;;  %v1749_v21 = vsel %vm16245_vm0, %v1485_v11, 0.0  ;;  %v10273_v11 = vpack.i.bf16 %v2216_v27, %v2191_v39 }
 0x1b3   : > { %1747 = vadd.xlane.f32.xlu1 %v1746_v26  ;;  %v9115_v26 = vpop.eup %9114  ;;  %16268 = vst [vmem:[#allocation24_spill] sm:$0xff] %v10255_v42  ;;  %v10261_v48 = vpop.xlane.xlu0 %1852  ;;  %v1038_v42 = vadd.f32 %v9963_v43, %v10201_v61 }
 0x1b4   : > { %v1540_v33 = vmul.f32 %v9980_v54, %v9115_v26  ;;  %16269 = vst [vmem:[#allocation25_spill] sm:$0xff] %v10261_v48  ;;  %v9117_v1 = vpop.eup %9116  ;;  %v1047_v48 = vpop.f32.mrf.mxu0 }
 0x1b5   : > { %1627 = vadd.xlane.f32.xlu0 %v1626_v10  ;;  %v1280_v10 = vpop.f32.mrf.mxu3  ;;  %v10264_v57 = vpop.xlane.xlu2 %1687  ;;  %v1447_v26 = vmul.f32 %v9980_v54, %v9117_v1 }
 0x1b6   : > { %16270 = vst [vmem:[#allocation26_spill] sm:$0xff] %v10264_v57  ;;  %v1281_v22 = vadd.f32 %v9963_v43, %v1280_v10  ;;  %v1048_v10 = vadd.f32 %v9963_v43, %v1047_v48 }
 0x1b8   : > { %9118 = vtanh.f32 %v1281_v22 }
 0x1b9   : > { %9120 = vtanh.f32 %v1048_v10 }
 0x1ba   : > { %1624 = vadd.xlane.f32.xlu2 %v1623_v5  ;;  %v1914_v5 = vsel %vm16245_vm0, %v1540_v33, 0.0  ;;  %v1635_v33 = vsel %vm16245_vm0, %v1447_v26, 0.0 }
 0x1bb   : > { %v10275_v55 = vpop.xlane.xlu0 %1573 }
 0x1bd   : > { %1753 = vadd.xlane.f32.xlu0 %v1752_v41  ;;  %v10270_v41 = vpop.xlane.xlu1 %1774  ;;  %v10279_v20 = vpop.xlane.xlu2 %1777 }
 0x1be   : > { %16271 = vst [vmem:[#allocation27_spill] sm:$0xff] %v10270_v41  ;;  %v2291_v41 = vperm.slane %v9648_v45, 6 }
 0x1bf   : > { %16272 = vst [vmem:[#allocation28_spill] sm:$0xff] %v10279_v20 }
 0x1c2   : > { %1750 = vadd.xlane.f32.xlu2 %v1749_v21  ;;  %v9119_v21 = vpop.eup %9118 }
 0x1c3   : > { %v1543_v22 = vmul.f32 %v9980_v54, %v9119_v21  ;;  %v9121_v39 = vpop.eup %9120  ;;  %v10286_v27 = vpop.xlane.xlu0 %1699 }
 0x1c4   : > { %v1450_v26 = vmul.f32 %v9980_v54, %v9121_v39 }
 0x1c5   : > { %1915 = vadd.xlane.f32.xlu0 %v1914_v5  ;;  %v10283_v5 = vpop.xlane.xlu1 %1846  ;;  %v1923_v1 = vsel %vm16245_vm0, %v1543_v22, 0.0  ;;  %v10289_v48 = vpop.xlane.xlu2 %1849 }
 0x1c6   : > { %16273 = vst [vmem:[#allocation29_spill] sm:$0xff] %v10283_v5  ;;  %v1644_v10 = vsel %vm16245_vm0, %v1450_v26, 0.0 }
 0x1c7   : > { %16274 = vst [vmem:[#allocation30_spill] sm:$0xff] %v10289_v48 }
 0x1cb   : > { %v10298_v21 = vpop.xlane.xlu0 %1789 }
 0x1cc   : > { %8617 = vperm.xlu1 %8615, %v10273_v11   ;;  %16276 = vst [vmem:[#allocation32_spill] sm:$0xff] %v10298_v21  ;;  %v1036_v21 = vadd.f32 %v9963_v43, %v10177_v52 }
 0x1cd   : > { %1636 = vadd.xlane.f32.xlu0 %v1635_v33  ;;  %v10292_v20 = vpop.xlane.xlu1 %1567  ;;  %v10296_v33 = vpop.f32.mrf.mxu0 }
 0x1ce   : > { %16275 = vst [vmem:[#allocation31_spill] sm:$0xff] %v10292_v20  ;;  %v10300_v22 = vpop.xlane.xlu2 %1570 }
 0x1cf   : > { %16277 = vst [vmem:[#allocation33_spill] sm:$0xff] %v10300_v22 }
 0x1d3   : > { %v10309_v48 = vpop.xlane.xlu0 %1861 }
 0x1d4   : > { %8627 = vset.pattern.permute.xlu1 %v9543_v4  ;;  %16279 = vst [vmem:[#allocation35_spill] sm:$0xff] %v10309_v48  ;;  %v1271_v48 = vadd.f32 %v9963_v43, %v10181_v0 }
 0x1d5   : > { %1924 = vadd.xlane.f32.xlu0 %v1923_v1  ;;  %v10303_v5 = vpop.xlane.xlu1 %1693  ;;  %v1268_v1 = vadd.f32 %v9963_v43, %v10159_v50  ;;  %v10307_v39 = vpop.f32.mrf.mxu0 }
 0x1d6   : > { %16278 = vst [vmem:[#allocation34_spill] sm:$0xff] %v10303_v5  ;;  %v10311_v26 = vpop.xlane.xlu2 %1696 }
 0x1d7   : > { %9122 = vtanh.f32 %v1268_v1  ;;  %16280 = vst [vmem:[#allocation36_spill] sm:$0xff] %v10311_v26 }
 0x1d8   : > { %9124 = vtanh.f32 %v1036_v21 }
 0x1d9   : > { %9126 = vtanh.f32 %v1271_v48 }
 0x1da   : > { %8611 = vperm.xlu2 %8609, %v9660_v51   ;;  %9128 = vtanh.f32 %v1038_v42 }
 0x1db   : > { %v10323_v1 = vpop.xlane.xlu0 %1582 }
 0x1dd   : > { %1645 = vadd.xlane.f32.xlu0 %v1644_v10  ;;  %v2316_v10 = vperm.slane %v9648_v45, 7  ;;  %v10317_v23 = vpop.xlane.xlu1 %1783  ;;  %v9123_v5 = vpop.eup %9122 }
 0x1de   : > { %16281 = vst [vmem:[#allocation37_spill] sm:$0xff] %v10317_v23  ;;  %v1055_v50 = vpop.f32.mrf.mxu0  ;;  %v1538_v26 = vmul.f32 %v9980_v54, %v9123_v5  ;;  %v10327_v57 = vpop.xlane.xlu2 %1786 }
 0x1df   : > { %v10319_v46 = vpack.i.bf16 %v2316_v10, %v2291_v41  ;;  %16282 = vst [vmem:[#allocation38_spill] sm:$0xff] %v10327_v57  ;;  %v9125_v52 = vpop.eup %9124 }
 0x1e0   : > { %v1908_v23 = vsel %vm16245_vm0, %v1538_v26, 0.0  ;;  %v1445_v21 = vmul.f32 %v9980_v54, %v9125_v52  ;;  %v9127_v0 = vpop.eup %9126 }
 0x1e1   : > { %v1539_v48 = vmul.f32 %v9980_v54, %v9127_v0 }
 0x1e2   : > { %8621 = vset.pattern.permute.xlu2 %v9584_v15  ;;  %v1629_v5 = vsel %vm16245_vm0, %v1445_v21, 0.0  ;;  %v1056_v21 = vadd.f32 %v9963_v43, %v1055_v50 }
 0x1e3   : > { %v10337_v58 = vpop.xlane.xlu0 %1708 }
 0x1e4   : > { %9130 = vtanh.f32 %v1056_v21 }
 0x1e5   : > { %v10330_v41 = vpop.xlane.xlu1 %1855 }
 0x1e6   : > { %16283 = vst [vmem:[#allocation39_spill] sm:$0xff] %v10330_v41  ;;  %v10333_v10 = vpop.f32.mrf.mxu0  ;;  %v10341_v57 = vpop.xlane.xlu2 %1858 }
 0x1e7   : > { %16284 = vst [vmem:[#allocation40_spill] sm:$0xff] %v10341_v57  ;;  %v9129_v41 = vpop.eup %9128 }
 0x1e8   : > { %v1446_v61 = vmul.f32 %v9980_v54, %v9129_v41 }
 0x1ea   : > { %v1632_v0 = vsel %vm16245_vm0, %v1446_v61, 0.0 }
 0x1eb   : > { %v10348_v17 = vpop.xlane.xlu0 %1798 }
 0x1ec   : > { %16286 = vst [vmem:[#allocation42_spill] sm:$0xff] %v10348_v17 }
 0x1ed   : > { %v10344_v26 = vpop.xlane.xlu1 %1576 }
 0x1ee   : > { %16285 = vst [vmem:[#allocation41_spill] sm:$0xff] %v10344_v26  ;;  %v10346_v52 = vpop.f32.mrf.mxu0  ;;  %v10351_v28 = vpop.xlane.xlu2 %1579 }
 0x1ef   : > { %16287 = vst [vmem:[#allocation43_spill] sm:$0xff] %v10351_v28  ;;  %v1043_v28 = vadd.f32 %v9963_v43, %v10242_v19  ;;  %v1046_v19 = vadd.f32 %v9963_v43, %v10258_v16 }
 0x1f1   : > { %8658 = vperm.xlu0 %8555, %v10319_v46  }
 0x1f5   : > { %v10355_v42 = vpop.xlane.xlu1 %1702 }
 0x1f6   : > { %1909 = vadd.xlane.f32.xlu1 %v1908_v23  ;;  %v1911_v23 = vsel %vm16245_vm0, %v1539_v48, 0.0  ;;  %16288 = vst [vmem:[#allocation44_spill] sm:$0xff] %v10355_v42  ;;  %v10357_v48 = vpop.xlane.xlu0 %1870  ;;  %v10360_v59 = vpop.xlane.xlu2 %1705 }
 0x1f7   : > { %16289 = vst [vmem:[#allocation45_spill] sm:$0xff] %v10357_v48 }
 0x1f8   : > { %16290 = vst [vmem:[#allocation46_spill] sm:$0xff] %v10360_v59 }
 0x1fd   : > { %v10363_v17 = vpop.xlane.xlu1 %1792 }
 0x1fe   : > { %1630 = vadd.xlane.f32.xlu1 %v1629_v5  ;;  %v1062_v5 = vpop.f32.mrf.mxu0  ;;  %16291 = vst [vmem:[#allocation47_spill] sm:$0xff] %v10363_v17  ;;  %v10367_v21 = vpop.xlane.xlu0 %1591  ;;  %v8497_v17 = vld [vmem:[%s9561_s12 + $0x8] sm:$0xff]  }
 0x1ff   : > { %v1063_v57 = vadd.f32 %v9963_v43, %v1062_v5 }
 0x201   : > { %9132 = vtanh.f32 %v1063_v57 }
 0x203   : > { %1912 = vadd.xlane.f32.xlu2 %v1911_v23  ;;  %v9131_v23 = vpop.eup %9130 }
 0x204   : > { %v1453_v41 = vmul.f32 %v9980_v54, %v9131_v23 }
 0x205   : > { %v10372_v48 = vpop.xlane.xlu1 %1864 }
 0x206   : > { %v1653_v50 = vsel %vm16245_vm0, %v1453_v41, 0.0  ;;  %16293 = vst [vmem:[#allocation49_spill] sm:$0xff] %v10372_v48  ;;  %v10376_v23 = vpop.xlane.xlu0 %1717 }
 0x207   : > { %v9133_v61 = vpop.eup %9132 }
 0x208   : > { %v1456_v5 = vmul.f32 %v9980_v54, %v9133_v61 }
 0x20a   : > { %v1662_v57 = vsel %vm16245_vm0, %v1456_v5, 0.0 }
 0x20b   : > { %1633 = vadd.xlane.f32.xlu2 %v1632_v0  ;;  %v10369_v0 = vpop.xlane.xlu2 %1795 }
 0x20c   : > { %16292 = vst [vmem:[#allocation48_spill] sm:$0xff] %v10369_v0  ;;  %v10384_v0 = vunpack.c.h.bf16 %v8497_v17 }
 0x20d   : > { %v10382_v59 = vpop.xlane.xlu1 %1585 }
 0x20e   : > { %16295 = vst [vmem:[#allocation51_spill] sm:$0xff] %v10382_v59  ;;  %v10389_v61 = vpop.xlane.xlu0 %1807  ;;  %v2541_v48 = vperm.slane %v10384_v0, 0 }
 0x20f   : > { %16296 = vst [vmem:[#allocation52_spill] sm:$0xff] %v10389_v61  ;;  %v1278_v61 = vadd.f32 %v9963_v43, %v10245_v56 }
 0x213   : > { %v10379_v41 = vpop.xlane.xlu2 %1867 }
 0x214   : > { %16294 = vst [vmem:[#allocation50_spill] sm:$0xff] %v10379_v41 }
 0x215   : > { %v10395_v41 = vpop.xlane.xlu1 %1711 }
 0x216   : > { %16298 = vst [vmem:[#allocation54_spill] sm:$0xff] %v10395_v41  ;;  %v10401_v26 = vpop.xlane.xlu0 %1879 }
 0x217   : > { %8629 = vperm.xlu1 %8627, %v10273_v11   ;;  %16299 = vst [vmem:[#allocation55_spill] sm:$0xff] %v10401_v26 }
 0x21b   : > { %1654 = vadd.xlane.f32.xlu0 %v1653_v50  ;;  %v1276_v50 = vadd.f32 %v9963_v43, %v10226_v25  ;;  %v10391_v5 = vpop.xlane.xlu2 %1588 }
 0x21c   : > { %16297 = vst [vmem:[#allocation53_spill] sm:$0xff] %v10391_v5 }
 0x21d   : > { %9134 = vtanh.f32 %v1276_v50  ;;  %v10409_v50 = vpop.xlane.xlu1 %1801 }
 0x21e   : > { %9136 = vtanh.f32 %v1043_v28  ;;  %16301 = vst [vmem:[#allocation57_spill] sm:$0xff] %v10409_v50  ;;  %v10415_v26 = vpop.xlane.xlu0 %1600  ;;  %v10428_v50 = vunpack.c.l.bf16 %v8497_v17 }
 0x21f   : > { %8639 = vset.pattern.permute.xlu1 %v9584_v15  ;;  %9138 = vtanh.f32 %v1278_v61 }
 0x220   : > { %9140 = vtanh.f32 %v1046_v19  ;;  %v2466_v35 = vperm.slane %v10428_v50, 5 }
 0x223   : > { %8623 = vperm.xlu2 %8621, %v10273_v11   ;;  %1663 = vadd.xlane.f32.xlu0 %v1662_v57  ;;  %v2566_v57 = vperm.slane %v10384_v0, 1  ;;  %v9135_v59 = vpop.eup %9134  ;;  %v10404_v25 = vpop.xlane.xlu2 %1714 }
 0x224   : > { %16300 = vst [vmem:[#allocation56_spill] sm:$0xff] %v10404_v25  ;;  %v1541_v5 = vmul.f32 %v9980_v54, %v9135_v59 }
 0x225   : > { %v10397_v42 = vpack.i.bf16 %v2566_v57, %v2541_v48  ;;  %v9137_v57 = vpop.eup %9136  ;;  %v10420_v28 = vpop.xlane.xlu1 %1873 }
 0x226   : > { %v1917_v48 = vsel %vm16245_vm0, %v1541_v5, 0.0  ;;  %v9139_v56 = vpop.eup %9138  ;;  %v1448_v59 = vmul.f32 %v9980_v54, %v9137_v57  ;;  %16303 = vst [vmem:[#allocation59_spill] sm:$0xff] %v10420_v28  ;;  %v10425_v16 = vpop.xlane.xlu0 %1726 }
 0x227   : > { %v1542_v61 = vmul.f32 %v9980_v54, %v9139_v56  ;;  %v9141_v43 = vpop.eup %9140  ;;  %v2366_v56 = vperm.slane %v10428_v50, 1 }
 0x228   : > { %v1638_v5 = vsel %vm16245_vm0, %v1448_v59, 0.0  ;;  %v1449_v57 = vmul.f32 %v9980_v54, %v9141_v43  ;;  %v2591_v54 = vperm.slane %v10384_v0, 2  ;;  %v2241_v43 = vperm.slane %v9648_v45, 4 }
 0x22b   : > { %8633 = vset.pattern.permute.xlu2 %v9536_v2  ;;  %v10417_v25 = vpop.xlane.xlu2 %1804 }
 0x22c   : > { %16302 = vst [vmem:[#allocation58_spill] sm:$0xff] %v10417_v25 }
 0x22d   : > { %v10436_v59 = vpop.xlane.xlu1 %1594 }
 0x22e   : > { %16305 = vst [vmem:[#allocation61_spill] sm:$0xff] %v10436_v59  ;;  %v10441_v17 = vpop.xlane.xlu0 %1816 }
 0x22f   : > { %16306 = vst [vmem:[#allocation62_spill] sm:$0xff] %v10441_v17 }
 0x233   : > { %v10430_v19 = vpop.xlane.xlu2 %1876 }
 0x234   : > { %16304 = vst [vmem:[#allocation60_spill] sm:$0xff] %v10430_v19 }
 0x235   : > { %v10450_v19 = vpop.xlane.xlu1 %1720 }
 0x236   : > { %16308 = vst [vmem:[#allocation64_spill] sm:$0xff] %v10450_v19  ;;  %v10491_v19 = vld [vmem:[%s15834_s2] ss:$0 sm:$0xff] }
 0x237   : > { %8759 = vperm.xlu0 %8555, %v10397_v42  }
 0x23d   : > { %v10462_v17 = vpop.xlane.xlu1 %1810 }
 0x23e   : > { %16311 = vst [vmem:[#allocation67_spill] sm:$0xff] %v10462_v17 }
 0x23f   : > { %8763 = vset.pattern.permute.xlu0 %v9584_v15 }
 0x241   : > { %1918 = vadd.xlane.f32.xlu1 %v1917_v48  ;;  %v1920_v48 = vsel %vm16245_vm0, %v1542_v61, 0.0  ;;  %v10443_v61 = vpop.xlane.xlu2 %1597 }
 0x242   : > { %16307 = vst [vmem:[#allocation63_spill] sm:$0xff] %v10443_v61 }
 0x247   : > { %8765 = vperm.xlu0 %8763, %v9576_v13   ;;  %v2341_v13 = vperm.slane %v10428_v50, 0 }
 0x249   : > { %1639 = vadd.xlane.f32.xlu1 %v1638_v5  ;;  %v1641_v5 = vsel %vm16245_vm0, %v1449_v57, 0.0  ;;  %v10439_v28 = vpack.i.bf16 %v2366_v56, %v2341_v13  ;;  %v10456_v56 = vpop.xlane.xlu0 %1888 }
 0x24a   : > { %16309 = vst [vmem:[#allocation65_spill] sm:$0xff] %v10456_v56 }
 0x24c   : > { %1921 = vadd.xlane.f32.xlu2 %v1920_v48  ;;  %v2266_v48 = vperm.slane %v9648_v45, 5 }
 0x24e   : > { %v10454_v13 = vpack.i.bf16 %v2266_v48, %v2241_v43  ;;  %v2416_v43 = vperm.slane %v10428_v50, 3 }
 0x24f   : > { %8770 = vperm.xlu0 %8763, %v9632_v40   ;;  %v2616_v40 = vperm.slane %v10384_v0, 3 }
 0x251   : > { %v10452_v57 = vpack.i.bf16 %v2616_v40, %v2591_v54  ;;  %v10465_v25 = vpop.xlane.xlu0 %1609  ;;  %v10471_v54 = vpop.xlane.xlu1 %1882  ;;  %v2391_v40 = vperm.slane %v10428_v50, 2 }
 0x252   : > { %16313 = vst [vmem:[#allocation69_spill] sm:$0xff] %v10471_v54  ;;  %v2666_v54 = vperm.slane %v10384_v0, 5 }
 0x253   : > { %v10478_v56 = vpack.i.bf16 %v2416_v43, %v2391_v40 }
 0x254   : > { %1642 = vadd.xlane.f32.xlu2 %v1641_v5  ;;  %v10459_v5 = vpop.xlane.xlu2 %1723 }
 0x255   : > { %16310 = vst [vmem:[#allocation66_spill] sm:$0xff] %v10459_v5  ;;  %v1282_v5 = vpop.f32.mrf.mxu3 }
 0x256   : > { %v1283_v40 = vadd.f32 %v10491_v19, %v1282_v5 }
 0x257   : > { %8775 = vperm.xlu0 %8763, %v10439_v28  }
 0x258   : > { %9142 = vtanh.f32 %v1283_v40  ;;  %v8443_v40 = vld [vmem:[%s9551_s8 + $0xa0] sm:$0xff] }
 0x259   : > { %v10476_v48 = vpop.xlane.xlu0 %1735  ;;  %8344 = vmatmul.msk.bf16.gmra.mxu0 %vm16245_vm0, %v8443_v40  ;;  %v1053_v40 = vadd.f32 %v10491_v19, %v10307_v39 }
 0x25c   : > { %v10468_v45 = vpop.xlane.xlu2 %1813 }
 0x25d   : > { %16312 = vst [vmem:[#allocation68_spill] sm:$0xff] %v10468_v45  ;;  %v2641_v45 = vperm.slane %v10384_v0, 4 }
 0x25e   : > { %v9143_v59 = vpop.eup %9142 }
 0x25f   : > { %8804 = vperm.xlu0 %8763, %v10452_v57   ;;  %v10494_v43 = vpack.i.bf16 %v2666_v54, %v2641_v45  ;;  %v10513_v45 = vld [vmem:[%s15835_s3] ss:$0 sm:$0xff] }
 0x260   : > { %v1544_v54 = vmul.f32 %v10513_v45, %v9143_v59 }
 0x262   : > { %8641 = vperm.xlu1 %8639, %v10454_v13  }
 0x264   : > { %v10481_v17 = vpop.xlane.xlu2 %1885 }
 0x265   : > { %16314 = vst [vmem:[#allocation70_spill] sm:$0xff] %v10481_v17  ;;  %v10497_v17 = vpop.xlane.xlu0 %1825 }
 0x266   : > { %16316 = vst [vmem:[#allocation72_spill] sm:$0xff] %v10497_v17 }
 0x267   : > { %8808 = vset.pattern.permute.xlu0 %v9543_v4 }
 0x26a   : > { %8651 = vset.pattern.permute.xlu1 %v9581_v14 }
 0x26c   : > { %8635 = vperm.xlu2 %8633, %v10454_v13   ;;  %v10499_v41 = vpop.xlane.xlu2 %1606 }
 0x26d   : > { %16317 = vst [vmem:[#allocation73_spill] sm:$0xff] %v10499_v41  ;;  %v10507_v5 = vpop.xlane.xlu0 %1897  ;;  %v2441_v41 = vperm.slane %v10428_v50, 4 }
 0x26e   : > { %16319 = vst [vmem:[#allocation75_spill] sm:$0xff] %v10507_v5 }
 0x26f   : > { %8810 = vperm.xlu0 %8808, %v9660_v51   ;;  %v10486_v51 = vpop.xlane.xlu1 %1603 }
 0x270   : > { %16315 = vst [vmem:[#allocation71_spill] sm:$0xff] %v10486_v51  ;;  %v1051_v51 = vadd.f32 %v10491_v19, %v10296_v33 }
 0x272   : > { %9144 = vtanh.f32 %v1051_v51  ;;  %v1926_v51 = vsel %vm16245_vm0, %v1544_v54, 0.0  ;;  %v10534_v54 = vpack.i.bf16 %v2466_v35, %v2441_v41 }
 0x273   : > { %9146 = vtanh.f32 %v1053_v40 }
 0x274   : > { %8645 = vset.pattern.permute.xlu2 %v9543_v4  ;;  %v10517_v17 = vpop.xlane.xlu2 %1732 }
 0x275   : > { %16320 = vst [vmem:[#allocation76_spill] sm:$0xff] %v10517_v17  ;;  %v10527_v59 = vpop.xlane.xlu0 %1618 }
 0x277   : > { %8815 = vperm.xlu0 %8808, %v10478_v56   ;;  %v10504_v61 = vpop.xlane.xlu1 %1729 }
 0x278   : > { %16318 = vst [vmem:[#allocation74_spill] sm:$0xff] %v10504_v61  ;;  %v9145_v33 = vpop.eup %9144 }
 0x279   : > { %v1451_v5 = vmul.f32 %v10513_v45, %v9145_v33  ;;  %v9147_v20 = vpop.eup %9146 }
 0x27a   : > { %v1452_v35 = vmul.f32 %v10513_v45, %v9147_v20 }
 0x27b   : > { %v1647_v17 = vsel %vm16245_vm0, %v1451_v5, 0.0 }
 0x27c   : > { %8647 = vperm.xlu2 %8645, %v10454_v13   ;;  %v10532_v22 = vpop.xlane.xlu2 %1822  ;;  %v1650_v40 = vsel %vm16245_vm0, %v1452_v35, 0.0 }
 0x27d   : > { %16322 = vst [vmem:[#allocation78_spill] sm:$0xff] %v10532_v22 }
 0x27f   : > { %8844 = vperm.xlu0 %8808, %v10494_v43   ;;  %v10521_v61 = vpop.xlane.xlu1 %1819 }
 0x280   : > { %16321 = vst [vmem:[#allocation77_spill] sm:$0xff] %v10521_v61  ;;  %v10541_v61 = vpop.xlane.xlu0 %1744 }
 0x281   : > { %16324 = vst [vmem:[#allocation80_spill] sm:$0xff] %v10541_v61 }
 0x284   : > { %8662 = vset.pattern.permute.xlu2 %v9584_v15  ;;  %v10545_v39 = vpop.xlane.xlu2 %1894 }
 0x285   : > { %16325 = vst [vmem:[#allocation81_spill] sm:$0xff] %v10545_v39  ;;  %v8541_v39 = vunpack.i.l.bf16 %v9973_v53 }
 0x287   : > { %8848 = vset.pattern.permute.xlu0 %v9581_v14  ;;  %v10536_v33 = vpop.xlane.xlu1 %1891  ;;  %v10567_v35 = vadd.f32 %v8541_v39, %v10275_v55  ;;  %v8554_v39 = vunpack.i.h.bf16 %v9999_v12 }
 0x288   : > { %16323 = vst [vmem:[#allocation79_spill] sm:$0xff] %v10536_v33  ;;  %v10553_v33 = vpop.xlane.xlu0 %1906 }
 0x289   : > { %16326 = vst [vmem:[#allocation82_spill] sm:$0xff] %v10553_v33 }
 0x28a   : > { %16329 = vst [vmem:[#allocation85_spill] sm:$0xff] %v10567_v35 }
 0x28c   : > { %1927 = vadd.xlane.f32.xlu1 %v1926_v51  ;;  %v2716_v51 = vperm.slane %v10384_v0, 7 }
 0x28f   : > { %8850 = vperm.xlu0 %8848, %v10273_v11   ;;  %v2691_v11 = vperm.slane %v10384_v0, 6  ;;  %v10549_v41 = vpop.xlane.xlu1 %1612 }
 0x291   : > { %v10543_v5 = vpack.i.bf16 %v2716_v51, %v2691_v11  ;;  %v10558_v11 = vpop.xlane.xlu2 %1615  ;;  %v15843_v51 = vmov 0  }
 0x294   : > { %1648 = vadd.xlane.f32.xlu1 %v1647_v17  ;;  %v8518_v17 = vunpack.i.h.bf16 %v9947_v29 }
 0x296   : > { %v10556_v0 = vadd.f32 %v8518_v17, %v10190_v24  ;;  %v8536_v17 = vunpack.i.h.bf16 %v9995_v9 }
 0x297   : > { %8855 = vperm.xlu0 %8848, %v10534_v54   ;;  %v10562_v20 = vpop.xlane.xlu1 %1738 }
 0x298   : > { %16327 = vst [vmem:[#allocation83_spill] sm:$0xff] %v10556_v0 }
 0x299   : > { %16328 = vst [vmem:[#allocation84_spill] sm:$0xff] %v10562_v20  ;;  %v10570_v24 = vpop.xlane.xlu2 %1741 }
 0x29a   : > { %16330 = vst [vmem:[#allocation86_spill] sm:$0xff] %v10570_v24 }
 0x29f   : > { %8884 = vperm.xlu0 %8848, %v10543_v5   ;;  %v10573_v33 = vpop.xlane.xlu1 %1900 }
 0x2a0   : > { %16331 = vst [vmem:[#allocation87_spill] sm:$0xff] %v10573_v33 }
 0x2a1   : > { %v10582_v55 = vpop.xlane.xlu2 %1903 }
 0x2a2   : > { %16334 = vst [vmem:[#allocation90_spill] sm:$0xff] %v10582_v55 }
 0x2a5   : > { %1651 = vadd.xlane.f32.xlu2 %v1650_v40  ;;  %v1628_v40 = vpop.xlane.xlu0 %1627 }
 0x2a7   : > { %8890 = vset.pattern.permute.xlu0 %v15843_v51  ;;  %v10577_v51 = vadd.f32 %v8536_v17, %v10323_v1  ;;  %v10590_v33 = vpop.xlane.xlu1 %1621  ;;  %v8571_v17 = vunpack.i.l.bf16 %v10021_v38 }
 0x2a8   : > { %3138 = vperm.xlu0 %8890, %v10556_v0   ;;  %v10588_v0 = vadd.f32 %v8554_v39, %v10367_v21  ;;  %v8566_v39 = vunpack.i.h.bf16 %v10035_v18 }
 0x2a9   : > { %16332 = vst [vmem:[#allocation88_spill] sm:$0xff] %v10577_v51 }
 0x2aa   : > { %16335 = vst [vmem:[#allocation91_spill] sm:$0xff] %v10588_v0 }
 0x2ad   : > { %8653 = vperm.xlu1 %8651, %v10454_v13   ;;  %v10580_v13 = vpop.xlane.xlu0 %1753 }
 0x2ae   : > { %16333 = vst [vmem:[#allocation89_spill] sm:$0xff] %v10580_v13 }
 0x2af   : > { %v10604_v21 = vpop.xlane.xlu1 %1747 }
 0x2b0   : > { %3153 = vperm.xlu0 %8890, %v10567_v35   ;;  %v10601_v35 = vadd.f32 %v8571_v17, %v10415_v26  ;;  %16338 = vst [vmem:[#allocation94_spill] sm:$0xff] %v10604_v21  ;;  %v8583_v26 = vunpack.i.l.bf16 %v10040_v7  ;;  %v1058_v17 = vadd.f32 %v10491_v19, %v10333_v10 }
 0x2b2   : > { %16337 = vst [vmem:[#allocation93_spill] sm:$0xff] %v10601_v35  ;;  %9148 = vtanh.f32 %v1058_v17  ;;  %v8590_v17 = vunpack.i.h.bf16 %v10075_v62 }
 0x2b5   : > { %8668 = vset.pattern.permute.xlu1 %v9543_v4  ;;  %v10593_v1 = vpop.xlane.xlu0 %1915 }
 0x2b6   : > { %16336 = vst [vmem:[#allocation92_spill] sm:$0xff] %v10593_v1  ;;  %v10611_v1 = vadd.f32 %v8566_v39, %v10465_v25  ;;  %v8595_v39 = vunpack.i.l.bf16 %v10061_v63 }
 0x2b7   : > { %v10614_v13 = vpop.permute.xlu1 %8617 }
 0x2b8   : > { %3162 = vperm.xlu0 %8890, %v10577_v51   ;;  %v10596_v51 = vpop.xlane.xlu2 %1624  ;;  %16340 = vst [vmem:[#allocation96_spill] sm:$0xff] %v10611_v1  ;;  %v9149_v22 = vpop.eup %9148 }
 0x2bd   : > { %8664 = vperm.xlu2 %8662, %v10319_v46   ;;  %8670 = vperm.xlu1 %8668, %v10319_v46  }
 0x2bf   : > { %v10628_v25 = vpop.xlane.xlu1 %1909 }
 0x2c0   : > { %3171 = vperm.xlu0 %8890, %v10588_v0   ;;  %v1637_v0 = vpop.xlane.xlu0 %1636  ;;  %v10607_v55 = vpop.xlane.xlu2 %1750  ;;  %16343 = vst [vmem:[#allocation99_spill] sm:$0xff] %v10628_v25 }
 0x2c1   : > { %16339 = vst [vmem:[#allocation95_spill] sm:$0xff] %v10607_v55  ;;  %v10642_v25 = vadd.f32 %v8590_v17, %v1637_v0 }
 0x2c3   : > { %16346 = vst [vmem:[#allocation102_spill] sm:$0xff] %v10642_v25 }
 0x2c5   : > { %8674 = vset.pattern.permute.xlu2 %v9581_v14  ;;  %8680 = vset.pattern.permute.xlu1 %v9536_v2 }
 0x2c7   : > { %v10639_v55 = vpop.xlane.xlu1 %1630 }
 0x2c8   : > { %3180 = vperm.xlu0 %8890, %v10601_v35   ;;  %v10621_v35 = vadd.f32 %v8583_v26, %v10527_v59  ;;  %v10623_v61 = vpop.xlane.xlu0 %1924  ;;  %v1061_v26 = vadd.f32 %v10491_v19, %v10346_v52 }
 0x2c9   : > { %16342 = vst [vmem:[#allocation98_spill] sm:$0xff] %v10623_v61  ;;  %v1454_v61 = vmul.f32 %v10513_v45, %v9149_v22  ;;  %v8607_v22 = vunpack.i.l.bf16 %v10079_v3 }
 0x2ca   : > { %16341 = vst [vmem:[#allocation97_spill] sm:$0xff] %v10621_v35  ;;  %9150 = vtanh.f32 %v1061_v26 }
 0x2cd   : > { %8676 = vperm.xlu2 %8674, %v10319_v46   ;;  %v10625_v46 = vpop.permute.xlu2 %8611 }
 0x2d0   : > { %3189 = vperm.xlu0 %8890, %v10611_v1   ;;  %v10631_v1 = vadd.f32 %v8595_v39, %v1628_v40  ;;  %v1646_v59 = vpop.xlane.xlu0 %1645  ;;  %v1656_v40 = vsel %vm16245_vm0, %v1454_v61, 0.0  ;;  %v9151_v52 = vpop.eup %9150 }
 0x2d1   : > { %v1455_v26 = vmul.f32 %v10513_v45, %v9151_v52  ;;  %v8614_v52 = vunpack.i.h.bf16 %v10625_v46 }
 0x2d2   : > { %16344 = vst [vmem:[#allocation100_spill] sm:$0xff] %v10631_v1 }
 0x2d5   : > { %8686 = vset.pattern.permute.xlu2 %v9543_v4  ;;  %v10633_v10 = vpop.xlane.xlu2 %1912 }
 0x2d6   : > { %16345 = vst [vmem:[#allocation101_spill] sm:$0xff] %v10633_v10  ;;  %v10653_v10 = vadd.f32 %v8607_v22, %v1646_v59 }
 0x2d8   : > { %3198 = vperm.xlu0 %8890, %v10621_v35   ;;  %v10646_v39 = vpop.permute.xlu0 %8658  ;;  %v10650_v35 = vpop.permute.xlu1 %8629  ;;  %16347 = vst [vmem:[#allocation103_spill] sm:$0xff] %v10653_v10 }
 0x2e0   : > { %3207 = vperm.xlu0 %8890, %v10631_v1   ;;  %v10648_v1 = vpop.xlane.xlu2 %1633  ;;  %v1655_v0 = vpop.xlane.xlu0 %1654 }
 0x2e1   : > { %v10659_v17 = vpop.xlane.xlu1 %1918 }
 0x2e2   : > { %16348 = vst [vmem:[#allocation104_spill] sm:$0xff] %v10659_v17 }
 0x2e7   : > { %1657 = vadd.xlane.f32.xlu1 %v1656_v40  ;;  %v1659_v40 = vsel %vm16245_vm0, %v1455_v26, 0.0  ;;  %v8631_v26 = vunpack.i.l.bf16 %v10650_v35 }
 0x2e8   : > { %3216 = vperm.xlu0 %8890, %v10642_v25   ;;  %v10657_v61 = vpop.permute.xlu2 %8623  ;;  %v8602_v25 = vunpack.i.h.bf16 %v10097_v44  ;;  %v1664_v59 = vpop.xlane.xlu0 %1663 }
 0x2e9   : > { %v10671_v24 = vadd.f32 %v8614_v52, %v1664_v59  ;;  %v8626_v59 = vunpack.i.h.bf16 %v10657_v61 }
 0x2ea   : > { %v10663_v21 = vadd.f32 %v8602_v25, %v1655_v0 }
 0x2eb   : > { %16351 = vst [vmem:[#allocation107_spill] sm:$0xff] %v10671_v24  ;;  %v10689_v17 = vadd.f32 %v8626_v59, %v10136_v8 }
 0x2ec   : > { %16349 = vst [vmem:[#allocation105_spill] sm:$0xff] %v10663_v21 }
 0x2ed   : > { %16354 = vst [vmem:[#allocation110_spill] sm:$0xff] %v10689_v17 }
 0x2f0   : > { %3225 = vperm.xlu0 %8890, %v10653_v10   ;;  %v10666_v22 = vpop.xlane.xlu2 %1921  ;;  %v10669_v10 = vpop.xlane.xlu1 %1639 }
 0x2f1   : > { %16350 = vst [vmem:[#allocation106_spill] sm:$0xff] %v10666_v22 }
 0x2f6   : > { %1660 = vadd.xlane.f32.xlu2 %v1659_v40  ;;  %v10681_v40 = vadd.f32 %v8631_v26, %v10037_v37 }
 0x2f8   : > { %3234 = vperm.xlu0 %8890, %v10663_v21   ;;  %v10676_v25 = vpop.xlane.xlu2 %1642  ;;  %v10678_v0 = vpop.permute.xlu1 %8641  ;;  %16352 = vst [vmem:[#allocation108_spill] sm:$0xff] %v10681_v40 }
 0x300   : > { %8682 = vperm.xlu1 %8680, %v10439_v28   ;;  %3243 = vperm.xlu0 %8890, %v10671_v24   ;;  %v10686_v52 = vpop.xlane.xlu1 %1927  ;;  %v10692_v24 = vpop.permute.xlu2 %8635 }
 0x301   : > { %16353 = vst [vmem:[#allocation109_spill] sm:$0xff] %v10686_v52  ;;  %v8637_v37 = vunpack.i.l.bf16 %v10692_v24 }
 0x303   : > { %v10698_v26 = vadd.f32 %v8637_v37, %v10228_v60  ;;  %v1065_v37 = vpop.f32.mrf.mxu0 }
 0x304   : > { %v1066_v52 = vadd.f32 %v10491_v19, %v1065_v37 }
 0x305   : > { %16355 = vst [vmem:[#allocation111_spill] sm:$0xff] %v10698_v26 }
 0x306   : > { %9152 = vtanh.f32 %v1066_v52 }
 0x308   : > { %8692 = vset.pattern.permute.xlu1 %v9581_v14  ;;  %3252 = vperm.xlu0 %8890, %v10681_v40   ;;  %v10701_v40 = vpop.xlane.xlu1 %1648  ;;  %v10705_v8 = vpop.permute.xlu2 %8647 }
 0x30b   : > { %v1067_v20 = vpop.f32.mrf.mxu0 }
 0x30c   : > { %v1068_v37 = vadd.f32 %v10491_v19, %v1067_v20 }
 0x30e   : > { %8688 = vperm.xlu2 %8686, %v10439_v28   ;;  %9154 = vtanh.f32 %v1068_v37 }
 0x310   : > { %8694 = vperm.xlu1 %8692, %v10439_v28   ;;  %3261 = vperm.xlu0 %8890, %v10689_v17  }
 0x316   : > { %8698 = vset.pattern.permute.xlu2 %v9536_v2 }
 0x318   : > { %3270 = vperm.xlu0 %8890, %v10698_v26   ;;  %8704 = vset.pattern.permute.xlu1 %v9584_v15  ;;  %v10711_v17 = vpop.xlane.xlu2 %1651  ;;  %v8650_v26 = vunpack.i.h.bf16 %v10705_v8 }
 0x31a   : > { %v10721_v21 = vadd.f32 %v8650_v26, %v10337_v58  ;;  %v8661_v58 = vunpack.i.h.bf16 %v10646_v39 }
 0x31c   : > { %16358 = vst [vmem:[#allocation114_spill] sm:$0xff] %v10721_v21  ;;  %v10736_v26 = vadd.f32 %v8661_v58, %v10425_v16  ;;  %v2491_v16 = vperm.slane %v10428_v50, 6 }
 0x31e   : > { %8700 = vperm.xlu2 %8698, %v10478_v56   ;;  %16360 = vst [vmem:[#allocation116_spill] sm:$0xff] %v10736_v26 }
 0x31f   : > { %v10708_v28 = vpop.permute.xlu1 %8653 }
 0x320   : > { %16356 = vst [vmem:[#allocation112_spill] sm:$0xff] %v10708_v28  ;;  %v8655_v59 = vunpack.i.l.bf16 %v10708_v28  ;;  %v10723_v22 = vpop.permute.xlu2 %8664 }
 0x322   : > { %v10714_v60 = vadd.f32 %v8655_v59, %v10286_v27  ;;  %v8666_v27 = vunpack.i.l.bf16 %v10723_v22  ;;  %v9153_v59 = vpop.eup %9152 }
 0x323   : > { %v1457_v28 = vmul.f32 %v10513_v45, %v9153_v59 }
 0x324   : > { %16357 = vst [vmem:[#allocation113_spill] sm:$0xff] %v10714_v60  ;;  %3279 = vperm.xlu0 %8890, %v10714_v60   ;;  %v10728_v60 = vadd.f32 %v8666_v27, %v10376_v23  ;;  %v9155_v27 = vpop.eup %9154 }
 0x325   : > { %v1665_v52 = vsel %vm16245_vm0, %v1457_v28, 0.0  ;;  %v1458_v19 = vmul.f32 %v10513_v45, %v9155_v27  ;;  %v16364_v27 = vmov 0  }
 0x326   : > { %8710 = vset.pattern.permute.xlu2 %v9581_v14  ;;  %16359 = vst [vmem:[#allocation115_spill] sm:$0xff] %v10728_v60 }
 0x327   : > { %v1668_v20 = vsel %vm16245_vm0, %v1458_v19, 0.0 }
 0x32c   : > { %3288 = vperm.xlu0 %8890, %v10721_v21   ;;  %v10738_v21 = vpop.permute.xlu2 %8676 }
 0x32d   : > { %v8679_v23 = vunpack.i.h.bf16 %v10738_v21 }
 0x32f   : > { %v10743_v59 = vadd.f32 %v8679_v23, %v10476_v48  ;;  %v2516_v48 = vperm.slane %v10428_v50, 7 }
 0x331   : > { %16361 = vst [vmem:[#allocation117_spill] sm:$0xff] %v10743_v59  ;;  %v8735_v45 = vpack.i.bf16 %v2516_v48, %v2491_v16  ;;  %v8529_v16 = vunpack.i.l.bf16 %v9970_v49 }
 0x334   : > { %3297 = vperm.xlu0 %8890, %v10728_v60   ;;  %v16384_v60 = vld [vmem:[#allocation6_spill] sm:$0xff] }
 0x33a   : > { %1666 = vadd.xlane.f32.xlu1 %v1665_v52 }
 0x33c   : > { %3306 = vperm.xlu0 %8890, %v10736_v26   ;;  %v16381_v26 = vld [vmem:[#allocation51_spill] sm:$0xff] }
 0x344   : > { %3315 = vperm.xlu0 %8890, %v10743_v59  }
 0x347   : > { %1669 = vadd.xlane.f32.xlu2 %v1668_v20 }
 0x353   : > { %8706 = vperm.xlu1 %8704, %v10478_v56  }
 0x35b   : > { %8716 = vset.pattern.permute.xlu1 %v9536_v2 }
 0x35f   : > { %8712 = vperm.xlu2 %8710, %v10478_v56   ;;  %v10790_v56 = vpop.permute.xlu1 %8670 }
 0x363   : > { %8718 = vperm.xlu1 %8716, %v10534_v54  }
 0x367   : > { %8722 = vset.pattern.permute.xlu2 %v9584_v15  ;;  %v10797_v37 = vpop.xlane.xlu1 %1657 }
 0x36b   : > { %8728 = vset.pattern.permute.xlu1 %v9543_v4 }
 0x36f   : > { %8724 = vperm.xlu2 %8722, %v10534_v54  }
 0x373   : > { %8730 = vperm.xlu1 %8728, %v10534_v54  }
 0x377   : > { %8734 = vset.pattern.permute.xlu2 %v9536_v2 }
 0x37b   : > { %8740 = vset.pattern.permute.xlu1 %v9584_v15 }
 0x37f   : > { %8736 = vperm.xlu2 %8734, %v8735_v45  }
 0x383   : > { %8742 = vperm.xlu1 %8740, %v8735_v45  }
 0x387   : > { %8746 = vset.pattern.permute.xlu2 %v9543_v4 }
 0x38b   : > { %8752 = vset.pattern.permute.xlu1 %v9581_v14 }
 0x38f   : > { %8748 = vperm.xlu2 %8746, %v8735_v45  }
 0x393   : > { %8754 = vperm.xlu1 %8752, %v8735_v45  }
 0x397   : > { %8779 = vset.pattern.permute.xlu2 %v9584_v15 }
 0x39b   : > { %8785 = vset.pattern.permute.xlu1 %v9543_v4 }
 0x39f   : > { %8781 = vperm.xlu2 %8779, %v10397_v42  }
 0x3a3   : > { %8787 = vperm.xlu1 %8785, %v10397_v42  }
 0x3a7   : > { %8791 = vset.pattern.permute.xlu2 %v9581_v14 }
 0x3ab   : > { %8797 = vset.pattern.permute.xlu1 %v9536_v2 }
 0x3af   : > { %8793 = vperm.xlu2 %8791, %v10397_v42   ;;  %v10779_v42 = vpop.xlane.xlu2 %1660 }
 0x3b3   : > { %8799 = vperm.xlu1 %8797, %v10452_v57  }
 0x3b7   : > { %8819 = vset.pattern.permute.xlu2 %v9543_v4  ;;  %v10783_v50 = vpop.permute.xlu2 %8688 }
 0x3bb   : > { %8825 = vset.pattern.permute.xlu1 %v9581_v14 }
 0x3bf   : > { %8821 = vperm.xlu2 %8819, %v10452_v57   ;;  %v10792_v54 = vpop.permute.xlu2 %8700 }
 0x3c3   : > { %8827 = vperm.xlu1 %8825, %v10452_v57   ;;  %v10787_v57 = vpop.permute.xlu0 %8759 }
 0x3c4   : > { %16362 = vst [vmem:[#allocation118_spill] sm:$0xff] %v10787_v57  ;;  %v16473_v57 = vld [vmem:[#allocation94_spill] sm:$0xff] }
 0x3c7   : > { %8831 = vset.pattern.permute.xlu2 %v9536_v2  ;;  %v10799_v58 = vpop.xlane.xlu2 %1669 }
 0x3cb   : > { %8837 = vset.pattern.permute.xlu1 %v9584_v15  ;;  %v8766_v28 = vpop.permute.xlu0 %8765 }
 0x3cc   : > { %v8767_v23 = vunpack.i.l.bf16 %v8766_v28  ;;  %v8768_v45 = vunpack.i.h.bf16 %v8766_v28 }
 0x3ce   : > { %v10807_v19 = vadd.f32 %v8767_v23, %v10063_v6  ;;  %v10824_v6 = vadd.f32 %v8529_v16, %v10197_v47  ;;  %v10830_v23 = vadd.f32 %v8768_v45, %v10250_v32  ;;  %v8530_v47 = vunpack.i.h.bf16 %v9970_v49  ;;  %v16370_v16 = vld [vmem:[#allocation31_spill] sm:$0xff] }
 0x3cf   : > { %8833 = vperm.xlu2 %8831, %v10494_v43  }
 0x3d0   : > { %16365 = vst [vmem:[#allocation120_spill] sm:$0xff] %v10807_v19  ;;  %v10846_v32 = vadd.f32 %v8530_v47, %v16370_v16 }
 0x3d1   : > { %16367 = vst [vmem:[#allocation122_spill] sm:$0xff] %v10824_v6 }
 0x3d2   : > { %16368 = vst [vmem:[#allocation123_spill] sm:$0xff] %v10830_v23 }
 0x3d3   : > { %8839 = vperm.xlu1 %8837, %v10494_v43   ;;  %v10820_v48 = vpop.permute.xlu0 %8770  ;;  %16371 = vst [vmem:[#allocation31_spill] sm:$0xff] %v10846_v32 }
 0x3d7   : > { %8859 = vset.pattern.permute.xlu2 %v9581_v14 }
 0x3db   : > { %8865 = vset.pattern.permute.xlu1 %v9536_v2  ;;  %v16372_v2 = vld [vmem:[#allocation33_spill] sm:$0xff] }
 0x3df   : > { %8861 = vperm.xlu2 %8859, %v10494_v43   ;;  %v8517_v43 = vunpack.i.l.bf16 %v9947_v29  ;;  %v10812_v29 = vpop.permute.xlu1 %8682 }
 0x3e1   : > { %v10802_v52 = vadd.f32 %v8517_v43, %v10010_v30  ;;  %v10817_v30 = vpop.permute.xlu2 %8712 }
 0x3e3   : > { %8867 = vperm.xlu1 %8865, %v10543_v5   ;;  %16363 = vst [vmem:[#allocation119_spill] sm:$0xff] %v10802_v52 }
 0x3e7   : > { %8871 = vset.pattern.permute.xlu2 %v9584_v15  ;;  %v10827_v43 = vpop.permute.xlu1 %8694 }
 0x3eb   : > { %8877 = vset.pattern.permute.xlu1 %v9543_v4 }
 0x3ef   : > { %8873 = vperm.xlu2 %8871, %v10543_v5   ;;  %v10843_v28 = vpop.xlane.xlu1 %1666 }
 0x3f3   : > { %8879 = vperm.xlu1 %8877, %v10543_v5   ;;  %v8523_v5 = vunpack.i.l.bf16 %v9950_v31 }
 0x3f5   : > { %v10815_v20 = vadd.f32 %v8523_v5, %v10173_v36  ;;  %v8524_v36 = vunpack.i.h.bf16 %v9950_v31  ;;  %v10834_v5 = vpop.permute.xlu2 %8724  ;;  %v8535_v31 = vunpack.i.l.bf16 %v9995_v9  ;;  %v8553_v9 = vunpack.i.l.bf16 %v9999_v12 }
 0x3f7   : > { %8888 = vset.pattern.permute.xlu2 %v16364_v27  ;;  %16366 = vst [vmem:[#allocation121_spill] sm:$0xff] %v10815_v20  ;;  %v10837_v14 = vadd.f32 %v8524_v36, %v10207_v34  ;;  %v10853_v34 = vadd.f32 %v8535_v31, %v16372_v2  ;;  %v16374_v36 = vld [vmem:[#allocation7_spill] sm:$0xff]  ;;  %v10859_v49 = vpop.permute.xlu1 %8706  ;;  %v8542_v31 = vunpack.i.h.bf16 %v9973_v53 }
 0x3f8   : > { %3126 = vperm.xlu2 %8888, %v10802_v52   ;;  %v8547_v15 = vunpack.i.l.bf16 %v16374_v36  ;;  %v8548_v12 = vunpack.i.h.bf16 %v16374_v36  ;;  %v8565_v36 = vunpack.i.l.bf16 %v10035_v18 }
 0x3f9   : > { %16369 = vst [vmem:[#allocation124_spill] sm:$0xff] %v10837_v14 }
 0x3fa   : > { %16373 = vst [vmem:[#allocation33_spill] sm:$0xff] %v10853_v34 }
 0x3fb   : > { %8889 = vset.pattern.permute.xlu1 %v16364_v27  ;;  %v10839_v27 = vpop.permute.xlu0 %8775 }
 0x3fc   : > { %3129 = vperm.xlu1 %8889, %v10807_v19  }
 0x3fd   : > { %v10850_v45 = vpop.permute.xlu2 %8736 }
 0x400   : > { %3132 = vperm.xlu2 %8888, %v10815_v20   ;;  %v16379_v20 = vld [vmem:[#allocation43_spill] sm:$0xff] }
 0x401   : > { %v10869_v2 = vadd.f32 %v8553_v9, %v16379_v20  ;;  %v8559_v20 = vunpack.i.l.bf16 %v16384_v60  ;;  %v16385_v9 = vld [vmem:[#allocation53_spill] sm:$0xff] }
 0x403   : > { %v10856_v4 = vpop.permute.xlu0 %8804  ;;  %16380 = vst [vmem:[#allocation43_spill] sm:$0xff] %v10869_v2 }
 0x404   : > { %3135 = vperm.xlu1 %8889, %v10824_v6   ;;  %16375 = vst [vmem:[#allocation7_spill] sm:$0xff] %v10856_v4 }
 0x405   : > { %v10866_v16 = vpop.permute.xlu2 %8748 }
 0x406   : > { %16378 = vst [vmem:[#allocation125_spill] sm:$0xff] %v10866_v16 }
 0x408   : > { %3141 = vperm.xlu2 %8888, %v10830_v23   ;;  %v16376_v23 = vld [vmem:[#allocation41_spill] sm:$0xff] }
 0x409   : > { %v10862_v47 = vadd.f32 %v8547_v15, %v16376_v23  ;;  %v10878_v15 = vadd.f32 %v8542_v31, %v16381_v26 }
 0x40b   : > { %16377 = vst [vmem:[#allocation41_spill] sm:$0xff] %v10862_v47  ;;  %v10872_v59 = vpop.permute.xlu0 %8810 }
 0x40c   : > { %3144 = vperm.xlu1 %8889, %v10837_v14   ;;  %16382 = vst [vmem:[#allocation51_spill] sm:$0xff] %v10878_v15 }
 0x40d   : > { %v10882_v23 = vpop.permute.xlu2 %8781 }
 0x40e   : > { %16383 = vst [vmem:[#allocation126_spill] sm:$0xff] %v10882_v23 }
 0x410   : > { %3147 = vperm.xlu2 %8888, %v10846_v32  }
 0x413   : > { %v10894_v26 = vpop.permute.xlu0 %8815 }
 0x414   : > { %3150 = vperm.xlu1 %8889, %v10853_v34   ;;  %v10875_v34 = vpop.permute.xlu1 %8718 }
 0x415   : > { %v10898_v31 = vpop.permute.xlu2 %8793 }
 0x418   : > { %3156 = vperm.xlu2 %8888, %v10862_v47   ;;  %v10886_v47 = vadd.f32 %v8548_v12, %v16385_v9  ;;  %v16392_v12 = vld [vmem:[#allocation8_spill] sm:$0xff] }
 0x419   : > { %v8577_v9 = vunpack.i.l.bf16 %v16392_v12 }
 0x41a   : > { %16386 = vst [vmem:[#allocation6_spill] sm:$0xff] %v10886_v47 }
 0x41b   : > { %v10911_v6 = vpop.permute.xlu0 %8844 }
 0x41c   : > { %3159 = vperm.xlu1 %8889, %v10869_v2   ;;  %v10889_v53 = vpop.permute.xlu1 %8730  ;;  %v16387_v2 = vld [vmem:[#allocation61_spill] sm:$0xff]  ;;  %16396 = vst [vmem:[#allocation127_spill] sm:$0xff] %v10911_v6 }
 0x41d   : > { %v10892_v32 = vadd.f32 %v8559_v20, %v16387_v2  ;;  %16389 = vst [vmem:[#allocation61_spill] sm:$0xff] %v10898_v31  ;;  %v8560_v2 = vunpack.i.h.bf16 %v16384_v60  ;;  %v16394_v20 = vld [vmem:[#allocation71_spill] sm:$0xff]  ;;  %v10914_v18 = vpop.permute.xlu2 %8821 }
 0x41e   : > { %v10909_v14 = vadd.f32 %v8577_v9, %v16394_v20  ;;  %v8578_v9 = vunpack.i.h.bf16 %v16392_v12  ;;  %v8589_v12 = vunpack.i.l.bf16 %v10075_v62  ;;  %v8773_v62 = vunpack.i.h.bf16 %v10820_v48 }
 0x41f   : > { %16388 = vst [vmem:[#allocation53_spill] sm:$0xff] %v10892_v32 }
 0x420   : > { %3165 = vperm.xlu2 %8888, %v10878_v15   ;;  %v16390_v15 = vld [vmem:[#allocation63_spill] sm:$0xff]  ;;  %16395 = vst [vmem:[#allocation71_spill] sm:$0xff] %v10909_v14 }
 0x421   : > { %v10901_v52 = vadd.f32 %v8565_v36, %v16390_v15  ;;  %v8572_v36 = vunpack.i.h.bf16 %v10021_v38  ;;  %v8772_v38 = vunpack.i.l.bf16 %v10820_v48  ;;  %v8601_v48 = vunpack.i.l.bf16 %v10097_v44 }
 0x422   : > { %v8613_v44 = vunpack.i.l.bf16 %v10625_v46 }
 0x423   : > { %16391 = vst [vmem:[#allocation63_spill] sm:$0xff] %v10901_v52  ;;  %v10924_v60 = vadd.f32 %v8572_v36, %v10549_v41  ;;  %v10927_v20 = vpop.permute.xlu0 %8850  ;;  %v10940_v41 = vadd.f32 %v8772_v38, %v10590_v33 }
 0x424   : > { %3168 = vperm.xlu1 %8889, %v10886_v47   ;;  %v10905_v47 = vpop.permute.xlu1 %8742 }
 0x425   : > { %16393 = vst [vmem:[#allocation8_spill] sm:$0xff] %v10905_v47 }
 0x426   : > { %16399 = vst [vmem:[#allocation128_spill] sm:$0xff] %v10924_v60 }
 0x427   : > { %16402 = vst [vmem:[#allocation131_spill] sm:$0xff] %v10940_v41 }
 0x428   : > { %3174 = vperm.xlu2 %8888, %v10892_v32   ;;  %v16397_v32 = vld [vmem:[#allocation73_spill] sm:$0xff] }
 0x429   : > { %v10917_v15 = vadd.f32 %v8560_v2, %v16397_v32  ;;  %v10933_v32 = vadd.f32 %v8578_v9, %v10558_v11  ;;  %v8584_v9 = vunpack.i.h.bf16 %v10040_v7 }
 0x42b   : > { %16398 = vst [vmem:[#allocation73_spill] sm:$0xff] %v10917_v15  ;;  %v10949_v11 = vpop.permute.xlu0 %8855  ;;  %v10956_v33 = vadd.f32 %v8584_v9, %v10639_v55  ;;  %v10977_v9 = vadd.f32 %v8601_v48, %v10676_v25  ;;  %v10993_v25 = vadd.f32 %v8613_v44, %v10711_v17  ;;  %v8608_v48 = vunpack.i.h.bf16 %v10079_v3 }
 0x42c   : > { %3177 = vperm.xlu1 %8889, %v10901_v52   ;;  %v10921_v52 = vpop.permute.xlu1 %8754  ;;  %16400 = vst [vmem:[#allocation129_spill] sm:$0xff] %v10933_v32  ;;  %v8619_v3 = vunpack.i.l.bf16 %v10614_v13 }
 0x42d   : > { %16405 = vst [vmem:[#allocation134_spill] sm:$0xff] %v10956_v33 }
 0x42e   : > { %16409 = vst [vmem:[#allocation138_spill] sm:$0xff] %v10977_v9 }
 0x42f   : > { %16412 = vst [vmem:[#allocation141_spill] sm:$0xff] %v10993_v25 }
 0x430   : > { %3183 = vperm.xlu2 %8888, %v10909_v14   ;;  %v10930_v14 = vpop.permute.xlu2 %8833 }
 0x434   : > { %3186 = vperm.xlu1 %8889, %v10917_v15   ;;  %v10937_v2 = vpop.permute.xlu1 %8787  ;;  %v10947_v15 = vadd.f32 %v8589_v12, %v10596_v51  ;;  %v10963_v51 = vadd.f32 %v8773_v62, %v10648_v1  ;;  %v8596_v12 = vunpack.i.h.bf16 %v10061_v63  ;;  %v8812_v1 = vunpack.i.l.bf16 %v10872_v59 }
 0x435   : > { %16401 = vst [vmem:[#allocation130_spill] sm:$0xff] %v10937_v2 }
 0x436   : > { %16403 = vst [vmem:[#allocation132_spill] sm:$0xff] %v10947_v15  ;;  %v10972_v55 = vadd.f32 %v8596_v12, %v10669_v10 }
 0x437   : > { %16406 = vst [vmem:[#allocation135_spill] sm:$0xff] %v10963_v51 }
 0x438   : > { %3192 = vperm.xlu2 %8888, %v10924_v60   ;;  %16408 = vst [vmem:[#allocation137_spill] sm:$0xff] %v10972_v55 }
 0x439   : > { %v10944_v36 = vpop.permute.xlu2 %8861 }
 0x43c   : > { %3195 = vperm.xlu1 %8889, %v10933_v32   ;;  %v10953_v32 = vpop.permute.xlu1 %8799 }
 0x43d   : > { %16404 = vst [vmem:[#allocation133_spill] sm:$0xff] %v10953_v32 }
 0x440   : > { %3201 = vperm.xlu2 %8888, %v10940_v41   ;;  %v10966_v41 = vpop.permute.xlu0 %8884 }
 0x441   : > { %16407 = vst [vmem:[#allocation136_spill] sm:$0xff] %v10966_v41  ;;  %v16449_v41 = vld [vmem:[#allocation56_spill] sm:$0xff] }
 0x444   : > { %3204 = vperm.xlu1 %8889, %v10947_v15   ;;  %v10969_v7 = vpop.permute.xlu1 %8827 }
 0x448   : > { %3210 = vperm.xlu2 %8888, %v10956_v33   ;;  %v10988_v10 = vpop.permute.xlu0 %3138  ;;  %v16435_v33 = vld [vmem:[#allocation36_spill] sm:$0xff] }
 0x449   : > { %v10960_v38 = vpop.permute.xlu2 %8873 }
 0x44c   : > { %3213 = vperm.xlu1 %8889, %v10963_v51   ;;  %v10983_v63 = vpop.permute.xlu1 %8839  ;;  %v10986_v51 = vadd.f32 %v8812_v1, %v10701_v40  ;;  %v8813_v40 = vunpack.i.h.bf16 %v10872_v59  ;;  %v11003_v1 = vadd.f32 %v8608_v48, %v10797_v37  ;;  %v11018_v59 = vadd.f32 %v8619_v3, %v10843_v28 }
 0x44d   : > { %v8625_v37 = vunpack.i.l.bf16 %v10657_v61  ;;  %v8852_v48 = vunpack.i.l.bf16 %v10927_v20  ;;  %v16422_v61 = vld [vmem:[#allocation17_spill] sm:$0xff] }
 0x44e   : > { %16411 = vst [vmem:[#allocation140_spill] sm:$0xff] %v10986_v51  ;;  %v11009_v46 = vadd.f32 %v8813_v40, %v10779_v42 }
 0x44f   : > { %16415 = vst [vmem:[#allocation144_spill] sm:$0xff] %v11003_v1  ;;  %v11026_v42 = vadd.f32 %v8625_v37, %v10799_v58 }
 0x450   : > { %3219 = vperm.xlu2 %8888, %v10972_v55   ;;  %v11005_v15 = vpop.permute.xlu0 %3153  ;;  %16416 = vst [vmem:[#allocation145_spill] sm:$0xff] %v11009_v46  ;;  %v16431_v55 = vld [vmem:[#allocation34_spill] sm:$0xff] }
 0x451   : > { %16417 = vst [vmem:[#allocation146_spill] sm:$0xff] %v11018_v59 }
 0x452   : > { %v10980_v62 = vpop.permute.xlu2 %3126  ;;  %16418 = vst [vmem:[#allocation147_spill] sm:$0xff] %v11026_v42 }
 0x453   : > { %16410 = vst [vmem:[#allocation139_spill] sm:$0xff] %v10980_v62 }
 0x454   : > { %3222 = vperm.xlu1 %8889, %v10977_v9  }
 0x455   : > { %v10999_v9 = vpop.permute.xlu1 %8867 }
 0x456   : > { %16414 = vst [vmem:[#allocation143_spill] sm:$0xff] %v10999_v9 }
 0x458   : > { %3228 = vperm.xlu2 %8888, %v10986_v51   ;;  %v8632_v51 = vunpack.i.h.bf16 %v10650_v35 }
 0x45a   : > { %v10995_v12 = vpop.permute.xlu2 %3132 }
 0x45b   : > { %16413 = vst [vmem:[#allocation142_spill] sm:$0xff] %v10995_v12 }
 0x45c   : > { %3231 = vperm.xlu1 %8889, %v10993_v25   ;;  %v11023_v25 = vpop.permute.xlu0 %3162 }
 0x460   : > { %3237 = vperm.xlu2 %8888, %v11003_v1   ;;  %v16420_v1 = vld [vmem:[#allocation15_spill] sm:$0xff] }
 0x461   : > { %v11033_v28 = vadd.f32 %v8852_v48, %v16420_v1  ;;  %v8853_v1 = vunpack.i.h.bf16 %v10927_v20 }
 0x462   : > { %v11011_v17 = vpop.permute.xlu2 %3141 }
 0x463   : > { %16421 = vst [vmem:[#allocation15_spill] sm:$0xff] %v11033_v28 }
 0x464   : > { %3240 = vperm.xlu1 %8889, %v11009_v46   ;;  %v8620_v46 = vunpack.i.h.bf16 %v10614_v13  ;;  %v11044_v37 = vpop.permute.xlu0 %3171 }
 0x465   : > { %v11015_v44 = vpop.permute.xlu1 %8879 }
 0x468   : > { %3246 = vperm.xlu2 %8888, %v11018_v59   ;;  %v11039_v59 = vadd.f32 %v8620_v46, %v16422_v61  ;;  %v8643_v46 = vunpack.i.l.bf16 %v10678_v0  ;;  %v16428_v61 = vld [vmem:[#allocation26_spill] sm:$0xff] }
 0x46a   : > { %v11028_v40 = vpop.permute.xlu2 %3147  ;;  %16423 = vst [vmem:[#allocation17_spill] sm:$0xff] %v11039_v59 }
 0x46b   : > { %16419 = vst [vmem:[#allocation148_spill] sm:$0xff] %v11028_v40 }
 0x46c   : > { %3249 = vperm.xlu1 %8889, %v11026_v42   ;;  %v16425_v42 = vld [vmem:[#allocation24_spill] sm:$0xff] }
 0x46d   : > { %v11048_v13 = vadd.f32 %v8632_v51, %v16425_v42  ;;  %v8649_v51 = vunpack.i.l.bf16 %v10705_v8  ;;  %v11065_v42 = vpop.permute.xlu0 %3180  ;;  %v8644_v8 = vunpack.i.h.bf16 %v10678_v0 }
 0x46e   : > { %v11035_v3 = vpop.permute.xlu1 %3129  ;;  %16433 = vst [vmem:[#allocation152_spill] sm:$0xff] %v11065_v42 }
 0x46f   : > { %16426 = vst [vmem:[#allocation24_spill] sm:$0xff] %v11048_v13 }
 0x470   : > { %3255 = vperm.xlu2 %8888, %v11033_v28   ;;  %v11056_v28 = vadd.f32 %v8853_v1, %v16428_v61  ;;  %v11072_v1 = vadd.f32 %v8649_v51, %v16435_v33  ;;  %v16444_v33 = vld [vmem:[#allocation112_spill] sm:$0xff] }
 0x471   : > { %v8656_v51 = vunpack.i.h.bf16 %v16444_v33 }
 0x472   : > { %v11042_v58 = vpop.permute.xlu2 %3156  ;;  %16429 = vst [vmem:[#allocation26_spill] sm:$0xff] %v11056_v28 }
 0x473   : > { %16424 = vst [vmem:[#allocation149_spill] sm:$0xff] %v11042_v58  ;;  %v16496_v58 = vld [vmem:[#allocation47_spill] sm:$0xff] }
 0x474   : > { %3258 = vperm.xlu1 %8889, %v11039_v59   ;;  %v11062_v59 = vadd.f32 %v8643_v46, %v16431_v55  ;;  %16436 = vst [vmem:[#allocation36_spill] sm:$0xff] %v11072_v1 }
 0x475   : > { %v11083_v60 = vpop.permute.xlu0 %3189 }
 0x476   : > { %v11051_v48 = vpop.permute.xlu1 %3135  ;;  %16432 = vst [vmem:[#allocation34_spill] sm:$0xff] %v11062_v59 }
 0x477   : > { %16427 = vst [vmem:[#allocation150_spill] sm:$0xff] %v11051_v48  ;;  %v16490_v48 = vld [vmem:[#allocation28_spill] sm:$0xff] }
 0x478   : > { %3264 = vperm.xlu2 %8888, %v11048_v13   ;;  %v8638_v13 = vunpack.i.h.bf16 %v10692_v24  ;;  %16441 = vst [vmem:[#allocation156_spill] sm:$0xff] %v11083_v60  ;;  %v16519_v60 = vld [vmem:[#allocation30_spill] sm:$0xff] }
 0x47a   : > { %v11058_v35 = vpop.permute.xlu2 %3165 }
 0x47b   : > { %16430 = vst [vmem:[#allocation151_spill] sm:$0xff] %v11058_v35  ;;  %v16506_v35 = vld [vmem:[#allocation68_spill] sm:$0xff] }
 0x47c   : > { %3267 = vperm.xlu1 %8889, %v11056_v28   ;;  %v16438_v28 = vld [vmem:[#allocation44_spill] sm:$0xff] }
 0x47d   : > { %v11078_v55 = vadd.f32 %v8638_v13, %v16438_v28  ;;  %v8660_v28 = vunpack.i.l.bf16 %v10646_v39  ;;  %v16446_v13 = vld [vmem:[#allocation54_spill] sm:$0xff]  ;;  %v8678_v39 = vunpack.i.l.bf16 %v10738_v21 }
 0x47e   : > { %v11067_v20 = vpop.permute.xlu1 %3144 }
 0x47f   : > { %16434 = vst [vmem:[#allocation153_spill] sm:$0xff] %v11067_v20 }
 0x480   : > { %3273 = vperm.xlu2 %8888, %v11062_v59   ;;  %16439 = vst [vmem:[#allocation44_spill] sm:$0xff] %v11078_v55  ;;  %v16442_v59 = vld [vmem:[#allocation46_spill] sm:$0xff] }
 0x481   : > { %v11087_v24 = vadd.f32 %v8644_v8, %v16442_v59  ;;  %v8672_v59 = vunpack.i.l.bf16 %v10790_v56  ;;  %v11104_v8 = vpop.permute.xlu0 %3198 }
 0x482   : > { %v11074_v61 = vpop.permute.xlu2 %3174  ;;  %16451 = vst [vmem:[#allocation158_spill] sm:$0xff] %v11104_v8 }
 0x483   : > { %16437 = vst [vmem:[#allocation154_spill] sm:$0xff] %v11074_v61 }
 0x484   : > { %3276 = vperm.xlu1 %8889, %v11072_v1   ;;  %16443 = vst [vmem:[#allocation46_spill] sm:$0xff] %v11087_v24  ;;  %v11095_v1 = vadd.f32 %v8656_v51, %v16446_v13 }
 0x486   : > { %v11081_v46 = vpop.permute.xlu1 %3150  ;;  %16447 = vst [vmem:[#allocation54_spill] sm:$0xff] %v11095_v1 }
 0x487   : > { %16440 = vst [vmem:[#allocation155_spill] sm:$0xff] %v11081_v46  ;;  %v8801_v46 = vunpack.i.l.bf16 %v10953_v32 }
 0x488   : > { %3282 = vperm.xlu2 %8888, %v11078_v55   ;;  %v11101_v55 = vadd.f32 %v8660_v28, %v16449_v41  ;;  %v8667_v41 = vunpack.i.h.bf16 %v10723_v22  ;;  %v16456_v28 = vld [vmem:[#allocation66_spill] sm:$0xff] }
 0x489   : > { %v11122_v6 = vpop.permute.xlu0 %3207 }
 0x48a   : > { %v11090_v19 = vpop.permute.xlu2 %3183  ;;  %16450 = vst [vmem:[#allocation56_spill] sm:$0xff] %v11101_v55 }
 0x48b   : > { %16445 = vst [vmem:[#allocation112_spill] sm:$0xff] %v11090_v19 }
 0x48c   : > { %3285 = vperm.xlu1 %8889, %v11087_v24   ;;  %v16453_v24 = vld [vmem:[#allocation64_spill] sm:$0xff]  ;;  %16459 = vst [vmem:[#allocation162_spill] sm:$0xff] %v11122_v6 }
 0x48d   : > { %v11111_v51 = vadd.f32 %v8672_v59, %v16453_v24  ;;  %v8673_v24 = vunpack.i.h.bf16 %v10790_v56 }
 0x48e   : > { %v11097_v0 = vpop.permute.xlu1 %3159 }
 0x48f   : > { %16448 = vst [vmem:[#allocation157_spill] sm:$0xff] %v11097_v0 }
 0x490   : > { %3291 = vperm.xlu2 %8888, %v11095_v1   ;;  %16454 = vst [vmem:[#allocation64_spill] sm:$0xff] %v11111_v51  ;;  %v11118_v1 = vadd.f32 %v8678_v39, %v16456_v28  ;;  %v8684_v39 = vunpack.i.l.bf16 %v10812_v29 }
 0x491   : > { %v11140_v4 = vpop.permute.xlu0 %3216 }
 0x492   : > { %v11106_v33 = vpop.permute.xlu2 %3192  ;;  %16457 = vst [vmem:[#allocation66_spill] sm:$0xff] %v11118_v1 }
 0x493   : > { %16452 = vst [vmem:[#allocation159_spill] sm:$0xff] %v11106_v33 }
 0x494   : > { %3294 = vperm.xlu1 %8889, %v11101_v55   ;;  %v16460_v55 = vld [vmem:[#allocation74_spill] sm:$0xff]  ;;  %16466 = vst [vmem:[#allocation165_spill] sm:$0xff] %v11140_v4  ;;  %v8751_v4 = vunpack.i.h.bf16 %v10866_v16 }
 0x495   : > { %v11126_v21 = vadd.f32 %v8667_v41, %v16460_v55  ;;  %v16467_v55 = vld [vmem:[#allocation84_spill] sm:$0xff] }
 0x496   : > { %v11113_v13 = vpop.permute.xlu1 %3168  ;;  %v11143_v41 = vadd.f32 %v8684_v39, %v16467_v55 }
 0x497   : > { %16455 = vst [vmem:[#allocation160_spill] sm:$0xff] %v11113_v13  ;;  %v8733_v13 = vunpack.i.h.bf16 %v10889_v53 }
 0x498   : > { %3300 = vperm.xlu2 %8888, %v11111_v51   ;;  %16461 = vst [vmem:[#allocation74_spill] sm:$0xff] %v11126_v21  ;;  %v16463_v51 = vld [vmem:[#allocation76_spill] sm:$0xff] }
 0x499   : > { %v11133_v22 = vadd.f32 %v8673_v24, %v16463_v51  ;;  %16468 = vst [vmem:[#allocation84_spill] sm:$0xff] %v11143_v41  ;;  %v8696_v24 = vunpack.i.l.bf16 %v10827_v43  ;;  %v11161_v55 = vpop.permute.xlu0 %3225 }
 0x49a   : > { %v11120_v9 = vpop.permute.xlu2 %3201 }
 0x49b   : > { %16458 = vst [vmem:[#allocation161_spill] sm:$0xff] %v11120_v9  ;;  %v11157_v33 = vadd.f32 %v8696_v24, %v16473_v57 }
 0x49c   : > { %3303 = vperm.xlu1 %8889, %v11118_v1   ;;  %16464 = vst [vmem:[#allocation76_spill] sm:$0xff] %v11133_v22  ;;  %v8777_v1 = vunpack.i.l.bf16 %v10839_v27 }
 0x49d   : > { %16474 = vst [vmem:[#allocation94_spill] sm:$0xff] %v11157_v33 }
 0x49e   : > { %v11129_v59 = vpop.permute.xlu1 %3177 }
 0x49f   : > { %16462 = vst [vmem:[#allocation163_spill] sm:$0xff] %v11129_v59 }
 0x4a0   : > { %3309 = vperm.xlu2 %8888, %v11126_v21   ;;  %v16470_v21 = vld [vmem:[#allocation86_spill] sm:$0xff] }
 0x4a1   : > { %v11149_v51 = vadd.f32 %v8777_v1, %v16470_v21  ;;  %v8691_v1 = vunpack.i.h.bf16 %v10783_v50  ;;  %v16476_v21 = vld [vmem:[#allocation95_spill] sm:$0xff]  ;;  %v11178_v19 = vpop.permute.xlu0 %3234 }
 0x4a2   : > { %v11136_v28 = vpop.permute.xlu2 %3210 }
 0x4a3   : > { %16465 = vst [vmem:[#allocation164_spill] sm:$0xff] %v11136_v28 }
 0x4a4   : > { %3312 = vperm.xlu1 %8889, %v11133_v22   ;;  %16471 = vst [vmem:[#allocation86_spill] sm:$0xff] %v11149_v51  ;;  %v8685_v22 = vunpack.i.h.bf16 %v10812_v29  ;;  %v8697_v29 = vunpack.i.h.bf16 %v10827_v43 }
 0x4a6   : > { %v11145_v56 = vpop.permute.xlu1 %3186 }
 0x4a7   : > { %16469 = vst [vmem:[#allocation166_spill] sm:$0xff] %v11145_v56 }
 0x4a8   : > { %3318 = vperm.xlu2 %8888, %v11143_v41   ;;  %v11166_v41 = vadd.f32 %v8685_v22, %v16476_v21  ;;  %v8708_v22 = vunpack.i.l.bf16 %v10859_v49 }
 0x4aa   : > { %v11153_v31 = vpop.permute.xlu2 %3219  ;;  %16477 = vst [vmem:[#allocation95_spill] sm:$0xff] %v11166_v41 }
 0x4ab   : > { %16472 = vst [vmem:[#allocation167_spill] sm:$0xff] %v11153_v31 }
 0x4ac   : > { %3321 = vperm.xlu1 %8889, %v11149_v51   ;;  %v16478_v51 = vld [vmem:[#allocation10_spill] sm:$0xff] }
 0x4ad   : > { %v11170_v31 = vadd.f32 %v8691_v1, %v16478_v51  ;;  %v8817_v51 = vunpack.i.l.bf16 %v10894_v26  ;;  %v16483_v1 = vld [vmem:[#allocation20_spill] sm:$0xff] }
 0x4ae   : > { %v11159_v39 = vpop.permute.xlu1 %3195  ;;  %v11187_v21 = vadd.f32 %v8708_v22, %v16483_v1  ;;  %v8709_v22 = vunpack.i.h.bf16 %v10859_v49  ;;  %v8720_v49 = vunpack.i.l.bf16 %v10875_v34 }
 0x4af   : > { %16475 = vst [vmem:[#allocation168_spill] sm:$0xff] %v11159_v39 }
 0x4b0   : > { %3327 = vperm.xlu2 %8888, %v11157_v33   ;;  %16479 = vst [vmem:[#allocation10_spill] sm:$0xff] %v11170_v31  ;;  %v16481_v33 = vld [vmem:[#allocation12_spill] sm:$0xff] }
 0x4b1   : > { %v11181_v39 = vadd.f32 %v8697_v29, %v16481_v33  ;;  %16484 = vst [vmem:[#allocation20_spill] sm:$0xff] %v11187_v21  ;;  %v8703_v33 = vunpack.i.h.bf16 %v10792_v54  ;;  %v11198_v29 = vpop.permute.xlu0 %3243 }
 0x4b2   : > { %v11175_v24 = vpop.permute.xlu2 %3228 }
 0x4b3   : > { %16482 = vst [vmem:[#allocation12_spill] sm:$0xff] %v11181_v39 }
 0x4b4   : > { %3330 = vperm.xlu1 %8889, %v11166_v41  }
 0x4b6   : > { %v11173_v57 = vpop.permute.xlu1 %3204 }
 0x4b7   : > { %16480 = vst [vmem:[#allocation169_spill] sm:$0xff] %v11173_v57 }
 0x4b8   : > { %3336 = vperm.xlu2 %8888, %v11170_v31   ;;  %v16486_v31 = vld [vmem:[#allocation19_spill] sm:$0xff] }
 0x4b9   : > { %v11195_v57 = vadd.f32 %v8817_v51, %v16486_v31  ;;  %v11210_v31 = vadd.f32 %v8709_v22, %v16490_v48  ;;  %v11215_v9 = vpop.permute.xlu0 %3252  ;;  %v8732_v48 = vunpack.i.l.bf16 %v10889_v53  ;;  %v8744_v53 = vunpack.i.l.bf16 %v10905_v47 }
 0x4ba   : > { %v11192_v41 = vpop.permute.xlu2 %3237 }
 0x4bb   : > { %16487 = vst [vmem:[#allocation19_spill] sm:$0xff] %v11195_v57  ;;  %v11273_v12 = vadd.f32 %v8744_v53, %v16506_v35 }
 0x4bc   : > { %3339 = vperm.xlu1 %8889, %v11181_v39   ;;  %v16488_v39 = vld [vmem:[#allocation27_spill] sm:$0xff]  ;;  %16491 = vst [vmem:[#allocation28_spill] sm:$0xff] %v11210_v31 }
 0x4bd   : > { %v11202_v28 = vadd.f32 %v8703_v33, %v16488_v39  ;;  %16507 = vst [vmem:[#allocation68_spill] sm:$0xff] %v11273_v12 }
 0x4be   : > { %v11189_v43 = vpop.permute.xlu1 %3213 }
 0x4bf   : > { %16485 = vst [vmem:[#allocation170_spill] sm:$0xff] %v11189_v43 }
 0x4c0   : > { %3345 = vperm.xlu2 %8888, %v11187_v21   ;;  %16489 = vst [vmem:[#allocation27_spill] sm:$0xff] %v11202_v28  ;;  %v8715_v21 = vunpack.i.h.bf16 %v10817_v30 }
 0x4c1   : > { %v11237_v43 = vpop.permute.xlu0 %3261 }
 0x4c2   : > { %v11212_v51 = vpop.permute.xlu2 %3246 }
 0x4c4   : > { %3348 = vperm.xlu1 %8889, %v11195_v57   ;;  %v16492_v57 = vld [vmem:[#allocation37_spill] sm:$0xff] }
 0x4c5   : > { %v11218_v39 = vadd.f32 %v8715_v21, %v16492_v57  ;;  %v11233_v57 = vadd.f32 %v8732_v48, %v16496_v58 }
 0x4c6   : > { %v11205_v1 = vpop.permute.xlu1 %3222 }
 0x4c7   : > { %16493 = vst [vmem:[#allocation37_spill] sm:$0xff] %v11218_v39 }
 0x4c8   : > { %3354 = vperm.xlu2 %8888, %v11202_v28   ;;  %v16494_v28 = vld [vmem:[#allocation38_spill] sm:$0xff]  ;;  %16497 = vst [vmem:[#allocation47_spill] sm:$0xff] %v11233_v57 }
 0x4c9   : > { %v11225_v0 = vadd.f32 %v8720_v49, %v16494_v28  ;;  %v8727_v49 = vunpack.i.h.bf16 %v10834_v5  ;;  %v11254_v61 = vpop.permute.xlu0 %3270 }
 0x4ca   : > { %v11229_v22 = vpop.permute.xlu2 %3255 }
 0x4cb   : > { %16495 = vst [vmem:[#allocation38_spill] sm:$0xff] %v11225_v0 }
 0x4cc   : > { %3357 = vperm.xlu1 %8889, %v11210_v31   ;;  %v8857_v31 = vunpack.i.l.bf16 %v10949_v11 }
 0x4ce   : > { %v11221_v33 = vpop.permute.xlu1 %3231 }
 0x4d0   : > { %3363 = vperm.xlu2 %8888, %v11218_v39   ;;  %v16498_v39 = vld [vmem:[#allocation48_spill] sm:$0xff] }
 0x4d1   : > { %v11241_v28 = vadd.f32 %v8857_v31, %v16498_v39  ;;  %v8738_v31 = vunpack.i.l.bf16 %v10850_v45  ;;  %v16502_v39 = vld [vmem:[#allocation58_spill] sm:$0xff] }
 0x4d2   : > { %v11251_v48 = vpop.permute.xlu2 %3264 }
 0x4d3   : > { %16499 = vst [vmem:[#allocation48_spill] sm:$0xff] %v11241_v28 }
 0x4d4   : > { %3366 = vperm.xlu1 %8889, %v11225_v0   ;;  %v16500_v0 = vld [vmem:[#allocation57_spill] sm:$0xff] }
 0x4d5   : > { %v11246_v56 = vadd.f32 %v8727_v49, %v16500_v0 }
 0x4d6   : > { %v11235_v21 = vpop.permute.xlu1 %3240 }
 0x4d7   : > { %16501 = vst [vmem:[#allocation57_spill] sm:$0xff] %v11246_v56 }
 0x4d8   : > { %3372 = vperm.xlu2 %8888, %v11233_v57   ;;  %v11258_v57 = vadd.f32 %v8733_v13, %v16502_v39  ;;  %v8756_v13 = vunpack.i.l.bf16 %v10921_v52 }
 0x4da   : > { %16503 = vst [vmem:[#allocation58_spill] sm:$0xff] %v11258_v57  ;;  %v11268_v40 = vpop.permute.xlu2 %3273 }
 0x4dc   : > { %3375 = vperm.xlu1 %8889, %v11241_v28   ;;  %v16504_v28 = vld [vmem:[#allocation67_spill] sm:$0xff] }
 0x4dd   : > { %v11262_v0 = vadd.f32 %v8738_v31, %v16504_v28  ;;  %v8739_v28 = vunpack.i.h.bf16 %v10850_v45  ;;  %v16508_v31 = vld [vmem:[#allocation77_spill] sm:$0xff] }
 0x4de   : > { %v11249_v58 = vpop.permute.xlu1 %3249  ;;  %v11279_v39 = vadd.f32 %v8756_v13, %v16508_v31  ;;  %v8757_v13 = vunpack.i.h.bf16 %v10921_v52  ;;  %v16518_v52 = vlaneseq }
 0x4df   : > { %16505 = vst [vmem:[#allocation67_spill] sm:$0xff] %v11262_v0 }
 0x4e0   : > { %3381 = vperm.xlu2 %8888, %v11246_v56   ;;  %v11270_v56 = vpop.permute.xlu0 %3279  ;;  %16509 = vst [vmem:[#allocation77_spill] sm:$0xff] %v11279_v39  ;;  %v11313_v62 = vand.u32 127, %v16518_v52 }
 0x4e2   : > { %v11288_v35 = vpop.permute.xlu2 %3282 }
 0x4e4   : > { %3384 = vperm.xlu1 %8889, %v11258_v57  }
 0x4e6   : > { %v11265_v49 = vpop.permute.xlu1 %3258 }
 0x4e8   : > { %3390 = vperm.xlu2 %8888, %v11262_v0   ;;  %v16510_v0 = vld [vmem:[#allocation78_spill] sm:$0xff]  ;;  %v11290_v53 = vpop.permute.xlu0 %3288 }
 0x4e9   : > { %v11285_v47 = vadd.f32 %v8739_v28, %v16510_v0 }
 0x4ea   : > { %v11304_v28 = vpop.permute.xlu2 %3291 }
 0x4eb   : > { %16511 = vst [vmem:[#allocation78_spill] sm:$0xff] %v11285_v47 }
 0x4ec   : > { %3393 = vperm.xlu1 %8889, %v11273_v12   ;;  %v16512_v12 = vld [vmem:[#allocation13_spill] sm:$0xff] }
 0x4ed   : > { %v11294_v45 = vadd.f32 %v8751_v4, %v16512_v12  ;;  %v16516_v4 = vld [vmem:[#allocation21_spill] sm:$0xff] }
 0x4ee   : > { %v11281_v57 = vpop.permute.xlu1 %3267 }
 0x4ef   : > { %16513 = vst [vmem:[#allocation13_spill] sm:$0xff] %v11294_v45 }
 0x4f0   : > { %3399 = vperm.xlu2 %8888, %v11279_v39   ;;  %v16514_v39 = vld [vmem:[#allocation14_spill] sm:$0xff]  ;;  %v11306_v16 = vpop.permute.xlu0 %3297 }
 0x4f1   : > { %v11301_v0 = vadd.f32 %v8757_v13, %v16514_v39  ;;  %v11317_v39 = vadd.s32 4294967288, %v11313_v62  ;;  %v11320_v13 = vadd.s32 4294967272, %v11313_v62 }
 0x4f2   : > { %v11330_v52 = vpop.permute.xlu2 %3300 }
 0x4f3   : > { %16515 = vst [vmem:[#allocation14_spill] sm:$0xff] %v11301_v0  ;;  %v3606_v20 = vperm.slane %v11270_v56, %v11320_v13 }
 0x4f4   : > { %3402 = vperm.xlu1 %8889, %v11285_v47   ;;  %v8789_v47 = vunpack.i.l.bf16 %v10937_v2 }
 0x4f6   : > { %v11297_v31 = vpop.permute.xlu1 %3276  ;;  %v11310_v12 = vadd.f32 %v8789_v47, %v16516_v4  ;;  %v3574_v47 = vperm.slane %v11161_v55, %v11317_v39  ;;  %v3580_v4 = vperm.slane %v11178_v19, %v11313_v62  ;;  %v3595_v55 = vperm.slane %v11237_v43, %v11317_v39 }
 0x4f7   : > { %v3601_v19 = vperm.slane %v11254_v61, %v11313_v62  ;;  %v3573_v43 = vperm.slane %v11205_v1, %v11313_v62  ;;  %v3616_v61 = vperm.slane %v11306_v16, %v11317_v39 }
 0x4f8   : > { %3408 = vperm.xlu2 %8888, %v11294_v45   ;;  %16517 = vst [vmem:[#allocation21_spill] sm:$0xff] %v11310_v12  ;;  %v8784_v45 = vunpack.i.h.bf16 %v10882_v23  ;;  %v11336_v8 = vpop.permute.xlu0 %3306  ;;  %v3588_v23 = vperm.slane %v11249_v58, %v11317_v39  ;;  %v3587_v58 = vperm.slane %v11212_v51, %v11313_v62  ;;  %v3594_v51 = vperm.slane %v11265_v49, %v11313_v62 }
 0x4f9   : > { %v3622_v56 = vperm.slane %v11336_v8, %v11313_v62  ;;  %v3602_v8 = vperm.slane %v11268_v40, %v11317_v39 }
 0x4fa   : > { %v11352_v32 = vadd.f32 %v8784_v45, %v16519_v60  ;;  %v3589_v60 = vsel %vm3514_vm1, %v3588_v23, %v3587_v58  ;;  %v3608_v23 = vperm.slane %v11288_v35, %v11313_v62  ;;  %v3599_v35 = vperm.slane %v11281_v57, %v11320_v13 }
 0x4fc   : > { %3411 = vperm.xlu1 %8889, %v11301_v0   ;;  %v11323_v0 = vadd.s32 4294967280, %v11313_v62 }
 0x4fe   : > { %v3286_v59 = vpop.permute.xlu1 %3285  ;;  %v3590_v6 = vperm.slane %v11215_v9, %v11323_v0  ;;  %v3611_v9 = vperm.slane %v11290_v53, %v11323_v0  ;;  %v16520_v53 = vld [vmem:[#allocation40_spill] sm:$0xff]  ;;  %v3576_v45 = vperm.slane %v11175_v24, %v11323_v0  ;;  %v3597_v24 = vperm.slane %v11251_v48, %v11323_v0 }
 0x4ff   : > { %v11365_v42 = vadd.f32 %v8801_v46, %v16520_v53  ;;  %v3609_v1 = vperm.slane %v3286_v59, %v11317_v39  ;;  %v3578_v46 = vperm.slane %v11221_v33, %v11320_v13  ;;  %v3604_v59 = vperm.slane %v11297_v31, %v11323_v0 }
 0x500   : > { %v3596_v33 = vsel %vm3514_vm1, %v3595_v55, %v3594_v51  ;;  %v3613_v48 = vperm.slane %v11304_v28, %v11320_v13 }
 0x501   : > { %v3610_v31 = vsel %vm3514_vm1, %v3609_v1, %v3608_v23  ;;  %v3598_v57 = vsel %vm3518_vm2, %v3597_v24, %v3596_v33  ;;  %v8824_v24 = vunpack.i.h.bf16 %v10914_v18 }
 0x502   : > { %v3612_v53 = vsel %vm3518_vm2, %v3611_v9, %v3610_v31 }
 0x504   : > { %3420 = vperm.xlu1 %8889, %v11310_v12   ;;  %v3585_v12 = vperm.slane %v11198_v29, %v11320_v13  ;;  %v3581_v29 = vperm.slane %v11192_v41, %v11317_v39  ;;  %v3583_v41 = vperm.slane %v11235_v21, %v11323_v0  ;;  %v3575_v21 = vsel %vm3514_vm1, %v3574_v47, %v3573_v43  ;;  %v3310_v43 = vpop.permute.xlu2 %3309 }
 0x505   : > { %v3592_v47 = vperm.slane %v11229_v22, %v11320_v13  ;;  %v3577_v58 = vsel %vm3518_vm2, %v3576_v45, %v3575_v21  ;;  %v3623_v1 = vperm.slane %v3310_v43, %v11317_v39  ;;  %v16523_v43 = vld [vmem:[#allocation60_spill] sm:$0xff] }
 0x506   : > { %v3295_v2 = vpop.permute.xlu1 %3294  ;;  %v3582_v16 = vsel %vm3514_vm1, %v3581_v29, %v3580_v4  ;;  %v3591_v29 = vsel %vm3518_vm2, %v3590_v6, %v3589_v60  ;;  %v3603_v6 = vsel %vm3514_vm1, %v3602_v8, %v3601_v19  ;;  %v3600_v19 = vsel %vm3522_vm3, %v3599_v35, %v3598_v57 }
 0x507   : > { %v3584_v4 = vsel %vm3518_vm2, %v3583_v41, %v3582_v16  ;;  %v3615_v40 = vperm.slane %v3295_v2, %v11313_v62  ;;  %v3579_v2 = vsel %vm3522_vm3, %v3578_v46, %v3577_v58  ;;  %v3593_v55 = vsel %vm3522_vm3, %v3592_v47, %v3591_v29  ;;  %v3316_v16 = vpop.permute.xlu0 %3315  ;;  %v16521_v47 = vld [vmem:[#allocation50_spill] sm:$0xff] }
 0x508   : > { %v3586_v22 = vsel %vm3522_vm3, %v3585_v12, %v3584_v4  ;;  %v3605_v41 = vsel %vm3518_vm2, %v3604_v59, %v3603_v6  ;;  %v3618_v12 = vperm.slane %v11330_v52, %v11323_v0  ;;  %v8829_v8 = vunpack.i.l.bf16 %v10969_v7 }
 0x509   : > { %v3617_v60 = vsel %vm3514_vm1, %v3616_v61, %v3615_v40  ;;  %v3755_v9 = vsel %vm3741_vm4, %v3586_v22, %v3579_v2  ;;  %v3607_v61 = vsel %vm3522_vm3, %v3606_v20, %v3605_v41  ;;  %v3614_v52 = vsel %vm3522_vm3, %v3613_v48, %v3612_v53  ;;  %v16525_v41 = vld [vmem:[#allocation70_spill] sm:$0xff]  ;;  %v16527_v48 = vld [vmem:[#allocation80_spill] sm:$0xff] }
 0x50a   : > { %v3756_v28 = vsel %vm3743_vm5, %v3593_v55, %v3755_v9  ;;  %v3619_v21 = vsel %vm3518_vm2, %v3618_v12, %v3617_v60  ;;  %v3627_v45 = vperm.slane %v3316_v16, %v11320_v13  ;;  %v3624_v4 = vsel %vm3514_vm1, %v3623_v1, %v3622_v56  ;;  %v16529_v12 = vld [vmem:[#allocation81_spill] sm:$0xff] }
 0x50b   : > { %v3757_v23 = vsel %vm3745_vm6, %v3600_v19, %v3756_v28  ;;  %v11427_v33 = vadd.f32 %v8829_v8, %v16521_v47  ;;  %v11438_v2 = vadd.f32 %v8824_v24, %v16523_v43  ;;  %v8841_v22 = vunpack.i.l.bf16 %v10983_v63  ;;  %v16531_v8 = vld [vmem:[#allocation89_spill] sm:$0xff]  ;;  %v16533_v28 = vld [vmem:[#allocation90_spill] sm:$0xff]  ;;  %v16545_v43 = vld [vmem:[#allocation32_spill] sm:$0xff] }
 0x50c   : > { %3429 = vperm.xlu1 %8889, %v11352_v32   ;;  %v3758_v20 = vsel %vm3747_vm7, %v3607_v61, %v3757_v23  ;;  %v8690_v53 = vunpack.i.l.bf16 %v10783_v50  ;;  %v8836_v60 = vunpack.i.h.bf16 %v10930_v14  ;;  %v8778_v16 = vunpack.i.h.bf16 %v10839_v27 }
 0x50d   : > { %v3759_v40 = vsel %vm3749_vm8, %v3614_v52, %v3758_v20  ;;  %16522 = vst [vmem:[#allocation30_spill] sm:$0xff] %v11427_v33  ;;  %v11445_v57 = vadd.f32 %v8841_v22, %v16525_v41  ;;  %v8864_v50 = vunpack.i.h.bf16 %v10944_v36  ;;  %v8881_v27 = vunpack.i.l.bf16 %v11015_v44  ;;  %v16535_v52 = vld [vmem:[#allocation9_spill] sm:$0xff]  ;;  %v16539_v20 = vld [vmem:[#allocation16_spill] sm:$0xff] }
 0x50e   : > { %v3304_v49 = vpop.permute.xlu1 %3303  ;;  %16524 = vst [vmem:[#allocation40_spill] sm:$0xff] %v11438_v2  ;;  %v11453_v19 = vadd.f32 %v8690_v53, %v16527_v48  ;;  %v11457_v1 = vadd.f32 %v8836_v60, %v16529_v12  ;;  %v11463_v9 = vadd.f32 %v8778_v16, %v16531_v8  ;;  %v8721_v41 = vunpack.i.h.bf16 %v10875_v34  ;;  %v16547_v53 = vld [vmem:[#allocation52_spill] sm:$0xff]  ;;  %v16549_v12 = vld [vmem:[#allocation42_spill] sm:$0xff] }
 0x50f   : > { %v3620_v51 = vperm.slane %v3304_v49, %v11320_v13  ;;  %16526 = vst [vmem:[#allocation50_spill] sm:$0xff] %v11445_v57  ;;  %v3524_v48 = vperm.slane %v10988_v10, %v11313_v62  ;;  %v3532_v8 = vperm.slane %v11005_v15, %v11317_v39  ;;  %v3538_v34 = vperm.slane %v11023_v25, %v11313_v62  ;;  %v16554_v15 = vld [vmem:[#allocation155_spill] sm:$0xff]  ;;  %v16555_v25 = vld [vmem:[#allocation158_spill] sm:$0xff] }
 0x510   : > { %16528 = vst [vmem:[#allocation60_spill] sm:$0xff] %v11453_v19  ;;  %v11516_v16 = vadd.f32 %v8721_v41, %v16549_v12  ;;  %v3513_v10 = vperm.slane %v11035_v3, %v11317_v39  ;;  %v16561_v12 = vld [vmem:[#allocation151_spill] sm:$0xff] }
 0x511   : > { %v3621_v59 = vsel %vm3522_vm3, %v3620_v51, %v3619_v21  ;;  %16530 = vst [vmem:[#allocation70_spill] sm:$0xff] %v11457_v1  ;;  %v11469_v21 = vadd.f32 %v8864_v50, %v16533_v28  ;;  %v16551_v28 = vld [vmem:[#allocation152_spill] sm:$0xff] }
 0x512   : > { %v3760_v31 = vsel %vm3751_vm9, %v3621_v59, %v3759_v40  ;;  %16532 = vst [vmem:[#allocation80_spill] sm:$0xff] %v11463_v9  ;;  %v16541_v40 = vld [vmem:[#allocation106_spill] sm:$0xff] }
 0x513   : > { %16534 = vst [vmem:[#allocation81_spill] sm:$0xff] %v11469_v21 }
 0x514   : > { %3438 = vperm.xlu1 %8889, %v11365_v42   ;;  %16550 = vst [vmem:[#allocation32_spill] sm:$0xff] %v11516_v16 }
 0x516   : > { %v3313_v46 = vpop.permute.xlu1 %3312 }
 0x517   : > { %v3625_v49 = vperm.slane %v3313_v46, %v11323_v0  ;;  %v8702_v46 = vunpack.i.l.bf16 %v10792_v54  ;;  %v8876_v54 = vunpack.i.h.bf16 %v10960_v38 }
 0x519   : > { %v3626_v29 = vsel %vm3518_vm2, %v3625_v49, %v3624_v4  ;;  %v11475_v23 = vadd.f32 %v8702_v46, %v16535_v52  ;;  %v16537_v49 = vld [vmem:[#allocation101_spill] sm:$0xff]  ;;  %v8714_v4 = vunpack.i.l.bf16 %v10817_v30  ;;  %v11491_v47 = vadd.f32 %v8876_v54, %v16541_v40  ;;  %v16556_v54 = vld [vmem:[#allocation162_spill] sm:$0xff] }
 0x51a   : > { %v3628_v35 = vsel %vm3522_vm3, %v3627_v45, %v3626_v29  ;;  %v11481_v45 = vadd.f32 %v8881_v27, %v16537_v49  ;;  %v3548_v46 = vperm.slane %v16551_v28, %v11323_v0  ;;  %v16552_v27 = vld [vmem:[#allocation156_spill] sm:$0xff]  ;;  %v16553_v52 = vld [vmem:[#allocation153_spill] sm:$0xff]  ;;  %v3564_v3 = vperm.slane %v16556_v54, %v11320_v13 }
 0x51b   : > { %v3761_v58 = vsel %vm3753_vm10, %v3628_v35, %v3760_v31  ;;  %16536 = vst [vmem:[#allocation89_spill] sm:$0xff] %v11475_v23  ;;  %v11487_v29 = vadd.f32 %v8714_v4, %v16539_v20  ;;  %v8818_v35 = vunpack.i.h.bf16 %v10894_v26  ;;  %v8858_v26 = vunpack.i.h.bf16 %v10949_v11  ;;  %v16557_v20 = vld [vmem:[#allocation139_spill] sm:$0xff] }
 0x51c   : > { %3447 = vperm.xlu1 %8889, %v11427_v33   ;;  %v3783_v56 = vsel %vm16245_vm0, %v3761_v58, -inf  ;;  %16538 = vst [vmem:[#allocation90_spill] sm:$0xff] %v11481_v45  ;;  %v16543_v58 = vld [vmem:[#allocation23_spill] sm:$0xff]  ;;  %v3543_v11 = vperm.slane %v11044_v37, %v11320_v13  ;;  %v3527_v49 = vperm.slane %v16553_v52, %v11323_v0  ;;  %v3531_v4 = vperm.slane %v16554_v15, %v11313_v62 }
 0x51d   : > { %3784 = vmax.xlane.f32.xlu0 %v3783_v56  ;;  %16540 = vst [vmem:[#allocation9_spill] sm:$0xff] %v11487_v29  ;;  %v11498_v30 = vadd.f32 %v8818_v35, %v16543_v58  ;;  %v8726_v56 = vunpack.i.l.bf16 %v10834_v5  ;;  %v11511_v60 = vadd.f32 %v8858_v26, %v16547_v53  ;;  %v3525_v5 = vperm.slane %v11011_v17, %v11317_v39  ;;  %v16558_v35 = vld [vmem:[#allocation163_spill] sm:$0xff]  ;;  %v16560_v26 = vld [vmem:[#allocation142_spill] sm:$0xff] }
 0x51e   : > { %v11435_v6 = vpop.permute.xlu1 %3321  ;;  %16542 = vst [vmem:[#allocation101_spill] sm:$0xff] %v11491_v47  ;;  %v3553_v17 = vperm.slane %v16552_v27, %v11317_v39  ;;  %v3559_v37 = vperm.slane %v16555_v25, %v11313_v62  ;;  %v3511_v40 = vperm.slane %v16557_v20, %v11313_v62  ;;  %v3546_v58 = vperm.slane %v16558_v35, %v11317_v39  ;;  %v16562_v27 = vld [vmem:[#allocation148_spill] sm:$0xff]  ;;  %v16563_v25 = vld [vmem:[#allocation154_spill] sm:$0xff] }
 0x51f   : > { %16544 = vst [vmem:[#allocation16_spill] sm:$0xff] %v11498_v30  ;;  %v11505_v22 = vadd.f32 %v8726_v56, %v16545_v43  ;;  %v16559_v56 = vld [vmem:[#allocation165_spill] sm:$0xff]  ;;  %v3517_v41 = vperm.slane %v16560_v26, %v11323_v0  ;;  %v3526_v53 = vsel %vm3514_vm1, %v3525_v5, %v3524_v48  ;;  %v3539_v28 = vperm.slane %v16561_v12, %v11317_v39  ;;  %v16564_v20 = vld [vmem:[#allocation160_spill] sm:$0xff]  ;;  %v16565_v48 = vld [vmem:[#allocation166_spill] sm:$0xff] }
 0x520   : > { %16548 = vst [vmem:[#allocation23_spill] sm:$0xff] %v11511_v60  ;;  %v3569_v43 = vperm.slane %v16559_v56, %v11323_v0  ;;  %v3529_v52 = vperm.slane %v16562_v27, %v11320_v13  ;;  %v3515_v15 = vsel %vm3514_vm1, %v3513_v10, %v3511_v40  ;;  %v3545_v54 = vperm.slane %v16563_v25, %v11313_v62  ;;  %v16566_v12 = vld [vmem:[#allocation170_spill] sm:$0xff]  ;;  %v16567_v27 = vld [vmem:[#allocation149_spill] sm:$0xff] }
 0x521   : > { %16546 = vst [vmem:[#allocation106_spill] sm:$0xff] %v11505_v22  ;;  %v3541_v35 = vperm.slane %v16564_v20, %v11323_v0  ;;  %v3528_v56 = vsel %vm3518_vm2, %v3527_v49, %v3526_v53  ;;  %v3533_v26 = vsel %vm3514_vm1, %v3532_v8, %v3531_v4  ;;  %v3552_v5 = vperm.slane %v16565_v48, %v11313_v62  ;;  %v16568_v10 = vld [vmem:[#allocation157_spill] sm:$0xff]  ;;  %v16570_v49 = vld [vmem:[#allocation150_spill] sm:$0xff]  ;;  %v16571_v53 = vld [vmem:[#allocation164_spill] sm:$0xff] }
 0x522   : > { %v3536_v40 = vperm.slane %v16568_v10, %v11320_v13  ;;  %v16569_v25 = vld [vmem:[#allocation161_spill] sm:$0xff]  ;;  %v3547_v20 = vsel %vm3514_vm1, %v3546_v58, %v3545_v54  ;;  %v3521_v8 = vperm.slane %v16570_v49, %v11320_v13  ;;  %v3540_v4 = vsel %vm3514_vm1, %v3539_v28, %v3538_v34  ;;  %v16573_v34 = vld [vmem:[#allocation168_spill] sm:$0xff] }
 0x523   : > { %v3566_v48 = vperm.slane %v16571_v53, %v11313_v62  ;;  %v3530_v10 = vsel %vm3522_vm3, %v3529_v52, %v3528_v56  ;;  %v3549_v58 = vsel %vm3518_vm2, %v3548_v46, %v3547_v20  ;;  %v3554_v54 = vsel %vm3514_vm1, %v3553_v17, %v3552_v5  ;;  %v16576_v17 = vld [vmem:[#allocation125_spill] sm:$0xff] }
 0x524   : > { %3456 = vperm.xlu1 %8889, %v11438_v2   ;;  %v3557_v28 = vperm.slane %v16573_v34, %v11320_v13  ;;  %v8750_v56 = vunpack.i.l.bf16 %v16576_v17  ;;  %v16580_v34 = vld [vmem:[#allocation8_spill] sm:$0xff] }
 0x526   : > { %v11442_v55 = vpop.permute.xlu1 %3330 }
 0x52c   : > { %3465 = vperm.xlu1 %8889, %v11445_v57  }
 0x52e   : > { %v11450_v51 = vpop.permute.xlu1 %3339 }
 0x531   : > { %3324 = vperm.xlu0 %8890, %v11453_v19  }
 0x534   : > { %3474 = vperm.xlu1 %8889, %v11457_v1  }
 0x536   : > { %v11465_v61 = vpop.permute.xlu1 %3348 }
 0x539   : > { %3333 = vperm.xlu0 %8890, %v11463_v9  }
 0x53c   : > { %3483 = vperm.xlu1 %8889, %v11469_v21  }
 0x53e   : > { %v11477_v59 = vpop.permute.xlu1 %3357 }
 0x541   : > { %3342 = vperm.xlu0 %8890, %v11475_v23  }
 0x544   : > { %3492 = vperm.xlu1 %8889, %v11481_v45  }
 0x546   : > { %v11494_v31 = vpop.permute.xlu1 %3366 }
 0x549   : > { %3351 = vperm.xlu0 %8890, %v11487_v29  }
 0x54c   : > { %3501 = vperm.xlu1 %8889, %v11491_v47  }
 0x54e   : > { %v11502_v24 = vpop.permute.xlu1 %3375 }
 0x551   : > { %3360 = vperm.xlu0 %8890, %v11498_v30   ;;  %v3560_v30 = vperm.slane %v16569_v25, %v11317_v39  ;;  %v3542_v25 = vsel %vm3518_vm2, %v3541_v35, %v3540_v4 }
 0x553   : > { %v3561_v46 = vsel %vm3514_vm1, %v3560_v30, %v3559_v37  ;;  %v16577_v30 = vld [vmem:[#allocation167_spill] sm:$0xff] }
 0x554   : > { %v3571_v37 = vperm.slane %v16577_v30, %v11320_v13 }
 0x556   : > { %v11520_v50 = vpop.permute.xlu1 %3384 }
 0x559   : > { %3369 = vperm.xlu0 %8890, %v11505_v22   ;;  %v3534_v22 = vperm.slane %v16567_v27, %v11323_v0  ;;  %v3519_v27 = vsel %vm3518_vm2, %v3517_v41, %v3515_v15  ;;  %v16574_v41 = vld [vmem:[#allocation112_spill] sm:$0xff]  ;;  %v16575_v15 = vld [vmem:[#allocation159_spill] sm:$0xff] }
 0x55a   : > { %v3550_v52 = vperm.slane %v16574_v41, %v11320_v13  ;;  %v3555_v35 = vperm.slane %v16575_v15, %v11323_v0  ;;  %v16581_v41 = vld [vmem:[#allocation72_spill] sm:$0xff] }
 0x55b   : > { %v3535_v29 = vsel %vm3518_vm2, %v3534_v22, %v3533_v26  ;;  %v3523_v26 = vsel %vm3522_vm3, %v3521_v8, %v3519_v27 }
 0x55c   : > { %v3537_v22 = vsel %vm3522_vm3, %v3536_v40, %v3535_v29  ;;  %v3742_v20 = vsel %vm3741_vm4, %v3530_v10, %v3523_v26  ;;  %v3551_v4 = vsel %vm3522_vm3, %v3550_v52, %v3549_v58 }
 0x55d   : > { %v3744_v40 = vsel %vm3743_vm5, %v3537_v22, %v3742_v20  ;;  %v16583_v22 = vld [vmem:[#allocation118_spill] sm:$0xff] }
 0x55e   : > { %v11590_v53 = vpop.permute.xlu1 %3393  ;;  %v8761_v15 = vunpack.i.l.bf16 %v16583_v22 }
 0x561   : > { %3378 = vperm.xlu0 %8890, %v11516_v16   ;;  %v3567_v16 = vperm.slane %v16566_v12, %v11317_v39  ;;  %v16572_v12 = vld [vmem:[#allocation169_spill] sm:$0xff] }
 0x562   : > { %v3562_v47 = vperm.slane %v16572_v12, %v11323_v0 }
 0x563   : > { %v3568_v49 = vsel %vm3514_vm1, %v3567_v16, %v3566_v48  ;;  %v3544_v16 = vsel %vm3522_vm3, %v3543_v11, %v3542_v25  ;;  %v3556_v48 = vsel %vm3518_vm2, %v3555_v35, %v3554_v54 }
 0x564   : > { %v3563_v5 = vsel %vm3518_vm2, %v3562_v47, %v3561_v46  ;;  %v3570_v29 = vsel %vm3518_vm2, %v3569_v43, %v3568_v49  ;;  %v3558_v12 = vsel %vm3522_vm3, %v3557_v28, %v3556_v48  ;;  %v3746_v8 = vsel %vm3745_vm6, %v3544_v16, %v3744_v40  ;;  %v16578_v47 = vld [vmem:[#allocation62_spill] sm:$0xff]  ;;  %v16584_v46 = vld [vmem:[#allocation11_spill] sm:$0xff]  ;;  %v11638_v16 = vpop.permute.xlu2 %3318  ;;  %v16590_v40 = vld [vmem:[#allocation25_spill] sm:$0xff] }
 0x565   : > { %v3565_v11 = vsel %vm3522_vm3, %v3564_v3, %v3563_v5  ;;  %v11614_v27 = vadd.f32 %v8750_v56, %v16578_v47  ;;  %v3572_v10 = vsel %vm3522_vm3, %v3571_v37, %v3570_v29  ;;  %v3748_v25 = vsel %vm3747_vm7, %v3551_v4, %v3746_v8  ;;  %v16586_v56 = vld [vmem:[#allocation61_spill] sm:$0xff]  ;;  %v16587_v5 = vld [vmem:[#allocation18_spill] sm:$0xff]  ;;  %v16592_v8 = vld [vmem:[#allocation7_spill] sm:$0xff] }
 0x566   : > { %v3750_v43 = vsel %vm3749_vm8, %v3558_v12, %v3748_v25  ;;  %v8745_v28 = vunpack.i.h.bf16 %v16580_v34  ;;  %v11623_v49 = vpop.permute.xlu1 %3402  ;;  %v11634_v17 = vadd.f32 %v8761_v15, %v16584_v46  ;;  %v8795_v26 = vunpack.i.l.bf16 %v16586_v56  ;;  %v16589_v48 = vld [vmem:[#allocation130_spill] sm:$0xff]  ;;  %v16593_v47 = vld [vmem:[#allocation35_spill] sm:$0xff] }
 0x567   : > { %16579 = vst [vmem:[#allocation52_spill] sm:$0xff] %v11614_v27  ;;  %v3752_v58 = vsel %vm3751_vm9, %v3565_v11, %v3750_v43  ;;  %v8790_v29 = vunpack.i.h.bf16 %v16589_v48  ;;  %v8806_v11 = vunpack.i.l.bf16 %v16592_v8  ;;  %v16595_v43 = vld [vmem:[#allocation133_spill] sm:$0xff] }
 0x568   : > { %v3754_v54 = vsel %vm3753_vm10, %v3572_v10, %v3752_v58  ;;  %v11627_v52 = vadd.f32 %v8745_v28, %v16581_v41  ;;  %16585 = vst [vmem:[#allocation152_spill] sm:$0xff] %v11634_v17  ;;  %v11641_v20 = vadd.f32 %v8795_v26, %v16587_v5  ;;  %v8802_v58 = vunpack.i.h.bf16 %v16595_v43  ;;  %v16596_v28 = vld [vmem:[#allocation45_spill] sm:$0xff]  ;;  %v16598_v5 = vld [vmem:[#allocation55_spill] sm:$0xff] }
 0x569   : > { %3387 = vperm.xlu0 %8890, %v11511_v60   ;;  %v3780_v3 = vsel %vm16245_vm0, %v3754_v54, -inf  ;;  %v11648_v30 = vadd.f32 %v8790_v29, %v16590_v40  ;;  %v11657_v10 = vadd.f32 %v8806_v11, %v16593_v47  ;;  %v8830_v41 = vunpack.i.h.bf16 %v10969_v7  ;;  %v16600_v29 = vld [vmem:[#allocation127_spill] sm:$0xff]  ;;  %v16601_v43 = vld [vmem:[#allocation65_spill] sm:$0xff] }
 0x56a   : > { %16582 = vst [vmem:[#allocation42_spill] sm:$0xff] %v11627_v52  ;;  %v8846_v40 = vunpack.i.l.bf16 %v16600_v29  ;;  %v8842_v7 = vunpack.i.h.bf16 %v10983_v63 }
 0x56b   : > { %16588 = vst [vmem:[#allocation156_spill] sm:$0xff] %v11641_v20  ;;  %v11679_v48 = vadd.f32 %v8830_v41, %v16598_v5 }
 0x56c   : > { %16591 = vst [vmem:[#allocation153_spill] sm:$0xff] %v11648_v30  ;;  %v11650_v37 = vpop.permute.xlu2 %3327 }
 0x56d   : > { %16594 = vst [vmem:[#allocation155_spill] sm:$0xff] %v11657_v10 }
 0x56e   : > { %v11631_v35 = vpop.permute.xlu1 %3411  ;;  %16599 = vst [vmem:[#allocation162_spill] sm:$0xff] %v11679_v48 }
 0x571   : > { %3396 = vperm.xlu0 %8890, %v11614_v27   ;;  %v16609_v27 = vld [vmem:[#allocation92_spill] sm:$0xff] }
 0x574   : > { %v11660_v25 = vpop.permute.xlu2 %3336 }
 0x576   : > { %3781 = vmax.xlane.f32.xlu1 %v3780_v3  ;;  %v11643_v4 = vpop.permute.xlu1 %3420  ;;  %v11668_v3 = vadd.f32 %v8802_v58, %v16596_v28  ;;  %v11684_v58 = vadd.f32 %v8846_v40, %v16601_v43  ;;  %v16606_v43 = vld [vmem:[#allocation82_spill] sm:$0xff] }
 0x578   : > { %16597 = vst [vmem:[#allocation158_spill] sm:$0xff] %v11668_v3 }
 0x579   : > { %3405 = vperm.xlu0 %8890, %v11627_v52   ;;  %16602 = vst [vmem:[#allocation139_spill] sm:$0xff] %v11684_v58 }
 0x57c   : > { %v11674_v46 = vpop.permute.xlu2 %3345 }
 0x57d   : > { %v3644_v57 = vperm.slane %v11674_v46, %v11317_v39  ;;  %v3641_v46 = vperm.slane %v11450_v51, %v11320_v13  ;;  %v3672_v51 = vperm.slane %v11590_v53, %v11317_v39 }
 0x57e   : > { %v11652_v12 = vpop.permute.xlu1 %3429 }
 0x581   : > { %3414 = vperm.xlu0 %8890, %v11634_v17  }
 0x584   : > { %v3355_v47 = vpop.permute.xlu2 %3354 }
 0x585   : > { %v3650_v33 = vperm.slane %v3355_v47, %v11313_v62 }
 0x586   : > { %v11663_v54 = vpop.permute.xlu1 %3438 }
 0x589   : > { %3423 = vperm.xlu0 %8890, %v11641_v20  }
 0x58c   : > { %v11693_v41 = vpop.permute.xlu2 %3363 }
 0x58e   : > { %v11676_v26 = vpop.permute.xlu1 %3447 }
 0x590   : > { %v11665_v34 = vpop.xlane.xlu0 %3784 }
 0x591   : > { %3432 = vperm.xlu0 %8890, %v11648_v30  }
 0x594   : > { %v3373_v63 = vpop.permute.xlu2 %3372 }
 0x595   : > { %v3660_v47 = vperm.slane %v3373_v63, %v11323_v0 }
 0x596   : > { %v11686_v28 = vpop.permute.xlu1 %3456 }
 0x599   : > { %3441 = vperm.xlu0 %8890, %v11657_v10   ;;  %v16603_v10 = vld [vmem:[#allocation75_spill] sm:$0xff] }
 0x59a   : > { %v11691_v30 = vadd.f32 %v8842_v7, %v16603_v10 }
 0x59c   : > { %16604 = vst [vmem:[#allocation163_spill] sm:$0xff] %v11691_v30  ;;  %v3382_v23 = vpop.permute.xlu2 %3381 }
 0x59e   : > { %v11695_v5 = vpop.permute.xlu1 %3465 }
 0x5a1   : > { %3450 = vperm.xlu0 %8890, %v11668_v3  }
 0x5a3   : > { %v11672_v15 = vpop.permute.xlu0 %3324 }
 0x5a4   : > { %v3391_v9 = vpop.permute.xlu2 %3390 }
 0x5a6   : > { %v11706_v10 = vpop.permute.xlu1 %3474 }
 0x5a9   : > { %3459 = vperm.xlu0 %8890, %v11679_v48   ;;  %v16605_v48 = vld [vmem:[#allocation143_spill] sm:$0xff] }
 0x5aa   : > { %v8869_v20 = vunpack.i.l.bf16 %v16605_v48 }
 0x5ab   : > { %v3334_v11 = vpop.permute.xlu0 %3333 }
 0x5ac   : > { %v11702_v17 = vadd.f32 %v8869_v20, %v16606_v43  ;;  %v16611_v20 = vld [vmem:[#allocation98_spill] sm:$0xff] }
 0x5ae   : > { %16607 = vst [vmem:[#allocation165_spill] sm:$0xff] %v11702_v17  ;;  %v11713_v21 = vpop.permute.xlu1 %3483 }
 0x5b1   : > { %3468 = vperm.xlu0 %8890, %v11684_v58   ;;  %v16608_v58 = vld [vmem:[#allocation136_spill] sm:$0xff] }
 0x5b2   : > { %v8886_v52 = vunpack.i.l.bf16 %v16608_v58 }
 0x5b3   : > { %v3343_v3 = vpop.permute.xlu0 %3342 }
 0x5b4   : > { %v11709_v60 = vadd.f32 %v8886_v52, %v16609_v27  ;;  %v3637_v27 = vperm.slane %v3334_v11, %v11317_v39  ;;  %v3630_v52 = vperm.slane %v11435_v6, %v11317_v39  ;;  %v3643_v6 = vperm.slane %v3343_v3, %v11313_v62 }
 0x5b5   : > { %v3657_v3 = vperm.slane %v11494_v31, %v11313_v62 }
 0x5b6   : > { %16610 = vst [vmem:[#allocation142_spill] sm:$0xff] %v11709_v60  ;;  %v11719_v1 = vpop.permute.xlu1 %3492  ;;  %v3645_v31 = vsel %vm3514_vm1, %v3644_v57, %v3643_v6 }
 0x5b9   : > { %3477 = vperm.xlu0 %8890, %v11691_v30   ;;  %v8882_v30 = vunpack.i.h.bf16 %v11015_v44  ;;  %v3636_v44 = vperm.slane %v11442_v55, %v11313_v62 }
 0x5bb   : > { %v11699_v40 = vpop.permute.xlu0 %3351  ;;  %v11716_v43 = vadd.f32 %v8882_v30, %v16611_v20  ;;  %v3634_v30 = vperm.slane %v11650_v37, %v11320_v13  ;;  %v3639_v20 = vperm.slane %v11660_v25, %v11323_v0  ;;  %v3638_v11 = vsel %vm3514_vm1, %v3637_v27, %v3636_v44 }
 0x5bc   : > { %v3655_v37 = vperm.slane %v11693_v41, %v11320_v13  ;;  %v3651_v25 = vperm.slane %v11477_v59, %v11317_v39  ;;  %v3632_v27 = vperm.slane %v11672_v15, %v11323_v0  ;;  %v3646_v41 = vperm.slane %v11465_v61, %v11323_v0 }
 0x5bd   : > { %16612 = vst [vmem:[#allocation151_spill] sm:$0xff] %v11716_v43  ;;  %v3648_v15 = vperm.slane %v11699_v40, %v11320_v13  ;;  %v3665_v44 = vperm.slane %v3382_v23, %v11317_v39  ;;  %v3671_v61 = vperm.slane %v3391_v9, %v11313_v62  ;;  %v3662_v9 = vperm.slane %v11502_v24, %v11320_v13 }
 0x5be   : > { %v11736_v2 = vpop.permute.xlu1 %3501  ;;  %v3652_v63 = vsel %vm3514_vm1, %v3651_v25, %v3650_v33  ;;  %v3647_v40 = vsel %vm3518_vm2, %v3646_v41, %v3645_v31  ;;  %v3678_v24 = vperm.slane %v11623_v49, %v11313_v62 }
 0x5c1   : > { %3486 = vperm.xlu0 %8890, %v11702_v17  }
 0x5c3   : > { %v3361_v7 = vpop.permute.xlu0 %3360 }
 0x5c9   : > { %3495 = vperm.xlu0 %8890, %v11709_v60   ;;  %v3629_v60 = vperm.slane %v11638_v16, %v11313_v62 }
 0x5cb   : > { %v3370_v45 = vpop.permute.xlu0 %3369  ;;  %v3631_v16 = vsel %vm3514_vm1, %v3630_v52, %v3629_v60  ;;  %v3640_v52 = vsel %vm3518_vm2, %v3639_v20, %v3638_v11 }
 0x5cc   : > { %v3658_v55 = vperm.slane %v3370_v45, %v11317_v39  ;;  %v3653_v45 = vperm.slane %v3361_v7, %v11323_v0  ;;  %v3633_v11 = vsel %vm3518_vm2, %v3632_v27, %v3631_v16  ;;  %v3642_v53 = vsel %vm3522_vm3, %v3641_v46, %v3640_v52 }
 0x5cd   : > { %v3649_v16 = vsel %vm3522_vm3, %v3648_v15, %v3647_v40  ;;  %v16614_v40 = vld [vmem:[#allocation122_spill] sm:$0xff] }
 0x5ce   : > { %v3659_v7 = vsel %vm3514_vm1, %v3658_v55, %v3657_v3  ;;  %v3654_v57 = vsel %vm3518_vm2, %v3653_v45, %v3652_v63  ;;  %v3673_v55 = vsel %vm3514_vm1, %v3672_v51, %v3671_v61  ;;  %v3635_v3 = vsel %vm3522_vm3, %v3634_v30, %v3633_v11 }
 0x5cf   : > { %v3661_v6 = vsel %vm3518_vm2, %v3660_v47, %v3659_v7  ;;  %v3656_v27 = vsel %vm3522_vm3, %v3655_v37, %v3654_v57  ;;  %v3683_v7 = vperm.slane %v11631_v35, %v11320_v13 }
 0x5d1   : > { %3504 = vperm.xlu0 %8890, %v11716_v43   ;;  %v3400_v43 = vpop.permute.xlu2 %3399 }
 0x5d3   : > { %v3379_v17 = vpop.permute.xlu0 %3378 }
 0x5d4   : > { %v3664_v59 = vperm.slane %v3379_v17, %v11313_v62  ;;  %v3676_v17 = vperm.slane %v3400_v43, %v11320_v13  ;;  %v3667_v43 = vperm.slane %v11520_v50, %v11323_v0  ;;  %v3762_v50 = vsel %vm3741_vm4, %v3642_v53, %v3635_v3 }
 0x5d5   : > { %v3763_v52 = vsel %vm3743_vm5, %v3649_v16, %v3762_v50 }
 0x5d6   : > { %v3666_v23 = vsel %vm3514_vm1, %v3665_v44, %v3664_v59  ;;  %v16613_v59 = vld [vmem:[#allocation120_spill] sm:$0xff]  ;;  %v3764_v49 = vsel %vm3745_vm6, %v3656_v27, %v3763_v52  ;;  %v16618_v27 = vld [vmem:[#allocation85_spill] sm:$0xff] }
 0x5d7   : > { %v3668_v47 = vsel %vm3518_vm2, %v3667_v43, %v3666_v23  ;;  %v16616_v43 = vld [vmem:[#allocation124_spill] sm:$0xff] }
 0x5d8   : > { %v16621_v52 = vld [vmem:[#allocation88_spill] sm:$0xff] }
 0x5d9   : > { %v3409_v46 = vpop.permute.xlu2 %3408 }
 0x5da   : > { %v3681_v31 = vperm.slane %v3409_v46, %v11323_v0 }
 0x5db   : > { %v3388_v19 = vpop.permute.xlu0 %3387 }
 0x5dc   : > { %v3669_v33 = vperm.slane %v3388_v19, %v11320_v13 }
 0x5de   : > { %v3670_v30 = vsel %vm3522_vm3, %v3669_v33, %v3668_v47 }
 0x5e3   : > { %v3397_v60 = vpop.permute.xlu0 %3396 }
 0x5e4   : > { %v3674_v20 = vperm.slane %v3397_v60, %v11323_v0  ;;  %v3663_v60 = vsel %vm3522_vm3, %v3662_v9, %v3661_v6 }
 0x5e5   : > { %v3765_v63 = vsel %vm3747_vm7, %v3663_v60, %v3764_v49  ;;  %v16619_v60 = vld [vmem:[#allocation126_spill] sm:$0xff] }
 0x5e6   : > { %v3675_v45 = vsel %vm3518_vm2, %v3674_v20, %v3673_v55  ;;  %v3766_v11 = vsel %vm3749_vm8, %v3670_v30, %v3765_v63  ;;  %v8783_v47 = vunpack.i.l.bf16 %v16619_v60  ;;  %v8807_v60 = vunpack.i.h.bf16 %v16592_v8  ;;  %v16641_v8 = vld [vmem:[#allocation100_spill] sm:$0xff] }
 0x5e7   : > { %v3677_v15 = vsel %vm3522_vm3, %v3676_v17, %v3675_v45 }
 0x5e8   : > { %v3767_v57 = vsel %vm3751_vm9, %v3677_v15, %v3766_v11  ;;  %v16625_v15 = vld [vmem:[#allocation91_spill] sm:$0xff]  ;;  %v8796_v11 = vunpack.i.h.bf16 %v16586_v56 }
 0x5e9   : > { %v11781_v25 = vpop.xlane.xlu1 %3781 }
 0x5ea   : > { %v11787_v19 = vperm.slane %v11781_v25, 0  ;;  %v11815_v23 = vperm.slane %v11781_v25, 1  ;;  %v11823_v16 = vperm.slane %v11781_v25, 2 }
 0x5eb   : > { %v3406_v41 = vpop.permute.xlu0 %3405 }
 0x5ec   : > { %v3679_v37 = vperm.slane %v3406_v41, %v11317_v39  ;;  %v3861_v51 = vsub.f32 %v16613_v59, %v11787_v19  ;;  %v3863_v17 = vsub.f32 %v16614_v40, %v11787_v19  ;;  %v3866_v55 = vsub.f32 %v16616_v43, %v11815_v23  ;;  %v16630_v40 = vld [vmem:[#allocation39_spill] sm:$0xff]  ;;  %v16633_v43 = vld [vmem:[#allocation96_spill] sm:$0xff] }
 0x5ed   : > { %v3869_v45 = vsub.f32 %v16618_v27, %v11823_v16 }
 0x5ee   : > { %v3680_v44 = vsel %vm3514_vm1, %v3679_v37, %v3678_v24  ;;  %v3990_v61 = vmul.f32 1.442695, %v3861_v51  ;;  %v3994_v33 = vmul.f32 1.442695, %v3863_v17  ;;  %v4000_v46 = vmul.f32 1.442695, %v3866_v55 }
 0x5ef   : > { %v3682_v20 = vsel %vm3518_vm2, %v3681_v31, %v3680_v44  ;;  %v11831_v24 = vperm.slane %v11781_v25, 3  ;;  %v4006_v50 = vmul.f32 1.442695, %v3869_v45  ;;  %v16622_v37 = vld [vmem:[#allocation22_spill] sm:$0xff]  ;;  %v8762_v31 = vunpack.i.h.bf16 %v16583_v22  ;;  %v16626_v44 = vld [vmem:[#allocation29_spill] sm:$0xff] }
 0x5f0   : > { %v3684_v53 = vsel %vm3522_vm3, %v3683_v7, %v3682_v20  ;;  %9156 = vpow2.f32 %v3990_v61  ;;  %v11840_v59 = vadd.f32 %v8783_v47, %v16622_v37  ;;  %v11854_v61 = vperm.slane %v11781_v25, 4  ;;  %v16637_v47 = vld [vmem:[#allocation97_spill] sm:$0xff] }
 0x5f1   : > { %v3768_v6 = vsel %vm3753_vm10, %v3684_v53, %v3767_v57  ;;  %9158 = vpow2.f32 %v3994_v33  ;;  %v3872_v30 = vsub.f32 %v16621_v52, %v11831_v24  ;;  %v3875_v7 = vsub.f32 %v16625_v15, %v11831_v24  ;;  %v16629_v53 = vld [vmem:[#allocation93_spill] sm:$0xff] }
 0x5f2   : > { %v3786_v35 = vsel %vm16245_vm0, %v3768_v6, -inf  ;;  %9160 = vpow2.f32 %v4000_v46  ;;  %16623 = vst [vmem:[#allocation166_spill] sm:$0xff] %v11840_v59  ;;  %v11850_v63 = vadd.f32 %v8762_v31, %v16626_v44  ;;  %v3878_v57 = vsub.f32 %v16629_v53, %v11854_v61  ;;  %v16634_v46 = vld [vmem:[#allocation49_spill] sm:$0xff] }
 0x5f3   : > { %3787 = vmax.xlane.f32.xlu2 %v3786_v35  ;;  %9162 = vpow2.f32 %v4006_v50  ;;  %v4012_v51 = vmul.f32 1.442695, %v3872_v30  ;;  %v4018_v20 = vmul.f32 1.442695, %v3875_v7  ;;  %v11863_v17 = vadd.f32 %v8796_v11, %v16630_v40  ;;  %v16638_v30 = vld [vmem:[#allocation59_spill] sm:$0xff]  ;;  %v16642_v44 = vld [vmem:[#allocation69_spill] sm:$0xff] }
 0x5f4   : > { %16627 = vst [vmem:[#allocation149_spill] sm:$0xff] %v11850_v63  ;;  %v11867_v6 = vperm.slane %v11781_v25, 5  ;;  %v4024_v35 = vmul.f32 1.442695, %v3878_v57  ;;  %v8823_v33 = vunpack.i.l.bf16 %v10914_v18  ;;  %v11880_v45 = vperm.slane %v11781_v25, 6  ;;  %v16645_v40 = vld [vmem:[#allocation102_spill] sm:$0xff] }
 0x5f5   : > { %9164 = vpow2.f32 %v4012_v51  ;;  %16631 = vst [vmem:[#allocation161_spill] sm:$0xff] %v11863_v17  ;;  %v11889_v37 = vadd.f32 %v8807_v60, %v16638_v30  ;;  %v8835_v31 = vunpack.i.l.bf16 %v10930_v14  ;;  %v11903_v11 = vperm.slane %v11781_v25, 7 }
 0x5f6   : > { %v11817_v9 = vpop.eup %9156  ;;  %9166 = vpow2.f32 %v4018_v20  ;;  %v3881_v55 = vsub.f32 %v16633_v43, %v11867_v6  ;;  %v11876_v27 = vadd.f32 %v8823_v33, %v16634_v46  ;;  %v3884_v52 = vsub.f32 %v16637_v47, %v11880_v45  ;;  %v16646_v33 = vld [vmem:[#allocation79_spill] sm:$0xff] }
 0x5f7   : > { %16615 = vst [vmem:[#allocation148_spill] sm:$0xff] %v11817_v9  ;;  %4376 = vperm.xlu0 %8890, %v11817_v9   ;;  %v11825_v3 = vpop.eup %9158  ;;  %9168 = vpow2.f32 %v4024_v35  ;;  %v3887_v7 = vsub.f32 %v16641_v8, %v11880_v45  ;;  %v11899_v20 = vadd.f32 %v8835_v31, %v16642_v44  ;;  %v8863_v57 = vunpack.i.l.bf16 %v10944_v36  ;;  %v16650_v47 = vld [vmem:[#allocation87_spill] sm:$0xff]  ;;  %v16653_v8 = vld [vmem:[#allocation105_spill] sm:$0xff] }
 0x5f8   : > { %16617 = vst [vmem:[#allocation154_spill] sm:$0xff] %v11825_v3  ;;  %v11834_v41 = vpop.eup %9160  ;;  %v4030_v50 = vmul.f32 1.442695, %v3881_v55  ;;  %v4036_v51 = vmul.f32 1.442695, %v3884_v52  ;;  %v3890_v35 = vsub.f32 %v16645_v40, %v11903_v11  ;;  %v11916_v55 = vperm.slane %v11665_v34, 0 }
 0x5f9   : > { %16620 = vst [vmem:[#allocation160_spill] sm:$0xff] %v11834_v41  ;;  %v11844_v49 = vpop.eup %9162  ;;  %v4042_v53 = vmul.f32 1.442695, %v3887_v7  ;;  %v11912_v43 = vadd.f32 %v8863_v57, %v16646_v33  ;;  %v8847_v46 = vunpack.i.h.bf16 %v16600_v29  ;;  %v11929_v30 = vperm.slane %v11665_v34, 1  ;;  %v16654_v44 = vld [vmem:[#allocation99_spill] sm:$0xff] }
 0x5fa   : > { %16624 = vst [vmem:[#allocation170_spill] sm:$0xff] %v11844_v49  ;;  %9170 = vpow2.f32 %v4030_v50  ;;  %v4048_v25 = vmul.f32 1.442695, %v3890_v35  ;;  %v16649_v50 = vld [vmem:[#allocation103_spill] sm:$0xff]  ;;  %v8875_v31 = vunpack.i.l.bf16 %v10960_v38  ;;  %v8870_v40 = vunpack.i.h.bf16 %v16605_v48 }
 0x5fb   : > { %v11857_v22 = vpop.eup %9164  ;;  %16635 = vst [vmem:[#allocation164_spill] sm:$0xff] %v11876_v27  ;;  %9172 = vpow2.f32 %v4036_v51  ;;  %v3893_v60 = vsub.f32 %v16649_v50, %v11916_v55  ;;  %v11925_v52 = vadd.f32 %v8847_v46, %v16650_v47  ;;  %v3896_v7 = vsub.f32 %v16653_v8, %v11929_v30  ;;  %v16657_v38 = vld [vmem:[#allocation107_spill] sm:$0xff]  ;;  %v11959_v8 = vpop.permute.xlu0 %3414 }
 0x5fc   : > { %16628 = vst [vmem:[#allocation157_spill] sm:$0xff] %v11857_v22  ;;  %v11870_v56 = vpop.eup %9166  ;;  %9174 = vpow2.f32 %v4042_v53  ;;  %v11938_v53 = vadd.f32 %v8875_v31, %v16654_v44  ;;  %v3899_v33 = vsub.f32 %v16657_v38, %v11929_v30  ;;  %v11952_v50 = vperm.slane %v11665_v34, 2  ;;  %v16660_v47 = vld [vmem:[#allocation119_spill] sm:$0xff]  ;;  %v16662_v44 = vld [vmem:[#allocation108_spill] sm:$0xff] }
 0x5fd   : > { %16632 = vst [vmem:[#allocation150_spill] sm:$0xff] %v11870_v56  ;;  %v11883_v18 = vpop.eup %9168  ;;  %9176 = vpow2.f32 %v4048_v25  ;;  %v4054_v51 = vmul.f32 1.442695, %v3893_v60  ;;  %v4060_v57 = vmul.f32 1.442695, %v3896_v7  ;;  %v16658_v25 = vld [vmem:[#allocation104_spill] sm:$0xff]  ;;  %v3860_v48 = vsub.f32 %v16660_v47, %v11787_v19 }
 0x5fe   : > { %16636 = vst [vmem:[#allocation169_spill] sm:$0xff] %v11883_v18  ;;  %v11948_v46 = vadd.f32 %v8870_v40, %v16658_v25  ;;  %v4066_v60 = vmul.f32 1.442695, %v3899_v33  ;;  %v16663_v40 = vld [vmem:[#allocation109_spill] sm:$0xff]  ;;  %v11969_v33 = vperm.slane %v11665_v34, 3  ;;  %v16665_v25 = vld [vmem:[#allocation83_spill] sm:$0xff] }
 0x5ff   : > { %4382 = vperm.xlu0 %8890, %v11825_v3   ;;  %16639 = vst [vmem:[#allocation168_spill] sm:$0xff] %v11889_v37  ;;  %9178 = vpow2.f32 %v4054_v51  ;;  %v8887_v51 = vunpack.i.h.bf16 %v16608_v58  ;;  %v3988_v7 = vmul.f32 1.442695, %v3860_v48  ;;  %v3864_v47 = vsub.f32 %v16665_v25, %v11815_v23  ;;  %v16667_v48 = vld [vmem:[#allocation110_spill] sm:$0xff]  ;;  %v16669_v25 = vld [vmem:[#allocation31_spill] sm:$0xff] }
 0x600   : > { %v11893_v15 = vpop.eup %9170  ;;  %16643 = vst [vmem:[#allocation159_spill] sm:$0xff] %v11899_v20  ;;  %9180 = vpow2.f32 %v4060_v57  ;;  %v3902_v57 = vsub.f32 %v16662_v44, %v11952_v50 }
 0x601   : > { %16640 = vst [vmem:[#allocation112_spill] sm:$0xff] %v11893_v15  ;;  %v11906_v14 = vpop.eup %9172  ;;  %9182 = vpow2.f32 %v4066_v60  ;;  %v11965_v38 = vadd.f32 %v8887_v51, %v16663_v40  ;;  %v3996_v60 = vmul.f32 1.442695, %v3864_v47  ;;  %v3905_v51 = vsub.f32 %v16667_v48, %v11969_v33  ;;  %v16671_v48 = vld [vmem:[#allocation111_spill] sm:$0xff] }
 0x602   : > { %16644 = vst [vmem:[#allocation125_spill] sm:$0xff] %v11906_v14  ;;  %v11919_v36 = vpop.eup %9174  ;;  %9184 = vpow2.f32 %v3988_v7  ;;  %v4072_v58 = vmul.f32 1.442695, %v3902_v57  ;;  %v11984_v7 = vperm.slane %v11665_v34, 4 }
 0x603   : > { %16647 = vst [vmem:[#allocation167_spill] sm:$0xff] %v11912_v43  ;;  %v11932_v29 = vpop.eup %9176  ;;  %v11978_v44 = vpop.permute.xlu0 %3423  ;;  %v4078_v57 = vmul.f32 1.442695, %v3905_v51  ;;  %v16673_v51 = vld [vmem:[#allocation41_spill] sm:$0xff] }
 0x604   : > { %16648 = vst [vmem:[#allocation62_spill] sm:$0xff] %v11919_v36  ;;  %9186 = vpow2.f32 %v4072_v58 }
 0x605   : > { %16651 = vst [vmem:[#allocation8_spill] sm:$0xff] %v11925_v52  ;;  %v11942_v35 = vpop.eup %9178  ;;  %9188 = vpow2.f32 %v3996_v60 }
 0x606   : > { %16652 = vst [vmem:[#allocation72_spill] sm:$0xff] %v11932_v29  ;;  %v11957_v31 = vpop.eup %9180  ;;  %9190 = vpow2.f32 %v4078_v57  ;;  %v16675_v57 = vld [vmem:[#allocation113_spill] sm:$0xff] }
 0x607   : > { %4391 = vperm.xlu0 %8890, %v11834_v41   ;;  %16655 = vst [vmem:[#allocation118_spill] sm:$0xff] %v11938_v53 }
 0x608   : > { %16656 = vst [vmem:[#allocation11_spill] sm:$0xff] %v11942_v35 }
 0x609   : > { %16659 = vst [vmem:[#allocation61_spill] sm:$0xff] %v11948_v46 }
 0x60a   : > { %16661 = vst [vmem:[#allocation18_spill] sm:$0xff] %v11957_v31 }
 0x60b   : > { %3417 = vperm.xlu2 %8888, %v11840_v59   ;;  %16664 = vst [vmem:[#allocation130_spill] sm:$0xff] %v11965_v38 }
 0x60f   : > { %4400 = vperm.xlu0 %8890, %v11844_v49  }
 0x613   : > { %3426 = vperm.xlu2 %8888, %v11850_v63   ;;  %v16703_v63 = vld [vmem:[#allocation146_spill] sm:$0xff] }
 0x617   : > { %4409 = vperm.xlu0 %8890, %v11857_v22  }
 0x61b   : > { %3435 = vperm.xlu2 %8888, %v11863_v17  }
 0x61f   : > { %4418 = vperm.xlu0 %8890, %v11870_v56  }
 0x623   : > { %3444 = vperm.xlu2 %8888, %v11876_v27   ;;  %v16701_v27 = vld [vmem:[#allocation140_spill] sm:$0xff] }
 0x624   : > { %v3894_v17 = vsub.f32 %v16701_v27, %v11916_v55  ;;  %v3704_v27 = vperm.slane %v11676_v26, %v11320_v13  ;;  %v3714_v26 = vperm.slane %v11695_v5, %v11317_v39 }
 0x627   : > { %4427 = vperm.xlu0 %8890, %v11883_v18  }
 0x62b   : > { %3453 = vperm.xlu2 %8888, %v11889_v37  }
 0x62f   : > { %4436 = vperm.xlu0 %8890, %v11893_v15  }
 0x633   : > { %3462 = vperm.xlu2 %8888, %v11899_v20  }
 0x637   : > { %4445 = vperm.xlu0 %8890, %v11906_v14   ;;  %v11997_v14 = vpop.permute.xlu0 %3432 }
 0x63b   : > { %3471 = vperm.xlu2 %8888, %v11912_v43  }
 0x63f   : > { %4454 = vperm.xlu0 %8890, %v11919_v36   ;;  %v12017_v22 = vpop.permute.xlu0 %3441 }
 0x643   : > { %3480 = vperm.xlu2 %8888, %v11925_v52  }
 0x647   : > { %4463 = vperm.xlu0 %8890, %v11932_v29   ;;  %v3908_v29 = vsub.f32 %v16671_v48, %v11984_v7  ;;  %v3911_v48 = vsub.f32 %v16675_v57, %v11984_v7  ;;  %v16679_v57 = vld [vmem:[#allocation114_spill] sm:$0xff] }
 0x649   : > { %v4084_v60 = vmul.f32 1.442695, %v3908_v29  ;;  %v12013_v29 = vperm.slane %v11665_v34, 5 }
 0x64b   : > { %3489 = vperm.xlu2 %8888, %v11938_v53   ;;  %v3914_v49 = vsub.f32 %v16679_v57, %v12013_v29  ;;  %v16683_v57 = vld [vmem:[#allocation115_spill] sm:$0xff] }
 0x64f   : > { %4472 = vperm.xlu0 %8890, %v11942_v35   ;;  %v11973_v35 = vpop.eup %9182 }
 0x650   : > { %16666 = vst [vmem:[#allocation25_spill] sm:$0xff] %v11973_v35  ;;  %v11980_v40 = vpop.eup %9184 }
 0x651   : > { %16668 = vst [vmem:[#allocation7_spill] sm:$0xff] %v11980_v40 }
 0x653   : > { %3498 = vperm.xlu2 %8888, %v11948_v46  }
 0x657   : > { %4481 = vperm.xlu0 %8890, %v11957_v31   ;;  %v3867_v31 = vsub.f32 %v16669_v25, %v11815_v23  ;;  %v3870_v25 = vsub.f32 %v16673_v51, %v11823_v16  ;;  %v16677_v51 = vld [vmem:[#allocation51_spill] sm:$0xff] }
 0x658   : > { %v3873_v56 = vsub.f32 %v16677_v51, %v11831_v24  ;;  %v16681_v51 = vld [vmem:[#allocation53_spill] sm:$0xff] }
 0x659   : > { %v4002_v47 = vmul.f32 1.442695, %v3867_v31  ;;  %v4008_v31 = vmul.f32 1.442695, %v3870_v25 }
 0x65a   : > { %v4014_v25 = vmul.f32 1.442695, %v3873_v56  ;;  %v12038_v56 = vpop.permute.xlu0 %3450 }
 0x65b   : > { %3507 = vperm.xlu2 %8888, %v11965_v38   ;;  %9192 = vpow2.f32 %v4002_v47  ;;  %v4090_v47 = vmul.f32 1.442695, %v3911_v48  ;;  %v4096_v48 = vmul.f32 1.442695, %v3914_v49  ;;  %v12047_v49 = vperm.slane %v11665_v34, 7 }
 0x65c   : > { %9194 = vpow2.f32 %v4084_v60 }
 0x65d   : > { %9196 = vpow2.f32 %v4008_v31  ;;  %v12030_v31 = vperm.slane %v11665_v34, 6 }
 0x65e   : > { %9198 = vpow2.f32 %v4090_v47 }
 0x65f   : > { %4490 = vperm.xlu0 %8890, %v11973_v35   ;;  %v11988_v35 = vpop.eup %9186  ;;  %9200 = vpow2.f32 %v4014_v25 }
 0x660   : > { %16670 = vst [vmem:[#allocation35_spill] sm:$0xff] %v11988_v35  ;;  %v11995_v36 = vpop.eup %9188  ;;  %9202 = vpow2.f32 %v4096_v48  ;;  %v16687_v48 = vld [vmem:[#allocation116_spill] sm:$0xff] }
 0x661   : > { %16672 = vst [vmem:[#allocation133_spill] sm:$0xff] %v11995_v36  ;;  %v12002_v15 = vpop.eup %9190 }
 0x662   : > { %16674 = vst [vmem:[#allocation45_spill] sm:$0xff] %v12002_v15 }
 0x663   : > { %4373 = vperm.xlu2 %8888, %v11980_v40  }
 0x666   : > { %v11990_v58 = vpop.xlane.xlu2 %3787 }
 0x667   : > { %4499 = vperm.xlu0 %8890, %v11988_v35   ;;  %v12009_v35 = vpop.eup %9192 }
 0x668   : > { %16676 = vst [vmem:[#allocation55_spill] sm:$0xff] %v12009_v35 }
 0x66b   : > { %4385 = vperm.xlu2 %8888, %v11995_v36  }
 0x66e   : > { %v12004_v18 = vpop.permute.xlu2 %3417 }
 0x66f   : > { %4508 = vperm.xlu0 %8890, %v12002_v15   ;;  %v12019_v15 = vpop.eup %9194 }
 0x670   : > { %16678 = vst [vmem:[#allocation127_spill] sm:$0xff] %v12019_v15  ;;  %v12026_v41 = vpop.eup %9196 }
 0x671   : > { %16680 = vst [vmem:[#allocation65_spill] sm:$0xff] %v12026_v41  ;;  %v12034_v36 = vpop.eup %9198 }
 0x672   : > { %16682 = vst [vmem:[#allocation75_spill] sm:$0xff] %v12034_v36  ;;  %v12043_v9 = vpop.eup %9200 }
 0x673   : > { %4394 = vperm.xlu2 %8888, %v12009_v35   ;;  %v3876_v35 = vsub.f32 %v16681_v51, %v11854_v61  ;;  %16684 = vst [vmem:[#allocation143_spill] sm:$0xff] %v12043_v9  ;;  %v16685_v51 = vld [vmem:[#allocation71_spill] sm:$0xff]  ;;  %v12051_v46 = vpop.eup %9202 }
 0x674   : > { %v3879_v38 = vsub.f32 %v16685_v51, %v11854_v61  ;;  %16686 = vst [vmem:[#allocation82_spill] sm:$0xff] %v12051_v46 }
 0x675   : > { %v4020_v47 = vmul.f32 1.442695, %v3876_v35 }
 0x676   : > { %v12021_v60 = vpop.permute.xlu2 %3426  ;;  %v4026_v35 = vmul.f32 1.442695, %v3879_v38 }
 0x677   : > { %4517 = vperm.xlu0 %8890, %v12019_v15   ;;  %9204 = vpow2.f32 %v4020_v47  ;;  %v16689_v47 = vld [vmem:[#allocation128_spill] sm:$0xff] }
 0x678   : > { %v3882_v51 = vsub.f32 %v16689_v47, %v11867_v6 }
 0x67a   : > { %v4032_v38 = vmul.f32 1.442695, %v3882_v51 }
 0x67b   : > { %4403 = vperm.xlu2 %8888, %v12026_v41   ;;  %v3917_v41 = vsub.f32 %v16683_v57, %v12030_v31  ;;  %v3920_v57 = vsub.f32 %v16687_v48, %v12047_v49 }
 0x67d   : > { %v4102_v25 = vmul.f32 1.442695, %v3917_v41  ;;  %v12060_v34 = vpop.eup %9204  ;;  %v4108_v41 = vmul.f32 1.442695, %v3920_v57  ;;  %v16693_v57 = vld [vmem:[#allocation131_spill] sm:$0xff] }
 0x67e   : > { %v12036_v15 = vpop.permute.xlu2 %3435  ;;  %16688 = vst [vmem:[#allocation136_spill] sm:$0xff] %v12060_v34  ;;  %v3885_v47 = vsub.f32 %v16693_v57, %v11880_v45 }
 0x67f   : > { %4526 = vperm.xlu0 %8890, %v12034_v36   ;;  %9206 = vpow2.f32 %v4102_v25  ;;  %v16691_v25 = vld [vmem:[#allocation117_spill] sm:$0xff] }
 0x680   : > { %9208 = vpow2.f32 %v4026_v35  ;;  %v3923_v48 = vsub.f32 %v16691_v25, %v12047_v49  ;;  %v16696_v25 = vld [vmem:[#allocation134_spill] sm:$0xff] }
 0x681   : > { %9210 = vpow2.f32 %v4108_v41  ;;  %v4038_v41 = vmul.f32 1.442695, %v3885_v47 }
 0x682   : > { %9212 = vpow2.f32 %v4032_v38  ;;  %v4114_v35 = vmul.f32 1.442695, %v3923_v48  ;;  %v3888_v38 = vsub.f32 %v16696_v25, %v11903_v11 }
 0x683   : > { %4412 = vperm.xlu2 %8888, %v12043_v9   ;;  %v12058_v9 = vpop.permute.xlu0 %3459 }
 0x684   : > { %9214 = vpow2.f32 %v4114_v35  ;;  %v16699_v35 = vld [vmem:[#allocation137_spill] sm:$0xff] }
 0x685   : > { %v12065_v53 = vpop.eup %9206  ;;  %9216 = vpow2.f32 %v4038_v41  ;;  %v3891_v47 = vsub.f32 %v16699_v35, %v11903_v11  ;;  %v3693_v35 = vperm.slane %v11652_v12, %v11317_v39 }
 0x686   : > { %v12053_v36 = vpop.permute.xlu2 %3444  ;;  %16690 = vst [vmem:[#allocation92_spill] sm:$0xff] %v12065_v53 }
 0x687   : > { %4535 = vperm.xlu0 %8890, %v12051_v46   ;;  %v12072_v46 = vpop.eup %9208  ;;  %v4050_v25 = vmul.f32 1.442695, %v3891_v47  ;;  %v3699_v47 = vperm.slane %v11663_v54, %v11313_v62  ;;  %v3702_v54 = vperm.slane %v12053_v36, %v11323_v0  ;;  %v3697_v36 = vperm.slane %v12036_v15, %v11320_v13 }
 0x688   : > { %16692 = vst [vmem:[#allocation98_spill] sm:$0xff] %v12072_v46 }
 0x68b   : > { %4421 = vperm.xlu2 %8888, %v12060_v34   ;;  %v12074_v43 = vpop.permute.xlu0 %3468  ;;  %v12079_v34 = vpop.eup %9210 }
 0x68c   : > { %16694 = vst [vmem:[#allocation120_spill] sm:$0xff] %v12079_v34  ;;  %v12084_v51 = vpop.eup %9212 }
 0x68d   : > { %16695 = vst [vmem:[#allocation122_spill] sm:$0xff] %v12084_v51 }
 0x68e   : > { %v12067_v52 = vpop.permute.xlu2 %3453 }
 0x68f   : > { %4544 = vperm.xlu0 %8890, %v12065_v53   ;;  %v12091_v53 = vpop.eup %9214 }
 0x690   : > { %16697 = vst [vmem:[#allocation124_spill] sm:$0xff] %v12091_v53 }
 0x693   : > { %4430 = vperm.xlu2 %8888, %v12072_v46   ;;  %v12089_v48 = vpop.permute.xlu0 %3477  ;;  %v4044_v46 = vmul.f32 1.442695, %v3888_v38  ;;  %v16702_v38 = vld [vmem:[#allocation144_spill] sm:$0xff] }
 0x695   : > { %9218 = vpow2.f32 %v4044_v46  ;;  %v3688_v46 = vperm.slane %v11643_v4, %v11323_v0  ;;  %v3707_v4 = vperm.slane %v12067_v52, %v11317_v39  ;;  %v3730_v52 = vperm.slane %v11719_v1, %v11323_v0 }
 0x696   : > { %v12081_v20 = vpop.permute.xlu2 %3462  ;;  %9220 = vpow2.f32 %v4050_v25  ;;  %v3686_v25 = vperm.slane %v12004_v18, %v11317_v39  ;;  %v3685_v18 = vperm.slane %v11959_v8, %v11313_v62  ;;  %v3695_v1 = vperm.slane %v11997_v14, %v11323_v0 }
 0x697   : > { %4553 = vperm.xlu0 %8890, %v12079_v34   ;;  %v12096_v34 = vpop.eup %9216  ;;  %v3711_v14 = vperm.slane %v12058_v9, %v11320_v13  ;;  %v3716_v9 = vperm.slane %v12074_v43, %v11323_v0 }
 0x698   : > { %16698 = vst [vmem:[#allocation85_spill] sm:$0xff] %v12096_v34  ;;  %v3687_v5 = vsel %vm3514_vm1, %v3686_v25, %v3685_v18  ;;  %v3690_v25 = vperm.slane %v11978_v44, %v11320_v13 }
 0x69b   : > { %4439 = vperm.xlu2 %8888, %v12084_v51   ;;  %v3487_v51 = vpop.permute.xlu0 %3486  ;;  %v12101_v37 = vpop.eup %9218 }
 0x69c   : > { %16700 = vst [vmem:[#allocation126_spill] sm:$0xff] %v12101_v37  ;;  %v12126_v40 = vpop.eup %9220 }
 0x69d   : > { %16704 = vst [vmem:[#allocation88_spill] sm:$0xff] %v12126_v40 }
 0x69e   : > { %v12093_v57 = vpop.permute.xlu2 %3471 }
 0x69f   : > { %4562 = vperm.xlu0 %8890, %v12091_v53   ;;  %v3897_v53 = vsub.f32 %v16702_v38, %v11929_v30  ;;  %v3692_v38 = vperm.slane %v12021_v60, %v11313_v62  ;;  %v3700_v60 = vperm.slane %v12017_v22, %v11317_v39  ;;  %v3713_v22 = vperm.slane %v12081_v20, %v11313_v62 }
 0x6a0   : > { %v3727_v20 = vperm.slane %v3487_v51, %v11313_v62  ;;  %v3718_v51 = vperm.slane %v12093_v57, %v11320_v13 }
 0x6a1   : > { %v4062_v12 = vmul.f32 1.442695, %v3897_v53  ;;  %v3706_v53 = vperm.slane %v12038_v56, %v11313_v62  ;;  %v3694_v8 = vsel %vm3514_vm1, %v3693_v35, %v3692_v38  ;;  %v3721_v56 = vperm.slane %v12089_v48, %v11317_v39 }
 0x6a2   : > { %v3701_v35 = vsel %vm3514_vm1, %v3700_v60, %v3699_v47  ;;  %v3689_v48 = vsel %vm3518_vm2, %v3688_v46, %v3687_v5  ;;  %v3696_v18 = vsel %vm3518_vm2, %v3695_v1, %v3694_v8  ;;  %v3715_v47 = vsel %vm3514_vm1, %v3714_v26, %v3713_v22 }
 0x6a3   : > { %4448 = vperm.xlu2 %8888, %v12096_v34   ;;  %v4056_v34 = vmul.f32 1.442695, %v3894_v17  ;;  %v3709_v17 = vperm.slane %v11686_v28, %v11323_v0  ;;  %v3720_v28 = vperm.slane %v11706_v10, %v11313_v62  ;;  %v3703_v15 = vsel %vm3518_vm2, %v3702_v54, %v3701_v35 }
 0x6a4   : > { %v3698_v60 = vsel %vm3522_vm3, %v3697_v36, %v3696_v18  ;;  %v3705_v26 = vsel %vm3522_vm3, %v3704_v27, %v3703_v15  ;;  %v3691_v8 = vsel %vm3522_vm3, %v3690_v25, %v3689_v48 }
 0x6a5   : > { %9222 = vpow2.f32 %v4056_v34  ;;  %v3708_v34 = vsel %vm3514_vm1, %v3707_v4, %v3706_v53  ;;  %v3722_v46 = vsel %vm3514_vm1, %v3721_v56, %v3720_v28  ;;  %v3725_v53 = vperm.slane %v11713_v21, %v11320_v13 }
 0x6a6   : > { %v3481_v41 = vpop.permute.xlu2 %3480  ;;  %v3710_v44 = vsel %vm3518_vm2, %v3709_v17, %v3708_v34  ;;  %v3735_v17 = vperm.slane %v11736_v2, %v11317_v39  ;;  %v3717_v28 = vsel %vm3518_vm2, %v3716_v9, %v3715_v47  ;;  %9224 = vpow2.f32 %v4062_v12  ;;  %v16708_v47 = vld [vmem:[#allocation15_spill] sm:$0xff]  ;;  %v16710_v9 = vld [vmem:[#allocation24_spill] sm:$0xff] }
 0x6a7   : > { %v3712_v43 = vsel %vm3522_vm3, %v3711_v14, %v3710_v44  ;;  %v3719_v2 = vsel %vm3522_vm3, %v3718_v51, %v3717_v28  ;;  %v3903_v51 = vsub.f32 %v16708_v47, %v11952_v50 }
 0x6ab   : > { %4457 = vperm.xlu2 %8888, %v12101_v37   ;;  %v3496_v37 = vpop.permute.xlu0 %3495  ;;  %v12165_v4 = vpop.eup %9222 }
 0x6ac   : > { %16705 = vst [vmem:[#allocation22_spill] sm:$0xff] %v12165_v4  ;;  %v3732_v21 = vperm.slane %v3496_v37, %v11320_v13  ;;  %v12206_v18 = vpop.eup %9224 }
 0x6ad   : > { %16707 = vst [vmem:[#allocation91_spill] sm:$0xff] %v12206_v18 }
 0x6ae   : > { %v3490_v3 = vpop.permute.xlu2 %3489 }
 0x6af   : > { %v3728_v10 = vperm.slane %v3490_v3, %v11317_v39  ;;  %v3723_v3 = vperm.slane %v3481_v41, %v11323_v0 }
 0x6b1   : > { %v3729_v41 = vsel %vm3514_vm1, %v3728_v10, %v3727_v20  ;;  %v3724_v57 = vsel %vm3518_vm2, %v3723_v3, %v3722_v46  ;;  %v3769_v10 = vsel %vm3741_vm4, %v3698_v60, %v3691_v8  ;;  %v16706_v3 = vsub.f32 %v16703_v63, %v11952_v50  ;;  %v16711_v60 = vld [vmem:[#allocation121_spill] sm:$0xff]  ;;  %v16714_v8 = vld [vmem:[#allocation123_spill] sm:$0xff] }
 0x6b2   : > { %v3731_v22 = vsel %vm3518_vm2, %v3730_v52, %v3729_v41  ;;  %v3770_v27 = vsel %vm3743_vm5, %v3705_v26, %v3769_v10  ;;  %v3726_v1 = vsel %vm3522_vm3, %v3725_v53, %v3724_v57  ;;  %v4074_v41 = vmul.f32 1.442695, %v3903_v51  ;;  %v16713_v57 = vld [vmem:[#allocation34_spill] sm:$0xff]  ;;  %v16717_v10 = vld [vmem:[#allocation44_spill] sm:$0xff] }
 0x6b3   : > { %4466 = vperm.xlu2 %8888, %v12126_v40   ;;  %v3505_v5 = vpop.permute.xlu0 %3504  ;;  %v3771_v34 = vsel %vm3745_vm6, %v3712_v43, %v3770_v27  ;;  %v3733_v25 = vsel %vm3522_vm3, %v3732_v21, %v3731_v22  ;;  %v3906_v46 = vsub.f32 %v16710_v9, %v11969_v33  ;;  %v3865_v43 = vsub.f32 %v16714_v8, %v11815_v23  ;;  %v16718_v27 = vld [vmem:[#allocation33_spill] sm:$0xff]  ;;  %v16729_v9 = vld [vmem:[#allocation74_spill] sm:$0xff]  ;;  %v16733_v8 = vld [vmem:[#allocation84_spill] sm:$0xff] }
 0x6b4   : > { %v3737_v36 = vperm.slane %v3505_v5, %v11323_v0  ;;  %v3772_v37 = vsel %vm3747_vm7, %v3719_v2, %v3771_v34  ;;  %v3909_v5 = vsub.f32 %v16713_v57, %v11984_v7  ;;  %v3912_v2 = vsub.f32 %v16717_v10, %v12013_v29 }
 0x6b5   : > { %v3773_v12 = vsel %vm3749_vm8, %v3726_v1, %v3772_v37  ;;  %v4080_v53 = vmul.f32 1.442695, %v3906_v46  ;;  %v3998_v21 = vmul.f32 1.442695, %v3865_v43  ;;  %v3868_v1 = vsub.f32 %v16718_v27, %v11823_v16  ;;  %v16722_v37 = vld [vmem:[#allocation43_spill] sm:$0xff] }
 0x6b6   : > { %v3499_v38 = vpop.permute.xlu2 %3498  ;;  %v3774_v48 = vsel %vm3751_vm9, %v3733_v25, %v3773_v12  ;;  %v4086_v28 = vmul.f32 1.442695, %v3909_v5  ;;  %v3921_v46 = vsub.f32 %v16729_v9, %v12047_v49 }
 0x6b7   : > { %v3734_v54 = vperm.slane %v3499_v38, %v11313_v62  ;;  %v4068_v38 = vmul.f32 1.442695, %v16706_v3 }
 0x6b9   : > { %v3736_v56 = vsel %vm3514_vm1, %v3735_v17, %v3734_v54  ;;  %9226 = vpow2.f32 %v4068_v38  ;;  %v3862_v54 = vsub.f32 %v16711_v60, %v11787_v19  ;;  %v16730_v60 = vld [vmem:[#allocation63_spill] sm:$0xff] }
 0x6ba   : > { %v3738_v20 = vsel %vm3518_vm2, %v3737_v36, %v3736_v56  ;;  %9228 = vpow2.f32 %v4074_v41  ;;  %v4092_v56 = vmul.f32 1.442695, %v3912_v2  ;;  %v4004_v36 = vmul.f32 1.442695, %v3868_v1  ;;  %v16737_v1 = vld [vmem:[#allocation94_spill] sm:$0xff] }
 0x6bb   : > { %4475 = vperm.xlu2 %8888, %v12165_v4   ;;  %v3992_v26 = vmul.f32 1.442695, %v3862_v54  ;;  %9230 = vpow2.f32 %v4080_v53  ;;  %v3877_v54 = vsub.f32 %v16730_v60, %v11854_v61  ;;  %v4110_v53 = vmul.f32 1.442695, %v3921_v46  ;;  %v16734_v61 = vld [vmem:[#allocation73_spill] sm:$0xff]  ;;  %v16745_v60 = vld [vmem:[#allocation20_spill] sm:$0xff] }
 0x6bd   : > { %9232 = vpow2.f32 %v3992_v26  ;;  %v4022_v57 = vmul.f32 1.442695, %v3877_v54 }
 0x6be   : > { %v3508_v52 = vpop.permute.xlu2 %3507  ;;  %9234 = vpow2.f32 %v4086_v28  ;;  %v3880_v28 = vsub.f32 %v16734_v61, %v11867_v6 }
 0x6bf   : > { %v3739_v35 = vperm.slane %v3508_v52, %v11320_v13  ;;  %v12213_v63 = vpop.eup %9226  ;;  %9236 = vpow2.f32 %v3998_v21  ;;  %v16721_v52 = vld [vmem:[#allocation54_spill] sm:$0xff] }
 0x6c0   : > { %16709 = vst [vmem:[#allocation29_spill] sm:$0xff] %v12213_v63  ;;  %v12220_v17 = vpop.eup %9228  ;;  %9238 = vpow2.f32 %v4092_v56  ;;  %v3915_v25 = vsub.f32 %v16721_v52, %v12013_v29  ;;  %v4028_v2 = vmul.f32 1.442695, %v3880_v28 }
 0x6c1   : > { %v3740_v14 = vsel %vm3522_vm3, %v3739_v35, %v3738_v20  ;;  %16712 = vst [vmem:[#allocation93_spill] sm:$0xff] %v12220_v17  ;;  %v12227_v22 = vpop.eup %9230  ;;  %9240 = vpow2.f32 %v4004_v36  ;;  %v3871_v35 = vsub.f32 %v16722_v37, %v11823_v16  ;;  %v16738_v36 = vld [vmem:[#allocation129_spill] sm:$0xff] }
 0x6c2   : > { %v3775_v15 = vsel %vm3753_vm10, %v3740_v14, %v3774_v48  ;;  %16715 = vst [vmem:[#allocation39_spill] sm:$0xff] %v12227_v22  ;;  %v4098_v20 = vmul.f32 1.442695, %v3915_v25  ;;  %v16725_v14 = vld [vmem:[#allocation64_spill] sm:$0xff]  ;;  %v3883_v52 = vsub.f32 %v16738_v36, %v11867_v6  ;;  %v12291_v25 = vperm.slane %v11990_v58, 1 }
 0x6c3   : > { %4484 = vperm.xlu2 %8888, %v12206_v18   ;;  %v3789_v44 = vsel %vm16245_vm0, %v3775_v15, -inf  ;;  %v12230_v19 = vpop.eup %9232  ;;  %v4010_v3 = vmul.f32 1.442695, %v3871_v35  ;;  %v3918_v48 = vsub.f32 %v16725_v14, %v12030_v31  ;;  %v16726_v15 = vld [vmem:[#allocation6_spill] sm:$0xff]  ;;  %v16742_v6 = vld [vmem:[#allocation132_spill] sm:$0xff] }
 0x6c4   : > { %3790 = vmax.xlane.f32.xlu1 %v3789_v44  ;;  %16716 = vst [vmem:[#allocation96_spill] sm:$0xff] %v12230_v19  ;;  %v12237_v23 = vpop.eup %9234  ;;  %9242 = vpow2.f32 %v4098_v20  ;;  %v3874_v44 = vsub.f32 %v16726_v15, %v11831_v24  ;;  %v12268_v24 = vperm.slane %v11990_v58, 0  ;;  %v4034_v20 = vmul.f32 1.442695, %v3883_v52  ;;  %v16741_v14 = vld [vmem:[#allocation10_spill] sm:$0xff] }
 0x6c5   : > { %16719 = vst [vmem:[#allocation49_spill] sm:$0xff] %v12237_v23  ;;  %v12240_v34 = vpop.eup %9236  ;;  %9244 = vpow2.f32 %v4010_v3  ;;  %v4104_v47 = vmul.f32 1.442695, %v3918_v48  ;;  %v3930_v48 = vsub.f32 %v16741_v14, %v12291_v25  ;;  %v3886_v15 = vsub.f32 %v16742_v6, %v11880_v45  ;;  %v16746_v45 = vld [vmem:[#allocation135_spill] sm:$0xff] }
 0x6c6   : > { %16720 = vst [vmem:[#allocation97_spill] sm:$0xff] %v12240_v34  ;;  %v12247_v12 = vpop.eup %9238  ;;  %v4016_v51 = vmul.f32 1.442695, %v3874_v44  ;;  %v3924_v43 = vsub.f32 %v16733_v8, %v12268_v24  ;;  %v3927_v56 = vsub.f32 %v16737_v1, %v12268_v24  ;;  %v12304_v44 = vperm.slane %v11990_v58, 2 }
 0x6c7   : > { %16723 = vst [vmem:[#allocation59_spill] sm:$0xff] %v12247_v12  ;;  %v12250_v38 = vpop.eup %9240  ;;  %9246 = vpow2.f32 %v4104_v47  ;;  %v4128_v47 = vmul.f32 1.442695, %v3930_v48  ;;  %v4040_v9 = vmul.f32 1.442695, %v3886_v15  ;;  %v16754_v48 = vld [vmem:[#allocation37_spill] sm:$0xff] }
 0x6c8   : > { %16724 = vst [vmem:[#allocation100_spill] sm:$0xff] %v12250_v38  ;;  %9248 = vpow2.f32 %v4016_v51  ;;  %v4116_v21 = vmul.f32 1.442695, %v3924_v43  ;;  %v4122_v37 = vmul.f32 1.442695, %v3927_v56  ;;  %v3933_v54 = vsub.f32 %v16745_v60, %v12304_v44 }
 0x6c9   : > { %9250 = vpow2.f32 %v4110_v53  ;;  %v3889_v53 = vsub.f32 %v16746_v45, %v11903_v11  ;;  %v16750_v11 = vld [vmem:[#allocation138_spill] sm:$0xff]  ;;  %v12346_v60 = vperm.slane %v11990_v58, 4 }
 0x6ca   : > { %v12257_v16 = vpop.eup %9242  ;;  %9252 = vpow2.f32 %v4022_v57  ;;  %v12317_v57 = vperm.slane %v11990_v58, 3  ;;  %v4134_v8 = vmul.f32 1.442695, %v3933_v54  ;;  %v3892_v56 = vsub.f32 %v16750_v11, %v11916_v55 }
 0x6cb   : > { %4493 = vperm.xlu2 %8888, %v12213_v63   ;;  %16727 = vst [vmem:[#allocation69_spill] sm:$0xff] %v12257_v16  ;;  %v12260_v41 = vpop.eup %9244  ;;  %9254 = vpow2.f32 %v4116_v21  ;;  %v4046_v61 = vmul.f32 1.442695, %v3889_v53  ;;  %v12324_v21 = vpop.permute.xlu0 %4376 }
 0x6cc   : > { %16728 = vst [vmem:[#allocation102_spill] sm:$0xff] %v12260_v41  ;;  %9256 = vpow2.f32 %v4028_v2  ;;  %v16749_v2 = vld [vmem:[#allocation27_spill] sm:$0xff]  ;;  %v3939_v6 = vsub.f32 %v16754_v48, %v12317_v57 }
 0x6cd   : > { %v12270_v26 = vpop.eup %9246  ;;  %9258 = vpow2.f32 %v4122_v37  ;;  %v3936_v1 = vsub.f32 %v16749_v2, %v12317_v57  ;;  %v12333_v37 = vpop.permute.xlu2 %4373  ;;  %v16758_v2 = vld [vmem:[#allocation47_spill] sm:$0xff] }
 0x6ce   : > { %16731 = vst [vmem:[#allocation79_spill] sm:$0xff] %v12270_v26  ;;  %v12273_v5 = vpop.eup %9248  ;;  %9260 = vpow2.f32 %v4034_v20  ;;  %v4052_v20 = vmul.f32 1.442695, %v3892_v56  ;;  %v4146_v54 = vmul.f32 1.442695, %v3939_v6  ;;  %v12361_v56 = vperm.slane %v11990_v58, 5 }
 0x6cf   : > { %16732 = vst [vmem:[#allocation103_spill] sm:$0xff] %v12273_v5  ;;  %v12280_v10 = vpop.eup %9250  ;;  %9262 = vpow2.f32 %v4128_v47  ;;  %v4140_v36 = vmul.f32 1.442695, %v3936_v1  ;;  %v16755_v47 = vld [vmem:[#allocation141_spill] sm:$0xff]  ;;  %v3942_v1 = vsub.f32 %v16758_v2, %v12346_v60 }
 0x6d0   : > { %16735 = vst [vmem:[#allocation87_spill] sm:$0xff] %v12280_v10  ;;  %v12283_v27 = vpop.eup %9252  ;;  %9264 = vpow2.f32 %v4040_v9  ;;  %v3895_v9 = vsub.f32 %v16755_v47, %v11916_v55  ;;  %v16759_v55 = vld [vmem:[#allocation145_spill] sm:$0xff] }
 0x6d1   : > { %16736 = vst [vmem:[#allocation105_spill] sm:$0xff] %v12283_v27  ;;  %v12293_v35 = vpop.eup %9254  ;;  %9266 = vpow2.f32 %v4134_v8  ;;  %v3898_v11 = vsub.f32 %v16759_v55, %v11929_v30 }
 0x6d2   : > { %16739 = vst [vmem:[#allocation99_spill] sm:$0xff] %v12293_v35  ;;  %v12296_v3 = vpop.eup %9256  ;;  %9268 = vpow2.f32 %v4046_v61  ;;  %v4058_v53 = vmul.f32 1.442695, %v3895_v9  ;;  %v16762_v9 = vld [vmem:[#allocation57_spill] sm:$0xff] }
 0x6d3   : > { %4502 = vperm.xlu2 %8888, %v12220_v17   ;;  %16740 = vst [vmem:[#allocation107_spill] sm:$0xff] %v12296_v3  ;;  %v12306_v51 = vpop.eup %9258  ;;  %9270 = vpow2.f32 %v4140_v36  ;;  %v12341_v15 = vpop.permute.xlu0 %4382  ;;  %v4064_v6 = vmul.f32 1.442695, %v3898_v11 }
 0x6d4   : > { %16743 = vst [vmem:[#allocation104_spill] sm:$0xff] %v12306_v51  ;;  %v12309_v46 = vpop.eup %9260  ;;  %9272 = vpow2.f32 %v4052_v20  ;;  %v4152_v20 = vmul.f32 1.442695, %v3942_v1  ;;  %v12378_v1 = vperm.slane %v11990_v58, 6 }
 0x6d5   : > { %16744 = vst [vmem:[#allocation119_spill] sm:$0xff] %v12309_v46  ;;  %v12319_v43 = vpop.eup %9262  ;;  %v12353_v61 = vpop.permute.xlu2 %4385  ;;  %9274 = vpow2.f32 %v4146_v54  ;;  %v3945_v54 = vsub.f32 %v16762_v9, %v12361_v56 }
 0x6d6   : > { %16747 = vst [vmem:[#allocation108_spill] sm:$0xff] %v12319_v43  ;;  %v12322_v28 = vpop.eup %9264  ;;  %9276 = vpow2.f32 %v4058_v53  ;;  %v16764_v53 = vld [vmem:[#allocation147_spill] sm:$0xff] }
 0x6d7   : > { %16748 = vst [vmem:[#allocation109_spill] sm:$0xff] %v12322_v28  ;;  %v12331_v52 = vpop.eup %9266  ;;  %9278 = vpow2.f32 %v4152_v20  ;;  %v3901_v2 = vsub.f32 %v16764_v53, %v11952_v50  ;;  %v4158_v55 = vmul.f32 1.442695, %v3945_v54  ;;  %v16768_v50 = vld [vmem:[#allocation17_spill] sm:$0xff] }
 0x6d8   : > { %16751 = vst [vmem:[#allocation83_spill] sm:$0xff] %v12331_v52  ;;  %v12336_v14 = vpop.eup %9268  ;;  %9280 = vpow2.f32 %v4064_v6  ;;  %v3904_v53 = vsub.f32 %v16768_v50, %v11969_v33 }
 0x6d9   : > { %16752 = vst [vmem:[#allocation110_spill] sm:$0xff] %v12333_v37  ;;  %v12348_v45 = vpop.eup %9270  ;;  %v4070_v20 = vmul.f32 1.442695, %v3901_v2  ;;  %9282 = vpow2.f32 %v4158_v55 }
 0x6da   : > { %16753 = vst [vmem:[#allocation31_spill] sm:$0xff] %v12336_v14  ;;  %v12351_v8 = vpop.eup %9272  ;;  %v4076_v2 = vmul.f32 1.442695, %v3904_v53  ;;  %v12409_v53 = vperm.slane %v11990_v58, 7  ;;  %v16778_v58 = vld [vmem:[#allocation36_spill] sm:$0xff] }
 0x6db   : > { %4511 = vperm.xlu2 %8888, %v12227_v22   ;;  %16756 = vst [vmem:[#allocation111_spill] sm:$0xff] %v12348_v45  ;;  %v12363_v36 = vpop.permute.xlu0 %4391  ;;  %v12365_v48 = vpop.eup %9274  ;;  %9284 = vpow2.f32 %v4070_v20  ;;  %v16773_v20 = vld [vmem:[#allocation26_spill] sm:$0xff] }
 0x6dc   : > { %16757 = vst [vmem:[#allocation41_spill] sm:$0xff] %v12351_v8  ;;  %v12368_v47 = vpop.eup %9276  ;;  %v3907_v50 = vsub.f32 %v16773_v20, %v11969_v33 }
 0x6dd   : > { %4379 = vperm.xlu1 %8889, %v12230_v19   ;;  %16760 = vst [vmem:[#allocation113_spill] sm:$0xff] %v12365_v48  ;;  %v12373_v30 = vpop.permute.xlu2 %4394  ;;  %v12380_v11 = vpop.eup %9278 }
 0x6de   : > { %16761 = vst [vmem:[#allocation51_spill] sm:$0xff] %v12368_v47  ;;  %v12385_v9 = vpop.eup %9280 }
 0x6df   : > { %16763 = vst [vmem:[#allocation114_spill] sm:$0xff] %v12373_v30 }
 0x6e0   : > { %16765 = vst [vmem:[#allocation53_spill] sm:$0xff] %v12380_v11 }
 0x6e1   : > { %16766 = vst [vmem:[#allocation115_spill] sm:$0xff] %v12385_v9 }
 0x6e3   : > { %4520 = vperm.xlu2 %8888, %v12237_v23  }
 0x6e5   : > { %4388 = vperm.xlu1 %8889, %v12240_v34   ;;  %v12392_v54 = vpop.permute.xlu2 %4403 }
 0x6e6   : > { %16769 = vst [vmem:[#allocation71_spill] sm:$0xff] %v12392_v54 }
 0x6eb   : > { %4529 = vperm.xlu2 %8888, %v12247_v12  }
 0x6ed   : > { %4397 = vperm.xlu1 %8889, %v12250_v38  }
 0x6f3   : > { %4538 = vperm.xlu2 %8888, %v12257_v16  }
 0x6f5   : > { %4406 = vperm.xlu1 %8889, %v12260_v41  }
 0x6fb   : > { %4547 = vperm.xlu2 %8888, %v12270_v26  }
 0x6fd   : > { %4415 = vperm.xlu1 %8889, %v12273_v5  }
 0x703   : > { %4556 = vperm.xlu2 %8888, %v12280_v10   ;;  %v12413_v10 = vpop.permute.xlu2 %4412 }
 0x704   : > { %16775 = vst [vmem:[#allocation131_spill] sm:$0xff] %v12413_v10 }
 0x705   : > { %4424 = vperm.xlu1 %8889, %v12283_v27   ;;  %v16816_v27 = vld [vmem:[#allocation38_spill] sm:$0xff] }
 0x706   : > { %v3940_v5 = vsub.f32 %v16816_v27, %v12346_v60  ;;  %v16820_v27 = vld [vmem:[#allocation58_spill] sm:$0xff] }
 0x70b   : > { %4565 = vperm.xlu2 %8888, %v12293_v35   ;;  %v12432_v12 = vpop.permute.xlu2 %4421 }
 0x70c   : > { %16782 = vst [vmem:[#allocation146_spill] sm:$0xff] %v12432_v12 }
 0x70d   : > { %4433 = vperm.xlu1 %8889, %v12296_v3  }
 0x713   : > { %4574 = vperm.xlu2 %8888, %v12306_v51  }
 0x715   : > { %4442 = vperm.xlu1 %8889, %v12309_v46  }
 0x71b   : > { %4583 = vperm.xlu2 %8888, %v12319_v43   ;;  %v12394_v43 = vpop.eup %9282 }
 0x71c   : > { %16770 = vst [vmem:[#allocation116_spill] sm:$0xff] %v12394_v43 }
 0x71d   : > { %4451 = vperm.xlu1 %8889, %v12322_v28  }
 0x723   : > { %4592 = vperm.xlu2 %8888, %v12331_v52  }
 0x725   : > { %4460 = vperm.xlu1 %8889, %v12336_v14  }
 0x72b   : > { %4601 = vperm.xlu2 %8888, %v12348_v45   ;;  %v16767_v45 = vld [vmem:[#allocation67_spill] sm:$0xff] }
 0x72c   : > { %v3948_v6 = vsub.f32 %v16767_v45, %v12378_v1  ;;  %v16772_v45 = vld [vmem:[#allocation77_spill] sm:$0xff] }
 0x72d   : > { %4469 = vperm.xlu1 %8889, %v12351_v8   ;;  %v3951_v51 = vsub.f32 %v16772_v45, %v12378_v1 }
 0x72e   : > { %v4164_v52 = vmul.f32 1.442695, %v3948_v6 }
 0x730   : > { %9286 = vpow2.f32 %v4164_v52  ;;  %v4082_v52 = vmul.f32 1.442695, %v3907_v50 }
 0x731   : > { %9288 = vpow2.f32 %v4076_v2  ;;  %v16777_v2 = vld [vmem:[#allocation13_spill] sm:$0xff] }
 0x732   : > { %v3954_v26 = vsub.f32 %v16777_v2, %v12409_v53 }
 0x733   : > { %4610 = vperm.xlu2 %8888, %v12365_v48   ;;  %v12382_v48 = vpop.permute.xlu0 %4400 }
 0x734   : > { %v4176_v16 = vmul.f32 1.442695, %v3954_v26 }
 0x735   : > { %4478 = vperm.xlu1 %8889, %v12368_v47  }
 0x737   : > { %v12406_v6 = vpop.xlane.xlu1 %3790 }
 0x73b   : > { %4619 = vperm.xlu2 %8888, %v12380_v11   ;;  %v12397_v11 = vpop.eup %9284  ;;  %v12399_v55 = vpop.permute.xlu0 %4409 }
 0x73c   : > { %16771 = vst [vmem:[#allocation128_spill] sm:$0xff] %v12397_v11  ;;  %v12411_v35 = vpop.eup %9286 }
 0x73d   : > { %4487 = vperm.xlu1 %8889, %v12385_v9   ;;  %16774 = vst [vmem:[#allocation117_spill] sm:$0xff] %v12411_v35  ;;  %v12416_v45 = vpop.eup %9288 }
 0x73e   : > { %16776 = vst [vmem:[#allocation134_spill] sm:$0xff] %v12416_v45 }
 0x743   : > { %4628 = vperm.xlu2 %8888, %v12394_v43   ;;  %v4170_v43 = vmul.f32 1.442695, %v3951_v51  ;;  %v12421_v33 = vpop.permute.xlu0 %4418  ;;  %v3910_v51 = vsub.f32 %v16778_v58, %v11984_v7 }
 0x745   : > { %4496 = vperm.xlu1 %8889, %v12397_v11   ;;  %9290 = vpow2.f32 %v4170_v43 }
 0x746   : > { %9292 = vpow2.f32 %v4082_v52  ;;  %v16783_v52 = vld [vmem:[#allocation46_spill] sm:$0xff] }
 0x747   : > { %9294 = vpow2.f32 %v4176_v16  ;;  %v3913_v2 = vsub.f32 %v16783_v52, %v12013_v29  ;;  %v12447_v16 = vpop.permute.xlu2 %4430 }
 0x748   : > { %16786 = vst [vmem:[#allocation121_spill] sm:$0xff] %v12447_v16 }
 0x74b   : > { %4637 = vperm.xlu2 %8888, %v12411_v35   ;;  %v12427_v50 = vpop.eup %9290  ;;  %v4088_v35 = vmul.f32 1.442695, %v3910_v51  ;;  %v12439_v58 = vpop.permute.xlu0 %4427  ;;  %v4094_v51 = vmul.f32 1.442695, %v3913_v2  ;;  %v16789_v2 = vld [vmem:[#allocation66_spill] sm:$0xff] }
 0x74c   : > { %16780 = vst [vmem:[#allocation140_spill] sm:$0xff] %v12427_v50  ;;  %v12430_v43 = vpop.eup %9292 }
 0x74d   : > { %4505 = vperm.xlu1 %8889, %v12416_v45   ;;  %16781 = vst [vmem:[#allocation144_spill] sm:$0xff] %v12430_v43  ;;  %9296 = vpow2.f32 %v4088_v35  ;;  %v12441_v26 = vpop.eup %9294  ;;  %v16787_v35 = vld [vmem:[#allocation56_spill] sm:$0xff] }
 0x74e   : > { %16784 = vst [vmem:[#allocation15_spill] sm:$0xff] %v12441_v26  ;;  %9298 = vpow2.f32 %v4094_v51  ;;  %v3916_v23 = vsub.f32 %v16787_v35, %v12030_v31 }
 0x74f   : > { %v12425_v20 = vpop.permute.xlu1 %4379  ;;  %v12462_v63 = vpop.permute.xlu2 %4439 }
 0x750   : > { %16779 = vst [vmem:[#allocation137_spill] sm:$0xff] %v12425_v20  ;;  %v4100_v19 = vmul.f32 1.442695, %v3916_v23  ;;  %v16794_v23 = vld [vmem:[#allocation76_spill] sm:$0xff] }
 0x751   : > { %16791 = vst [vmem:[#allocation44_spill] sm:$0xff] %v12462_v63  ;;  %v3922_v40 = vsub.f32 %v16794_v23, %v12047_v49 }
 0x752   : > { %9300 = vpow2.f32 %v4100_v19 }
 0x753   : > { %4646 = vperm.xlu2 %8888, %v12427_v50   ;;  %v12444_v50 = vpop.eup %9296  ;;  %v12453_v52 = vpop.permute.xlu0 %4436 }
 0x754   : > { %16785 = vst [vmem:[#allocation24_spill] sm:$0xff] %v12444_v50  ;;  %v12455_v22 = vpop.eup %9298 }
 0x755   : > { %4514 = vperm.xlu1 %8889, %v12430_v43   ;;  %16788 = vst [vmem:[#allocation34_spill] sm:$0xff] %v12455_v22 }
 0x757   : > { %v12437_v7 = vpop.permute.xlu1 %4388  ;;  %v12473_v19 = vpop.permute.xlu2 %4448 }
 0x758   : > { %v12464_v18 = vpop.eup %9300  ;;  %16796 = vst [vmem:[#allocation64_spill] sm:$0xff] %v12473_v19 }
 0x759   : > { %16792 = vst [vmem:[#allocation33_spill] sm:$0xff] %v12464_v18 }
 0x75b   : > { %4655 = vperm.xlu2 %8888, %v12441_v26   ;;  %v3919_v26 = vsub.f32 %v16789_v2, %v12030_v31  ;;  %v12466_v35 = vpop.permute.xlu0 %4445  ;;  %v4112_v31 = vmul.f32 1.442695, %v3922_v40  ;;  %v16802_v40 = vld [vmem:[#allocation95_spill] sm:$0xff] }
 0x75c   : > { %16793 = vst [vmem:[#allocation54_spill] sm:$0xff] %v12466_v35  ;;  %v3928_v23 = vsub.f32 %v16802_v40, %v12291_v25 }
 0x75d   : > { %4523 = vperm.xlu1 %8889, %v12444_v50   ;;  %v4106_v51 = vmul.f32 1.442695, %v3919_v26 }
 0x75f   : > { %v12451_v29 = vpop.permute.xlu1 %4397  ;;  %9302 = vpow2.f32 %v4106_v51  ;;  %v12486_v49 = vpop.permute.xlu2 %4457 }
 0x760   : > { %9304 = vpow2.f32 %v4112_v31  ;;  %16801 = vst [vmem:[#allocation84_spill] sm:$0xff] %v12486_v49  ;;  %v4124_v31 = vmul.f32 1.442695, %v3928_v23  ;;  %v16810_v23 = vld [vmem:[#allocation19_spill] sm:$0xff] }
 0x761   : > { %v3934_v8 = vsub.f32 %v16810_v23, %v12304_v44 }
 0x763   : > { %v12478_v26 = vpop.permute.xlu0 %4454 }
 0x764   : > { %16798 = vst [vmem:[#allocation74_spill] sm:$0xff] %v12478_v26 }
 0x765   : > { %4532 = vperm.xlu1 %8889, %v12455_v22   ;;  %v12475_v2 = vpop.eup %9302  ;;  %v16799_v22 = vld [vmem:[#allocation86_spill] sm:$0xff] }
 0x766   : > { %16797 = vst [vmem:[#allocation6_spill] sm:$0xff] %v12475_v2  ;;  %v3925_v50 = vsub.f32 %v16799_v22, %v12268_v24  ;;  %v12484_v43 = vpop.eup %9304 }
 0x767   : > { %v12460_v17 = vpop.permute.xlu1 %4406  ;;  %16800 = vst [vmem:[#allocation63_spill] sm:$0xff] %v12484_v43  ;;  %v12498_v22 = vpop.permute.xlu2 %4466 }
 0x768   : > { %16790 = vst [vmem:[#allocation123_spill] sm:$0xff] %v12460_v17  ;;  %v4118_v51 = vmul.f32 1.442695, %v3925_v50  ;;  %v16807_v50 = vld [vmem:[#allocation12_spill] sm:$0xff]  ;;  %v16826_v17 = vld [vmem:[#allocation14_spill] sm:$0xff] }
 0x769   : > { %16806 = vst [vmem:[#allocation10_spill] sm:$0xff] %v12498_v22  ;;  %v3931_v9 = vsub.f32 %v16807_v50, %v12291_v25  ;;  %v3946_v22 = vsub.f32 %v16820_v27, %v12361_v56  ;;  %v3955_v19 = vsub.f32 %v16826_v17, %v12409_v53  ;;  %v12601_v17 = vperm.slane %v12406_v6, 1 }
 0x76a   : > { %9306 = vpow2.f32 %v4118_v51 }
 0x76b   : > { %v12493_v45 = vpop.permute.xlu0 %4463  ;;  %9308 = vpow2.f32 %v4124_v31  ;;  %v4130_v40 = vmul.f32 1.442695, %v3931_v9  ;;  %v4136_v31 = vmul.f32 1.442695, %v3934_v8  ;;  %v16813_v9 = vld [vmem:[#allocation28_spill] sm:$0xff]  ;;  %16830 = vst [vmem:[#allocation77_spill] sm:$0xff] %v12601_v17 }
 0x76c   : > { %16804 = vst [vmem:[#allocation94_spill] sm:$0xff] %v12493_v45  ;;  %v3937_v46 = vsub.f32 %v16813_v9, %v12317_v57 }
 0x76d   : > { %4541 = vperm.xlu1 %8889, %v12464_v18   ;;  %9310 = vpow2.f32 %v4130_v40 }
 0x76e   : > { %9312 = vpow2.f32 %v4136_v31  ;;  %v4142_v23 = vmul.f32 1.442695, %v3937_v46  ;;  %v4148_v31 = vmul.f32 1.442695, %v3940_v5  ;;  %v16818_v46 = vld [vmem:[#allocation48_spill] sm:$0xff] }
 0x76f   : > { %v12471_v4 = vpop.permute.xlu1 %4415  ;;  %v12513_v14 = vpop.permute.xlu2 %4475  ;;  %v3943_v38 = vsub.f32 %v16818_v46, %v12346_v60  ;;  %v4160_v46 = vmul.f32 1.442695, %v3946_v22  ;;  %v16824_v22 = vld [vmem:[#allocation78_spill] sm:$0xff] }
 0x770   : > { %16795 = vst [vmem:[#allocation43_spill] sm:$0xff] %v12471_v4  ;;  %v12495_v11 = vpop.eup %9306  ;;  %9314 = vpow2.f32 %v4142_v23 }
 0x771   : > { %16805 = vst [vmem:[#allocation129_spill] sm:$0xff] %v12495_v11  ;;  %v12506_v47 = vpop.eup %9308  ;;  %9316 = vpow2.f32 %v4148_v31  ;;  %v4154_v23 = vmul.f32 1.442695, %v3943_v38  ;;  %v16822_v38 = vld [vmem:[#allocation68_spill] sm:$0xff] }
 0x772   : > { %16809 = vst [vmem:[#allocation20_spill] sm:$0xff] %v12506_v47  ;;  %v3949_v63 = vsub.f32 %v16822_v38, %v12378_v1 }
 0x773   : > { %v12504_v51 = vpop.permute.xlu0 %4472  ;;  %v12515_v28 = vpop.eup %9310  ;;  %9318 = vpow2.f32 %v4154_v23 }
 0x774   : > { %16812 = vst [vmem:[#allocation27_spill] sm:$0xff] %v12515_v28  ;;  %v12526_v3 = vpop.eup %9312  ;;  %9320 = vpow2.f32 %v4160_v46  ;;  %v4166_v23 = vmul.f32 1.442695, %v3949_v63 }
 0x775   : > { %4550 = vperm.xlu1 %8889, %v12475_v2   ;;  %16815 = vst [vmem:[#allocation37_spill] sm:$0xff] %v12526_v3 }
 0x776   : > { %v12535_v41 = vpop.eup %9314  ;;  %9322 = vpow2.f32 %v4166_v23  ;;  %v12587_v23 = vperm.slane %v12406_v6, 0 }
 0x777   : > { %v12482_v18 = vpop.permute.xlu1 %4424  ;;  %v12524_v40 = vpop.permute.xlu2 %4484  ;;  %16817 = vst [vmem:[#allocation141_spill] sm:$0xff] %v12535_v41 }
 0x778   : > { %v12546_v59 = vpop.eup %9316  ;;  %16827 = vst [vmem:[#allocation67_spill] sm:$0xff] %v12587_v23 }
 0x779   : > { %16819 = vst [vmem:[#allocation47_spill] sm:$0xff] %v12546_v59  ;;  %v12557_v26 = vpop.eup %9318 }
 0x77a   : > { %16821 = vst [vmem:[#allocation145_spill] sm:$0xff] %v12557_v26 }
 0x77b   : > { %v12517_v50 = vpop.permute.xlu0 %4481 }
 0x77d   : > { %4559 = vperm.xlu1 %8889, %v12484_v43  }
 0x77f   : > { %v12491_v2 = vpop.permute.xlu1 %4433  ;;  %v12537_v9 = vpop.permute.xlu2 %4493 }
 0x780   : > { %16803 = vst [vmem:[#allocation73_spill] sm:$0xff] %v12491_v2 }
 0x783   : > { %v12529_v8 = vpop.permute.xlu0 %4490 }
 0x785   : > { %4568 = vperm.xlu1 %8889, %v12495_v11  }
 0x787   : > { %v12502_v43 = vpop.permute.xlu1 %4442  ;;  %v12549_v5 = vpop.permute.xlu2 %4502 }
 0x788   : > { %16808 = vst [vmem:[#allocation132_spill] sm:$0xff] %v12502_v43  ;;  %v12566_v43 = vpop.eup %9320 }
 0x789   : > { %16823 = vst [vmem:[#allocation57_spill] sm:$0xff] %v12566_v43  ;;  %v12577_v49 = vpop.eup %9322 }
 0x78a   : > { %16825 = vst [vmem:[#allocation147_spill] sm:$0xff] %v12577_v49 }
 0x78b   : > { %v12544_v34 = vpop.permute.xlu0 %4499 }
 0x78d   : > { %4577 = vperm.xlu1 %8889, %v12506_v47  }
 0x78f   : > { %v12511_v11 = vpop.permute.xlu1 %4451  ;;  %v12564_v16 = vpop.permute.xlu2 %4511 }
 0x790   : > { %16811 = vst [vmem:[#allocation135_spill] sm:$0xff] %v12511_v11  ;;  %v3952_v11 = vsub.f32 %v16824_v22, %v12409_v53  ;;  %v4178_v22 = vmul.f32 1.442695, %v3955_v19 }
 0x792   : > { %v4172_v38 = vmul.f32 1.442695, %v3952_v11  ;;  %v16829_v11 = vld [vmem:[#allocation21_spill] sm:$0xff] }
 0x793   : > { %v12555_v31 = vpop.permute.xlu0 %4508 }
 0x794   : > { %9324 = vpow2.f32 %v4172_v38  ;;  %v4834_v37 = vperm.slane %v12555_v31, %v11317_v39 }
 0x795   : > { %4586 = vperm.xlu1 %8889, %v12515_v28   ;;  %9326 = vpow2.f32 %v4178_v22  ;;  %v3961_v22 = vsub.f32 %v11352_v32, %v12601_v17  ;;  %v4813_v32 = vperm.slane %v12504_v51, %v11317_v39  ;;  %v4824_v17 = vperm.slane %v12529_v8, %v11320_v13 }
 0x797   : > { %v12522_v47 = vpop.permute.xlu1 %4460  ;;  %v12575_v46 = vpop.permute.xlu2 %4520  ;;  %v4190_v12 = vmul.f32 1.442695, %v3961_v22 }
 0x798   : > { %16814 = vst [vmem:[#allocation138_spill] sm:$0xff] %v12522_v47 }
 0x79a   : > { %v12589_v54 = vpop.eup %9324 }
 0x79b   : > { %v12568_v27 = vpop.permute.xlu0 %4517  ;;  %16828 = vst [vmem:[#allocation17_spill] sm:$0xff] %v12589_v54  ;;  %v12603_v20 = vpop.eup %9326 }
 0x79c   : > { %16831 = vst [vmem:[#allocation26_spill] sm:$0xff] %v12603_v20  ;;  %v4840_v51 = vperm.slane %v12568_v27, %v11313_v62 }
 0x79d   : > { %4595 = vperm.xlu1 %8889, %v12526_v3  }
 0x79f   : > { %v12533_v28 = vpop.permute.xlu1 %4469  ;;  %v12591_v47 = vpop.permute.xlu2 %4529 }
 0x7a0   : > { %v4812_v31 = vperm.slane %v12533_v28, %v11313_v62  ;;  %v4841_v28 = vperm.slane %v12575_v46, %v11317_v39 }
 0x7a3   : > { %v12580_v63 = vpop.permute.xlu0 %4526 }
 0x7a5   : > { %4604 = vperm.xlu1 %8889, %v12535_v41  }
 0x7a7   : > { %v12542_v3 = vpop.permute.xlu1 %4478  ;;  %v12606_v19 = vpop.permute.xlu2 %4538 }
 0x7ab   : > { %v12598_v2 = vpop.permute.xlu0 %4535 }
 0x7ad   : > { %4613 = vperm.xlu1 %8889, %v12546_v59  }
 0x7af   : > { %v12553_v41 = vpop.permute.xlu1 %4487  ;;  %v12618_v10 = vpop.permute.xlu2 %4547 }
 0x7b0   : > { %v4822_v27 = vperm.slane %v12553_v41, %v11323_v0  ;;  %v16834_v41 = vld [vmem:[#allocation30_spill] sm:$0xff] }
 0x7b5   : > { %4622 = vperm.xlu1 %8889, %v12557_v26  }
 0x7b7   : > { %v12562_v59 = vpop.permute.xlu1 %4496 }
 0x7b8   : > { %v4827_v22 = vperm.slane %v12562_v59, %v11317_v39  ;;  %v4826_v59 = vperm.slane %v12537_v9, %v11313_v62 }
 0x7ba   : > { %v4828_v45 = vsel %vm3514_vm1, %v4827_v22, %v4826_v59  ;;  %v12664_v22 = vperm.slane %v12406_v6, 3 }
 0x7bd   : > { %4631 = vperm.xlu1 %8889, %v12566_v43  }
 0x7bf   : > { %v12573_v26 = vpop.permute.xlu1 %4505 }
 0x7c0   : > { %v4833_v9 = vperm.slane %v12573_v26, %v11313_v62 }
 0x7c5   : > { %4640 = vperm.xlu1 %8889, %v12577_v49   ;;  %v3958_v49 = vsub.f32 %v16829_v11, %v12587_v23  ;;  %v4545_v11 = vpop.permute.xlu0 %4544  ;;  %v12611_v23 = vperm.slane %v12406_v6, 2 }
 0x7c7   : > { %v12584_v43 = vpop.permute.xlu1 %4514  ;;  %v4184_v4 = vmul.f32 1.442695, %v3958_v49  ;;  %v3964_v49 = vsub.f32 %v11365_v42, %v12611_v23  ;;  %v4820_v42 = vperm.slane %v12524_v40, %v11317_v39  ;;  %v4855_v40 = vperm.slane %v4545_v11, %v11317_v39 }
 0x7c8   : > { %v3967_v11 = vsub.f32 %v16834_v41, %v12611_v23  ;;  %v4835_v41 = vsel %vm3514_vm1, %v4834_v37, %v4833_v9  ;;  %v4857_v9 = vperm.slane %v12618_v10, %v11323_v0 }
 0x7c9   : > { %9328 = vpow2.f32 %v4184_v4  ;;  %v4819_v4 = vperm.slane %v12517_v50, %v11313_v62  ;;  %v4845_v50 = vperm.slane %v12580_v63, %v11320_v13  ;;  %v4815_v63 = vperm.slane %v12513_v14, %v11323_v0 }
 0x7ca   : > { %9330 = vpow2.f32 %v4190_v12  ;;  %v4829_v12 = vperm.slane %v12544_v34, %v11323_v0  ;;  %v4850_v34 = vperm.slane %v12598_v2, %v11323_v0  ;;  %v4831_v14 = vperm.slane %v12549_v5, %v11320_v13 }
 0x7cb   : > { %v4821_v2 = vsel %vm3514_vm1, %v4820_v42, %v4819_v4  ;;  %v4814_v42 = vsel %vm3514_vm1, %v4813_v32, %v4812_v31  ;;  %v4817_v5 = vperm.slane %v12542_v3, %v11320_v13  ;;  %v4842_v32 = vsel %vm3514_vm1, %v4841_v28, %v4840_v51 }
 0x7cc   : > { %v4830_v46 = vsel %vm3518_vm2, %v4829_v12, %v4828_v45  ;;  %v4852_v45 = vperm.slane %v12606_v19, %v11320_v13  ;;  %v4557_v12 = vpop.permute.xlu2 %4556  ;;  %v4816_v31 = vsel %vm3518_vm2, %v4815_v63, %v4814_v42 }
 0x7cd   : > { %4649 = vperm.xlu1 %8889, %v12589_v54   ;;  %v4832_v37 = vsel %vm3522_vm3, %v4831_v14, %v4830_v46  ;;  %v4862_v63 = vperm.slane %v4557_v12, %v11317_v39 }
 0x7cf   : > { %v12596_v38 = vpop.permute.xlu1 %4523  ;;  %v12613_v30 = vpop.eup %9328 }
 0x7d0   : > { %16832 = vst [vmem:[#allocation13_spill] sm:$0xff] %v12613_v30  ;;  %v12640_v8 = vpop.eup %9330  ;;  %v4843_v26 = vperm.slane %v12596_v38, %v11323_v0  ;;  %v4836_v38 = vperm.slane %v12564_v16, %v11323_v0 }
 0x7d1   : > { %16833 = vst [vmem:[#allocation36_spill] sm:$0xff] %v12640_v8 }
 0x7d5   : > { %4658 = vperm.xlu1 %8889, %v12603_v20  }
 0x7d7   : > { %v4533_v54 = vpop.permute.xlu1 %4532 }
 0x7d8   : > { %v4848_v35 = vperm.slane %v4533_v54, %v11317_v39  ;;  %v4847_v54 = vperm.slane %v12591_v47, %v11313_v62  ;;  %v4838_v47 = vperm.slane %v12584_v43, %v11320_v13  ;;  %v4844_v43 = vsel %vm3518_vm2, %v4843_v26, %v4842_v32 }
 0x7dd   : > { %4667 = vperm.xlu1 %8889, %v12613_v30   ;;  %v4196_v30 = vmul.f32 1.442695, %v3964_v49  ;;  %v4554_v49 = vpop.permute.xlu0 %4553 }
 0x7de   : > { %v4861_v14 = vperm.slane %v4554_v49, %v11313_v62  ;;  %v12716_v49 = vperm.slane %v12406_v6, 4 }
 0x7df   : > { %v4542_v20 = vpop.permute.xlu1 %4541  ;;  %9332 = vpow2.f32 %v4196_v30  ;;  %v4823_v30 = vsel %vm3518_vm2, %v4822_v27, %v4821_v2 }
 0x7e0   : > { %v4854_v59 = vperm.slane %v4542_v20, %v11313_v62  ;;  %v4202_v20 = vmul.f32 1.442695, %v3967_v11  ;;  %v4825_v3 = vsel %vm3522_vm3, %v4824_v17, %v4823_v30  ;;  %v4818_v17 = vsel %vm3522_vm3, %v4817_v5, %v4816_v31 }
 0x7e1   : > { %v4987_v11 = vsel %vm3741_vm4, %v4825_v3, %v4818_v17  ;;  %v16838_v3 = vld [vmem:[#allocation50_spill] sm:$0xff] }
 0x7e2   : > { %v4856_v51 = vsel %vm3514_vm1, %v4855_v40, %v4854_v59  ;;  %9334 = vpow2.f32 %v4202_v20  ;;  %v4988_v10 = vsel %vm3743_vm5, %v4832_v37, %v4987_v11  ;;  %v4863_v59 = vsel %vm3514_vm1, %v4862_v63, %v4861_v14  ;;  %v16841_v63 = vld [vmem:[#allocation70_spill] sm:$0xff] }
 0x7e3   : > { %v3973_v37 = vsub.f32 %v16838_v3, %v12716_v49  ;;  %v16852_v3 = vld [vmem:[#allocation101_spill] sm:$0xff] }
 0x7e5   : > { %4676 = vperm.xlu1 %8889, %v12640_v8   ;;  %v4849_v8 = vsel %vm3514_vm1, %v4848_v35, %v4847_v54  ;;  %v12689_v27 = vpop.eup %9332  ;;  %v4837_v35 = vsel %vm3518_vm2, %v4836_v38, %v4835_v41  ;;  %v4563_v28 = vpop.permute.xlu0 %4562  ;;  %v4858_v54 = vsel %vm3518_vm2, %v4857_v9, %v4856_v51  ;;  %v16839_v51 = vld [vmem:[#allocation60_spill] sm:$0xff] }
 0x7e6   : > { %16835 = vst [vmem:[#allocation46_spill] sm:$0xff] %v12689_v27  ;;  %v4851_v16 = vsel %vm3518_vm2, %v4850_v34, %v4849_v8  ;;  %v4839_v2 = vsel %vm3522_vm3, %v4838_v47, %v4837_v35  ;;  %v4846_v8 = vsel %vm3522_vm3, %v4845_v50, %v4844_v43  ;;  %v16836_v34 = vld [vmem:[#allocation40_spill] sm:$0xff]  ;;  %v4866_v50 = vperm.slane %v4563_v28, %v11320_v13 }
 0x7e7   : > { %v4551_v4 = vpop.permute.xlu1 %4550  ;;  %v3970_v40 = vsub.f32 %v16836_v34, %v12664_v22  ;;  %v4989_v42 = vsel %vm3745_vm6, %v4839_v2, %v4988_v10  ;;  %v12732_v35 = vperm.slane %v12406_v6, 5 }
 0x7e8   : > { %v4859_v19 = vperm.slane %v4551_v4, %v11320_v13  ;;  %v4853_v4 = vsel %vm3522_vm3, %v4852_v45, %v4851_v16  ;;  %v4990_v5 = vsel %vm3747_vm7, %v4846_v8, %v4989_v42  ;;  %v12722_v12 = vpop.eup %9334  ;;  %v4214_v16 = vmul.f32 1.442695, %v3973_v37  ;;  %v16842_v8 = vld [vmem:[#allocation80_spill] sm:$0xff] }
 0x7e9   : > { %v4991_v47 = vsel %vm3749_vm8, %v4853_v4, %v4990_v5  ;;  %v4208_v38 = vmul.f32 1.442695, %v3970_v40  ;;  %16837 = vst [vmem:[#allocation56_spill] sm:$0xff] %v12722_v12  ;;  %v3976_v17 = vsub.f32 %v16841_v63, %v12732_v35  ;;  %v3929_v34 = vsub.f32 %v16842_v8, %v12291_v25  ;;  %v16846_v25 = vld [vmem:[#allocation89_spill] sm:$0xff]  ;;  %v16854_v63 = vld [vmem:[#allocation16_spill] sm:$0xff]  ;;  %v16857_v8 = vld [vmem:[#allocation106_spill] sm:$0xff] }
 0x7ea   : > { %v4860_v30 = vsel %vm3522_vm3, %v4859_v19, %v4858_v54  ;;  %v3926_v19 = vsub.f32 %v16839_v51, %v12268_v24  ;;  %v16844_v24 = vld [vmem:[#allocation81_spill] sm:$0xff]  ;;  %v12755_v4 = vperm.slane %v12406_v6, 6 }
 0x7eb   : > { %v4992_v45 = vsel %vm3751_vm9, %v4860_v30, %v4991_v47  ;;  %9336 = vpow2.f32 %v4208_v38  ;;  %v4220_v11 = vmul.f32 1.442695, %v3976_v17  ;;  %v3979_v14 = vsub.f32 %v16844_v24, %v12732_v35 }
 0x7ec   : > { %9338 = vpow2.f32 %v4214_v16  ;;  %v4120_v28 = vmul.f32 1.442695, %v3926_v19  ;;  %v4126_v54 = vmul.f32 1.442695, %v3929_v34  ;;  %v3932_v30 = vsub.f32 %v16846_v25, %v12304_v44 }
 0x7ed   : > { %4685 = vperm.xlu1 %8889, %v12689_v27   ;;  %v4226_v42 = vmul.f32 1.442695, %v3979_v14  ;;  %v12770_v38 = vperm.slane %v12406_v6, 7  ;;  %v3941_v34 = vsub.f32 %v16857_v8, %v12346_v60  ;;  %v16862_v60 = vld [vmem:[#allocation23_spill] sm:$0xff]  ;;  %v4770_v8 = vperm.slane %v12451_v29, %v11313_v62 }
 0x7ee   : > { %9340 = vpow2.f32 %v4120_v28  ;;  %v4132_v5 = vmul.f32 1.442695, %v3932_v30 }
 0x7ef   : > { %v4560_v26 = vpop.permute.xlu1 %4559  ;;  %9342 = vpow2.f32 %v4220_v11  ;;  %v3985_v37 = vsub.f32 %v16852_v3, %v12770_v38 }
 0x7f0   : > { %v4864_v46 = vperm.slane %v4560_v26, %v11323_v0  ;;  %9344 = vpow2.f32 %v4126_v54 }
 0x7f1   : > { %v12736_v9 = vpop.eup %9336  ;;  %9346 = vpow2.f32 %v4226_v42  ;;  %v4238_v19 = vmul.f32 1.442695, %v3985_v37  ;;  %v16860_v42 = vld [vmem:[#allocation32_spill] sm:$0xff]  ;;  %v4764_v37 = vperm.slane %v12437_v7, %v11317_v39  ;;  %v16865_v7 = vld [vmem:[#allocation42_spill] sm:$0xff] }
 0x7f2   : > { %v4865_v41 = vsel %vm3518_vm2, %v4864_v46, %v4863_v59  ;;  %16840 = vst [vmem:[#allocation66_spill] sm:$0xff] %v12736_v9  ;;  %v12745_v40 = vpop.eup %9338  ;;  %9348 = vpow2.f32 %v4132_v5  ;;  %v3944_v25 = vsub.f32 %v16860_v42, %v12361_v56  ;;  %v3947_v5 = vsub.f32 %v16862_v60, %v12361_v56  ;;  %v16868_v42 = vld [vmem:[#allocation110_spill] sm:$0xff] }
 0x7f3   : > { %v4867_v32 = vsel %vm3522_vm3, %v4866_v50, %v4865_v41  ;;  %16843 = vst [vmem:[#allocation76_spill] sm:$0xff] %v12745_v40  ;;  %v16848_v50 = vld [vmem:[#allocation90_spill] sm:$0xff]  ;;  %v4766_v56 = vperm.slane %v12363_v36, %v11323_v0  ;;  %v4782_v36 = vperm.slane %v12421_v33, %v11320_v13 }
 0x7f4   : > { %v4993_v20 = vsel %vm3753_vm10, %v4867_v32, %v4992_v45  ;;  %v12752_v26 = vpop.eup %9340  ;;  %v3982_v59 = vsub.f32 %v16848_v50, %v12755_v4  ;;  %v16850_v45 = vld [vmem:[#allocation9_spill] sm:$0xff]  ;;  %v4156_v50 = vmul.f32 1.442695, %v3944_v25  ;;  %v4756_v25 = vperm.slane %v16868_v42, %v11313_v62  ;;  %v16870_v60 = vld [vmem:[#allocation114_spill] sm:$0xff] }
 0x7f5   : > { %4694 = vperm.xlu1 %8889, %v12722_v12   ;;  %v5015_v31 = vsel %vm16245_vm0, %v4993_v20, 0.0  ;;  %16845 = vst [vmem:[#allocation86_spill] sm:$0xff] %v12752_v26  ;;  %v12760_v46 = vpop.eup %9342  ;;  %v3935_v20 = vsub.f32 %v16850_v45, %v12304_v44  ;;  %v3938_v44 = vsub.f32 %v16854_v63, %v12317_v57  ;;  %v4150_v57 = vmul.f32 1.442695, %v3941_v34  ;;  %v16866_v34 = vld [vmem:[#allocation54_spill] sm:$0xff]  ;;  %v16997_v12 = vld [vmem:[#allocation85_spill] sm:$0xff] }
 0x7f6   : > { %5016 = vadd.xlane.f32.xlu0 %v5015_v31  ;;  %16847 = vst [vmem:[#allocation95_spill] sm:$0xff] %v12760_v46  ;;  %v12767_v47 = vpop.eup %9344  ;;  %v4232_v32 = vmul.f32 1.442695, %v3982_v59  ;;  %v4798_v33 = vperm.slane %v16866_v34, %v11313_v62 }
 0x7f7   : > { %v12729_v43 = vpop.permute.xlu1 %4568  ;;  %16849 = vst [vmem:[#allocation12_spill] sm:$0xff] %v12767_v47  ;;  %v12775_v31 = vpop.eup %9346  ;;  %v4138_v16 = vmul.f32 1.442695, %v3935_v20  ;;  %v4144_v28 = vmul.f32 1.442695, %v3938_v44 }
 0x7f8   : > { %16851 = vst [vmem:[#allocation19_spill] sm:$0xff] %v12775_v31  ;;  %9350 = vpow2.f32 %v4232_v32  ;;  %v12780_v51 = vpop.eup %9348  ;;  %v16863_v32 = vld [vmem:[#allocation52_spill] sm:$0xff]  ;;  %v4162_v20 = vmul.f32 1.442695, %v3947_v5  ;;  %v16871_v5 = vld [vmem:[#allocation146_spill] sm:$0xff] }
 0x7f9   : > { %16853 = vst [vmem:[#allocation28_spill] sm:$0xff] %v12780_v51  ;;  %9352 = vpow2.f32 %v4138_v16  ;;  %v3950_v45 = vsub.f32 %v16863_v32, %v12378_v1  ;;  %v4757_v16 = vperm.slane %v12324_v21, %v11317_v39  ;;  %v4771_v1 = vperm.slane %v12382_v48, %v11317_v39 }
 0x7fa   : > { %9354 = vpow2.f32 %v4238_v19  ;;  %v4761_v19 = vperm.slane %v12341_v15, %v11320_v13  ;;  %v3953_v21 = vsub.f32 %v16865_v7, %v12409_v53  ;;  %v4777_v15 = vperm.slane %v12399_v55, %v11313_v62  ;;  %v16874_v7 = vld [vmem:[#allocation73_spill] sm:$0xff] }
 0x7fb   : > { %9356 = vpow2.f32 %v4144_v28  ;;  %v4168_v3 = vmul.f32 1.442695, %v3950_v45  ;;  %v4763_v28 = vperm.slane %v12353_v61, %v11313_v62  ;;  %v4787_v48 = vperm.slane %v12439_v58, %v11323_v0 }
 0x7fc   : > { %9358 = vpow2.f32 %v4150_v57  ;;  %v4792_v61 = vperm.slane %v12453_v52, %v11317_v39  ;;  %v4785_v55 = vperm.slane %v12482_v18, %v11317_v39  ;;  %v16867_v57 = vld [vmem:[#allocation94_spill] sm:$0xff]  ;;  %v4768_v52 = vperm.slane %v16870_v60, %v11320_v13  ;;  %v16872_v18 = vld [vmem:[#allocation137_spill] sm:$0xff]  ;;  %v16877_v60 = vld [vmem:[#allocation71_spill] sm:$0xff] }
 0x7fd   : > { %4703 = vperm.xlu1 %8889, %v12736_v9   ;;  %9360 = vpow2.f32 %v4156_v50  ;;  %v4765_v53 = vsel %vm3514_vm1, %v4764_v37, %v4763_v28  ;;  %v4808_v29 = vperm.slane %v16867_v57, %v11323_v0  ;;  %v16869_v50 = vld [vmem:[#allocation131_spill] sm:$0xff]  ;;  %v4784_v32 = vperm.slane %v16871_v5, %v11313_v62  ;;  %v16875_v57 = vld [vmem:[#allocation138_spill] sm:$0xff] }
 0x7fe   : > { %v12787_v17 = vpop.eup %9350  ;;  %9362 = vpow2.f32 %v4162_v20  ;;  %v4778_v58 = vperm.slane %v16869_v50, %v11317_v39  ;;  %v4759_v45 = vperm.slane %v16872_v18, %v11323_v0  ;;  %v16873_v20 = vld [vmem:[#allocation43_spill] sm:$0xff]  ;;  %v4767_v37 = vsel %vm3518_vm2, %v4766_v56, %v4765_v53  ;;  %v16878_v18 = vld [vmem:[#allocation64_spill] sm:$0xff] }
 0x7ff   : > { %v12741_v2 = vpop.permute.xlu1 %4577  ;;  %16855 = vst [vmem:[#allocation38_spill] sm:$0xff] %v12787_v17  ;;  %v12790_v11 = vpop.eup %9352  ;;  %9364 = vpow2.f32 %v4168_v3  ;;  %v4780_v3 = vperm.slane %v16873_v20, %v11323_v0  ;;  %v4772_v28 = vsel %vm3514_vm1, %v4771_v1, %v4770_v8  ;;  %v4791_v34 = vperm.slane %v16874_v7, %v11313_v62  ;;  %v16879_v20 = vld [vmem:[#allocation123_spill] sm:$0xff]  ;;  %v16881_v7 = vld [vmem:[#allocation84_spill] sm:$0xff] }
 0x800   : > { %16856 = vst [vmem:[#allocation48_spill] sm:$0xff] %v12790_v11  ;;  %v12795_v24 = vpop.eup %9354  ;;  %v4806_v42 = vperm.slane %v16875_v57, %v11317_v39  ;;  %v4773_v5 = vperm.slane %v16877_v60, %v11323_v0  ;;  %v4786_v56 = vsel %vm3514_vm1, %v4785_v55, %v4784_v32  ;;  %v4758_v8 = vsel %vm3514_vm1, %v4757_v16, %v4756_v25 }
 0x801   : > { %16858 = vst [vmem:[#allocation58_spill] sm:$0xff] %v12795_v24  ;;  %v12800_v54 = vpop.eup %9356  ;;  %v4779_v53 = vsel %vm3514_vm1, %v4778_v58, %v4777_v15  ;;  %v4805_v57 = vperm.slane %v16881_v7, %v11313_v62  ;;  %v4788_v32 = vsel %vm3518_vm2, %v4787_v48, %v4786_v56  ;;  %v4793_v16 = vsel %vm3514_vm1, %v4792_v61, %v4791_v34  ;;  %v16883_v15 = vld [vmem:[#allocation132_spill] sm:$0xff]  ;;  %v16886_v61 = vld [vmem:[#allocation74_spill] sm:$0xff] }
 0x802   : > { %16859 = vst [vmem:[#allocation68_spill] sm:$0xff] %v12800_v54  ;;  %v12807_v59 = vpop.eup %9358  ;;  %v4781_v55 = vsel %vm3518_vm2, %v4780_v3, %v4779_v53  ;;  %v4796_v25 = vperm.slane %v16883_v15, %v11320_v13  ;;  %v16889_v15 = vld [vmem:[#allocation152_spill] sm:$0xff] }
 0x803   : > { %16861 = vst [vmem:[#allocation78_spill] sm:$0xff] %v12807_v59  ;;  %v12824_v44 = vpop.eup %9360  ;;  %v4807_v58 = vsel %vm3514_vm1, %v4806_v42, %v4805_v57  ;;  %v4783_v42 = vsel %vm3522_vm3, %v4782_v36, %v4781_v55  ;;  %v4174_v36 = vmul.f32 1.442695, %v3953_v21 }
 0x804   : > { %16864 = vst [vmem:[#allocation14_spill] sm:$0xff] %v12824_v44  ;;  %v12868_v50 = vpop.eup %9362  ;;  %v4809_v57 = vsel %vm3518_vm2, %v4808_v29, %v4807_v58 }
 0x805   : > { %4712 = vperm.xlu1 %8889, %v12745_v40   ;;  %16876 = vst [vmem:[#allocation21_spill] sm:$0xff] %v12868_v50  ;;  %v12877_v1 = vpop.eup %9364  ;;  %9366 = vpow2.f32 %v4174_v36 }
 0x806   : > { %16880 = vst [vmem:[#allocation30_spill] sm:$0xff] %v12877_v1 }
 0x807   : > { %v12750_v10 = vpop.permute.xlu1 %4586 }
 0x80a   : > { %4571 = vperm.xlu0 %8890, %v12752_v26  }
 0x80d   : > { %4721 = vperm.xlu1 %8889, %v12760_v46  }
 0x80f   : > { %v12765_v41 = vpop.permute.xlu1 %4595 }
 0x812   : > { %4580 = vperm.xlu0 %8890, %v12767_v47  }
 0x815   : > { %4730 = vperm.xlu1 %8889, %v12775_v31   ;;  %v4869_v31 = vperm.slane %v12729_v43, %v11317_v39 }
 0x817   : > { %v12782_v6 = vpop.permute.xlu1 %4604 }
 0x818   : > { %v4890_v46 = vperm.slane %v12782_v6, %v11317_v39 }
 0x81a   : > { %4589 = vperm.xlu0 %8890, %v12780_v51  }
 0x81d   : > { %4739 = vperm.xlu1 %8889, %v12787_v17  }
 0x81f   : > { %v12797_v14 = vpop.permute.xlu1 %4613 }
 0x822   : > { %4598 = vperm.xlu0 %8890, %v12790_v11   ;;  %v4760_v11 = vsel %vm3518_vm2, %v4759_v45, %v4758_v8  ;;  %v16885_v45 = vld [vmem:[#allocation44_spill] sm:$0xff] }
 0x823   : > { %v4762_v34 = vsel %vm3522_vm3, %v4761_v19, %v4760_v11 }
 0x825   : > { %4748 = vperm.xlu1 %8889, %v12795_v24  }
 0x827   : > { %v12805_v30 = vpop.permute.xlu1 %4622 }
 0x82a   : > { %4607 = vperm.xlu0 %8890, %v12800_v54   ;;  %v16882_v54 = vld [vmem:[#allocation135_spill] sm:$0xff] }
 0x82b   : > { %v4801_v60 = vperm.slane %v16882_v54, %v11323_v0  ;;  %v16884_v54 = vld [vmem:[#allocation121_spill] sm:$0xff] }
 0x82f   : > { %v12822_v63 = vpop.permute.xlu1 %4631 }
 0x832   : > { %4616 = vperm.xlu0 %8890, %v12807_v59   ;;  %v4775_v59 = vperm.slane %v16879_v20, %v11320_v13  ;;  %v4774_v20 = vsel %vm3518_vm2, %v4773_v5, %v4772_v28  ;;  %v4803_v28 = vperm.slane %v16886_v61, %v11320_v13 }
 0x834   : > { %v4776_v48 = vsel %vm3522_vm3, %v4775_v59, %v4774_v20 }
 0x837   : > { %v12894_v7 = vpop.permute.xlu1 %4640 }
 0x83a   : > { %4625 = vperm.xlu0 %8890, %v12824_v44   ;;  %v4799_v44 = vperm.slane %v16878_v18, %v11317_v39  ;;  %v4769_v18 = vsel %vm3522_vm3, %v4768_v52, %v4767_v37  ;;  %v4789_v52 = vperm.slane %v16884_v54, %v11320_v13  ;;  %v4794_v37 = vperm.slane %v16885_v45, %v11323_v0  ;;  %v16891_v45 = vld [vmem:[#allocation156_spill] sm:$0xff] }
 0x83b   : > { %v4980_v56 = vsel %vm3741_vm4, %v4769_v18, %v4762_v34  ;;  %v16894_v34 = vld [vmem:[#allocation153_spill] sm:$0xff] }
 0x83c   : > { %v4800_v3 = vsel %vm3514_vm1, %v4799_v44, %v4798_v33  ;;  %v4790_v8 = vsel %vm3522_vm3, %v4789_v52, %v4788_v32  ;;  %v4795_v53 = vsel %vm3518_vm2, %v4794_v37, %v4793_v16  ;;  %v16887_v44 = vld [vmem:[#allocation10_spill] sm:$0xff]  ;;  %v4981_v33 = vsel %vm3743_vm5, %v4776_v48, %v4980_v56  ;;  %v16888_v16 = vld [vmem:[#allocation67_spill] sm:$0xff]  ;;  %v12929_v52 = vpop.eup %9366 }
 0x83d   : > { %v4802_v5 = vsel %vm3518_vm2, %v4801_v60, %v4800_v3  ;;  %v4810_v59 = vperm.slane %v16887_v44, %v11320_v13  ;;  %v4797_v20 = vsel %vm3522_vm3, %v4796_v25, %v4795_v53  ;;  %v4982_v11 = vsel %vm3745_vm6, %v4783_v42, %v4981_v33  ;;  %16890 = vst [vmem:[#allocation40_spill] sm:$0xff] %v12929_v52 }
 0x83e   : > { %v4804_v19 = vsel %vm3522_vm3, %v4803_v28, %v4802_v5  ;;  %v4983_v18 = vsel %vm3747_vm7, %v4790_v8, %v4982_v11  ;;  %v3956_v25 = vsub.f32 %v16889_v15, %v16888_v16  ;;  %v3959_v37 = vsub.f32 %v16891_v45, %v16888_v16  ;;  %v16893_v28 = vld [vmem:[#allocation77_spill] sm:$0xff]  ;;  %v12941_v5 = vpop.permute.xlu2 %4565  ;;  %v16902_v45 = vld [vmem:[#allocation139_spill] sm:$0xff] }
 0x83f   : > { %v4811_v60 = vsel %vm3522_vm3, %v4810_v59, %v4809_v57  ;;  %v4984_v55 = vsel %vm3749_vm8, %v4797_v20, %v4983_v18  ;;  %v12926_v58 = vpop.permute.xlu1 %4649  ;;  %v3962_v42 = vsub.f32 %v16894_v34, %v16893_v28  ;;  %v16896_v57 = vld [vmem:[#allocation155_spill] sm:$0xff]  ;;  %v4868_v17 = vperm.slane %v12941_v5, %v11313_v62 }
 0x840   : > { %v4985_v29 = vsel %vm3751_vm9, %v4804_v19, %v4984_v55  ;;  %v4180_v54 = vmul.f32 1.442695, %v3956_v25  ;;  %v4186_v48 = vmul.f32 1.442695, %v3959_v37  ;;  %v3965_v44 = vsub.f32 %v16896_v57, %v12611_v23  ;;  %v16898_v19 = vld [vmem:[#allocation158_spill] sm:$0xff] }
 0x841   : > { %v4986_v32 = vsel %vm3753_vm10, %v4811_v60, %v4985_v29  ;;  %v4192_v56 = vmul.f32 1.442695, %v3962_v42  ;;  %v3968_v36 = vsub.f32 %v16898_v19, %v12664_v22  ;;  %v16900_v29 = vld [vmem:[#allocation162_spill] sm:$0xff]  ;;  %v3974_v37 = vsub.f32 %v16902_v45, %v12716_v49 }
 0x842   : > { %4634 = vperm.xlu0 %8890, %v12868_v50   ;;  %v5012_v21 = vsel %vm16245_vm0, %v4986_v32, 0.0  ;;  %9368 = vpow2.f32 %v4180_v54  ;;  %v4198_v59 = vmul.f32 1.442695, %v3965_v44  ;;  %v3971_v32 = vsub.f32 %v16900_v29, %v12664_v22  ;;  %v16904_v44 = vld [vmem:[#allocation163_spill] sm:$0xff] }
 0x843   : > { %9370 = vpow2.f32 %v4186_v48  ;;  %v4204_v60 = vmul.f32 1.442695, %v3968_v36 }
 0x844   : > { %9372 = vpow2.f32 %v4192_v56  ;;  %v4216_v56 = vmul.f32 1.442695, %v3974_v37 }
 0x845   : > { %9374 = vpow2.f32 %v4198_v59  ;;  %v3977_v59 = vsub.f32 %v16904_v44, %v12732_v35 }
 0x846   : > { %v12952_v20 = vpop.permute.xlu2 %4574  ;;  %9376 = vpow2.f32 %v4204_v60 }
 0x847   : > { %v12934_v3 = vpop.permute.xlu1 %4658  ;;  %v4222_v60 = vmul.f32 1.442695, %v3977_v59  ;;  %v16908_v59 = vld [vmem:[#allocation142_spill] sm:$0xff] }
 0x848   : > { %v12936_v61 = vpop.eup %9368 }
 0x849   : > { %16892 = vst [vmem:[#allocation50_spill] sm:$0xff] %v12936_v61  ;;  %v12945_v53 = vpop.eup %9370 }
 0x84a   : > { %4643 = vperm.xlu0 %8890, %v12877_v1   ;;  %16895 = vst [vmem:[#allocation60_spill] sm:$0xff] %v12945_v53  ;;  %v12950_v33 = vpop.eup %9372 }
 0x84b   : > { %16897 = vst [vmem:[#allocation70_spill] sm:$0xff] %v12950_v33  ;;  %v12959_v18 = vpop.eup %9374 }
 0x84c   : > { %16899 = vst [vmem:[#allocation80_spill] sm:$0xff] %v12959_v18  ;;  %v12970_v54 = vpop.eup %9376 }
 0x84d   : > { %16901 = vst [vmem:[#allocation81_spill] sm:$0xff] %v12970_v54 }
 0x84e   : > { %v12962_v55 = vpop.permute.xlu2 %4583 }
 0x84f   : > { %5013 = vadd.xlane.f32.xlu1 %v5012_v21  ;;  %v12943_v8 = vpop.permute.xlu1 %4667  ;;  %v4210_v21 = vmul.f32 1.442695, %v3971_v32  ;;  %v4878_v51 = vperm.slane %v12962_v55, %v11323_v0 }
 0x851   : > { %9378 = vpow2.f32 %v4210_v21  ;;  %v16906_v21 = vld [vmem:[#allocation165_spill] sm:$0xff] }
 0x852   : > { %4652 = vperm.xlu0 %8890, %v12929_v52   ;;  %9380 = vpow2.f32 %v4216_v56  ;;  %v3980_v45 = vsub.f32 %v16906_v21, %v12755_v4 }
 0x853   : > { %9382 = vpow2.f32 %v4222_v60 }
 0x856   : > { %v12977_v34 = vpop.permute.xlu2 %4592 }
 0x857   : > { %v12954_v11 = vpop.permute.xlu1 %4676  ;;  %v12981_v57 = vpop.eup %9378 }
 0x858   : > { %16903 = vst [vmem:[#allocation89_spill] sm:$0xff] %v12981_v57  ;;  %v12990_v32 = vpop.eup %9380 }
 0x859   : > { %16905 = vst [vmem:[#allocation90_spill] sm:$0xff] %v12990_v32  ;;  %v12995_v56 = vpop.eup %9382 }
 0x85a   : > { %4661 = vperm.xlu0 %8890, %v12936_v61   ;;  %16907 = vst [vmem:[#allocation9_spill] sm:$0xff] %v12995_v56 }
 0x85e   : > { %v12986_v36 = vpop.permute.xlu2 %4601 }
 0x85f   : > { %v12966_v15 = vpop.permute.xlu1 %4685 }
 0x862   : > { %4670 = vperm.xlu0 %8890, %v12945_v53  }
 0x867   : > { %v12979_v42 = vpop.permute.xlu1 %4694 }
 0x869   : > { %v12968_v25 = vpop.xlane.xlu0 %5016 }
 0x86a   : > { %4679 = vperm.xlu0 %8890, %v12950_v33  }
 0x86f   : > { %v12988_v29 = vpop.permute.xlu1 %4703 }
 0x872   : > { %4688 = vperm.xlu0 %8890, %v12959_v18   ;;  %v3983_v18 = vsub.f32 %v16908_v59, %v12755_v4 }
 0x874   : > { %v4234_v60 = vmul.f32 1.442695, %v3983_v18 }
 0x877   : > { %v12999_v44 = vpop.permute.xlu1 %4712 }
 0x87a   : > { %4697 = vperm.xlu0 %8890, %v12970_v54   ;;  %v12997_v54 = vpop.permute.xlu2 %4610 }
 0x87b   : > { %v4894_v55 = vperm.slane %v12997_v54, %v11320_v13  ;;  %v4870_v54 = vsel %vm3514_vm1, %v4869_v31, %v4868_v17  ;;  %v4885_v31 = vperm.slane %v12765_v41, %v11323_v0 }
 0x87c   : > { %v12975_v48 = vpop.permute.xlu0 %4571 }
 0x87d   : > { %v4871_v43 = vperm.slane %v12975_v48, %v11323_v0  ;;  %v4911_v48 = vperm.slane %v12894_v7, %v11317_v39  ;;  %v4901_v7 = vperm.slane %v12805_v30, %v11320_v13 }
 0x87f   : > { %v13011_v61 = vpop.permute.xlu1 %4721 }
 0x882   : > { %4706 = vperm.xlu0 %8890, %v12981_v57   ;;  %v4228_v57 = vmul.f32 1.442695, %v3980_v45  ;;  %v4620_v21 = vpop.permute.xlu2 %4619  ;;  %v16910_v45 = vld [vmem:[#allocation151_spill] sm:$0xff] }
 0x883   : > { %v3986_v53 = vsub.f32 %v16910_v45, %v12770_v38 }
 0x884   : > { %v4581_v19 = vpop.permute.xlu0 %4580  ;;  %9384 = vpow2.f32 %v4228_v57 }
 0x885   : > { %9386 = vpow2.f32 %v4234_v60 }
 0x887   : > { %v13016_v1 = vpop.permute.xlu1 %4730 }
 0x88a   : > { %4715 = vperm.xlu0 %8890, %v12990_v32   ;;  %v13006_v32 = vpop.eup %9384  ;;  %v4629_v18 = vpop.permute.xlu2 %4628 }
 0x88b   : > { %16909 = vst [vmem:[#allocation101_spill] sm:$0xff] %v13006_v32  ;;  %v13013_v57 = vpop.eup %9386 }
 0x88c   : > { %v4590_v37 = vpop.permute.xlu0 %4589  ;;  %16911 = vst [vmem:[#allocation16_spill] sm:$0xff] %v13013_v57 }
 0x88f   : > { %v13021_v45 = vpop.permute.xlu1 %4739 }
 0x892   : > { %4724 = vperm.xlu0 %8890, %v12995_v56   ;;  %v4240_v56 = vmul.f32 1.442695, %v3986_v53  ;;  %v4876_v53 = vperm.slane %v4581_v19, %v11317_v39  ;;  %v4889_v19 = vperm.slane %v12986_v36, %v11313_v62  ;;  %v4904_v36 = vperm.slane %v4629_v18, %v11317_v39 }
 0x894   : > { %v13004_v33 = vpop.permute.xlu0 %4598  ;;  %9388 = vpow2.f32 %v4240_v56  ;;  %v4875_v56 = vperm.slane %v12741_v2, %v11313_v62  ;;  %v4882_v2 = vperm.slane %v4590_v37, %v11313_v62  ;;  %v4896_v37 = vperm.slane %v12797_v14, %v11313_v62 }
 0x895   : > { %v4887_v14 = vperm.slane %v13004_v33, %v11320_v13  ;;  %v4891_v17 = vsel %vm3514_vm1, %v4890_v46, %v4889_v19  ;;  %v4906_v19 = vperm.slane %v12822_v63, %v11323_v0  ;;  %v4917_v63 = vperm.slane %v12926_v58, %v11313_v62 }
 0x896   : > { %v4877_v5 = vsel %vm3514_vm1, %v4876_v53, %v4875_v56 }
 0x897   : > { %v13040_v26 = vpop.permute.xlu1 %4748  ;;  %v4879_v6 = vsel %vm3518_vm2, %v4878_v51, %v4877_v5 }
 0x89a   : > { %4733 = vperm.xlu0 %8890, %v13006_v32   ;;  %v13018_v50 = vpop.eup %9388  ;;  %v4638_v32 = vpop.permute.xlu2 %4637 }
 0x89b   : > { %16912 = vst [vmem:[#allocation106_spill] sm:$0xff] %v13018_v50  ;;  %v4910_v53 = vperm.slane %v4638_v32, %v11313_v62 }
 0x89c   : > { %v4608_v52 = vpop.permute.xlu0 %4607 }
 0x8a2   : > { %4742 = vperm.xlu0 %8890, %v13013_v57   ;;  %v4873_v57 = vperm.slane %v12952_v20, %v11320_v13  ;;  %v4647_v47 = vpop.permute.xlu2 %4646 }
 0x8a3   : > { %v4915_v18 = vperm.slane %v4647_v47, %v11320_v13  ;;  %v4912_v47 = vsel %vm3514_vm1, %v4911_v48, %v4910_v53  ;;  %v4922_v48 = vperm.slane %v12934_v3, %v11320_v13 }
 0x8a4   : > { %v4617_v59 = vpop.permute.xlu0 %4616 }
 0x8a5   : > { %v4897_v20 = vperm.slane %v4617_v59, %v11317_v39  ;;  %v4892_v59 = vperm.slane %v4608_v52, %v11323_v0 }
 0x8a7   : > { %v4898_v52 = vsel %vm3514_vm1, %v4897_v20, %v4896_v37  ;;  %v4893_v33 = vsel %vm3518_vm2, %v4892_v59, %v4891_v17 }
 0x8a8   : > { %v4895_v37 = vsel %vm3522_vm3, %v4894_v55, %v4893_v33 }
 0x8aa   : > { %4751 = vperm.xlu0 %8890, %v13018_v50   ;;  %v4883_v50 = vperm.slane %v12977_v34, %v11317_v39  ;;  %v4899_v34 = vperm.slane %v4620_v21, %v11323_v0  ;;  %v4880_v21 = vperm.slane %v12750_v10, %v11320_v13  ;;  %v4872_v10 = vsel %vm3518_vm2, %v4871_v43, %v4870_v54  ;;  %v4656_v43 = vpop.permute.xlu2 %4655 }
 0x8ac   : > { %v4626_v60 = vpop.permute.xlu0 %4625  ;;  %v4884_v32 = vsel %vm3514_vm1, %v4883_v50, %v4882_v2  ;;  %v4881_v50 = vsel %vm3522_vm3, %v4880_v21, %v4879_v6  ;;  %v4900_v5 = vsel %vm3518_vm2, %v4899_v34, %v4898_v52  ;;  %v4874_v2 = vsel %vm3522_vm3, %v4873_v57, %v4872_v10 }
 0x8ad   : > { %v4903_v40 = vperm.slane %v4626_v60, %v11313_v62  ;;  %v4886_v60 = vsel %vm3518_vm2, %v4885_v31, %v4884_v32  ;;  %v4902_v57 = vsel %vm3522_vm3, %v4901_v7, %v4900_v5  ;;  %v4920_v21 = vperm.slane %v4656_v43, %v11323_v0 }
 0x8ae   : > { %v4888_v30 = vsel %vm3522_vm3, %v4887_v14, %v4886_v60 }
 0x8af   : > { %v4905_v41 = vsel %vm3514_vm1, %v4904_v36, %v4903_v40  ;;  %v4994_v36 = vsel %vm3741_vm4, %v4881_v50, %v4874_v2 }
 0x8b0   : > { %v4907_v53 = vsel %vm3518_vm2, %v4906_v19, %v4905_v41 }
 0x8b4   : > { %v4635_v24 = vpop.permute.xlu0 %4634 }
 0x8b5   : > { %v4908_v46 = vperm.slane %v4635_v24, %v11320_v13 }
 0x8b7   : > { %v4909_v55 = vsel %vm3522_vm3, %v4908_v46, %v4907_v53 }
 0x8bc   : > { %v4644_v56 = vpop.permute.xlu0 %4643 }
 0x8bd   : > { %v4913_v51 = vperm.slane %v4644_v56, %v11323_v0  ;;  %v4995_v56 = vsel %vm3743_vm5, %v4888_v30, %v4994_v36 }
 0x8be   : > { %v4996_v6 = vsel %vm3745_vm6, %v4895_v37, %v4995_v56 }
 0x8bf   : > { %v4914_v34 = vsel %vm3518_vm2, %v4913_v51, %v4912_v47  ;;  %v4997_v14 = vsel %vm3747_vm7, %v4902_v57, %v4996_v6  ;;  %v16914_v57 = vld [vmem:[#allocation7_spill] sm:$0xff] }
 0x8c0   : > { %v4916_v58 = vsel %vm3522_vm3, %v4915_v18, %v4914_v34  ;;  %v4998_v31 = vsel %vm3749_vm8, %v4909_v55, %v4997_v14 }
 0x8c1   : > { %v4999_v10 = vsel %vm3751_vm9, %v4916_v58, %v4998_v31 }
 0x8c2   : > { %v13085_v20 = vpop.xlane.xlu1 %5013 }
 0x8c3   : > { %v5028_v40 = vperm.slane %v13085_v20, 0  ;;  %v13091_v24 = vperm.slane %v13085_v20, 1  ;;  %v13115_v7 = vperm.slane %v13085_v20, 2  ;;  %v13131_v55 = vperm.slane %v13085_v20, 3 }
 0x8c4   : > { %v4653_v59 = vpop.permute.xlu0 %4652 }
 0x8c5   : > { %9390 = vrcp.f32 %v5028_v40  ;;  %v4918_v54 = vperm.slane %v4653_v59, %v11317_v39  ;;  %v5103_v5 = vand.u32 2147483648, %v5028_v40  ;;  %v5101_v46 = vand.u32 2147483647, %v5028_v40 }
 0x8c6   : > { %9392 = vrcp.f32 %v13091_v24  ;;  %vm5097_vm12 = vweird.f32 %v5028_v40  ;;  %v5121_v6 = vand.u32 2147483648, %v13091_v24  ;;  %v5119_v14 = vand.u32 2147483647, %v13091_v24 }
 0x8c7   : > { %v4919_v32 = vsel %vm3514_vm1, %v4918_v54, %v4917_v63  ;;  %9394 = vrcp.f32 %v13115_v7  ;;  %v5104_v2 = vor.u32 1.1754944e-38, %v5103_v5  ;;  %vm5102_vm14 = vcmp.eq.f32.partialorder %v5101_v46, 8.507059e+37  ;;  %v16913_v63 = vld [vmem:[#allocation166_spill] sm:$0xff] }
 0x8c8   : > { %v4921_v52 = vsel %vm3518_vm2, %v4920_v21, %v4919_v32  ;;  %v3957_v36 = vsub.f32 %v16913_v63, %v16888_v16  ;;  %v16916_v16 = vld [vmem:[#allocation149_spill] sm:$0xff]  ;;  %v13167_v63 = vperm.slane %v13085_v20, 5 }
 0x8c9   : > { %v4923_v17 = vsel %vm3522_vm3, %v4922_v48, %v4921_v52  ;;  %v3960_v58 = vsub.f32 %v16916_v16, %v16893_v28  ;;  %v16917_v48 = vld [vmem:[#allocation154_spill] sm:$0xff] }
 0x8ca   : > { %v5000_v51 = vsel %vm3753_vm10, %v4923_v17, %v4999_v10  ;;  %v4182_v56 = vmul.f32 1.442695, %v3957_v36  ;;  %v5122_v17 = vor.u32 1.1754944e-38, %v5121_v6 }
 0x8cb   : > { %v9391_v18 = vpop.eup %9390  ;;  %v5018_v3 = vsel %vm16245_vm0, %v5000_v51, 0.0  ;;  %v4188_v10 = vmul.f32 1.442695, %v3960_v58 }
 0x8cc   : > { %5019 = vadd.xlane.f32.xlu2 %v5018_v3  ;;  %v5093_v50 = vmul.f32 %v9391_v18, %v5028_v40  ;;  %v9393_v33 = vpop.eup %9392  ;;  %vm5098_vm11 = vweird.f32 %v9391_v18  ;;  %9396 = vpow2.f32 %v4182_v56 }
 0x8cd   : > { %v5111_v19 = vmul.f32 %v9393_v33, %v13091_v24  ;;  %vm5099_vm13 = vmor %vm5097_vm12, %vm5098_vm11  ;;  %v9395_v37 = vpop.eup %9394  ;;  %vm5116_vm15 = vweird.f32 %v9393_v33  ;;  %vm5115_vm11 = vweird.f32 %v13091_v24  ;;  %9398 = vrcp.f32 %v13131_v55 }
 0x8ce   : > { %v5094_v60 = vsub.f32 1.0, %v5093_v50  ;;  %v5129_v40 = vmul.f32 %v9395_v37, %v13115_v7  ;;  %vm5117_vm12 = vmor %vm5115_vm11, %vm5116_vm15  ;;  %9400 = vpow2.f32 %v4188_v10  ;;  %vm5133_vm15 = vweird.f32 %v13115_v7 }
 0x8cf   : > { %v5112_v43 = vsub.f32 1.0, %v5111_v19  ;;  %v5137_v19 = vand.u32 2147483647, %v13115_v7 }
 0x8d0   : > { %v5095_v41 = vmul.f32 %v9391_v18, %v5094_v60  ;;  %v5130_v21 = vsub.f32 1.0, %v5129_v40  ;;  %v5139_v60 = vand.u32 2147483648, %v13115_v7  ;;  %v16925_v40 = vld [vmem:[#allocation100_spill] sm:$0xff] }
 0x8d1   : > { %v5113_v59 = vmul.f32 %v9393_v33, %v5112_v43 }
 0x8d2   : > { %v5096_v47 = vadd.f32 %v9391_v18, %v5095_v41  ;;  %v5131_v31 = vmul.f32 %v9395_v37, %v5130_v21  ;;  %v13144_v51 = vpop.eup %9396  ;;  %v16921_v41 = vld [vmem:[#allocation97_spill] sm:$0xff] }
 0x8d3   : > { %v5114_v54 = vadd.f32 %v9393_v33, %v5113_v59  ;;  %16919 = vst [vmem:[#allocation52_spill] sm:$0xff] %v13144_v51  ;;  %v9399_v50 = vpop.eup %9398  ;;  %v16924_v59 = vld [vmem:[#allocation164_spill] sm:$0xff] }
 0x8d4   : > { %v5100_v30 = vsel %vm5099_vm13, %v9391_v18, %v5096_v47  ;;  %vm5120_vm13 = vcmp.eq.f32.partialorder %v5119_v14, 8.507059e+37  ;;  %v13147_v18 = vperm.slane %v13085_v20, 4  ;;  %v5132_v24 = vadd.f32 %v9395_v37, %v5131_v31 }
 0x8d5   : > { %v13120_v34 = vsel %vm5102_vm14, %v5104_v2, %v5100_v30  ;;  %v5118_v52 = vsel %vm5117_vm12, %v9393_v33, %v5114_v54  ;;  %vm5134_vm14 = vweird.f32 %v9395_v37  ;;  %v16920_v33 = vld [vmem:[#allocation161_spill] sm:$0xff]  ;;  %v5147_v2 = vmul.f32 %v9399_v50, %v13131_v55 }
 0x8d6   : > { %v13126_v53 = vmul.f32 %v16914_v57, %v13120_v34  ;;  %v13138_v32 = vmul.f32 %v16917_v48, %v13120_v34  ;;  %v13149_v3 = vsel %vm5120_vm13, %v5122_v17, %v5118_v52  ;;  %v3963_v5 = vsub.f32 %v16920_v33, %v16893_v28  ;;  %vm5135_vm11 = vmor %vm5133_vm15, %vm5134_vm14  ;;  %v13164_v28 = vpop.eup %9400  ;;  %v16928_v52 = vld [vmem:[#allocation168_spill] sm:$0xff]  ;;  %v16929_v17 = vld [vmem:[#allocation102_spill] sm:$0xff] }
 0x8d7   : > { %v13157_v46 = vmul.f32 %v16921_v41, %v13149_v3  ;;  %9402 = vrcp.f32 %v13147_v18  ;;  %v5136_v47 = vsel %vm5135_vm11, %v9395_v37, %v5132_v24  ;;  %v5140_v30 = vor.u32 1.1754944e-38, %v5139_v60  ;;  %16923 = vst [vmem:[#allocation54_spill] sm:$0xff] %v13164_v28 }
 0x8d8   : > { %16915 = vst [vmem:[#allocation32_spill] sm:$0xff] %v13126_v53  ;;  %5797 = vperm.xlu0 %8890, %v13126_v53   ;;  %v4194_v43 = vmul.f32 1.442695, %v3963_v5  ;;  %vm5138_vm12 = vcmp.eq.f32.partialorder %v5137_v19, 8.507059e+37  ;;  %v5148_v7 = vsub.f32 1.0, %v5147_v2  ;;  %v3966_v37 = vsub.f32 %v16924_v59, %v12611_v23  ;;  %v16933_v59 = vld [vmem:[#allocation103_spill] sm:$0xff] }
 0x8d9   : > { %16918 = vst [vmem:[#allocation23_spill] sm:$0xff] %v13138_v32  ;;  %v13169_v36 = vsel %vm5138_vm12, %v5140_v30, %v5136_v47  ;;  %vm5152_vm13 = vweird.f32 %v9399_v50  ;;  %v5157_v14 = vand.u32 2147483648, %v13131_v55  ;;  %v3969_v31 = vsub.f32 %v16928_v52, %v12664_v22 }
 0x8da   : > { %16922 = vst [vmem:[#allocation42_spill] sm:$0xff] %v13157_v46  ;;  %9404 = vpow2.f32 %v4194_v43  ;;  %v13176_v56 = vmul.f32 %v16925_v40, %v13169_v36  ;;  %v5149_v54 = vmul.f32 %v9399_v50, %v5148_v7  ;;  %v4200_v6 = vmul.f32 1.442695, %v3966_v37  ;;  %v16932_v43 = vld [vmem:[#allocation159_spill] sm:$0xff] }
 0x8db   : > { %9406 = vrcp.f32 %v13167_v63  ;;  %v13189_v10 = vmul.f32 %v16929_v17, %v13169_v36  ;;  %vm5151_vm14 = vweird.f32 %v13131_v55  ;;  %v5155_v24 = vand.u32 2147483647, %v13131_v55 }
 0x8dc   : > { %16926 = vst [vmem:[#allocation94_spill] sm:$0xff] %v13176_v56  ;;  %v5150_v58 = vadd.f32 %v9399_v50, %v5149_v54  ;;  %9408 = vpow2.f32 %v4200_v6  ;;  %vm5153_vm15 = vmor %vm5151_vm14, %vm5152_vm13  ;;  %v5158_v41 = vor.u32 1.1754944e-38, %v5157_v14  ;;  %v4206_v19 = vmul.f32 1.442695, %v3969_v31 }
 0x8dd   : > { %v9403_v57 = vpop.eup %9402  ;;  %16930 = vst [vmem:[#allocation131_spill] sm:$0xff] %v13189_v10  ;;  %vm5156_vm11 = vcmp.eq.f32.partialorder %v5155_v24, 8.507059e+37  ;;  %v13198_v22 = vperm.slane %v13085_v20, 6  ;;  %v3972_v7 = vsub.f32 %v16932_v43, %v12716_v49  ;;  %vm5169_vm13 = vweird.f32 %v13147_v18 }
 0x8de   : > { %v5165_v21 = vmul.f32 %v9403_v57, %v13147_v18  ;;  %v5154_v60 = vsel %vm5153_vm15, %v9399_v50, %v5150_v58  ;;  %vm5170_vm12 = vweird.f32 %v9403_v57  ;;  %9410 = vpow2.f32 %v4206_v19 }
 0x8df   : > { %v13200_v2 = vsel %vm5156_vm11, %v5158_v41, %v5154_v60  ;;  %v5175_v50 = vand.u32 2147483648, %v13147_v18  ;;  %v5173_v40 = vand.u32 2147483647, %v13147_v18  ;;  %9412 = vrcp.f32 %v13198_v22  ;;  %vm5171_vm14 = vmor %vm5169_vm13, %vm5170_vm12  ;;  %v16938_v60 = vld [vmem:[#allocation105_spill] sm:$0xff] }
 0x8e0   : > { %5806 = vperm.xlu0 %8890, %v13138_v32   ;;  %v13181_v16 = vpop.eup %9404  ;;  %v5166_v48 = vsub.f32 1.0, %v5165_v21  ;;  %v13208_v37 = vmul.f32 %v16933_v59, %v13200_v2  ;;  %v4212_v58 = vmul.f32 1.442695, %v3972_v7  ;;  %v13217_v14 = vperm.slane %v13085_v20, 7  ;;  %v16942_v7 = vld [vmem:[#allocation8_spill] sm:$0xff]  ;;  %v16943_v59 = vld [vmem:[#allocation107_spill] sm:$0xff] }
 0x8e1   : > { %16927 = vst [vmem:[#allocation110_spill] sm:$0xff] %v13181_v16  ;;  %v9407_v23 = vpop.eup %9406  ;;  %v5176_v6 = vor.u32 1.1754944e-38, %v5175_v50  ;;  %vm5174_vm15 = vcmp.eq.f32.partialorder %v5173_v40, 8.507059e+37  ;;  %v5193_v17 = vand.u32 2147483648, %v13167_v63  ;;  %vm5187_vm12 = vweird.f32 %v13167_v63 }
 0x8e2   : > { %v5167_v33 = vmul.f32 %v9403_v57, %v5166_v48  ;;  %v5183_v5 = vmul.f32 %v9407_v23, %v13167_v63  ;;  %v13195_v47 = vpop.eup %9408  ;;  %16934 = vst [vmem:[#allocation146_spill] sm:$0xff] %v13208_v37  ;;  %vm5188_vm11 = vweird.f32 %v9407_v23  ;;  %9414 = vpow2.f32 %v4212_v58 }
 0x8e3   : > { %16931 = vst [vmem:[#allocation114_spill] sm:$0xff] %v13195_v47  ;;  %v5191_v20 = vand.u32 2147483647, %v13167_v63  ;;  %9416 = vrcp.f32 %v13217_v14  ;;  %vm5189_vm13 = vmor %vm5187_vm12, %vm5188_vm11  ;;  %v5194_v19 = vor.u32 1.1754944e-38, %v5193_v17  ;;  %vm5205_vm11 = vweird.f32 %v13198_v22 }
 0x8e4   : > { %4664 = vperm.xlu2 %8888, %v13144_v51   ;;  %v5168_v55 = vadd.f32 %v9403_v57, %v5167_v33  ;;  %v5184_v30 = vsub.f32 1.0, %v5183_v5  ;;  %v13214_v48 = vpop.eup %9410 }
 0x8e5   : > { %16935 = vst [vmem:[#allocation137_spill] sm:$0xff] %v13214_v48  ;;  %v9413_v31 = vpop.eup %9412 }
 0x8e6   : > { %v5172_v54 = vsel %vm5171_vm14, %v9403_v57, %v5168_v55  ;;  %v5185_v21 = vmul.f32 %v9407_v23, %v5184_v30  ;;  %v16937_v57 = vld [vmem:[#allocation167_spill] sm:$0xff]  ;;  %v5201_v41 = vmul.f32 %v9413_v31, %v13198_v22  ;;  %vm5192_vm14 = vcmp.eq.f32.partialorder %v5191_v20, 8.507059e+37 }
 0x8e7   : > { %v13219_v52 = vsel %vm5174_vm15, %v5176_v6, %v5172_v54  ;;  %v3975_v24 = vsub.f32 %v16937_v57, %v12716_v49  ;;  %v13237_v30 = vperm.slane %v12968_v25, 0  ;;  %vm5206_vm15 = vweird.f32 %v9413_v31  ;;  %v16947_v20 = vld [vmem:[#allocation119_spill] sm:$0xff] }
 0x8e8   : > { %5812 = vperm.xlu0 %8890, %v13157_v46   ;;  %16936 = vst [vmem:[#allocation43_spill] sm:$0xff] %v13219_v52  ;;  %v5186_v18 = vadd.f32 %v9407_v23, %v5185_v21  ;;  %v13227_v33 = vmul.f32 %v16938_v60, %v13219_v52  ;;  %v13234_v49 = vpop.eup %9414  ;;  %v5202_v63 = vsub.f32 1.0, %v5201_v41  ;;  %v5211_v57 = vand.u32 2147483648, %v13198_v22  ;;  %vm5207_vm12 = vmor %vm5205_vm11, %vm5206_vm15 }
 0x8e9   : > { %v4218_v55 = vmul.f32 1.442695, %v3975_v24  ;;  %16940 = vst [vmem:[#allocation138_spill] sm:$0xff] %v13234_v49  ;;  %v9417_v43 = vpop.eup %9416  ;;  %v16946_v24 = vld [vmem:[#allocation118_spill] sm:$0xff]  ;;  %v5209_v41 = vand.u32 2147483647, %v13198_v22  ;;  %vm5223_vm15 = vweird.f32 %v13217_v14 }
 0x8ea   : > { %16939 = vst [vmem:[#allocation73_spill] sm:$0xff] %v13227_v33  ;;  %v5190_v5 = vsel %vm5189_vm13, %v9407_v23, %v5186_v18  ;;  %v3978_v23 = vsub.f32 %v16942_v7, %v12732_v35  ;;  %v5203_v54 = vmul.f32 %v9413_v31, %v5202_v63  ;;  %v5219_v21 = vmul.f32 %v9417_v43, %v13217_v14 }
 0x8eb   : > { %v13239_v50 = vsel %vm5192_vm14, %v5194_v19, %v5190_v5  ;;  %9418 = vpow2.f32 %v4218_v55  ;;  %v3981_v60 = vsub.f32 %v16946_v24, %v12755_v4  ;;  %v5212_v7 = vor.u32 1.1754944e-38, %v5211_v57 }
 0x8ec   : > { %4673 = vperm.xlu2 %8888, %v13164_v28   ;;  %16941 = vst [vmem:[#allocation71_spill] sm:$0xff] %v13239_v50  ;;  %v13246_v40 = vmul.f32 %v16943_v59, %v13239_v50  ;;  %9420 = vrcp.f32 %v13237_v30  ;;  %v4224_v6 = vmul.f32 1.442695, %v3978_v23  ;;  %v5204_v18 = vadd.f32 %v9413_v31, %v5203_v54 }
 0x8ed   : > { %v5220_v17 = vsub.f32 1.0, %v5219_v21  ;;  %v13259_v5 = vmul.f32 %v16947_v20, %v13239_v50  ;;  %v4230_v23 = vmul.f32 1.442695, %v3981_v60  ;;  %vm5210_vm13 = vcmp.eq.f32.partialorder %v5209_v41, 8.507059e+37 }
 0x8ee   : > { %16944 = vst [vmem:[#allocation64_spill] sm:$0xff] %v13246_v40  ;;  %9422 = vpow2.f32 %v4224_v6  ;;  %v5208_v19 = vsel %vm5207_vm12, %v9413_v31, %v5204_v18  ;;  %v13268_v4 = vperm.slane %v12968_v25, 1  ;;  %vm5224_vm14 = vweird.f32 %v9417_v43  ;;  %v16951_v6 = vld [vmem:[#allocation61_spill] sm:$0xff] }
 0x8ef   : > { %16948 = vst [vmem:[#allocation84_spill] sm:$0xff] %v13259_v5  ;;  %v5221_v55 = vmul.f32 %v9417_v43, %v5220_v17  ;;  %v13270_v54 = vsel %vm5210_vm13, %v5212_v7, %v5208_v19  ;;  %9424 = vpow2.f32 %v4230_v23  ;;  %v5229_v31 = vand.u32 2147483648, %v13217_v14  ;;  %v16952_v17 = vld [vmem:[#allocation109_spill] sm:$0xff]  ;;  %vm5225_vm11 = vmor %vm5223_vm15, %vm5224_vm14 }
 0x8f0   : > { %5821 = vperm.xlu0 %8890, %v13176_v56   ;;  %16950 = vst [vmem:[#allocation132_spill] sm:$0xff] %v13270_v54  ;;  %v3984_v18 = vsub.f32 %v16951_v6, %v12770_v38  ;;  %v13278_v57 = vmul.f32 %v16952_v17, %v13270_v54  ;;  %v5227_v24 = vand.u32 2147483647, %v13217_v14  ;;  %9426 = vrcp.f32 %v13268_v4 }
 0x8f1   : > { %v13251_v58 = vpop.eup %9418  ;;  %v5222_v22 = vadd.f32 %v9417_v43, %v5221_v55  ;;  %v5230_v41 = vor.u32 1.1754944e-38, %v5229_v31  ;;  %v5247_v6 = vand.u32 2147483648, %v13237_v30  ;;  %vm5241_vm14 = vweird.f32 %v13237_v30 }
 0x8f2   : > { %16945 = vst [vmem:[#allocation123_spill] sm:$0xff] %v13251_v58  ;;  %v9421_v35 = vpop.eup %9420  ;;  %v4236_v19 = vmul.f32 1.442695, %v3984_v18  ;;  %vm5228_vm12 = vcmp.eq.f32.partialorder %v5227_v24, 8.507059e+37  ;;  %v5245_v18 = vand.u32 2147483647, %v13237_v30  ;;  %v13508_v51 = vmul.f32 %v16997_v12, %v13270_v54 }
 0x8f3   : > { %v5237_v63 = vmul.f32 %v9421_v35, %v13237_v30  ;;  %16953 = vst [vmem:[#allocation121_spill] sm:$0xff] %v13278_v57  ;;  %v5226_v60 = vsel %vm5225_vm11, %v9417_v43, %v5222_v22  ;;  %vm5242_vm13 = vweird.f32 %v9421_v35  ;;  %v16955_v43 = vld [vmem:[#allocation130_spill] sm:$0xff]  ;;  %v4932_v54 = vperm.slane %v12954_v11, %v11317_v39 }
 0x8f4   : > { %4682 = vperm.xlu2 %8888, %v13181_v16   ;;  %v13265_v59 = vpop.eup %9422  ;;  %v13289_v7 = vsel %vm5228_vm12, %v5230_v41, %v5226_v60  ;;  %9428 = vpow2.f32 %v4236_v19  ;;  %v3987_v22 = vsub.f32 %v16955_v43, %v12770_v38  ;;  %vm5243_vm15 = vmor %vm5241_vm14, %vm5242_vm13  ;;  %v5248_v60 = vor.u32 1.1754944e-38, %v5247_v6  ;;  %16998 = vst [vmem:[#allocation100_spill] sm:$0xff] %v13508_v51 }
 0x8f5   : > { %16949 = vst [vmem:[#allocation135_spill] sm:$0xff] %v13265_v59  ;;  %v5238_v21 = vsub.f32 1.0, %v5237_v63  ;;  %v13284_v55 = vpop.eup %9424  ;;  %v13287_v63 = vperm.slane %v12968_v25, 2  ;;  %vm5246_vm11 = vcmp.eq.f32.partialorder %v5245_v18, 8.507059e+37  ;;  %v13307_v41 = vperm.slane %v12968_v25, 3 }
 0x8f6   : > { %16954 = vst [vmem:[#allocation44_spill] sm:$0xff] %v13284_v55  ;;  %v9427_v23 = vpop.eup %9426  ;;  %vm5259_vm13 = vweird.f32 %v13268_v4 }
 0x8f7   : > { %v5239_v20 = vmul.f32 %v9421_v35, %v5238_v21  ;;  %v16956_v21 = vld [vmem:[#allocation31_spill] sm:$0xff]  ;;  %9430 = vrcp.f32 %v13287_v63  ;;  %v5255_v24 = vmul.f32 %v9427_v23, %v13268_v4  ;;  %vm5260_vm12 = vweird.f32 %v9427_v23 }
 0x8f8   : > { %5830 = vperm.xlu0 %8890, %v13189_v10   ;;  %v13297_v31 = vmul.f32 %v16956_v21, %v13289_v7  ;;  %v16960_v21 = vld [vmem:[#allocation41_spill] sm:$0xff]  ;;  %vm5261_vm14 = vmor %vm5259_vm13, %vm5260_vm12  ;;  %vm5277_vm12 = vweird.f32 %v13287_v63 }
 0x8f9   : > { %v5240_v14 = vadd.f32 %v9421_v35, %v5239_v20  ;;  %v4242_v20 = vmul.f32 1.442695, %v3987_v22  ;;  %v5256_v30 = vsub.f32 1.0, %v5255_v24 }
 0x8fa   : > { %16957 = vst [vmem:[#allocation74_spill] sm:$0xff] %v13297_v31  ;;  %v13304_v38 = vpop.eup %9428 }
 0x8fb   : > { %v5244_v17 = vsel %vm5243_vm15, %v9421_v35, %v5240_v14  ;;  %16958 = vst [vmem:[#allocation10_spill] sm:$0xff] %v13304_v38  ;;  %9432 = vpow2.f32 %v4242_v20  ;;  %v13317_v14 = vpop.permute.xlu0 %4661  ;;  %v5257_v6 = vmul.f32 %v9427_v23, %v5256_v30  ;;  %v5265_v20 = vand.u32 2147483648, %v13268_v4 }
 0x8fc   : > { %4691 = vperm.xlu2 %8888, %v13195_v47   ;;  %v13309_v19 = vsel %vm5246_vm11, %v5248_v60, %v5244_v17  ;;  %9434 = vrcp.f32 %v13307_v41  ;;  %v5263_v30 = vand.u32 2147483647, %v13268_v4 }
 0x8fd   : > { %16959 = vst [vmem:[#allocation67_spill] sm:$0xff] %v13309_v19  ;;  %v9431_v43 = vpop.eup %9430  ;;  %v13314_v35 = vmul.f32 %v16960_v21, %v13309_v19  ;;  %v5258_v17 = vadd.f32 %v9427_v23, %v5257_v6  ;;  %v16963_v21 = vld [vmem:[#allocation51_spill] sm:$0xff] }
 0x8fe   : > { %v5273_v22 = vmul.f32 %v9431_v43, %v13287_v63  ;;  %vm5264_vm15 = vcmp.eq.f32.partialorder %v5263_v30, 8.507059e+37  ;;  %vm5278_vm11 = vweird.f32 %v9431_v43 }
 0x8ff   : > { %16961 = vst [vmem:[#allocation152_spill] sm:$0xff] %v13314_v35  ;;  %vm5279_vm13 = vmor %vm5277_vm12, %vm5278_vm11  ;;  %vm5295_vm11 = vweird.f32 %v13307_v41 }
 0x900   : > { %5839 = vperm.xlu0 %8890, %v13208_v37   ;;  %v5274_v24 = vsub.f32 1.0, %v5273_v22 }
 0x901   : > { %v13321_v18 = vpop.eup %9432 }
 0x902   : > { %16962 = vst [vmem:[#allocation156_spill] sm:$0xff] %v13321_v18  ;;  %v9435_v60 = vpop.eup %9434 }
 0x903   : > { %v5291_v6 = vmul.f32 %v9435_v60, %v13307_v41  ;;  %v13333_v22 = vpop.permute.xlu0 %4670 }
 0x904   : > { %4700 = vperm.xlu2 %8888, %v13214_v48  }
 0x908   : > { %5848 = vperm.xlu0 %8890, %v13227_v33  }
 0x90c   : > { %4709 = vperm.xlu2 %8888, %v13234_v49  }
 0x910   : > { %5857 = vperm.xlu0 %8890, %v13246_v40   ;;  %v16965_v40 = vld [vmem:[#allocation148_spill] sm:$0xff] }
 0x911   : > { %v13337_v33 = vmul.f32 %v16965_v40, %v13120_v34  ;;  %v5281_v40 = vand.u32 2147483647, %v13287_v63 }
 0x913   : > { %16966 = vst [vmem:[#allocation153_spill] sm:$0xff] %v13337_v33 }
 0x914   : > { %4718 = vperm.xlu2 %8888, %v13251_v58  }
 0x918   : > { %5866 = vperm.xlu0 %8890, %v13259_v5   ;;  %v5266_v5 = vor.u32 1.1754944e-38, %v5265_v20 }
 0x91c   : > { %4727 = vperm.xlu2 %8888, %v13265_v59   ;;  %v13424_v59 = vperm.slane %v12968_v25, 7 }
 0x91e   : > { %v5373_v47 = vand.u32 2147483648, %v13424_v59 }
 0x920   : > { %5875 = vperm.xlu0 %8890, %v13278_v57   ;;  %v5275_v57 = vmul.f32 %v9431_v43, %v5274_v24  ;;  %v16967_v24 = vld [vmem:[#allocation115_spill] sm:$0xff]  ;;  %v5374_v28 = vor.u32 1.1754944e-38, %v5373_v47 }
 0x922   : > { %v5276_v4 = vadd.f32 %v9431_v43, %v5275_v57 }
 0x924   : > { %4736 = vperm.xlu2 %8888, %v13284_v55   ;;  %v16981_v55 = vld [vmem:[#allocation143_spill] sm:$0xff] }
 0x928   : > { %5884 = vperm.xlu0 %8890, %v13297_v31   ;;  %v13327_v31 = vmul.f32 %v16963_v21, %v13309_v19  ;;  %v13340_v21 = vperm.slane %v12968_v25, 4 }
 0x92a   : > { %16964 = vst [vmem:[#allocation77_spill] sm:$0xff] %v13327_v31  ;;  %9436 = vrcp.f32 %v13340_v21 }
 0x92c   : > { %4745 = vperm.xlu2 %8888, %v13304_v38  }
 0x930   : > { %5893 = vperm.xlu0 %8890, %v13314_v35   ;;  %v5262_v35 = vsel %vm5261_vm14, %v9427_v23, %v5258_v17  ;;  %v5292_v23 = vsub.f32 1.0, %v5291_v6  ;;  %v5283_v17 = vand.u32 2147483648, %v13287_v63  ;;  %v16969_v6 = vld [vmem:[#allocation133_spill] sm:$0xff]  ;;  %vm5282_vm14 = vcmp.eq.f32.partialorder %v5281_v40, 8.507059e+37  ;;  %v13365_v63 = vpop.permute.xlu0 %4679 }
 0x931   : > { %v13342_v37 = vsel %vm5264_vm15, %v5266_v5, %v5262_v35  ;;  %v5280_v5 = vsel %vm5279_vm13, %v9431_v43, %v5276_v4  ;;  %vm5296_vm15 = vweird.f32 %v9435_v60  ;;  %v5301_v43 = vand.u32 2147483648, %v13307_v41  ;;  %v16971_v4 = vld [vmem:[#allocation128_spill] sm:$0xff] }
 0x932   : > { %v13348_v20 = vmul.f32 %v16967_v24, %v13342_v37  ;;  %v5293_v57 = vmul.f32 %v9435_v60, %v5292_v23  ;;  %v5284_v35 = vor.u32 1.1754944e-38, %v5283_v17  ;;  %v13361_v24 = vperm.slane %v12968_v25, 5  ;;  %vm5297_vm12 = vmor %vm5295_vm11, %vm5296_vm15 }
 0x933   : > { %v5299_v17 = vand.u32 2147483647, %v13307_v41  ;;  %vm5313_vm15 = vweird.f32 %v13340_v21 }
 0x934   : > { %4754 = vperm.xlu2 %8888, %v13321_v18   ;;  %16968 = vst [vmem:[#allocation155_spill] sm:$0xff] %v13348_v20  ;;  %v13363_v10 = vsel %vm5282_vm14, %v5284_v35, %v5280_v5  ;;  %v5294_v56 = vadd.f32 %v9435_v60, %v5293_v57  ;;  %9438 = vrcp.f32 %v13361_v24  ;;  %v5302_v35 = vor.u32 1.1754944e-38, %v5301_v43 }
 0x935   : > { %v13371_v23 = vmul.f32 %v16971_v4, %v13363_v10  ;;  %vm5300_vm13 = vcmp.eq.f32.partialorder %v5299_v17, 8.507059e+37  ;;  %v13385_v4 = vperm.slane %v12968_v25, 6 }
 0x936   : > { %v5298_v5 = vsel %vm5297_vm12, %v9435_v60, %v5294_v56  ;;  %v16975_v56 = vld [vmem:[#allocation134_spill] sm:$0xff] }
 0x937   : > { %16972 = vst [vmem:[#allocation162_spill] sm:$0xff] %v13371_v23  ;;  %v13387_v41 = vsel %vm5300_vm13, %v5302_v35, %v5298_v5  ;;  %9440 = vrcp.f32 %v13385_v4  ;;  %v16977_v35 = vld [vmem:[#allocation65_spill] sm:$0xff] }
 0x938   : > { %5902 = vperm.xlu0 %8890, %v13327_v31   ;;  %v13358_v31 = vmul.f32 %v16969_v6, %v13149_v3  ;;  %v16973_v6 = vld [vmem:[#allocation55_spill] sm:$0xff]  ;;  %v13390_v46 = vpop.permute.xlu0 %4688  ;;  %v13394_v60 = vmul.f32 %v16975_v56, %v13387_v41  ;;  %9442 = vrcp.f32 %v13424_v59 }
 0x93a   : > { %16970 = vst [vmem:[#allocation158_spill] sm:$0xff] %v13358_v31 }
 0x93b   : > { %16976 = vst [vmem:[#allocation163_spill] sm:$0xff] %v13394_v60 }
 0x93c   : > { %5800 = vperm.xlu2 %8888, %v13337_v33   ;;  %v16979_v33 = vld [vmem:[#allocation144_spill] sm:$0xff] }
 0x93d   : > { %v13409_v18 = vmul.f32 %v16979_v33, %v13387_v41  ;;  %v13421_v33 = vmul.f32 %v16981_v55, %v13200_v2  ;;  %v5335_v55 = vand.u32 2147483647, %v13361_v24 }
 0x93f   : > { %v13353_v30 = vpop.xlane.xlu2 %5019  ;;  %16980 = vst [vmem:[#allocation142_spill] sm:$0xff] %v13409_v18 }
 0x940   : > { %5911 = vperm.xlu0 %8890, %v13348_v20   ;;  %v9437_v20 = vpop.eup %9436  ;;  %16982 = vst [vmem:[#allocation151_spill] sm:$0xff] %v13421_v33 }
 0x941   : > { %v5309_v57 = vmul.f32 %v9437_v20, %v13340_v21  ;;  %v9439_v53 = vpop.eup %9438  ;;  %vm5314_vm14 = vweird.f32 %v9437_v20 }
 0x942   : > { %v5327_v5 = vmul.f32 %v9439_v53, %v13361_v24  ;;  %v9441_v56 = vpop.eup %9440  ;;  %vm5315_vm11 = vmor %vm5313_vm15, %vm5314_vm14  ;;  %vm5332_vm13 = vweird.f32 %v9439_v53  ;;  %vm5331_vm14 = vweird.f32 %v13361_v24 }
 0x943   : > { %v5310_v32 = vsub.f32 1.0, %v5309_v57  ;;  %vm5333_vm15 = vmor %vm5331_vm14, %vm5332_vm13  ;;  %vm5349_vm13 = vweird.f32 %v13385_v4 }
 0x944   : > { %5809 = vperm.xlu2 %8888, %v13358_v31   ;;  %v13382_v31 = vmul.f32 %v16973_v6, %v13149_v3  ;;  %v13403_v6 = vmul.f32 %v16977_v35, %v13169_v36  ;;  %v13415_v35 = vpop.permute.xlu0 %4697 }
 0x945   : > { %v5311_v17 = vmul.f32 %v9437_v20, %v5310_v32  ;;  %v5317_v32 = vand.u32 2147483647, %v13340_v21 }
 0x946   : > { %16974 = vst [vmem:[#allocation139_spill] sm:$0xff] %v13382_v31 }
 0x947   : > { %v13376_v40 = vpop.permute.xlu2 %4664  ;;  %16978 = vst [vmem:[#allocation165_spill] sm:$0xff] %v13403_v6  ;;  %v5312_v57 = vadd.f32 %v9437_v20, %v5311_v17  ;;  %vm5318_vm12 = vcmp.eq.f32.partialorder %v5317_v32, 8.507059e+37 }
 0x948   : > { %5920 = vperm.xlu0 %8890, %v13371_v23   ;;  %v5328_v23 = vsub.f32 1.0, %v5327_v5 }
 0x949   : > { %v5316_v17 = vsel %vm5315_vm11, %v9437_v20, %v5312_v57  ;;  %v5337_v20 = vand.u32 2147483648, %v13361_v24  ;;  %vm5336_vm11 = vcmp.eq.f32.partialorder %v5335_v55, 8.507059e+37 }
 0x94a   : > { %v5329_v5 = vmul.f32 %v9439_v53, %v5328_v23  ;;  %v16983_v23 = vld [vmem:[#allocation24_spill] sm:$0xff] }
 0x94c   : > { %5818 = vperm.xlu2 %8888, %v13382_v31   ;;  %v5319_v31 = vand.u32 2147483648, %v13340_v21  ;;  %v5330_v58 = vadd.f32 %v9439_v53, %v5329_v5  ;;  %v13440_v32 = vpop.permute.xlu0 %4706 }
 0x94e   : > { %v5320_v38 = vor.u32 1.1754944e-38, %v5319_v31 }
 0x94f   : > { %v13397_v43 = vpop.permute.xlu2 %4673 }
 0x950   : > { %5929 = vperm.xlu0 %8890, %v13394_v60   ;;  %v13426_v21 = vsel %vm5318_vm12, %v5320_v38, %v5316_v17  ;;  %v5334_v38 = vsel %vm5333_vm15, %v9439_v53, %v5330_v58  ;;  %v16985_v17 = vld [vmem:[#allocation136_spill] sm:$0xff]  ;;  %vm5350_vm12 = vweird.f32 %v9441_v56  ;;  %v5355_v53 = vand.u32 2147483648, %v13385_v4  ;;  %v16987_v58 = vld [vmem:[#allocation34_spill] sm:$0xff] }
 0x951   : > { %v13432_v31 = vmul.f32 %v16983_v23, %v13426_v21  ;;  %v13444_v5 = vmul.f32 %v16985_v17, %v13219_v52  ;;  %v13447_v23 = vperm.slane %v13353_v30, 0  ;;  %vm5351_vm14 = vmor %vm5349_vm13, %vm5350_vm12  ;;  %v16989_v17 = vld [vmem:[#allocation98_spill] sm:$0xff]  ;;  %vm5367_vm12 = vweird.f32 %v13424_v59 }
 0x953   : > { %16984 = vst [vmem:[#allocation166_spill] sm:$0xff] %v13432_v31  ;;  %9444 = vrcp.f32 %v13447_v23  ;;  %v5389_v12 = vand.u32 2147483647, %v13447_v23 }
 0x954   : > { %5827 = vperm.xlu2 %8888, %v13403_v6   ;;  %v5345_v6 = vmul.f32 %v9441_v56, %v13385_v4  ;;  %16986 = vst [vmem:[#allocation7_spill] sm:$0xff] %v13444_v5  ;;  %v13473_v49 = vpop.permute.xlu0 %4715 }
 0x957   : > { %v13413_v60 = vpop.permute.xlu2 %4682 }
 0x958   : > { %5938 = vperm.xlu0 %8890, %v13409_v18   ;;  %v5346_v18 = vsub.f32 1.0, %v5345_v6  ;;  %v5338_v6 = vor.u32 1.1754944e-38, %v5337_v20  ;;  %v5353_v20 = vand.u32 2147483647, %v13385_v4 }
 0x95a   : > { %v5347_v57 = vmul.f32 %v9441_v56, %v5346_v18  ;;  %v13449_v24 = vsel %vm5336_vm11, %v5338_v6, %v5334_v38  ;;  %v5356_v6 = vor.u32 1.1754944e-38, %v5355_v53  ;;  %vm5354_vm15 = vcmp.eq.f32.partialorder %v5353_v20, 8.507059e+37 }
 0x95b   : > { %v13455_v18 = vmul.f32 %v16987_v58, %v13449_v24  ;;  %v13469_v58 = vperm.slane %v13353_v30, 1 }
 0x95c   : > { %5836 = vperm.xlu2 %8888, %v13421_v33   ;;  %v5348_v33 = vadd.f32 %v9441_v56, %v5347_v57  ;;  %v13493_v16 = vpop.permute.xlu0 %4724 }
 0x95d   : > { %16988 = vst [vmem:[#allocation149_spill] sm:$0xff] %v13455_v18  ;;  %9446 = vrcp.f32 %v13469_v58 }
 0x95e   : > { %v5352_v38 = vsel %vm5351_vm14, %v9441_v56, %v5348_v33  ;;  %v16991_v56 = vld [vmem:[#allocation33_spill] sm:$0xff] }
 0x95f   : > { %v13437_v25 = vpop.permute.xlu2 %4691  ;;  %v13471_v4 = vsel %vm5354_vm15, %v5356_v6, %v5352_v38  ;;  %v16993_v6 = vld [vmem:[#allocation122_spill] sm:$0xff] }
 0x960   : > { %5947 = vperm.xlu0 %8890, %v13432_v31   ;;  %v9443_v31 = vpop.eup %9442  ;;  %v13478_v33 = vmul.f32 %v16991_v56, %v13471_v4 }
 0x961   : > { %v5363_v57 = vmul.f32 %v9443_v31, %v13424_v59  ;;  %vm5368_vm11 = vweird.f32 %v9443_v31 }
 0x962   : > { %16992 = vst [vmem:[#allocation161_spill] sm:$0xff] %v13478_v33  ;;  %vm5369_vm13 = vmor %vm5367_vm12, %vm5368_vm11  ;;  %vm5385_vm11 = vweird.f32 %v13447_v23 }
 0x963   : > { %v5364_v48 = vsub.f32 1.0, %v5363_v57 }
 0x964   : > { %5845 = vperm.xlu2 %8888, %v13444_v5   ;;  %v13466_v5 = vmul.f32 %v16989_v17, %v13219_v52  ;;  %v13487_v17 = vmul.f32 %v16993_v6, %v13239_v50  ;;  %v5371_v6 = vand.u32 2147483647, %v13424_v59 }
 0x965   : > { %v5365_v20 = vmul.f32 %v9443_v31, %v5364_v48 }
 0x966   : > { %16990 = vst [vmem:[#allocation154_spill] sm:$0xff] %v13466_v5  ;;  %vm5372_vm14 = vcmp.eq.f32.partialorder %v5371_v6, 8.507059e+37 }
 0x967   : > { %v13460_v55 = vpop.permute.xlu2 %4700  ;;  %16994 = vst [vmem:[#allocation97_spill] sm:$0xff] %v13487_v17  ;;  %v5366_v57 = vadd.f32 %v9443_v31, %v5365_v20 }
 0x968   : > { %5956 = vperm.xlu0 %8890, %v13455_v18   ;;  %v9445_v18 = vpop.eup %9444 }
 0x969   : > { %v5381_v38 = vmul.f32 %v9445_v18, %v13447_v23  ;;  %v13490_v56 = vpop.eup %9446  ;;  %v5370_v20 = vsel %vm5369_vm13, %v9443_v31, %v5366_v57  ;;  %vm5386_vm15 = vweird.f32 %v9445_v18  ;;  %v16999_v57 = vld [vmem:[#allocation63_spill] sm:$0xff]  ;;  %vm5390_vm13 = vcmp.eq.f32.partialorder %v5389_v12, 8.507059e+37 }
 0x96a   : > { %v13513_v59 = vsel %vm5372_vm14, %v5374_v28, %v5370_v20  ;;  %vm5387_vm12 = vmor %vm5385_vm11, %vm5386_vm15  ;;  %v13526_v28 = vpop.permute.xlu0 %4733  ;;  %vm5404_vm14 = vweird.f32 %v13490_v56  ;;  %vm5403_vm15 = vweird.f32 %v13469_v58 }
 0x96b   : > { %v13519_v47 = vmul.f32 %v16999_v57, %v13513_v59  ;;  %v4927_v57 = vperm.slane %v12943_v8, %v11323_v0  ;;  %v5407_v8 = vand.u32 2147483647, %v13469_v58  ;;  %vm13582_vm11 = vmor %vm5403_vm15, %vm5404_vm14 }
 0x96c   : > { %5854 = vperm.xlu2 %8888, %v13466_v5   ;;  %v5382_v5 = vsub.f32 1.0, %v5381_v38 }
 0x96d   : > { %17000 = vst [vmem:[#allocation168_spill] sm:$0xff] %v13519_v47 }
 0x96e   : > { %v5383_v38 = vmul.f32 %v9445_v18, %v5382_v5  ;;  %v5391_v5 = vand.u32 2147483648, %v13447_v23  ;;  %v17001_v23 = vld [vmem:[#allocation126_spill] sm:$0xff] }
 0x96f   : > { %v13481_v53 = vpop.permute.xlu2 %4709 }
 0x970   : > { %5965 = vperm.xlu0 %8890, %v13478_v33   ;;  %v16995_v33 = vld [vmem:[#allocation6_spill] sm:$0xff]  ;;  %v5384_v27 = vadd.f32 %v9445_v18, %v5383_v38  ;;  %v5392_v38 = vor.u32 1.1754944e-38, %v5391_v5 }
 0x971   : > { %v13497_v48 = vmul.f32 %v16995_v33, %v13471_v4  ;;  %v13511_v33 = vperm.slane %v13353_v30, 2 }
 0x973   : > { %16996 = vst [vmem:[#allocation164_spill] sm:$0xff] %v13497_v48  ;;  %9448 = vrcp.f32 %v13511_v33 }
 0x974   : > { %5863 = vperm.xlu2 %8888, %v13487_v17   ;;  %v5399_v17 = vmul.f32 %v13490_v56, %v13469_v58 }
 0x976   : > { %v5400_v31 = vsub.f32 1.0, %v5399_v17  ;;  %v5388_v17 = vsel %vm5387_vm12, %v9445_v18, %v5384_v27  ;;  %v4938_v27 = vperm.slane %v12966_v15, %v11313_v62  ;;  %v4959_v15 = vperm.slane %v13011_v61, %v11313_v62 }
 0x977   : > { %v13501_v9 = vpop.permute.xlu2 %4718  ;;  %v4925_v61 = vperm.slane %v13376_v40, %v11317_v39  ;;  %v13602_v40 = vpop.permute.xlu0 %4742  ;;  %vm5408_vm12 = vcmp.eq.f32.partialorder %v5407_v8, 8.507059e+37  ;;  %v4941_v8 = vperm.slane %v13437_v25, %v11323_v0  ;;  %v17012_v25 = vld [vmem:[#allocation20_spill] sm:$0xff] }
 0x978   : > { %5974 = vperm.xlu0 %8890, %v13497_v48   ;;  %v5401_v20 = vmul.f32 %v13490_v56, %v5400_v31  ;;  %v13533_v48 = vperm.slane %v13353_v30, 3  ;;  %v13545_v31 = vsel %vm5390_vm13, %v5392_v38, %v5388_v17  ;;  %v5409_v38 = vand.u32 2147483648, %v13469_v58 }
 0x979   : > { %17003 = vst [vmem:[#allocation159_spill] sm:$0xff] %v13545_v31  ;;  %v13554_v11 = vpop.eup %9448  ;;  %v4929_v58 = vperm.slane %v13333_v22, %v11320_v13  ;;  %v4934_v17 = vperm.slane %v13365_v63, %v11323_v0  ;;  %v4931_v22 = vperm.slane %v13397_v43, %v11313_v62  ;;  %v4950_v43 = vperm.slane %v13440_v32, %v11320_v13 }
 0x97a   : > { %v5402_v12 = vadd.f32 %v13490_v56, %v5401_v20  ;;  %9450 = vrcp.f32 %v13533_v48  ;;  %v17006_v20 = vld [vmem:[#allocation129_spill] sm:$0xff]  ;;  %v5410_v50 = vor.u32 1.1754944e-38, %v5409_v38  ;;  %vm5421_vm13 = vweird.f32 %v13511_v33 }
 0x97b   : > { %v13568_v5 = vmul.f32 %v17006_v20, %v13545_v31  ;;  %vm5422_vm14 = vweird.f32 %v13554_v11 }
 0x97c   : > { %5872 = vperm.xlu2 %8888, %v13508_v51   ;;  %v13537_v51 = vmul.f32 %v17001_v23, %v13289_v7  ;;  %v17004_v23 = vld [vmem:[#allocation22_spill] sm:$0xff]  ;;  %vm13709_vm15 = vmor %vm5421_vm13, %vm5422_vm14  ;;  %vm5439_vm13 = vweird.f32 %v13533_v48 }
 0x97d   : > { %v13563_v18 = vmul.f32 %v17004_v23, %v13309_v19  ;;  %17007 = vst [vmem:[#allocation167_spill] sm:$0xff] %v13568_v5  ;;  %v4924_v23 = vperm.slane %v13317_v14, %v11313_v62  ;;  %v5406_v14 = vsel %vm13582_vm11, %v13490_v56, %v5402_v12  ;;  %v4960_v19 = vperm.slane %v13493_v16, %v11317_v39  ;;  %v17010_v12 = vld [vmem:[#allocation88_spill] sm:$0xff] }
 0x97e   : > { %17002 = vst [vmem:[#allocation102_spill] sm:$0xff] %v13537_v51  ;;  %v4946_v56 = vperm.slane %v13460_v55, %v11317_v39  ;;  %v13611_v20 = vmul.f32 %v17010_v12, %v13289_v7  ;;  %v4945_v16 = vperm.slane %v13415_v35, %v11313_v62  ;;  %v13618_v38 = vsel %vm5408_vm12, %v5410_v50, %v5406_v14 }
 0x97f   : > { %v13524_v6 = vpop.permute.xlu2 %4727  ;;  %17005 = vst [vmem:[#allocation103_spill] sm:$0xff] %v13563_v18  ;;  %v4955_v55 = vperm.slane %v13473_v49, %v11323_v0  ;;  %v4926_v52 = vsel %vm3514_vm1, %v4925_v61, %v4924_v23  ;;  %v4961_v35 = vsel %vm3514_vm1, %v4960_v19, %v4959_v15  ;;  %v4952_v50 = vperm.slane %v13481_v53, %v11313_v62 }
 0x980   : > { %5983 = vperm.xlu0 %8890, %v13519_v47   ;;  %v4939_v47 = vperm.slane %v13390_v46, %v11317_v39  ;;  %v5417_v46 = vmul.f32 %v13554_v11, %v13511_v33  ;;  %17011 = vst [vmem:[#allocation105_spill] sm:$0xff] %v13611_v20  ;;  %v13620_v31 = vpop.eup %9450  ;;  %v4936_v49 = vperm.slane %v13413_v60, %v11320_v13 }
 0x981   : > { %v4947_v61 = vsel %vm3514_vm1, %v4946_v56, %v4945_v16  ;;  %v13639_v23 = vmul.f32 %v17012_v25, %v13618_v38  ;;  %v4966_v19 = vperm.slane %v13526_v28, %v11313_v62  ;;  %v4962_v53 = vperm.slane %v13524_v6, %v11323_v0 }
 0x982   : > { %v4940_v63 = vsel %vm3514_vm1, %v4939_v47, %v4938_v27  ;;  %v5418_v47 = vsub.f32 1.0, %v5417_v46  ;;  %v4933_v27 = vsel %vm3514_vm1, %v4932_v54, %v4931_v22  ;;  %v4928_v54 = vsel %vm3518_vm2, %v4927_v57, %v4926_v52 }
 0x983   : > { %17013 = vst [vmem:[#allocation8_spill] sm:$0xff] %v13639_v23  ;;  %v5435_v15 = vmul.f32 %v13620_v31, %v13533_v48  ;;  %v4971_v60 = vperm.slane %v13602_v40, %v11320_v13  ;;  %v4935_v14 = vsel %vm3518_vm2, %v4934_v17, %v4933_v27  ;;  %v4942_v46 = vsel %vm3518_vm2, %v4941_v8, %v4940_v63 }
 0x984   : > { %5881 = vperm.xlu2 %8888, %v13537_v51   ;;  %v5419_v28 = vmul.f32 %v13554_v11, %v5418_v47  ;;  %v17014_v52 = vperm.slane %v12988_v29, %v11323_v0  ;;  %v17015_v57 = vperm.slane %v12999_v44, %v11317_v39  ;;  %v4957_v40 = vperm.slane %v13501_v9, %v11320_v13  ;;  %v4752_v47 = vpop.permute.xlu0 %4751 }
 0x985   : > { %v4930_v56 = vsel %vm3522_vm3, %v4929_v58, %v4928_v54  ;;  %v4937_v12 = vsel %vm3522_vm3, %v4936_v49, %v4935_v14  ;;  %v17016_v29 = vperm.slane %v12979_v42, %v11320_v13  ;;  %v4963_v16 = vsel %vm3518_vm2, %v4962_v53, %v4961_v35  ;;  %v17020_v53 = vld [vmem:[#allocation27_spill] sm:$0xff] }
 0x986   : > { %v4949_v6 = vsel %vm3518_vm2, %v17014_v52, %v4947_v61  ;;  %v4954_v22 = vsel %vm3514_vm1, %v17015_v57, %v4952_v50  ;;  %v5436_v9 = vsub.f32 1.0, %v5435_v15  ;;  %v17017_v50 = vperm.slane %v13021_v45, %v11323_v0 }
 0x987   : > { %v4737_v51 = vpop.permute.xlu2 %4736  ;;  %v4944_v44 = vsel %vm3522_vm3, %v17016_v29, %v4942_v46  ;;  %v4951_v58 = vsel %vm3522_vm3, %v4950_v43, %v4949_v6  ;;  %v4956_v27 = vsel %vm3518_vm2, %v4955_v55, %v4954_v22  ;;  %v5420_v42 = vadd.f32 %v13554_v11, %v5419_v28 }
 0x988   : > { %5992 = vperm.xlu0 %8890, %v13568_v5   ;;  %v13605_v5 = vperm.slane %v13353_v30, 4  ;;  %v4967_v32 = vperm.slane %v4737_v51, %v11317_v39  ;;  %v5001_v35 = vsel %vm3741_vm4, %v4937_v12, %v4930_v56  ;;  %v4958_v49 = vsel %vm3522_vm3, %v4957_v40, %v4956_v27  ;;  %v17026_v27 = vld [vmem:[#allocation37_spill] sm:$0xff] }
 0x989   : > { %v5425_v61 = vand.u32 2147483647, %v13511_v33  ;;  %v5427_v25 = vand.u32 2147483648, %v13511_v33  ;;  %v5002_v43 = vsel %vm3743_vm5, %v4944_v44, %v5001_v35  ;;  %v17018_v55 = vperm.slane %v13016_v1, %v11320_v13 }
 0x98a   : > { %9452 = vrcp.f32 %v13605_v5  ;;  %v4968_v17 = vsel %vm3514_vm1, %v4967_v32, %v4966_v19  ;;  %v17019_v19 = vperm.slane %v13040_v26, %v11317_v39  ;;  %v4976_v15 = vperm.slane %v4752_v47, %v11323_v0 }
 0x98b   : > { %v4970_v32 = vsel %vm3518_vm2, %v17017_v50, %v4968_v17  ;;  %v4965_v45 = vsel %vm3522_vm3, %v17018_v55, %v4963_v16  ;;  %v5003_v14 = vsel %vm3745_vm6, %v4951_v58, %v5002_v43  ;;  %v5437_v57 = vmul.f32 %v13620_v31, %v5436_v9  ;;  %v17024_v17 = vld [vmem:[#allocation91_spill] sm:$0xff] }
 0x98c   : > { %5890 = vperm.xlu2 %8888, %v13611_v20   ;;  %v4972_v28 = vsel %vm3522_vm3, %v4971_v60, %v4970_v32  ;;  %v5004_v52 = vsel %vm3747_vm7, %v4958_v49, %v5003_v14  ;;  %v5424_v60 = vsel %vm13709_vm15, %v13554_v11, %v5420_v42  ;;  %v5428_v40 = vor.u32 1.1754944e-38, %v5427_v25 }
 0x98d   : > { %v5005_v22 = vsel %vm3749_vm8, %v4965_v45, %v5004_v52  ;;  %v13726_v56 = vmul.f32 %v17024_v17, %v13342_v37  ;;  %vm5426_vm11 = vcmp.eq.f32.partialorder %v5425_v61, 8.507059e+37  ;;  %v13731_v29 = vperm.slane %v13353_v30, 5  ;;  %v17028_v61 = vld [vmem:[#allocation29_spill] sm:$0xff] }
 0x98e   : > { %v13734_v44 = vsel %vm5426_vm11, %v5428_v40, %v5424_v60  ;;  %v5438_v9 = vadd.f32 %v13620_v31, %v5437_v57  ;;  %vm5440_vm12 = vweird.f32 %v13620_v31  ;;  %v5445_v58 = vand.u32 2147483648, %v13533_v48  ;;  %v17034_v60 = vld [vmem:[#allocation47_spill] sm:$0xff]  ;;  %v17038_v40 = vld [vmem:[#allocation96_spill] sm:$0xff] }
 0x98f   : > { %v4746_v51 = vpop.permute.xlu2 %4745  ;;  %17025 = vst [vmem:[#allocation118_spill] sm:$0xff] %v13726_v56  ;;  %v13743_v50 = vmul.f32 %v17026_v27, %v13734_v44  ;;  %v5443_v32 = vand.u32 2147483647, %v13533_v48  ;;  %9454 = vrcp.f32 %v13731_v29  ;;  %vm5441_vm14 = vmor %vm5439_vm13, %vm5440_vm12  ;;  %v13753_v25 = vmul.f32 %v17028_v61, %v13363_v10 }
 0x990   : > { %6001 = vperm.xlu0 %8890, %v13639_v23   ;;  %v4973_v63 = vperm.slane %v4746_v51, %v11313_v62  ;;  %v13675_v8 = vpop.eup %9452  ;;  %v13700_v51 = vmul.f32 %v17020_v53, %v13618_v38  ;;  %v5442_v42 = vsel %vm5441_vm14, %v13620_v31, %v5438_v9  ;;  %v5446_v49 = vor.u32 1.1754944e-38, %v5445_v58  ;;  %v17040_v9 = vld [vmem:[#allocation145_spill] sm:$0xff] }
 0x991   : > { %v5453_v26 = vmul.f32 %v13675_v8, %v13605_v5  ;;  %17027 = vst [vmem:[#allocation119_spill] sm:$0xff] %v13743_v50  ;;  %vm5444_vm15 = vcmp.eq.f32.partialorder %v5443_v32, 8.507059e+37  ;;  %v13756_v43 = vperm.slane %v13353_v30, 6  ;;  %vm5458_vm11 = vweird.f32 %v13675_v8  ;;  %v17095_v23 = vld [vmem:[#allocation113_spill] sm:$0xff] }
 0x992   : > { %v4975_v54 = vsel %vm3514_vm1, %v17019_v19, %v4973_v63  ;;  %17021 = vst [vmem:[#allocation107_spill] sm:$0xff] %v13700_v51  ;;  %v5006_v63 = vsel %vm3751_vm9, %v4972_v28, %v5005_v22  ;;  %v13758_v55 = vsel %vm5444_vm15, %v5446_v49, %v5442_v42  ;;  %v5463_v45 = vand.u32 2147483648, %v13605_v5  ;;  %v17030_v19 = vld [vmem:[#allocation141_spill] sm:$0xff] }
 0x993   : > { %v4977_v33 = vsel %vm3518_vm2, %v4976_v15, %v4975_v54  ;;  %v5454_v47 = vsub.f32 1.0, %v5453_v26  ;;  %17029 = vst [vmem:[#allocation61_spill] sm:$0xff] %v13753_v25  ;;  %v13766_v54 = vmul.f32 %v17030_v19, %v13758_v55  ;;  %vm5457_vm12 = vweird.f32 %v13605_v5  ;;  %v17032_v28 = vld [vmem:[#allocation93_spill] sm:$0xff] }
 0x994   : > { %5899 = vperm.xlu2 %8888, %v13563_v18   ;;  %v5461_v53 = vand.u32 2147483647, %v13605_v5  ;;  %9456 = vrcp.f32 %v13756_v43  ;;  %vm5459_vm13 = vmor %vm5457_vm12, %vm5458_vm11  ;;  %v13776_v1 = vmul.f32 %v17032_v28, %v13363_v10  ;;  %v13779_v26 = vperm.slane %v13353_v30, 7  ;;  %v17036_v30 = vld [vmem:[#allocation39_spill] sm:$0xff] }
 0x995   : > { %v5455_v35 = vmul.f32 %v13675_v8, %v5454_v47  ;;  %v9455_v31 = vpop.eup %9454  ;;  %17031 = vst [vmem:[#allocation109_spill] sm:$0xff] %v13766_v54  ;;  %v13793_v22 = vmul.f32 %v17036_v30, %v13387_v41  ;;  %v13798_v17 = vmul.f32 %v17038_v40, %v13120_v34  ;;  %vm5475_vm11 = vweird.f32 %v13731_v29 }
 0x996   : > { %v5471_v14 = vmul.f32 %v9455_v31, %v13731_v29  ;;  %17033 = vst [vmem:[#allocation130_spill] sm:$0xff] %v13776_v1  ;;  %vm5462_vm14 = vcmp.eq.f32.partialorder %v5461_v53, 8.507059e+37  ;;  %9458 = vrcp.f32 %v13779_v26  ;;  %vm5476_vm15 = vweird.f32 %v9455_v31  ;;  %v17046_v53 = vld [vmem:[#allocation57_spill] sm:$0xff] }
 0x997   : > { %v4755_v46 = vpop.permute.xlu2 %4754  ;;  %v5456_v48 = vadd.f32 %v13675_v8, %v5455_v35  ;;  %17037 = vst [vmem:[#allocation41_spill] sm:$0xff] %v13793_v22  ;;  %v5479_v58 = vand.u32 2147483647, %v13731_v29  ;;  %vm5477_vm12 = vmor %vm5475_vm11, %vm5476_vm15  ;;  %v17042_v35 = vld [vmem:[#allocation49_spill] sm:$0xff]  ;;  %v5499_v19 = vand.u32 2147483648, %v13756_v43  ;;  %vm5493_vm15 = vweird.f32 %v13756_v43 }
 0x998   : > { %v4978_v6 = vperm.slane %v4755_v46, %v11320_v13  ;;  %6010 = vperm.xlu0 %8890, %v13700_v51   ;;  %v5464_v46 = vor.u32 1.1754944e-38, %v5463_v45  ;;  %v5472_v5 = vsub.f32 1.0, %v5471_v14  ;;  %17039 = vst [vmem:[#allocation51_spill] sm:$0xff] %v13798_v17  ;;  %v13812_v49 = vmul.f32 %v17042_v35, %v13426_v21 }
 0x999   : > { %v5460_v15 = vsel %vm5459_vm13, %v13675_v8, %v5456_v48  ;;  %vm5480_vm13 = vcmp.eq.f32.partialorder %v5479_v58, 8.507059e+37  ;;  %v17044_v48 = vld [vmem:[#allocation160_spill] sm:$0xff]  ;;  %v5497_v14 = vand.u32 2147483647, %v13756_v43  ;;  %v5500_v28 = vor.u32 1.1754944e-38, %v5499_v19 }
 0x99a   : > { %v4979_v12 = vsel %vm3522_vm3, %v4978_v6, %v4977_v33  ;;  %v13781_v52 = vsel %vm5462_vm14, %v5464_v46, %v5460_v15  ;;  %v9457_v6 = vpop.eup %9456  ;;  %v5473_v57 = vmul.f32 %v9455_v31, %v5472_v5  ;;  %17043 = vst [vmem:[#allocation115_spill] sm:$0xff] %v13812_v49  ;;  %v17048_v5 = vld [vmem:[#allocation59_spill] sm:$0xff]  ;;  %v5517_v40 = vand.u32 2147483648, %v13779_v26 }
 0x99b   : > { %v5007_v11 = vsel %vm3753_vm10, %v4979_v12, %v5006_v63  ;;  %v13786_v8 = vmul.f32 %v17034_v60, %v13781_v52  ;;  %v5489_v33 = vmul.f32 %v9457_v6, %v13756_v43  ;;  %v13804_v47 = vmul.f32 %v17040_v9, %v13781_v52  ;;  %v17054_v9 = vld [vmem:[#allocation69_spill] sm:$0xff] }
 0x99c   : > { %5908 = vperm.xlu2 %8888, %v13726_v56   ;;  %v5021_v16 = vsel %vm16245_vm0, %v5007_v11, 0.0  ;;  %v5474_v12 = vadd.f32 %v9455_v31, %v5473_v57  ;;  %v9459_v11 = vpop.eup %9458  ;;  %vm5494_vm14 = vweird.f32 %v9457_v6  ;;  %v13832_v60 = vmul.f32 %v17048_v5, %v13449_v24 }
 0x99d   : > { %5022 = vadd.xlane.f32.xlu1 %v5021_v16  ;;  %17035 = vst [vmem:[#allocation31_spill] sm:$0xff] %v13786_v8  ;;  %v5490_v63 = vsub.f32 1.0, %v5489_v33  ;;  %v5481_v16 = vand.u32 2147483648, %v13731_v29  ;;  %v5507_v32 = vmul.f32 %v9459_v11, %v13779_v26  ;;  %v13819_v29 = vmul.f32 %v17044_v48, %v13149_v3  ;;  %vm5495_vm11 = vmor %vm5493_vm15, %vm5494_vm14  ;;  %v17050_v33 = vld [vmem:[#allocation170_spill] sm:$0xff]  ;;  %v17060_v48 = vld [vmem:[#allocation79_spill] sm:$0xff] }
 0x99e   : > { %17041 = vst [vmem:[#allocation148_spill] sm:$0xff] %v13804_v47  ;;  %v5478_v34 = vsel %vm5477_vm12, %v9455_v31, %v5474_v12  ;;  %vm5498_vm12 = vcmp.eq.f32.partialorder %v5497_v14, 8.507059e+37  ;;  %v13839_v30 = vmul.f32 %v17050_v33, %v13169_v36  ;;  %vm5511_vm14 = vweird.f32 %v13779_v26  ;;  %v17069_v33 = vld [vmem:[#allocation169_spill] sm:$0xff] }
 0x99f   : > { %v5491_v27 = vmul.f32 %v9457_v6, %v5490_v63  ;;  %v5482_v42 = vor.u32 1.1754944e-38, %v5481_v16  ;;  %17045 = vst [vmem:[#allocation133_spill] sm:$0xff] %v13819_v29  ;;  %v5508_v31 = vsub.f32 1.0, %v5507_v32  ;;  %v5515_v63 = vand.u32 2147483647, %v13779_v26  ;;  %v17056_v26 = vld [vmem:[#allocation157_spill] sm:$0xff] }
 0x9a0   : > { %6019 = vperm.xlu0 %8890, %v13743_v50   ;;  %17049 = vst [vmem:[#allocation55_spill] sm:$0xff] %v13832_v60  ;;  %v5518_v36 = vor.u32 1.1754944e-38, %v5517_v40  ;;  %v13852_v58 = vmul.f32 %v17054_v9, %v13449_v24  ;;  %v17074_v9 = vld [vmem:[#allocation71_spill] sm:$0xff] }
 0x9a1   : > { %v13814_v61 = vsel %vm5480_vm13, %v5482_v42, %v5478_v34  ;;  %v5492_v45 = vadd.f32 %v9457_v6, %v5491_v27  ;;  %v5509_v46 = vmul.f32 %v9459_v11, %v5508_v31  ;;  %17051 = vst [vmem:[#allocation134_spill] sm:$0xff] %v13839_v30  ;;  %vm5512_vm13 = vweird.f32 %v9459_v11  ;;  %v13854_v34 = vpop.permute.xlu0 %5797  ;;  %v13856_v27 = vpop.permute.xlu2 %5800  ;;  %v17062_v31 = vld [vmem:[#allocation150_spill] sm:$0xff] }
 0x9a2   : > { %v13825_v15 = vmul.f32 %v17046_v53, %v13814_v61  ;;  %vm5513_vm15 = vmor %vm5511_vm14, %vm5512_vm13  ;;  %17055 = vst [vmem:[#allocation144_spill] sm:$0xff] %v13852_v58  ;;  %v13863_v42 = vmul.f32 %v17056_v26, %v13200_v2  ;;  %v13878_v19 = vmul.f32 %v17062_v31, %v13200_v2  ;;  %v17068_v2 = vld [vmem:[#allocation43_spill] sm:$0xff]  ;;  %v17075_v26 = vld [vmem:[#allocation112_spill] sm:$0xff] }
 0x9a3   : > { %v5496_v3 = vsel %vm5495_vm11, %v9457_v6, %v5492_v45  ;;  %v5510_v43 = vadd.f32 %v9459_v11, %v5509_v46  ;;  %v17052_v6 = vld [vmem:[#allocation147_spill] sm:$0xff]  ;;  %vm5516_vm11 = vcmp.eq.f32.partialorder %v5515_v63, 8.507059e+37  ;;  %v13873_v45 = vmul.f32 %v17060_v48, %v13471_v4 }
 0x9a4   : > { %5917 = vperm.xlu2 %8888, %v13753_v25   ;;  %17047 = vst [vmem:[#allocation128_spill] sm:$0xff] %v13825_v15  ;;  %v13834_v57 = vsel %vm5498_vm12, %v5500_v28, %v5496_v3  ;;  %v17064_v3 = vld [vmem:[#allocation26_spill] sm:$0xff]  ;;  %v17066_v28 = vld [vmem:[#allocation87_spill] sm:$0xff] }
 0x9a5   : > { %v13845_v12 = vmul.f32 %v17052_v6, %v13834_v57  ;;  %v5514_v16 = vsel %vm5513_vm15, %v9459_v11, %v5510_v43  ;;  %17057 = vst [vmem:[#allocation143_spill] sm:$0xff] %v13863_v42  ;;  %v17058_v11 = vld [vmem:[#allocation17_spill] sm:$0xff]  ;;  %v13892_v5 = vmul.f32 %v17066_v28, %v13513_v59  ;;  %v13897_v43 = vmul.f32 %v17069_v33, %v17068_v2  ;;  %v17071_v63 = vld [vmem:[#allocation159_spill] sm:$0xff]  ;;  %v17079_v2 = vld [vmem:[#allocation132_spill] sm:$0xff] }
 0x9a6   : > { %v13858_v32 = vsel %vm5516_vm11, %v5518_v36, %v5514_v16  ;;  %17061 = vst [vmem:[#allocation136_spill] sm:$0xff] %v13873_v45  ;;  %v17072_v16 = vld [vmem:[#allocation99_spill] sm:$0xff]  ;;  %v17080_v33 = vld [vmem:[#allocation125_spill] sm:$0xff] }
 0x9a7   : > { %17053 = vst [vmem:[#allocation65_spill] sm:$0xff] %v13845_v12  ;;  %v13868_v35 = vmul.f32 %v17058_v11, %v13858_v32  ;;  %v13887_v46 = vmul.f32 %v17064_v3, %v13858_v32  ;;  %v13906_v36 = vmul.f32 %v17072_v16, %v17071_v63  ;;  %v13911_v11 = vmul.f32 %v17075_v26, %v17074_v9  ;;  %v17077_v3 = vld [vmem:[#allocation104_spill] sm:$0xff] }
 0x9a8   : > { %6028 = vperm.xlu0 %8890, %v13766_v54   ;;  %17063 = vst [vmem:[#allocation34_spill] sm:$0xff] %v13878_v19  ;;  %v13920_v28 = vmul.f32 %v17077_v3, %v17071_v63  ;;  %v13925_v16 = vmul.f32 %v17080_v33, %v17079_v2  ;;  %v17082_v9 = vld [vmem:[#allocation108_spill] sm:$0xff]  ;;  %v17084_v3 = vld [vmem:[#allocation62_spill] sm:$0xff]  ;;  %v17086_v33 = vld [vmem:[#allocation83_spill] sm:$0xff] }
 0x9a9   : > { %17059 = vst [vmem:[#allocation24_spill] sm:$0xff] %v13868_v35  ;;  %v13880_v53 = vpop.permute.xlu0 %5806  ;;  %v13882_v14 = vpop.permute.xlu2 %5809  ;;  %v13930_v26 = vmul.f32 %v17082_v9, %v13618_v38  ;;  %v17088_v9 = vld [vmem:[#allocation72_spill] sm:$0xff] }
 0x9aa   : > { %17065 = vst [vmem:[#allocation98_spill] sm:$0xff] %v13887_v46 }
 0x9ab   : > { %17067 = vst [vmem:[#allocation33_spill] sm:$0xff] %v13892_v5 }
 0x9ac   : > { %5926 = vperm.xlu2 %8888, %v13776_v1   ;;  %17070 = vst [vmem:[#allocation122_spill] sm:$0xff] %v13897_v43 }
 0x9ad   : > { %17073 = vst [vmem:[#allocation6_spill] sm:$0xff] %v13906_v36 }
 0x9ae   : > { %17076 = vst [vmem:[#allocation85_spill] sm:$0xff] %v13911_v11 }
 0x9af   : > { %17078 = vst [vmem:[#allocation63_spill] sm:$0xff] %v13920_v28 }
 0x9b0   : > { %6037 = vperm.xlu0 %8890, %v13786_v8   ;;  %17081 = vst [vmem:[#allocation126_spill] sm:$0xff] %v13925_v16  ;;  %v17093_v8 = vld [vmem:[#allocation11_spill] sm:$0xff] }
 0x9b1   : > { %v13900_v40 = vpop.permute.xlu0 %5812  ;;  %v13902_v6 = vpop.permute.xlu2 %5818  ;;  %17083 = vst [vmem:[#allocation22_spill] sm:$0xff] %v13930_v26 }
 0x9b4   : > { %5935 = vperm.xlu2 %8888, %v13793_v22  }
 0x9b6   : > { %5803 = vperm.xlu1 %8889, %v13798_v17  }
 0x9b8   : > { %6046 = vperm.xlu0 %8890, %v13804_v47   ;;  %v13949_v47 = vmul.f32 %v17088_v9, %v13289_v7 }
 0x9b9   : > { %v13914_v48 = vpop.permute.xlu0 %5821  ;;  %v13916_v31 = vpop.permute.xlu2 %5827 }
 0x9ba   : > { %17089 = vst [vmem:[#allocation20_spill] sm:$0xff] %v13949_v47 }
 0x9bc   : > { %5944 = vperm.xlu2 %8888, %v13812_v49   ;;  %v17103_v49 = vld [vmem:[#allocation116_spill] sm:$0xff] }
 0x9be   : > { %5815 = vperm.xlu1 %8889, %v13819_v29  }
 0x9c0   : > { %6055 = vperm.xlu0 %8890, %v13825_v15  }
 0x9c1   : > { %v13934_v15 = vpop.permute.xlu2 %5836 }
 0x9c4   : > { %5953 = vperm.xlu2 %8888, %v13832_v60  }
 0x9c6   : > { %5824 = vperm.xlu1 %8889, %v13839_v30   ;;  %v17132_v30 = vld [vmem:[#allocation56_spill] sm:$0xff] }
 0x9c8   : > { %6064 = vperm.xlu0 %8890, %v13845_v12   ;;  %v13944_v12 = vmul.f32 %v17086_v33, %v13734_v44  ;;  %v17092_v33 = vld [vmem:[#allocation67_spill] sm:$0xff] }
 0x9c9   : > { %v13953_v50 = vpop.permute.xlu2 %5845  ;;  %v13963_v51 = vmul.f32 %v17093_v8, %v17092_v33 }
 0x9ca   : > { %17087 = vst [vmem:[#allocation88_spill] sm:$0xff] %v13944_v12 }
 0x9cb   : > { %17094 = vst [vmem:[#allocation91_spill] sm:$0xff] %v13963_v51 }
 0x9cc   : > { %5962 = vperm.xlu2 %8888, %v13852_v58  }
 0x9ce   : > { %5833 = vperm.xlu1 %8889, %v13863_v42  }
 0x9d0   : > { %6073 = vperm.xlu0 %8890, %v13868_v35   ;;  %v13939_v35 = vmul.f32 %v17084_v3, %v17079_v2  ;;  %v17090_v2 = vld [vmem:[#allocation111_spill] sm:$0xff] }
 0x9d1   : > { %v13958_v3 = vmul.f32 %v17090_v2, %v13758_v55  ;;  %v13968_v9 = vpop.permute.xlu2 %5854  ;;  %v17097_v2 = vld [vmem:[#allocation18_spill] sm:$0xff] }
 0x9d2   : > { %17085 = vst [vmem:[#allocation129_spill] sm:$0xff] %v13939_v35 }
 0x9d3   : > { %17091 = vst [vmem:[#allocation27_spill] sm:$0xff] %v13958_v3 }
 0x9d4   : > { %5971 = vperm.xlu2 %8888, %v13873_v45  }
 0x9d6   : > { %5842 = vperm.xlu1 %8889, %v13878_v19  }
 0x9d8   : > { %6082 = vperm.xlu0 %8890, %v13887_v46   ;;  %v13932_v46 = vpop.permute.xlu0 %5830 }
 0x9dc   : > { %5980 = vperm.xlu2 %8888, %v13892_v5  }
 0x9de   : > { %5851 = vperm.xlu1 %8889, %v13897_v43  }
 0x9e0   : > { %v13951_v54 = vpop.permute.xlu0 %5839 }
 0x9e4   : > { %5989 = vperm.xlu2 %8888, %v13906_v36  }
 0x9e6   : > { %5860 = vperm.xlu1 %8889, %v13911_v11  }
 0x9e8   : > { %v13966_v7 = vpop.permute.xlu0 %5848 }
 0x9ec   : > { %5998 = vperm.xlu2 %8888, %v13920_v28  }
 0x9ee   : > { %5869 = vperm.xlu1 %8889, %v13925_v16  }
 0x9f0   : > { %v13982_v33 = vpop.permute.xlu0 %5857 }
 0x9f4   : > { %6007 = vperm.xlu2 %8888, %v13930_v26   ;;  %v13977_v26 = vmul.f32 %v17097_v2, %v13342_v37  ;;  %v17101_v2 = vld [vmem:[#allocation25_spill] sm:$0xff] }
 0x9f5   : > { %v13998_v45 = vmul.f32 %v17101_v2, %v13342_v37  ;;  %v17105_v37 = vld [vmem:[#allocation35_spill] sm:$0xff] }
 0x9f6   : > { %5878 = vperm.xlu1 %8889, %v13939_v35   ;;  %17098 = vst [vmem:[#allocation29_spill] sm:$0xff] %v13977_v26  ;;  %v14015_v2 = vmul.f32 %v17105_v37, %v13363_v10  ;;  %v17107_v10 = vld [vmem:[#allocation117_spill] sm:$0xff] }
 0x9f7   : > { %17102 = vst [vmem:[#allocation93_spill] sm:$0xff] %v13998_v45  ;;  %v14025_v37 = vmul.f32 %v17107_v10, %v13834_v57 }
 0x9f8   : > { %v14008_v1 = vpop.permute.xlu0 %5866  ;;  %17106 = vst [vmem:[#allocation39_spill] sm:$0xff] %v14015_v2 }
 0x9f9   : > { %17108 = vst [vmem:[#allocation96_spill] sm:$0xff] %v14025_v37 }
 0x9fc   : > { %6016 = vperm.xlu2 %8888, %v13944_v12   ;;  %v13972_v12 = vmul.f32 %v17095_v23, %v13758_v55 }
 0x9fe   : > { %5887 = vperm.xlu1 %8889, %v13949_v47   ;;  %17096 = vst [vmem:[#allocation37_spill] sm:$0xff] %v13972_v12 }
 0xa04   : > { %6025 = vperm.xlu2 %8888, %v13958_v3   ;;  %v13984_v3 = vpop.permute.xlu2 %5863 }
 0xa06   : > { %5896 = vperm.xlu1 %8889, %v13963_v51  }
 0xa0c   : > { %6034 = vperm.xlu2 %8888, %v13972_v12   ;;  %v17099_v12 = vld [vmem:[#allocation53_spill] sm:$0xff] }
 0xa0d   : > { %v13993_v5 = vmul.f32 %v17099_v12, %v13781_v52 }
 0xa0e   : > { %5905 = vperm.xlu1 %8889, %v13977_v26   ;;  %v14004_v26 = vmul.f32 %v17103_v49, %v13814_v61 }
 0xa0f   : > { %17100 = vst [vmem:[#allocation141_spill] sm:$0xff] %v13993_v5 }
 0xa10   : > { %v13980_v8 = vpop.xlane.xlu1 %5022  ;;  %17104 = vst [vmem:[#allocation47_spill] sm:$0xff] %v14004_v26 }
 0xa11   : > { %v5052_v28 = vperm.slane %v13980_v8, 0  ;;  %v5053_v36 = vperm.slane %v13980_v8, 1  ;;  %v13989_v23 = vperm.slane %v13980_v8, 2 }
 0xa13   : > { %9460 = vrcp.f32 %v5052_v28  ;;  %v5533_v47 = vand.u32 2147483647, %v5052_v28  ;;  %v5535_v25 = vand.u32 2147483648, %v5052_v28  ;;  %vm5529_vm13 = vweird.f32 %v5052_v28 }
 0xa14   : > { %9462 = vrcp.f32 %v5053_v36  ;;  %6043 = vperm.xlu2 %8888, %v13993_v5   ;;  %v14010_v5 = vpop.permute.xlu2 %5872  ;;  %v5553_v20 = vand.u32 2147483648, %v5053_v36 }
 0xa15   : > { %9464 = vrcp.f32 %v13989_v23  ;;  %vm5534_vm15 = vcmp.eq.f32.partialorder %v5533_v47, 8.507059e+37  ;;  %v5551_v47 = vand.u32 2147483647, %v5053_v36 }
 0xa16   : > { %5914 = vperm.xlu1 %8889, %v13998_v45  }
 0xa19   : > { %v9461_v58 = vpop.eup %9460 }
 0xa1a   : > { %v9463_v60 = vpop.eup %9462  ;;  %v5525_v12 = vmul.f32 %v9461_v58, %v5052_v28  ;;  %vm5530_vm12 = vweird.f32 %v9461_v58 }
 0xa1b   : > { %v14006_v22 = vpop.eup %9464  ;;  %v5543_v51 = vmul.f32 %v9463_v60, %v5053_v36  ;;  %vm5531_vm14 = vmor %vm5529_vm13, %vm5530_vm12  ;;  %vm5548_vm11 = vweird.f32 %v9463_v60  ;;  %vm5547_vm12 = vweird.f32 %v5053_v36  ;;  %v14049_v36 = vperm.slane %v13980_v8, 4 }
 0xa1c   : > { %6052 = vperm.xlu2 %8888, %v14004_v26   ;;  %v5526_v45 = vsub.f32 1.0, %v5525_v12  ;;  %v5561_v56 = vmul.f32 %v14006_v22, %v13989_v23  ;;  %v14021_v26 = vperm.slane %v13980_v8, 3  ;;  %vm5549_vm13 = vmor %vm5547_vm12, %vm5548_vm11  ;;  %vm5565_vm11 = vweird.f32 %v13989_v23 }
 0xa1d   : > { %v5544_v35 = vsub.f32 1.0, %v5543_v51  ;;  %v5536_v51 = vor.u32 1.1754944e-38, %v5535_v25  ;;  %v14038_v25 = vpop.permute.xlu0 %5875 }
 0xa1e   : > { %5923 = vperm.xlu1 %8889, %v14015_v2   ;;  %v5527_v49 = vmul.f32 %v9461_v58, %v5526_v45  ;;  %v5562_v45 = vsub.f32 1.0, %v5561_v56  ;;  %9466 = vrcp.f32 %v14021_v26 }
 0xa1f   : > { %v5545_v16 = vmul.f32 %v9463_v60, %v5544_v35  ;;  %v17109_v35 = vld [vmem:[#allocation45_spill] sm:$0xff]  ;;  %9468 = vrcp.f32 %v14049_v36 }
 0xa20   : > { %v5528_v18 = vadd.f32 %v9461_v58, %v5527_v49  ;;  %v14032_v28 = vmul.f32 %v17109_v35, %v13387_v41  ;;  %v17111_v49 = vld [vmem:[#allocation13_spill] sm:$0xff]  ;;  %v5563_v41 = vmul.f32 %v14006_v22, %v5562_v45 }
 0xa21   : > { %v5546_v2 = vadd.f32 %v9463_v60, %v5545_v16 }
 0xa22   : > { %v5532_v12 = vsel %vm5531_vm14, %v9461_v58, %v5528_v18  ;;  %17110 = vst [vmem:[#allocation145_spill] sm:$0xff] %v14032_v28  ;;  %v14040_v18 = vpop.permute.xlu2 %5881  ;;  %v5554_v58 = vor.u32 1.1754944e-38, %v5553_v20  ;;  %vm5552_vm14 = vcmp.eq.f32.partialorder %v5551_v47, 8.507059e+37  ;;  %v17116_v20 = vld [vmem:[#allocation127_spill] sm:$0xff]  ;;  %v17118_v47 = vld [vmem:[#allocation36_spill] sm:$0xff] }
 0xa23   : > { %v14027_v11 = vsel %vm5534_vm15, %v5536_v51, %v5532_v12  ;;  %v5550_v56 = vsel %vm5549_vm13, %v9463_v60, %v5546_v2  ;;  %v17114_v12 = vld [vmem:[#allocation140_spill] sm:$0xff]  ;;  %vm5566_vm15 = vweird.f32 %v14006_v22  ;;  %v5571_v2 = vand.u32 2147483648, %v13989_v23 }
 0xa24   : > { %6061 = vperm.xlu2 %8888, %v14025_v37   ;;  %v14036_v10 = vmul.f32 %v17111_v49, %v14027_v11  ;;  %v14051_v51 = vsel %vm5552_vm14, %v5554_v58, %v5550_v56  ;;  %v14055_v35 = vmul.f32 %v17114_v12, %v13834_v57  ;;  %v5564_v49 = vadd.f32 %v14006_v22, %v5563_v41  ;;  %v9467_v60 = vpop.eup %9466  ;;  %vm5567_vm12 = vmor %vm5565_vm11, %vm5566_vm15 }
 0xa25   : > { %17113 = vst [vmem:[#allocation160_spill] sm:$0xff] %v14051_v51  ;;  %v14063_v45 = vmul.f32 %v17116_v20, %v13426_v21  ;;  %v14067_v56 = vmul.f32 %v17118_v47, %v14051_v51  ;;  %v5569_v58 = vand.u32 2147483647, %v13989_v23  ;;  %v5579_v12 = vmul.f32 %v9467_v60, %v14021_v26  ;;  %v14076_v20 = vpop.permute.xlu0 %5884 }
 0xa26   : > { %17112 = vst [vmem:[#allocation49_spill] sm:$0xff] %v14036_v10  ;;  %5932 = vperm.xlu1 %8889, %v14032_v28   ;;  %6091 = vperm.xlu0 %8890, %v14036_v10   ;;  %v5568_v41 = vsel %vm5567_vm12, %v14006_v22, %v5564_v49  ;;  %v5572_v47 = vor.u32 1.1754944e-38, %v5571_v2  ;;  %v14083_v23 = vperm.slane %v13980_v8, 5  ;;  %v9469_v49 = vpop.eup %9468  ;;  %v17123_v28 = vld [vmem:[#allocation75_spill] sm:$0xff]  ;;  %v17125_v2 = vld [vmem:[#allocation46_spill] sm:$0xff]  ;;  %vm5584_vm14 = vweird.f32 %v9467_v60 }
 0xa27   : > { %17115 = vst [vmem:[#allocation57_spill] sm:$0xff] %v14055_v35  ;;  %vm5570_vm13 = vcmp.eq.f32.partialorder %v5569_v58, 8.507059e+37  ;;  %v5580_v22 = vsub.f32 1.0, %v5579_v12  ;;  %v14094_v43 = vmul.f32 %v17123_v28, %v13426_v21  ;;  %v17128_v21 = vld [vmem:[#allocation52_spill] sm:$0xff]  ;;  %vm5583_vm15 = vweird.f32 %v14021_v26 }
 0xa28   : > { %v14046_v16 = vpop.permute.xlu1 %5803  ;;  %17117 = vst [vmem:[#allocation59_spill] sm:$0xff] %v14063_v45  ;;  %v14085_v37 = vsel %vm5570_vm13, %v5572_v47, %v5568_v41  ;;  %9470 = vrcp.f32 %v14083_v23  ;;  %v5597_v41 = vmul.f32 %v9469_v49, %v14049_v36  ;;  %v14112_v28 = vmul.f32 %v17128_v21, %v14027_v11  ;;  %vm5585_vm11 = vmor %vm5583_vm15, %vm5584_vm14 }
 0xa29   : > { %17119 = vst [vmem:[#allocation170_spill] sm:$0xff] %v14067_v56  ;;  %v14098_v58 = vmul.f32 %v17125_v2, %v14085_v37  ;;  %v14124_v29 = vmul.f32 %v17132_v30, %v14085_v37  ;;  %v14135_v30 = vperm.slane %v13980_v8, 6  ;;  %vm5602_vm13 = vweird.f32 %v9469_v49 }
 0xa2a   : > { %17120 = vst [vmem:[#allocation147_spill] sm:$0xff] %v14085_v37  ;;  %v5598_v19 = vsub.f32 1.0, %v5597_v41  ;;  %vm5601_vm14 = vweird.f32 %v14049_v36 }
 0xa2b   : > { %17124 = vst [vmem:[#allocation157_spill] sm:$0xff] %v14094_v43  ;;  %9472 = vrcp.f32 %v14135_v30  ;;  %vm5603_vm15 = vmor %vm5601_vm14, %vm5602_vm13  ;;  %vm5619_vm13 = vweird.f32 %v14083_v23 }
 0xa2c   : > { %6070 = vperm.xlu2 %8888, %v14055_v35   ;;  %v14078_v35 = vpop.permute.xlu2 %5890  ;;  %17126 = vst [vmem:[#allocation17_spill] sm:$0xff] %v14098_v58  ;;  %v5599_v21 = vmul.f32 %v9469_v49, %v5598_v19 }
 0xa2d   : > { %v14106_v47 = vpop.permute.xlu0 %5893  ;;  %17129 = vst [vmem:[#allocation150_spill] sm:$0xff] %v14112_v28 }
 0xa2e   : > { %5941 = vperm.xlu1 %8889, %v14063_v45   ;;  %6100 = vperm.xlu0 %8890, %v14067_v56   ;;  %v17121_v45 = vld [vmem:[#allocation15_spill] sm:$0xff]  ;;  %v14114_v42 = vpop.eup %9470  ;;  %17133 = vst [vmem:[#allocation87_spill] sm:$0xff] %v14124_v29 }
 0xa2f   : > { %v14089_v56 = vmul.f32 %v17121_v45, %v13858_v32  ;;  %v5581_v45 = vmul.f32 %v9467_v60, %v5580_v22  ;;  %v17130_v22 = vld [vmem:[#allocation82_spill] sm:$0xff] }
 0xa30   : > { %v14080_v10 = vpop.permute.xlu1 %5815 }
 0xa31   : > { %17122 = vst [vmem:[#allocation69_spill] sm:$0xff] %v14089_v56  ;;  %v5582_v2 = vadd.f32 %v9467_v60, %v5581_v45  ;;  %v5587_v45 = vand.u32 2147483647, %v14021_v26 }
 0xa33   : > { %v5586_v41 = vsel %vm5585_vm11, %v9467_v60, %v5582_v2  ;;  %vm5588_vm12 = vcmp.eq.f32.partialorder %v5587_v45, 8.507059e+37  ;;  %v17138_v45 = vld [vmem:[#allocation92_spill] sm:$0xff] }
 0xa34   : > { %6079 = vperm.xlu2 %8888, %v14089_v56   ;;  %v14108_v56 = vpop.permute.xlu2 %5899 }
 0xa35   : > { %17127 = vst [vmem:[#allocation79_spill] sm:$0xff] %v14108_v56  ;;  %v14143_v19 = vpop.permute.xlu0 %5902 }
 0xa36   : > { %5950 = vperm.xlu1 %8889, %v14094_v43   ;;  %6109 = vperm.xlu0 %8890, %v14098_v58   ;;  %v5589_v58 = vand.u32 2147483648, %v14021_v26  ;;  %v14120_v43 = vmul.f32 %v17130_v22, %v13449_v24  ;;  %v17135_v26 = vld [vmem:[#allocation54_spill] sm:$0xff] }
 0xa37   : > { %v14141_v56 = vmul.f32 %v17135_v26, %v14051_v51 }
 0xa38   : > { %v14104_v12 = vpop.permute.xlu1 %5824  ;;  %17131 = vst [vmem:[#allocation26_spill] sm:$0xff] %v14120_v43  ;;  %v5590_v24 = vor.u32 1.1754944e-38, %v5589_v58  ;;  %v5607_v58 = vand.u32 2147483648, %v14049_v36 }
 0xa39   : > { %17136 = vst [vmem:[#allocation169_spill] sm:$0xff] %v14141_v56 }
 0xa3a   : > { %v14137_v17 = vsel %vm5588_vm12, %v5590_v24, %v5586_v41  ;;  %v17140_v41 = vld [vmem:[#allocation66_spill] sm:$0xff]  ;;  %vm5620_vm12 = vweird.f32 %v14114_v42 }
 0xa3b   : > { %17134 = vst [vmem:[#allocation43_spill] sm:$0xff] %v14137_v17  ;;  %v14155_v24 = vmul.f32 %v17140_v41, %v14137_v17  ;;  %vm5621_vm14 = vmor %vm5619_vm13, %vm5620_vm12  ;;  %vm5637_vm12 = vweird.f32 %v14135_v30 }
 0xa3c   : > { %6088 = vperm.xlu2 %8888, %v14112_v28   ;;  %v5615_v28 = vmul.f32 %v14114_v42, %v14083_v23  ;;  %v14145_v2 = vpop.permute.xlu2 %5908 }
 0xa3d   : > { %17137 = vst [vmem:[#allocation159_spill] sm:$0xff] %v14145_v2 }
 0xa3e   : > { %5959 = vperm.xlu1 %8889, %v14120_v43   ;;  %6118 = vperm.xlu0 %8890, %v14124_v29   ;;  %v5600_v43 = vadd.f32 %v9469_v49, %v5599_v21  ;;  %v5616_v60 = vsub.f32 1.0, %v5615_v28  ;;  %v14151_v29 = vmul.f32 %v17138_v45, %v13471_v4  ;;  %17141 = vst [vmem:[#allocation71_spill] sm:$0xff] %v14155_v24  ;;  %v5605_v28 = vand.u32 2147483647, %v14049_v36  ;;  %v17142_v36 = vld [vmem:[#allocation110_spill] sm:$0xff] }
 0xa3f   : > { %v5608_v4 = vor.u32 1.1754944e-38, %v5607_v58  ;;  %v14164_v45 = vperm.slane %v13980_v8, 7  ;;  %v14172_v2 = vmul.f32 %v17142_v36, %v14051_v51  ;;  %v5625_v8 = vand.u32 2147483648, %v14083_v23  ;;  %v17146_v58 = vld [vmem:[#allocation76_spill] sm:$0xff]  ;;  %v17149_v51 = vld [vmem:[#allocation114_spill] sm:$0xff] }
 0xa40   : > { %v14132_v22 = vpop.permute.xlu1 %5833  ;;  %17139 = vst [vmem:[#allocation99_spill] sm:$0xff] %v14151_v29  ;;  %v5604_v21 = vsel %vm5603_vm15, %v9469_v49, %v5600_v43  ;;  %v5617_v26 = vmul.f32 %v14114_v42, %v5616_v60  ;;  %vm5606_vm11 = vcmp.eq.f32.partialorder %v5605_v28, 8.507059e+37  ;;  %v14176_v43 = vpop.eup %9472  ;;  %v17144_v49 = vld [vmem:[#allocation120_spill] sm:$0xff] }
 0xa41   : > { %17143 = vst [vmem:[#allocation112_spill] sm:$0xff] %v14172_v2  ;;  %v14180_v60 = vmul.f32 %v17144_v49, %v13513_v59  ;;  %9474 = vrcp.f32 %v14164_v45  ;;  %v5633_v49 = vmul.f32 %v14176_v43, %v14135_v30 }
 0xa43   : > { %17145 = vst [vmem:[#allocation104_spill] sm:$0xff] %v14180_v60 }
 0xa44   : > { %6097 = vperm.xlu2 %8888, %v14141_v56   ;;  %v14168_v56 = vsel %vm5606_vm11, %v5608_v4, %v5604_v21  ;;  %v5623_v21 = vand.u32 2147483647, %v14083_v23  ;;  %v14193_v4 = vpop.permute.xlu2 %5917  ;;  %vm5638_vm11 = vweird.f32 %v14176_v43 }
 0xa45   : > { %v14187_v28 = vmul.f32 %v17146_v58, %v14168_v56  ;;  %17148 = vst [vmem:[#allocation125_spill] sm:$0xff] %v14193_v4  ;;  %v5626_v58 = vor.u32 1.1754944e-38, %v5625_v8  ;;  %v14208_v4 = vmul.f32 %v17149_v51, %v14085_v37  ;;  %v17153_v8 = vld [vmem:[#allocation95_spill] sm:$0xff]  ;;  %vm14248_vm13 = vmor %vm5637_vm12, %vm5638_vm11  ;;  %vm5655_vm11 = vweird.f32 %v14164_v45 }
 0xa46   : > { %5968 = vperm.xlu1 %8889, %v14151_v29   ;;  %6127 = vperm.xlu0 %8890, %v14155_v24   ;;  %v5618_v29 = vadd.f32 %v14114_v42, %v5617_v26  ;;  %v14191_v26 = vpop.permute.xlu0 %5911  ;;  %vm5624_vm15 = vcmp.eq.f32.partialorder %v5623_v21, 8.507059e+37  ;;  %v17160_v37 = vld [vmem:[#allocation19_spill] sm:$0xff] }
 0xa47   : > { %17147 = vst [vmem:[#allocation132_spill] sm:$0xff] %v14187_v28  ;;  %v14204_v23 = vpop.eup %9474 }
 0xa48   : > { %v14166_v41 = vpop.permute.xlu1 %5842  ;;  %v5622_v36 = vsel %vm5621_vm14, %v14114_v42, %v5618_v29  ;;  %17150 = vst [vmem:[#allocation108_spill] sm:$0xff] %v14208_v4  ;;  %v17151_v29 = vld [vmem:[#allocation124_spill] sm:$0xff]  ;;  %v5651_v21 = vmul.f32 %v14204_v23, %v14164_v45 }
 0xa49   : > { %v14213_v42 = vmul.f32 %v17151_v29, %v13513_v59  ;;  %v17156_v29 = vld [vmem:[#allocation137_spill] sm:$0xff] }
 0xa4a   : > { %v5652_v59 = vsub.f32 1.0, %v5651_v21  ;;  %v5641_v21 = vand.u32 2147483647, %v14135_v30 }
 0xa4b   : > { %17152 = vst [vmem:[#allocation62_spill] sm:$0xff] %v14213_v42 }
 0xa4c   : > { %6106 = vperm.xlu2 %8888, %v14172_v2   ;;  %v14202_v2 = vsel %vm5624_vm15, %v5626_v58, %v5622_v36  ;;  %vm5642_vm14 = vcmp.eq.f32.partialorder %v5641_v21, 8.507059e+37  ;;  %vm5656_vm15 = vweird.f32 %v14204_v23  ;;  %v6209_v21 = vperm.slane %v13966_v7, %v11317_v39 }
 0xa4d   : > { %v6225_v7 = vperm.slane %v14038_v25, %v11323_v0  ;;  %vm14315_vm12 = vmor %vm5655_vm11, %vm5656_vm15  ;;  %v6190_v25 = vperm.slane %v14080_v10, %v11323_v0  ;;  %v6197_v10 = vperm.slane %v13916_v31, %v11323_v0 }
 0xa4e   : > { %5977 = vperm.xlu1 %8889, %v14180_v60   ;;  %6136 = vperm.xlu0 %8890, %v14187_v28   ;;  %v5634_v60 = vsub.f32 1.0, %v5633_v49  ;;  %v14217_v28 = vmul.f32 %v17153_v8, %v14202_v2  ;;  %v14224_v36 = vpop.permute.xlu0 %5920  ;;  %v14226_v49 = vpop.permute.xlu2 %5926  ;;  %v14232_v8 = vmul.f32 %v17156_v29, %v14137_v17  ;;  %v5653_v29 = vmul.f32 %v14204_v23, %v5652_v59 }
 0xa4f   : > { %17155 = vst [vmem:[#allocation72_spill] sm:$0xff] %v14226_v49  ;;  %v14244_v49 = vmul.f32 %v17160_v37, %v14202_v2  ;;  %v6194_v59 = vperm.slane %v13914_v48, %v11313_v62  ;;  %v6187_v48 = vperm.slane %v13882_v14, %v11313_v62  ;;  %v17168_v14 = vld [vmem:[#allocation138_spill] sm:$0xff] }
 0xa50   : > { %v14200_v24 = vpop.permute.xlu1 %5851  ;;  %17154 = vst [vmem:[#allocation83_spill] sm:$0xff] %v14217_v28  ;;  %v5635_v51 = vmul.f32 %v14176_v43, %v5634_v60  ;;  %v17158_v60 = vld [vmem:[#allocation86_spill] sm:$0xff] }
 0xa51   : > { %17157 = vst [vmem:[#allocation111_spill] sm:$0xff] %v14232_v8 }
 0xa52   : > { %17161 = vst [vmem:[#allocation11_spill] sm:$0xff] %v14244_v49 }
 0xa54   : > { %6115 = vperm.xlu2 %8888, %v14208_v4   ;;  %v5636_v4 = vadd.f32 %v14176_v43, %v5635_v51  ;;  %v6195_v51 = vperm.slane %v14104_v12, %v11317_v39  ;;  %v6208_v12 = vperm.slane %v13953_v50, %v11313_v62 }
 0xa56   : > { %5986 = vperm.xlu1 %8889, %v14213_v42   ;;  %6145 = vperm.xlu0 %8890, %v14217_v28   ;;  %v5643_v42 = vand.u32 2147483648, %v14135_v30  ;;  %v14240_v28 = vmul.f32 %v17158_v60, %v17071_v63  ;;  %v5640_v37 = vsel %vm14248_vm13, %v14176_v43, %v5636_v4  ;;  %v6188_v30 = vperm.slane %v13900_v40, %v11317_v39  ;;  %v17164_v60 = vld [vmem:[#allocation12_spill] sm:$0xff]  ;;  %v14282_v4 = vpop.permute.xlu0 %5929 }
 0xa57   : > { %v6199_v63 = vperm.slane %v13932_v46, %v11320_v13  ;;  %v17165_v43 = vld [vmem:[#allocation28_spill] sm:$0xff]  ;;  %17166 = vst [vmem:[#allocation113_spill] sm:$0xff] %v14282_v4  ;;  %v5654_v46 = vadd.f32 %v14204_v23, %v5653_v29 }
 0xa58   : > { %v14228_v58 = vpop.permute.xlu1 %5860  ;;  %17159 = vst [vmem:[#allocation67_spill] sm:$0xff] %v14240_v28  ;;  %v5644_v17 = vor.u32 1.1754944e-38, %v5643_v42  ;;  %v14278_v40 = vmul.f32 %v17165_v43, %v13734_v44 }
 0xa59   : > { %v5658_v50 = vsel %vm14315_vm12, %v14204_v23, %v5654_v46  ;;  %v6216_v4 = vperm.slane %v14228_v58, %v11317_v39  ;;  %v6183_v23 = vperm.slane %v14046_v16, %v11323_v0  ;;  %v6211_v58 = vperm.slane %v14200_v24, %v11323_v0  ;;  %v17174_v24 = vld [vmem:[#allocation123_spill] sm:$0xff] }
 0xa5a   : > { %v14286_v42 = vsel %vm5642_vm14, %v5644_v17, %v5640_v37  ;;  %v6215_v17 = vperm.slane %v13982_v33, %v11313_v62  ;;  %v17170_v37 = vld [vmem:[#allocation38_spill] sm:$0xff] }
 0xa5b   : > { %v14313_v43 = vmul.f32 %v17170_v37, %v14286_v42  ;;  %v6196_v37 = vsel %vm3514_vm1, %v6195_v51, %v6194_v59 }
 0xa5c   : > { %6124 = vperm.xlu2 %8888, %v14232_v8   ;;  %v6180_v8 = vperm.slane %v13854_v34, %v11313_v62  ;;  %v14268_v34 = vmul.f32 %v17164_v60, %v13618_v38  ;;  %v14284_v38 = vpop.permute.xlu2 %5935  ;;  %v14298_v60 = vmul.f32 %v17168_v14, %v14168_v56  ;;  %v5659_v14 = vand.u32 2147483647, %v14164_v45 }
 0xa5d   : > { %17167 = vst [vmem:[#allocation18_spill] sm:$0xff] %v14284_v38  ;;  %v6189_v38 = vsel %vm3514_vm1, %v6188_v30, %v6187_v48  ;;  %v6217_v46 = vsel %vm3514_vm1, %v6216_v4, %v6215_v17 }
 0xa5e   : > { %5995 = vperm.xlu1 %8889, %v14240_v28   ;;  %6154 = vperm.xlu0 %8890, %v14244_v49   ;;  %v6181_v49 = vperm.slane %v13856_v27, %v11317_v39  ;;  %v6204_v27 = vperm.slane %v13951_v54, %v11323_v0  ;;  %17169 = vst [vmem:[#allocation53_spill] sm:$0xff] %v14298_v60  ;;  %v5661_v54 = vand.u32 2147483648, %v14164_v45  ;;  %vm5660_vm13 = vcmp.eq.f32.partialorder %v5659_v14, 8.507059e+37  ;;  %v14359_v51 = vpop.permute.xlu0 %5938 }
 0xa5f   : > { %17171 = vst [vmem:[#allocation25_spill] sm:$0xff] %v14313_v43  ;;  %v6192_v45 = vperm.slane %v13902_v6, %v11320_v13  ;;  %v6191_v59 = vsel %vm3518_vm2, %v6190_v25, %v6189_v38  ;;  %v6198_v6 = vsel %vm3518_vm2, %v6197_v10, %v6196_v37  ;;  %v6213_v38 = vperm.slane %v13968_v9, %v11320_v13  ;;  %v17176_v9 = vld [vmem:[#allocation58_spill] sm:$0xff] }
 0xa60   : > { %v14274_v28 = vpop.permute.xlu1 %5869  ;;  %v6182_v29 = vsel %vm3514_vm1, %v6181_v49, %v6180_v8  ;;  %v5662_v49 = vor.u32 1.1754944e-38, %v5661_v54  ;;  %v6210_v8 = vsel %vm3514_vm1, %v6209_v21, %v6208_v12  ;;  %v14357_v21 = vmul.f32 %v17174_v24, %v14168_v56 }
 0xa61   : > { %v6222_v31 = vperm.slane %v14274_v28, %v11313_v62  ;;  %v6218_v28 = vperm.slane %v13984_v3, %v11323_v0  ;;  %v6193_v4 = vsel %vm3522_vm3, %v6192_v45, %v6191_v59  ;;  %v6200_v17 = vsel %vm3522_vm3, %v6199_v63, %v6198_v6 }
 0xa62   : > { %v14349_v48 = vsel %vm5660_vm13, %v5662_v49, %v5658_v50  ;;  %17175 = vst [vmem:[#allocation116_spill] sm:$0xff] %v14357_v21  ;;  %v6212_v12 = vsel %vm3518_vm2, %v6211_v58, %v6210_v8  ;;  %v6229_v63 = vperm.slane %v14040_v18, %v11313_v62  ;;  %v17178_v25 = vperm.slane %v13880_v53, %v11320_v13 }
 0xa63   : > { %v14376_v33 = vmul.f32 %v17176_v9, %v14349_v48  ;;  %v6214_v45 = vsel %vm3522_vm3, %v6213_v38, %v6212_v12  ;;  %v6230_v10 = vperm.slane %v14076_v20, %v11317_v39  ;;  %v17179_v49 = vperm.slane %v14008_v1, %v11320_v13  ;;  %v17186_v12 = vld [vmem:[#allocation68_spill] sm:$0xff] }
 0xa64   : > { %6133 = vperm.xlu2 %8888, %v14298_v60   ;;  %v6201_v60 = vperm.slane %v14132_v22, %v11313_v62  ;;  %v6202_v22 = vperm.slane %v13934_v15, %v11317_v39  ;;  %v6206_v15 = vperm.slane %v14166_v41, %v11320_v13  ;;  %v14367_v54 = vpop.permute.xlu2 %5944  ;;  %v6184_v41 = vsel %vm3518_vm2, %v6183_v23, %v6182_v29 }
 0xa65   : > { %17177 = vst [vmem:[#allocation35_spill] sm:$0xff] %v14376_v33  ;;  %v6186_v50 = vsel %vm3522_vm3, %v17178_v25, %v6184_v41  ;;  %v6231_v59 = vsel %vm3514_vm1, %v6230_v10, %v6229_v63  ;;  %v6234_v20 = vperm.slane %v14078_v35, %v11320_v13  ;;  %v17182_v35 = vld [vmem:[#allocation48_spill] sm:$0xff]  ;;  %v17183_v41 = vld [vmem:[#allocation3_spill] sm:$0xff]  ;;  %v14447_v9 = vmul.f32 %v17186_v12, %v13758_v55  ;;  %v17189_v25 = vld [vmem:[#allocation78_spill] sm:$0xff] }
 0xa66   : > { %6004 = vperm.xlu1 %8889, %v14268_v34   ;;  %6163 = vperm.xlu0 %8890, %v14313_v43   ;;  %v6203_v16 = vsel %vm3514_vm1, %v6202_v22, %v6201_v60  ;;  %v6223_v60 = vperm.slane %v14010_v5, %v11317_v39  ;;  %v6219_v5 = vsel %vm3518_vm2, %v6218_v28, %v6217_v46  ;;  %v14429_v38 = vpop.permute.xlu0 %5947  ;;  %v17202_v43 = vld [vmem:[#allocation160_spill] sm:$0xff] }
 0xa67   : > { %v6205_v3 = vsel %vm3518_vm2, %v6204_v27, %v6203_v16  ;;  %v6404_v27 = vsel %vm3741_vm4, %v6193_v4, %v6186_v50  ;;  %v6221_v22 = vsel %vm3522_vm3, %v17179_v49, %v6219_v5  ;;  %v14461_v50 = vmul.f32 %v17189_v25, %v13781_v52 }
 0xa68   : > { %v5879_v30 = vpop.permute.xlu1 %5878  ;;  %v6224_v14 = vsel %vm3514_vm1, %v6223_v60, %v6222_v31  ;;  %v6207_v37 = vsel %vm3522_vm3, %v6206_v15, %v6205_v3  ;;  %v6405_v18 = vsel %vm3743_vm5, %v6200_v17, %v6404_v27  ;;  %v14425_v15 = vmul.f32 %v17182_v35, %v13734_v44  ;;  %v17184_v44 = vld [vmem:[#allocation44_spill] sm:$0xff] }
 0xa69   : > { %v6227_v29 = vperm.slane %v5879_v30, %v11320_v13  ;;  %v6226_v53 = vsel %vm3518_vm2, %v6225_v7, %v6224_v14  ;;  %v6406_v8 = vsel %vm3745_vm6, %v6207_v37, %v6405_v18  ;;  %v17180_v7 = vld [vmem:[#allocation135_spill] sm:$0xff]  ;;  %v14442_v17 = vmul.f32 %v17184_v44, %v14286_v42  ;;  %v17192_v18 = vld [vmem:[#allocation14_spill] sm:$0xff] }
 0xa6a   : > { %v14410_v6 = vmul.f32 %v17180_v7, %v14202_v2  ;;  %v6407_v31 = vsel %vm3747_vm7, %v6214_v45, %v6406_v8  ;;  %v17190_v45 = vld [vmem:[#allocation156_spill] sm:$0xff] }
 0xa6b   : > { %v6228_v58 = vsel %vm3522_vm3, %v6227_v29, %v6226_v53  ;;  %v6408_v16 = vsel %vm3749_vm8, %v6221_v22, %v6407_v31  ;;  %17185 = vst [vmem:[#allocation45_spill] sm:$0xff] %v14442_v17  ;;  %v17187_v29 = vld [vmem:[#allocation10_spill] sm:$0xff]  ;;  %v14472_v10 = vmul.f32 %v17190_v45, %v14349_v48  ;;  %v14477_v53 = vmul.f32 %v17192_v18, %v13814_v61  ;;  %v17193_v22 = vld [vmem:[#allocation21_spill] sm:$0xff] }
 0xa6c   : > { %6142 = vperm.xlu2 %8888, %v14357_v21   ;;  %17181 = vst [vmem:[#allocation117_spill] sm:$0xff] %v14410_v6  ;;  %v6409_v24 = vsel %vm3751_vm9, %v6228_v58, %v6408_v16  ;;  %v14431_v28 = vpop.permute.xlu2 %5953  ;;  %v14456_v63 = vmul.f32 %v17187_v29, %v14349_v48  ;;  %v14488_v8 = vmul.f32 %v17193_v22, %v13814_v61  ;;  %v17194_v58 = vld [vmem:[#allocation5_spill] sm:$0xff]  ;;  %v17196_v16 = vld [vmem:[#allocation40_spill] sm:$0xff] }
 0xa6d   : > { %17191 = vst [vmem:[#allocation140_spill] sm:$0xff] %v14472_v10  ;;  %v14504_v35 = vmul.f32 %v17196_v16, %v13858_v32  ;;  %v17198_v32 = vld [vmem:[#allocation60_spill] sm:$0xff]  ;;  %v6236_v22 = vperm.slane %v14106_v47, %v11313_v62 }
 0xa6e   : > { %6013 = vperm.xlu1 %8889, %v14278_v40   ;;  %6172 = vperm.xlu0 %8890, %v14376_v33   ;;  %v14450_v3 = vpop.permute.xlu0 %5956  ;;  %17188 = vst [vmem:[#allocation13_spill] sm:$0xff] %v14456_v63  ;;  %v14524_v45 = vmul.f32 %v17198_v32, %v14027_v11  ;;  %v17199_v32 = vld [vmem:[#allocation113_spill] sm:$0xff] }
 0xa70   : > { %v5888_v23 = vpop.permute.xlu1 %5887 }
 0xa71   : > { %v6232_v30 = vperm.slane %v5888_v23, %v11323_v0 }
 0xa73   : > { %v6233_v1 = vsel %vm3518_vm2, %v6232_v30, %v6231_v59 }
 0xa74   : > { %6151 = vperm.xlu2 %8888, %v14410_v6   ;;  %v6235_v46 = vsel %vm3522_vm3, %v6234_v20, %v6233_v1  ;;  %v14452_v5 = vpop.permute.xlu2 %5962  ;;  %v17195_v20 = vld [vmem:[#allocation30_spill] sm:$0xff] }
 0xa75   : > { %v6410_v60 = vsel %vm3753_vm10, %v6235_v46, %v6409_v24  ;;  %v14495_v7 = vmul.f32 %v17195_v20, %v13834_v57  ;;  %v17197_v57 = vld [vmem:[#allocation50_spill] sm:$0xff]  ;;  %v6246_v20 = vperm.slane %v14191_v26, %v11323_v0 }
 0xa76   : > { %6022 = vperm.xlu1 %8889, %v14425_v15   ;;  %6436 = vst.msk [vmem:[%s14419_s30] sm:$0xff] %vm16245_vm0, %v6410_v60  ;;  %8893 = vset.pattern.permute.xlu0 %v17183_v41  ;;  %v14466_v37 = vpop.permute.xlu0 %5965  ;;  %v6440_v30 = vsel %vm16245_vm0, %v6410_v60, -inf  ;;  %v14515_v44 = vmul.f32 %v17197_v57, %v14027_v11  ;;  %v6251_v11 = vperm.slane %v14224_v36, %v11317_v39  ;;  %v17201_v36 = vld [vmem:[#allocation159_spill] sm:$0xff] }
 0xa77   : > { %v6257_v41 = vperm.slane %v17199_v32, %v11313_v62  ;;  %v17203_v32 = vld [vmem:[#allocation70_spill] sm:$0xff] }
 0xa78   : > { %v14438_v4 = vpop.permute.xlu1 %5896  ;;  %v14555_v21 = vmul.f32 %v17203_v32, %v17202_v43 }
 0xa79   : > { %v6237_v16 = vperm.slane %v14438_v4, %v11317_v39  ;;  %v6262_v4 = vperm.slane %v14359_v51, %v11320_v13 }
 0xa7c   : > { %6160 = vperm.xlu2 %8888, %v14442_v17   ;;  %v14468_v27 = vpop.permute.xlu2 %5971  ;;  %v6244_v17 = vperm.slane %v17201_v36, %v11317_v39 }
 0xa7e   : > { %6031 = vperm.xlu1 %8889, %v14447_v9   ;;  %v14482_v23 = vpop.permute.xlu0 %5974 }
 0xa80   : > { %v5906_v14 = vpop.permute.xlu1 %5905 }
 0xa81   : > { %v6243_v57 = vperm.slane %v5906_v14, %v11313_v62  ;;  %v6267_v14 = vperm.slane %v14429_v38, %v11323_v0  ;;  %v6238_v38 = vsel %vm3514_vm1, %v6237_v16, %v6236_v22  ;;  %v17205_v22 = vld [vmem:[#allocation72_spill] sm:$0xff] }
 0xa82   : > { %v6255_v16 = vperm.slane %v17205_v22, %v11320_v13 }
 0xa83   : > { %v6245_v36 = vsel %vm3514_vm1, %v6244_v17, %v6243_v57  ;;  %v17206_v17 = vld [vmem:[#allocation18_spill] sm:$0xff] }
 0xa84   : > { %6169 = vperm.xlu2 %8888, %v14456_v63   ;;  %v14484_v49 = vpop.permute.xlu2 %5980 }
 0xa86   : > { %6040 = vperm.xlu1 %8889, %v14461_v50   ;;  %v14497_v31 = vpop.permute.xlu0 %5983 }
 0xa88   : > { %v14464_v55 = vpop.permute.xlu1 %5914 }
 0xa8c   : > { %6178 = vperm.xlu2 %8888, %v14472_v10   ;;  %v14499_v1 = vpop.permute.xlu2 %5989  ;;  %v6278_v10 = vperm.slane %v14466_v37, %v11313_v62 }
 0xa8e   : > { %6049 = vperm.xlu1 %8889, %v14477_v53   ;;  %v14507_v46 = vpop.permute.xlu0 %5992 }
 0xa90   : > { %v14480_v52 = vpop.permute.xlu1 %5923 }
 0xa91   : > { %v6253_v51 = vperm.slane %v14480_v52, %v11323_v0 }
 0xa94   : > { %8892 = vset.pattern.permute.xlu2 %v17194_v58  ;;  %v14509_v24 = vpop.permute.xlu2 %5998  ;;  %v17200_v58 = vld [vmem:[#allocation125_spill] sm:$0xff] }
 0xa95   : > { %v6250_v47 = vperm.slane %v17200_v58, %v11313_v62  ;;  %v6272_v58 = vperm.slane %v14450_v3, %v11317_v39  ;;  %v17204_v3 = vld [vmem:[#allocation79_spill] sm:$0xff] }
 0xa96   : > { %6058 = vperm.xlu1 %8889, %v14488_v8   ;;  %v14518_v29 = vpop.permute.xlu0 %6001  ;;  %v6239_v32 = vperm.slane %v17204_v3, %v11323_v0 }
 0xa97   : > { %v6252_v37 = vsel %vm3514_vm1, %v6251_v11, %v6250_v47 }
 0xa98   : > { %6441 = vmax.xlane.f32.xlu0 %v6440_v30  ;;  %v5933_v59 = vpop.permute.xlu1 %5932  ;;  %v6241_v30 = vperm.slane %v14143_v19, %v11320_v13  ;;  %v6240_v11 = vsel %vm3518_vm2, %v6239_v32, %v6238_v38 }
 0xa99   : > { %v6258_v26 = vperm.slane %v5933_v59, %v11317_v39  ;;  %v6271_v59 = vperm.slane %v14431_v28, %v11313_v62  ;;  %v6248_v28 = vperm.slane %v14464_v55, %v11320_v13  ;;  %v6247_v55 = vsel %vm3518_vm2, %v6246_v20, %v6245_v36  ;;  %v17208_v36 = vld [vmem:[#allocation80_spill] sm:$0xff] }
 0xa9b   : > { %v6259_v52 = vsel %vm3514_vm1, %v6258_v26, %v6257_v41  ;;  %v6273_v3 = vsel %vm3514_vm1, %v6272_v58, %v6271_v59  ;;  %v6254_v41 = vsel %vm3518_vm2, %v6253_v51, %v6252_v37  ;;  %v6281_v58 = vperm.slane %v14468_v27, %v11323_v0 }
 0xa9c   : > { %v14520_v25 = vpop.permute.xlu2 %6007  ;;  %v6249_v59 = vsel %vm3522_vm3, %v6248_v28, %v6247_v55  ;;  %v6286_v51 = vperm.slane %v14484_v49, %v11317_v39  ;;  %v6242_v27 = vsel %vm3522_vm3, %v6241_v30, %v6240_v11  ;;  %v6283_v37 = vperm.slane %v14482_v23, %v11320_v13 }
 0xa9d   : > { %v6411_v28 = vsel %vm3741_vm4, %v6249_v59, %v6242_v27  ;;  %v17211_v59 = vld [vmem:[#allocation89_spill] sm:$0xff] }
 0xa9e   : > { %6067 = vperm.xlu1 %8889, %v14495_v7   ;;  %v14542_v63 = vpop.permute.xlu0 %6010 }
 0xaa0   : > { %v5942_v61 = vpop.permute.xlu1 %5941 }
 0xaa1   : > { %v6264_v33 = vperm.slane %v5942_v61, %v11313_v62  ;;  %v6260_v61 = vperm.slane %v17206_v17, %v11323_v0 }
 0xaa3   : > { %v6261_v47 = vsel %vm3518_vm2, %v6260_v61, %v6259_v52 }
 0xaa4   : > { %v14544_v19 = vpop.permute.xlu2 %6016  ;;  %v6263_v32 = vsel %vm3522_vm3, %v6262_v4, %v6261_v47  ;;  %v17209_v47 = vld [vmem:[#allocation43_spill] sm:$0xff] }
 0xaa6   : > { %6076 = vperm.xlu1 %8889, %v14504_v35  }
 0xaa8   : > { %v14511_v60 = vpop.permute.xlu1 %5950 }
 0xaa9   : > { %v6269_v22 = vperm.slane %v14511_v60, %v11320_v13  ;;  %v17207_v60 = vld [vmem:[#allocation147_spill] sm:$0xff] }
 0xaae   : > { %6085 = vperm.xlu1 %8889, %v14515_v44  }
 0xab0   : > { %v5960_v12 = vpop.permute.xlu1 %5959 }
 0xab1   : > { %v6274_v57 = vperm.slane %v5960_v12, %v11323_v0  ;;  %v6276_v12 = vperm.slane %v14452_v5, %v11320_v13  ;;  %v14608_v5 = vpop.permute.xlu2 %6025 }
 0xab3   : > { %v6275_v38 = vsel %vm3518_vm2, %v6274_v57, %v6273_v3 }
 0xab4   : > { %v6277_v30 = vsel %vm3522_vm3, %v6276_v12, %v6275_v38 }
 0xab6   : > { %6094 = vperm.xlu1 %8889, %v14524_v45  }
 0xab8   : > { %v5969_v18 = vpop.permute.xlu1 %5968 }
 0xab9   : > { %v6279_v43 = vperm.slane %v5969_v18, %v11317_v39  ;;  %v6265_v18 = vperm.slane %v14367_v54, %v11317_v39  ;;  %v14645_v12 = vpop.permute.xlu2 %6034 }
 0xabb   : > { %v6266_v26 = vsel %vm3514_vm1, %v6265_v18, %v6264_v33  ;;  %v6280_v54 = vsel %vm3514_vm1, %v6279_v43, %v6278_v10  ;;  %v6256_v33 = vsel %vm3522_vm3, %v6255_v16, %v6254_v41  ;;  %v14604_v10 = vmul.f32 %v17208_v36, %v17207_v60  ;;  %v14606_v43 = vpop.permute.xlu0 %6019  ;;  %v17212_v60 = vld [vmem:[#allocation90_spill] sm:$0xff] }
 0xabc   : > { %v6282_v49 = vsel %vm3518_vm2, %v6281_v58, %v6280_v54  ;;  %v6412_v16 = vsel %vm3743_vm5, %v6256_v33, %v6411_v28  ;;  %v14658_v36 = vmul.f32 %v17212_v60, %v14168_v56  ;;  %v6293_v60 = vperm.slane %v14507_v46, %v11317_v39 }
 0xabd   : > { %v6413_v17 = vsel %vm3745_vm6, %v6263_v32, %v6412_v16  ;;  %v6284_v23 = vsel %vm3522_vm3, %v6283_v37, %v6282_v49  ;;  %v17213_v49 = vld [vmem:[#allocation9_spill] sm:$0xff] }
 0xabe   : > { %6103 = vperm.xlu1 %8889, %v14555_v21   ;;  %v14667_v37 = vmul.f32 %v17213_v49, %v14202_v2  ;;  %v6304_v49 = vperm.slane %v14542_v63, %v11320_v13  ;;  %v6302_v63 = vperm.slane %v14520_v25, %v11323_v0 }
 0xac0   : > { %v5978_v6 = vpop.permute.xlu1 %5977 }
 0xac1   : > { %v6285_v20 = vperm.slane %v5978_v6, %v11313_v62  ;;  %v6268_v6 = vsel %vm3518_vm2, %v6267_v14, %v6266_v26  ;;  %v6288_v14 = vperm.slane %v14497_v31, %v11323_v0  ;;  %v17210_v26 = vld [vmem:[#allocation81_spill] sm:$0xff]  ;;  %v14654_v38 = vpop.permute.xlu2 %6043 }
 0xac2   : > { %v6270_v52 = vsel %vm3522_vm3, %v6269_v22, %v6268_v6  ;;  %v14634_v31 = vmul.f32 %v17210_v26, %v17209_v47 }
 0xac3   : > { %v6287_v4 = vsel %vm3514_vm1, %v6286_v51, %v6285_v20  ;;  %v6414_v18 = vsel %vm3747_vm7, %v6270_v52, %v6413_v17  ;;  %v14643_v54 = vpop.permute.xlu0 %6028  ;;  %v14651_v20 = vmul.f32 %v17211_v59, %v17209_v47  ;;  %v17214_v52 = vld [vmem:[#allocation101_spill] sm:$0xff] }
 0xac4   : > { %v6289_v3 = vsel %vm3518_vm2, %v6288_v14, %v6287_v4  ;;  %v6415_v11 = vsel %vm3749_vm8, %v6277_v30, %v6414_v18  ;;  %v14674_v16 = vmul.f32 %v17214_v52, %v14286_v42  ;;  %v17215_v14 = vld [vmem:[#allocation16_spill] sm:$0xff]  ;;  %v17216_v18 = vld [vmem:[#allocation106_spill] sm:$0xff]  ;;  %v6292_v52 = vperm.slane %v14499_v1, %v11313_v62 }
 0xac5   : > { %v6416_v41 = vsel %vm3751_vm9, %v6284_v23, %v6415_v11  ;;  %v14681_v17 = vmul.f32 %v17215_v14, %v14286_v42  ;;  %v6309_v14 = vperm.slane %v14606_v43, %v11323_v0  ;;  %v6313_v1 = vperm.slane %v14608_v5, %v11313_v62 }
 0xac6   : > { %6112 = vperm.xlu1 %8889, %v14604_v10   ;;  %v6307_v43 = vperm.slane %v14544_v19, %v11317_v39 }
 0xac8   : > { %v5987_v61 = vpop.permute.xlu1 %5986 }
 0xac9   : > { %v6290_v57 = vperm.slane %v5987_v61, %v11320_v13  ;;  %v14663_v6 = vpop.permute.xlu2 %6052 }
 0xacb   : > { %v6291_v55 = vsel %vm3522_vm3, %v6290_v57, %v6289_v3  ;;  %v6038_v33 = vpop.permute.xlu0 %6037  ;;  %v14688_v57 = vmul.f32 %v17216_v18, %v14349_v48  ;;  %v6299_v48 = vperm.slane %v14518_v29, %v11313_v62  ;;  %v6314_v29 = vperm.slane %v14643_v54, %v11317_v39 }
 0xacc   : > { %v14637_v22 = vsel %vm3753_vm10, %v6291_v55, %v6416_v41  ;;  %v17218_v41 = vld [vmem:[#allocation2_spill] sm:$0xff]  ;;  %v6320_v46 = vperm.slane %v6038_v33, %v11313_v62  ;;  %v6294_v54 = vsel %vm3514_vm1, %v6293_v60, %v6292_v52  ;;  %v6297_v33 = vperm.slane %v14509_v24, %v11320_v13 }
 0xacd   : > { %6437 = vst.msk [vmem:[%s14419_s30 + $0x8] sm:$0xff] %vm16245_vm0, %v14637_v22  ;;  %v6323_v60 = vperm.slane %v14654_v38, %v11323_v0  ;;  %v6328_v24 = vperm.slane %v14663_v6, %v11317_v39 }
 0xace   : > { %6121 = vperm.xlu1 %8889, %v14634_v31   ;;  %17217 = vst [vmem:[#allocation127_spill] sm:$0xff] %v14688_v57 }
 0xad0   : > { %v14647_v58 = vpop.permute.xlu1 %5995 }
 0xad1   : > { %v6062_v30 = vpop.permute.xlu2 %6061 }
 0xad3   : > { %v14661_v32 = vpop.permute.xlu0 %6046 }
 0xad6   : > { %6130 = vperm.xlu1 %8889, %v14651_v20  }
 0xad8   : > { %v6005_v51 = vpop.permute.xlu1 %6004 }
 0xad9   : > { %v14684_v61 = vpop.permute.xlu2 %6070  ;;  %v6300_v47 = vperm.slane %v6005_v51, %v11317_v39 }
 0xadb   : > { %v14676_v56 = vpop.permute.xlu0 %6055  ;;  %v6301_v51 = vsel %vm3514_vm1, %v6300_v47, %v6299_v48 }
 0xadc   : > { %v6303_v25 = vsel %vm3518_vm2, %v6302_v63, %v6301_v51  ;;  %v6325_v63 = vperm.slane %v14661_v32, %v11320_v13 }
 0xade   : > { %6139 = vperm.xlu1 %8889, %v14658_v36  }
 0xae0   : > { %v6014_v27 = vpop.permute.xlu1 %6013 }
 0xae1   : > { %v14693_v55 = vpop.permute.xlu2 %6079  ;;  %v6306_v18 = vperm.slane %v6014_v27, %v11313_v62  ;;  %v6295_v27 = vperm.slane %v14647_v58, %v11323_v0 }
 0xae3   : > { %v6065_v2 = vpop.permute.xlu0 %6064  ;;  %v6308_v48 = vsel %vm3514_vm1, %v6307_v43, %v6306_v18  ;;  %v6296_v51 = vsel %vm3518_vm2, %v6295_v27, %v6294_v54 }
 0xae4   : > { %v6310_v38 = vsel %vm3518_vm2, %v6309_v14, %v6308_v48  ;;  %v6298_v43 = vsel %vm3522_vm3, %v6297_v33, %v6296_v51 }
 0xae6   : > { %6148 = vperm.xlu1 %8889, %v14667_v37  }
 0xae8   : > { %v14670_v28 = vpop.permute.xlu1 %6022 }
 0xae9   : > { %v14699_v59 = vpop.permute.xlu2 %6088  ;;  %v6311_v19 = vperm.slane %v14670_v28, %v11320_v13  ;;  %v6305_v28 = vsel %vm3522_vm3, %v6304_v49, %v6303_v25 }
 0xaeb   : > { %v14691_v11 = vpop.permute.xlu0 %6073 }
 0xaee   : > { %6157 = vperm.xlu1 %8889, %v14674_v16  }
 0xaf0   : > { %v6032_v4 = vpop.permute.xlu1 %6031 }
 0xaf1   : > { %v14750_v18 = vpop.permute.xlu2 %6097 }
 0xaf3   : > { %v14697_v26 = vpop.permute.xlu0 %6082 }
 0xaf4   : > { %v6346_v48 = vperm.slane %v14697_v26, %v11320_v13 }
 0xaf6   : > { %6166 = vperm.xlu1 %8889, %v14681_v17  }
 0xaf8   : > { %v6041_v23 = vpop.permute.xlu1 %6040 }
 0xafb   : > { %v14742_v52 = vpop.permute.xlu0 %6091 }
 0xafe   : > { %6175 = vperm.xlu1 %8889, %v14688_v57   ;;  %v6335_v57 = vperm.slane %v6065_v2, %v11317_v39  ;;  %v6334_v2 = vperm.slane %v6062_v30, %v11313_v62  ;;  %v6318_v30 = vperm.slane %v14645_v12, %v11320_v13  ;;  %v6330_v12 = vperm.slane %v14676_v56, %v11323_v0 }
 0xb00   : > { %v6050_v3 = vpop.permute.xlu1 %6049  ;;  %v6336_v49 = vsel %vm3514_vm1, %v6335_v57, %v6334_v2  ;;  %v6341_v57 = vperm.slane %v14691_v11, %v11313_v62 }
 0xb01   : > { %v6327_v5 = vperm.slane %v6050_v3, %v11313_v62 }
 0xb03   : > { %v6329_v6 = vsel %vm3514_vm1, %v6328_v24, %v6327_v5 }
 0xb06   : > { %8891 = vset.pattern.permute.xlu1 %v17218_v41  ;;  %v6321_v41 = vperm.slane %v6041_v23, %v11317_v39  ;;  %v6316_v23 = vperm.slane %v6032_v4, %v11323_v0  ;;  %v6315_v4 = vsel %vm3514_vm1, %v6314_v29, %v6313_v1  ;;  %v6312_v1 = vsel %vm3522_vm3, %v6311_v19, %v6310_v38 }
 0xb08   : > { %v6059_v42 = vpop.permute.xlu1 %6058  ;;  %v6322_v58 = vsel %vm3514_vm1, %v6321_v41, %v6320_v46  ;;  %v6317_v41 = vsel %vm3518_vm2, %v6316_v23, %v6315_v4  ;;  %v6339_v23 = vperm.slane %v14684_v61, %v11320_v13  ;;  %v6344_v61 = vperm.slane %v14693_v55, %v11323_v0 }
 0xb09   : > { %v6324_v29 = vsel %vm3518_vm2, %v6323_v60, %v6322_v58  ;;  %v6332_v46 = vperm.slane %v6059_v42, %v11320_v13  ;;  %v6319_v14 = vsel %vm3522_vm3, %v6318_v30, %v6317_v41  ;;  %v6418_v42 = vsel %vm3741_vm4, %v6305_v28, %v6298_v43  ;;  %v6101_v60 = vpop.permute.xlu0 %6100  ;;  %v14788_v30 = vpop.permute.xlu2 %6106 }
 0xb0a   : > { %v6326_v32 = vsel %vm3522_vm3, %v6325_v63, %v6324_v29  ;;  %v6419_v54 = vsel %vm3743_vm5, %v6312_v1, %v6418_v42  ;;  %v6443_v41 = vsel %vm16245_vm0, %v14637_v22, -inf  ;;  %v17220_v42 = vld [vmem:[#allocation4_spill] sm:$0xff] }
 0xb0b   : > { %v6420_v5 = vsel %vm3745_vm6, %v6319_v14, %v6419_v54  ;;  %v17219_v14 = vmov 0  }
 0xb0c   : > { %v6421_v11 = vsel %vm3747_vm7, %v6326_v32, %v6420_v5 }
 0xb10   : > { %v6068_v47 = vpop.permute.xlu1 %6067 }
 0xb11   : > { %v6337_v3 = vperm.slane %v6068_v47, %v11323_v0  ;;  %v6331_v47 = vsel %vm3518_vm2, %v6330_v12, %v6329_v6  ;;  %v6110_v28 = vpop.permute.xlu0 %6109  ;;  %v6116_v29 = vpop.permute.xlu2 %6115 }
 0xb12   : > { %v6333_v33 = vsel %vm3522_vm3, %v6332_v46, %v6331_v47 }
 0xb13   : > { %v6338_v27 = vsel %vm3518_vm2, %v6337_v3, %v6336_v49  ;;  %v6422_v4 = vsel %vm3749_vm8, %v6333_v33, %v6421_v11  ;;  %v6362_v11 = vperm.slane %v6110_v28, %v11313_v62 }
 0xb14   : > { %v6340_v2 = vsel %vm3522_vm3, %v6339_v23, %v6338_v27 }
 0xb15   : > { %v6423_v55 = vsel %vm3751_vm9, %v6340_v2, %v6422_v4  ;;  %v6356_v2 = vperm.slane %v6101_v60, %v11317_v39  ;;  %v6349_v4 = vperm.slane %v14699_v59, %v11317_v39 }
 0xb18   : > { %v6077_v56 = vpop.permute.xlu1 %6076 }
 0xb19   : > { %v6342_v25 = vperm.slane %v6077_v56, %v11317_v39  ;;  %v14797_v46 = vpop.permute.xlu0 %6118  ;;  %v6125_v63 = vpop.permute.xlu2 %6124 }
 0xb1a   : > { %v6367_v59 = vperm.slane %v14797_v46, %v11320_v13 }
 0xb1b   : > { %v6343_v19 = vsel %vm3514_vm1, %v6342_v25, %v6341_v57 }
 0xb1c   : > { %v6345_v58 = vsel %vm3518_vm2, %v6344_v61, %v6343_v19  ;;  %v6355_v61 = vperm.slane %v14750_v18, %v11313_v62  ;;  %v6351_v19 = vperm.slane %v14742_v52, %v11323_v0 }
 0xb1d   : > { %v6347_v24 = vsel %vm3522_vm3, %v6346_v48, %v6345_v58 }
 0xb1e   : > { %v6424_v3 = vsel %vm3753_vm10, %v6347_v24, %v6423_v55  ;;  %v6357_v24 = vsel %vm3514_vm1, %v6356_v2, %v6355_v61 }
 0xb1f   : > { %v6446_v51 = vsel %vm16245_vm0, %v6424_v3, -inf  ;;  %6438 = vst.msk [vmem:[%s14419_s30 + $0x10] sm:$0xff] %vm16245_vm0, %v6424_v3 }
 0xb20   : > { %6447 = vmax.xlane.f32.xlu2 %v6446_v51  ;;  %v6086_v26 = vpop.permute.xlu1 %6085 }
 0xb21   : > { %v6128_v49 = vpop.permute.xlu0 %6127  ;;  %v6134_v1 = vpop.permute.xlu2 %6133  ;;  %v6348_v18 = vperm.slane %v6086_v26, %v11313_v62 }
 0xb22   : > { %v6376_v58 = vperm.slane %v6134_v1, %v11313_v62  ;;  %v6372_v26 = vperm.slane %v6128_v49, %v11323_v0 }
 0xb28   : > { %6444 = vmax.xlane.f32.xlu1 %v6443_v41  ;;  %v14795_v38 = vpop.permute.xlu1 %6094  ;;  %v6360_v41 = vperm.slane %v14788_v30, %v11320_v13 }
 0xb29   : > { %v6137_v27 = vpop.permute.xlu0 %6136  ;;  %v14802_v22 = vpop.permute.xlu2 %6142 }
 0xb2a   : > { %v6377_v60 = vperm.slane %v6137_v27, %v11317_v39 }
 0xb2c   : > { %v6378_v1 = vsel %vm3514_vm1, %v6377_v60, %v6376_v58 }
 0xb30   : > { %v6104_v6 = vpop.permute.xlu1 %6103 }
 0xb31   : > { %v6146_v32 = vpop.permute.xlu0 %6145  ;;  %v6152_v56 = vpop.permute.xlu2 %6151  ;;  %v6358_v3 = vperm.slane %v6104_v6, %v11323_v0  ;;  %v6370_v6 = vperm.slane %v6125_v63, %v11317_v39 }
 0xb32   : > { %v6383_v27 = vperm.slane %v6146_v32, %v11313_v62 }
 0xb33   : > { %v6359_v30 = vsel %vm3518_vm2, %v6358_v3, %v6357_v24 }
 0xb38   : > { %v6113_v12 = vpop.permute.xlu1 %6112  ;;  %6658 = vperm.xlu2 %8892, %v11313_v62  }
 0xb39   : > { %v14806_v54 = vpop.permute.xlu0 %6154  ;;  %v6161_v33 = vpop.permute.xlu2 %6160  ;;  %v6363_v5 = vperm.slane %v6113_v12, %v11317_v39  ;;  %v6365_v12 = vperm.slane %v6116_v29, %v11323_v0  ;;  %v6353_v29 = vperm.slane %v14795_v38, %v11320_v13  ;;  %v6361_v38 = vsel %vm3522_vm3, %v6360_v41, %v6359_v30 }
 0xb3a   : > { %v6388_v2 = vperm.slane %v14806_v54, %v11320_v13  ;;  %v6391_v58 = vperm.slane %v6161_v33, %v11317_v39 }
 0xb3b   : > { %v6364_v51 = vsel %vm3514_vm1, %v6363_v5, %v6362_v11  ;;  %v6386_v11 = vperm.slane %v6152_v56, %v11323_v0 }
 0xb3c   : > { %v6366_v5 = vsel %vm3518_vm2, %v6365_v12, %v6364_v51 }
 0xb40   : > { %v6122_v43 = vpop.permute.xlu1 %6121  ;;  %8895 = vset.pattern.permute.xlu2 %v17219_v14 }
 0xb41   : > { %6652 = vperm.xlu1 %8891, %v11313_v62   ;;  %v6164_v48 = vpop.permute.xlu0 %6163  ;;  %v6170_v55 = vpop.permute.xlu2 %6169  ;;  %v6369_v52 = vperm.slane %v6122_v43, %v11313_v62 }
 0xb42   : > { %v6393_v56 = vperm.slane %v6164_v48, %v11323_v0  ;;  %v6397_v33 = vperm.slane %v6170_v55, %v11313_v62 }
 0xb43   : > { %v6371_v63 = vsel %vm3514_vm1, %v6370_v6, %v6369_v52 }
 0xb48   : > { %v6131_v23 = vpop.permute.xlu1 %6130 }
 0xb49   : > { %8894 = vset.pattern.permute.xlu1 %v17220_v42  ;;  %v6374_v49 = vperm.slane %v6131_v23, %v11320_v13  ;;  %v6173_v24 = vpop.permute.xlu0 %6172  ;;  %v6179_v51 = vpop.permute.xlu2 %6178 }
 0xb4a   : > { %v6398_v41 = vperm.slane %v6173_v24, %v11317_v39  ;;  %v17223_v24 = vld [vmem:[#allocation32_spill] sm:$0xff] }
 0xb50   : > { %v6140_v47 = vpop.permute.xlu1 %6139 }
 0xb51   : > { %6670 = vperm.xlu1 %8894, %v11313_v62   ;;  %v6379_v43 = vperm.slane %v6140_v47, %v11323_v0  ;;  %v6381_v47 = vperm.slane %v14802_v22, %v11320_v13 }
 0xb53   : > { %v6380_v23 = vsel %vm3518_vm2, %v6379_v43, %v6378_v1  ;;  %v6402_v43 = vperm.slane %v6179_v51, %v11320_v13  ;;  %v17226_v51 = vld [vmem:[#allocation51_spill] sm:$0xff] }
 0xb58   : > { %v6149_v57 = vpop.permute.xlu1 %6148 }
 0xb59   : > { %8896 = vset.pattern.permute.xlu1 %v17219_v14  ;;  %v6384_v28 = vperm.slane %v6149_v57, %v11317_v39  ;;  %v6350_v57 = vsel %vm3514_vm1, %v6349_v4, %v6348_v18  ;;  %v6368_v4 = vsel %vm3522_vm3, %v6367_v59, %v6366_v5  ;;  %v6373_v18 = vsel %vm3518_vm2, %v6372_v26, %v6371_v63 }
 0xb5a   : > { %v6375_v60 = vsel %vm3522_vm3, %v6374_v49, %v6373_v18 }
 0xb5b   : > { %v6385_v32 = vsel %vm3514_vm1, %v6384_v28, %v6383_v27  ;;  %v6382_v28 = vsel %vm3522_vm3, %v6381_v47, %v6380_v23  ;;  %v6399_v27 = vsel %vm3514_vm1, %v6398_v41, %v6397_v33 }
 0xb5c   : > { %v6387_v22 = vsel %vm3518_vm2, %v6386_v11, %v6385_v32  ;;  %v14887_v32 = vpop.xlane.xlu0 %6441 }
 0xb5d   : > { %v6389_v48 = vsel %vm3522_vm3, %v6388_v2, %v6387_v22  ;;  %v6456_v47 = vperm.slane %v14887_v32, 0  ;;  %v6457_v2 = vperm.slane %v14887_v32, 1  ;;  %v6458_v33 = vperm.slane %v14887_v32, 2 }
 0xb5f   : > { %vm6520_vm11 = vcmp.eq.f32.partialorder %v17223_v24, %v6456_v47  ;;  %v17237_v24 = vld [vmem:[#allocation97_spill] sm:$0xff] }
 0xb60   : > { %v6158_v25 = vpop.permute.xlu1 %6157 }
 0xb61   : > { %v6390_v46 = vperm.slane %v6158_v25, %v11313_v62  ;;  %v6352_v25 = vsel %vm3518_vm2, %v6351_v19, %v6350_v57 }
 0xb62   : > { %v6354_v19 = vsel %vm3522_vm3, %v6353_v29, %v6352_v25  ;;  %v17222_v25 = vld [vmem:[#allocation42_spill] sm:$0xff] }
 0xb63   : > { %v6392_v3 = vsel %vm3514_vm1, %v6391_v58, %v6390_v46  ;;  %v6425_v52 = vsel %vm3741_vm4, %v6361_v38, %v6354_v19  ;;  %v17221_v58 = vld [vmem:[#allocation153_spill] sm:$0xff]  ;;  %vm6525_vm15 = vcmp.eq.f32.partialorder %v17222_v25, %v6457_v2 }
 0xb64   : > { %v6426_v59 = vsel %vm3743_vm5, %v6368_v4, %v6425_v52  ;;  %v6394_v12 = vsel %vm3518_vm2, %v6393_v56, %v6392_v3  ;;  %vm6521_vm14 = vcmp.eq.f32.partialorder %v17221_v58, %v6456_v47  ;;  %v17224_v3 = vld [vmem:[#allocation23_spill] sm:$0xff]  ;;  %v17227_v52 = vld [vmem:[#allocation133_spill] sm:$0xff] }
 0xb65   : > { %v6427_v55 = vsel %vm3745_vm6, %v6375_v60, %v6426_v59  ;;  %vm6523_vm12 = vcmp.eq.f32.partialorder %v17224_v3, %v6456_v47  ;;  %v17225_v60 = vld [vmem:[#allocation165_spill] sm:$0xff] }
 0xb66   : > { %vm6530_vm13 = vcmp.eq.f32.partialorder %v17225_v60, %v6458_v33 }
 0xb68   : > { %v6167_v61 = vpop.permute.xlu1 %6166 }
 0xb69   : > { %v6395_v54 = vperm.slane %v6167_v61, %v11320_v13  ;;  %v6428_v61 = vsel %vm3747_vm7, %v6382_v28, %v6427_v55 }
 0xb6a   : > { %v6429_v30 = vsel %vm3749_vm8, %v6389_v48, %v6428_v61  ;;  %v17229_v48 = vld [vmem:[#allocation158_spill] sm:$0xff]  ;;  %v17231_v61 = vld [vmem:[#allocation7_spill] sm:$0xff] }
 0xb6b   : > { %v6396_v6 = vsel %vm3522_vm3, %v6395_v54, %v6394_v12  ;;  %v6459_v12 = vperm.slane %v14887_v32, 3 }
 0xb6c   : > { %v6430_v46 = vsel %vm3751_vm9, %v6396_v6, %v6429_v30 }
 0xb70   : > { %v6176_v26 = vpop.permute.xlu1 %6175 }
 0xb71   : > { %v6400_v1 = vperm.slane %v6176_v26, %v11323_v0  ;;  %v17228_v26 = vld [vmem:[#allocation151_spill] sm:$0xff] }
 0xb73   : > { %v6401_v57 = vsel %vm3518_vm2, %v6400_v1, %v6399_v27  ;;  %v17230_v1 = vld [vmem:[#allocation94_spill] sm:$0xff] }
 0xb74   : > { %v6403_v5 = vsel %vm3522_vm3, %v6402_v43, %v6401_v57  ;;  %v6460_v43 = vperm.slane %v14887_v32, 4  ;;  %v17232_v57 = vld [vmem:[#allocation139_spill] sm:$0xff] }
 0xb75   : > { %v6431_v29 = vsel %vm3753_vm10, %v6403_v5, %v6430_v46  ;;  %v17233_v46 = vld [vmem:[#allocation131_spill] sm:$0xff] }
 0xb76   : > { %v6449_v63 = vsel %vm16245_vm0, %v6431_v29, -inf  ;;  %6439 = vst.msk [vmem:[%s14419_s30 + $0x18] sm:$0xff] %vm16245_vm0, %v6431_v29  ;;  %vm6528_vm0 = vcmp.eq.f32.partialorder %v17230_v1, %v6458_v33  ;;  %v17244_v1 = vld [vmem:[#allocation122_spill] sm:$0xff] }
 0xb77   : > { %6450 = vmax.xlane.f32.xlu0 %v6449_v63  ;;  %v17234_v63 = vld [vmem:[#allocation154_spill] sm:$0xff] }
 0xb8b   : > { %6664 = vperm.xlu0 %8893, %v11313_v62  }
 0xb93   : > { %v14884_v49 = vpop.xlane.xlu2 %6447  ;;  %8897 = vset.pattern.permute.xlu0 %v17219_v14 }
 0xb9b   : > { %v14891_v11 = vpop.permute.xlu2 %6658  ;;  %v14897_v23 = vpop.xlane.xlu1 %6444 }
 0xb9c   : > { %v6673_v38 = vsel %vm6521_vm14, %v14891_v11, 32  ;;  %v6677_v4 = vsel %vm6525_vm15, %v14891_v11, 32  ;;  %vm6522_vm14 = vcmp.eq.f32.partialorder %v17226_v51, %v6456_v47  ;;  %vm6526_vm15 = vcmp.eq.f32.partialorder %v17227_v52, %v6457_v2  ;;  %v17235_v47 = vld [vmem:[#allocation134_spill] sm:$0xff]  ;;  %v17240_v52 = vld [vmem:[#allocation100_spill] sm:$0xff] }
 0xb9d   : > { %6804 = vperm.xlu1 %8896, %v6673_v38   ;;  %6816 = vperm.xlu0 %8897, %v6677_v4   ;;  %v6461_v4 = vperm.slane %v14887_v32, 5  ;;  %v6462_v51 = vperm.slane %v14887_v32, 6 }
 0xbb3   : > { %v14899_v14 = vpop.permute.xlu1 %6652 }
 0xbb4   : > { %v6672_v18 = vsel %vm6520_vm11, %v14899_v14, 32  ;;  %vm6533_vm11 = vcmp.eq.f32.partialorder %v17228_v26, %v6459_v12  ;;  %v6680_v27 = vsel %vm6528_vm0, %v14899_v14, 32  ;;  %vm6539_vm0 = vcmp.eq.f32.partialorder %v17234_v63, %v6460_v43  ;;  %v17242_v26 = vld [vmem:[#allocation64_spill] sm:$0xff] }
 0xbb5   : > { %6801 = vperm.xlu2 %8895, %v6672_v18   ;;  %v6685_v55 = vsel %vm6533_vm11, %v14891_v11, 32  ;;  %vm6529_vm11 = vcmp.eq.f32.partialorder %v17235_v47, %v6458_v33  ;;  %v17238_v18 = vld [vmem:[#allocation143_spill] sm:$0xff]  ;;  %v6464_v47 = vperm.slane %v14897_v23, 0 }
 0xbb6   : > { %v6681_v25 = vsel %vm6529_vm11, %v14891_v11, 32 }
 0xbc3   : > { %v14903_v22 = vpop.permute.xlu1 %6670 }
 0xbc4   : > { %v6675_v54 = vsel %vm6523_vm12, %v14903_v22, 32  ;;  %vm6524_vm12 = vcmp.eq.f32.partialorder %v17229_v48, %v6457_v2  ;;  %v6691_v58 = vsel %vm6539_vm0, %v14903_v22, 32  ;;  %vm6545_vm0 = vcmp.eq.f32.partialorder %v17240_v52, %v6462_v51  ;;  %v17254_v52 = vld [vmem:[#allocation152_spill] sm:$0xff] }
 0xbc5   : > { %6810 = vperm.xlu1 %8896, %v6675_v54   ;;  %v6676_v6 = vsel %vm6524_vm12, %v14899_v14, 32 }
 0xbea   : > { %v14907_v56 = vpop.xlane.xlu0 %6450 }
 0xbfd   : > { %v14910_v19 = vpop.permute.xlu0 %6664 }
 0xbfe   : > { %v6682_v28 = vsel %vm6530_vm13, %v14910_v19, 32  ;;  %v6674_v41 = vsel %vm6522_vm14, %v14910_v19, 32  ;;  %v6678_v59 = vsel %vm6526_vm15, %v14910_v19, 32  ;;  %vm6536_vm13 = vcmp.eq.f32.partialorder %v17231_v61, %v6460_v43  ;;  %v17245_v61 = vld [vmem:[#allocation84_spill] sm:$0xff] }
 0xbff   : > { %6831 = vperm.xlu0 %8897, %v6682_v28   ;;  %6807 = vperm.xlu2 %8895, %v6674_v41   ;;  %vm6527_vm14 = vcmp.eq.f32.partialorder %v17232_v57, %v6457_v2  ;;  %v6688_v30 = vsel %vm6536_vm13, %v14899_v14, 32  ;;  %vm6531_vm15 = vcmp.eq.f32.partialorder %v17233_v46, %v6458_v33  ;;  %v17236_v2 = vld [vmem:[#allocation146_spill] sm:$0xff]  ;;  %vm6542_vm13 = vcmp.eq.f32.partialorder %v17237_v24, %v6461_v4  ;;  %v17239_v33 = vld [vmem:[#allocation73_spill] sm:$0xff] }
 0xc00   : > { %6819 = vperm.xlu1 %8896, %v6678_v59   ;;  %v6679_v5 = vsel %vm6527_vm14, %v14903_v22, 32  ;;  %v6683_v29 = vsel %vm6531_vm15, %v14903_v22, 32  ;;  %vm6534_vm12 = vcmp.eq.f32.partialorder %v17236_v2, %v6459_v12  ;;  %vm6532_vm14 = vcmp.eq.f32.partialorder %v17238_v18, %v6459_v12  ;;  %v17241_v28 = vld [vmem:[#allocation34_spill] sm:$0xff] }
 0xc01   : > { %v6686_v38 = vsel %vm6534_vm12, %v14910_v19, 32  ;;  %v6694_v3 = vsel %vm6542_vm13, %v14910_v19, 32  ;;  %v6684_v54 = vsel %vm6532_vm14, %v14899_v14, 32  ;;  %vm6537_vm15 = vcmp.eq.f32.partialorder %v17239_v33, %v6460_v43 }
 0xc02   : > { %v6689_v60 = vsel %vm6537_vm15, %v14891_v11, 32  ;;  %vm6535_vm11 = vcmp.eq.f32.partialorder %v17241_v28, %v6459_v12  ;;  %v6697_v41 = vsel %vm6545_vm0, %v14891_v11, 32  ;;  %vm6540_vm12 = vcmp.eq.f32.partialorder %v17242_v26, %v6461_v4  ;;  %v17256_v26 = vld [vmem:[#allocation20_spill] sm:$0xff] }
 0xc03   : > { %v6687_v59 = vsel %vm6535_vm11, %v14903_v22, 32  ;;  %v6692_v48 = vsel %vm6540_vm12, %v14899_v14, 32  ;;  %vm6538_vm14 = vcmp.eq.f32.partialorder %v17244_v1, %v6460_v43  ;;  %vm6543_vm15 = vcmp.eq.f32.partialorder %v17245_v61, %v6461_v4  ;;  %v17248_v43 = vld [vmem:[#allocation121_spill] sm:$0xff]  ;;  %v17258_v61 = vld [vmem:[#allocation91_spill] sm:$0xff] }
 0xc04   : > { %v6690_v12 = vsel %vm6538_vm14, %v14910_v19, 32  ;;  %v6695_v57 = vsel %vm6543_vm15, %v14903_v22, 32  ;;  %vm6546_vm12 = vcmp.eq.f32.partialorder %v17248_v43, %v6462_v51  ;;  %v6465_v18 = vperm.slane %v14897_v23, 1 }
 0xc05   : > { %v6698_v63 = vsel %vm6546_vm12, %v14910_v19, 32  ;;  %vm6552_vm12 = vcmp.eq.f32.partialorder %v17254_v52, %v6464_v47 }
 0xc06   : > { %v6704_v28 = vsel %vm6552_vm12, %v14899_v14, 32 }
 0xc07   : > { %6840 = vperm.xlu0 %8897, %v6685_v55   ;;  %6813 = vperm.xlu2 %8895, %v6676_v6   ;;  %v6463_v55 = vperm.slane %v14887_v32, 7  ;;  %v17243_v6 = vld [vmem:[#allocation102_spill] sm:$0xff] }
 0xc08   : > { %6825 = vperm.xlu1 %8896, %v6680_v27  }
 0xc09   : > { %vm6548_vm13 = vcmp.eq.f32.partialorder %v17243_v6, %v6463_v55  ;;  %v17257_v6 = vld [vmem:[#allocation77_spill] sm:$0xff] }
 0xc0a   : > { %v6700_v27 = vsel %vm6548_vm13, %v14899_v14, 32 }
 0xc0f   : > { %6849 = vperm.xlu0 %8897, %v6688_v30   ;;  %6822 = vperm.xlu2 %8895, %v6679_v5   ;;  %v17246_v30 = vld [vmem:[#allocation105_spill] sm:$0xff] }
 0xc10   : > { %6834 = vperm.xlu1 %8896, %v6683_v29   ;;  %vm6551_vm0 = vcmp.eq.f32.partialorder %v17246_v30, %v6463_v55  ;;  %v17247_v5 = vld [vmem:[#allocation85_spill] sm:$0xff] }
 0xc11   : > { %vm6541_vm11 = vcmp.eq.f32.partialorder %v17247_v5, %v6461_v4  ;;  %v6703_v46 = vsel %vm6551_vm0, %v14903_v22, 32  ;;  %v17251_v4 = vld [vmem:[#allocation74_spill] sm:$0xff]  ;;  %v17260_v5 = vld [vmem:[#allocation155_spill] sm:$0xff] }
 0xc12   : > { %v6693_v29 = vsel %vm6541_vm11, %v14891_v11, 32  ;;  %vm6549_vm15 = vcmp.eq.f32.partialorder %v17251_v4, %v6463_v55  ;;  %vm6558_vm12 = vcmp.eq.f32.partialorder %v17260_v5, %v6465_v18 }
 0xc13   : > { %v6701_v24 = vsel %vm6549_vm15, %v14891_v11, 32  ;;  %vm6555_vm15 = vcmp.eq.f32.partialorder %v17257_v6, %v6464_v47  ;;  %v6710_v43 = vsel %vm6558_vm12, %v14910_v19, 32 }
 0xc14   : > { %v6707_v1 = vsel %vm6555_vm15, %v14903_v22, 32 }
 0xc17   : > { %6858 = vperm.xlu0 %8897, %v6691_v58   ;;  %6828 = vperm.xlu2 %8895, %v6681_v25   ;;  %v17249_v58 = vld [vmem:[#allocation103_spill] sm:$0xff]  ;;  %v17250_v25 = vld [vmem:[#allocation126_spill] sm:$0xff] }
 0xc18   : > { %6843 = vperm.xlu1 %8896, %v6686_v38   ;;  %vm6554_vm13 = vcmp.eq.f32.partialorder %v17249_v58, %v6464_v47  ;;  %vm6544_vm14 = vcmp.eq.f32.partialorder %v17250_v25, %v6462_v51 }
 0xc19   : > { %v6706_v2 = vsel %vm6554_vm13, %v14910_v19, 32  ;;  %v6696_v38 = vsel %vm6544_vm14, %v14899_v14, 32  ;;  %vm6550_vm14 = vcmp.eq.f32.partialorder %v17256_v26, %v6463_v55 }
 0xc1f   : > { %6867 = vperm.xlu0 %8897, %v6694_v3   ;;  %6837 = vperm.xlu2 %8895, %v6684_v54   ;;  %v17252_v3 = vld [vmem:[#allocation118_spill] sm:$0xff]  ;;  %v17253_v54 = vld [vmem:[#allocation129_spill] sm:$0xff] }
 0xc20   : > { %6852 = vperm.xlu1 %8896, %v6689_v60   ;;  %vm6557_vm0 = vcmp.eq.f32.partialorder %v17252_v3, %v6465_v18  ;;  %vm6547_vm11 = vcmp.eq.f32.partialorder %v17253_v54, %v6462_v51  ;;  %v6702_v51 = vsel %vm6550_vm14, %v14910_v19, 32  ;;  %v17262_v54 = vld [vmem:[#allocation41_spill] sm:$0xff] }
 0xc21   : > { %v6709_v33 = vsel %vm6557_vm0, %v14891_v11, 32  ;;  %v6699_v60 = vsel %vm6547_vm11, %v14903_v22, 32  ;;  %vm6553_vm0 = vcmp.eq.f32.partialorder %v17258_v61, %v6464_v47  ;;  %v6467_v47 = vperm.slane %v14897_v23, 3  ;;  %v6817_v61 = vpop.permute.xlu0 %6816 }
 0xc22   : > { %v6705_v55 = vsel %vm6553_vm0, %v14891_v11, 32 }
 0xc23   : > { %vm6566_vm14 = vcmp.eq.f32.partialorder %v17262_v54, %v6467_v47 }
 0xc27   : > { %6876 = vperm.xlu0 %8897, %v6697_v41   ;;  %6846 = vperm.xlu2 %8895, %v6687_v59   ;;  %v6466_v41 = vperm.slane %v14897_v23, 2  ;;  %v17255_v59 = vld [vmem:[#allocation61_spill] sm:$0xff] }
 0xc28   : > { %6861 = vperm.xlu1 %8896, %v6692_v48  }
 0xc29   : > { %vm6560_vm13 = vcmp.eq.f32.partialorder %v17255_v59, %v6466_v41  ;;  %v15007_v59 = vperm.slane %v14897_v23, 4 }
 0xc2a   : > { %v6712_v48 = vsel %vm6560_vm13, %v14899_v14, 32 }
 0xc2f   : > { %6885 = vperm.xlu0 %8897, %v6700_v27   ;;  %6855 = vperm.xlu2 %8895, %v6690_v12   ;;  %v6805_v27 = vpop.permute.xlu1 %6804  ;;  %v6802_v12 = vpop.permute.xlu2 %6801 }
 0xc30   : > { %6870 = vperm.xlu1 %8896, %v6695_v57   ;;  %v17259_v57 = vld [vmem:[#allocation130_spill] sm:$0xff] }
 0xc31   : > { %vm6563_vm11 = vcmp.eq.f32.partialorder %v17259_v57, %v6466_v41 }
 0xc32   : > { %v6715_v30 = vsel %vm6563_vm11, %v14903_v22, 32 }
 0xc37   : > { %6894 = vperm.xlu0 %8897, %v6703_v46   ;;  %6864 = vperm.xlu2 %8895, %v6693_v29   ;;  %v7184_v46 = vperm.slane %v6802_v12, %v11313_v62  ;;  %v7185_v29 = vperm.slane %v6805_v27, %v11317_v39  ;;  %v17266_v27 = vld [vmem:[#allocation163_spill] sm:$0xff] }
 0xc38   : > { %6879 = vperm.xlu1 %8896, %v6698_v63   ;;  %v6811_v63 = vpop.permute.xlu1 %6810  ;;  %vm6564_vm12 = vcmp.eq.f32.partialorder %v17266_v27, %v6467_v47  ;;  %v15043_v27 = vperm.slane %v14897_v23, 6 }
 0xc39   : > { %v6716_v12 = vsel %vm6564_vm12, %v14899_v14, 32 }
 0xc3f   : > { %6903 = vperm.xlu0 %8897, %v6706_v2   ;;  %6873 = vperm.xlu2 %8895, %v6696_v38   ;;  %v7186_v2 = vsel %vm3514_vm1, %v7185_v29, %v7184_v46  ;;  %v7189_v38 = vperm.slane %v6811_v63, %v11320_v13  ;;  %v17269_v29 = vld [vmem:[#allocation142_spill] sm:$0xff] }
 0xc40   : > { %6888 = vperm.xlu1 %8896, %v6701_v24   ;;  %v17261_v24 = vld [vmem:[#allocation162_spill] sm:$0xff] }
 0xc41   : > { %vm6561_vm13 = vcmp.eq.f32.partialorder %v17261_v24, %v6466_v41 }
 0xc47   : > { %6912 = vperm.xlu0 %8897, %v6709_v33   ;;  %6882 = vperm.xlu2 %8895, %v6699_v60   ;;  %v17263_v33 = vld [vmem:[#allocation29_spill] sm:$0xff]  ;;  %v6718_v60 = vsel %vm6566_vm14, %v14910_v19, 32 }
 0xc48   : > { %6897 = vperm.xlu1 %8896, %v6704_v28   ;;  %vm6556_vm15 = vcmp.eq.f32.partialorder %v17263_v33, %v6465_v18  ;;  %v6713_v28 = vsel %vm6561_vm13, %v14891_v11, 32 }
 0xc49   : > { %v6708_v52 = vsel %vm6556_vm15, %v14899_v14, 32  ;;  %vm6567_vm15 = vcmp.eq.f32.partialorder %v17269_v29, %v6467_v47 }
 0xc4f   : > { %6921 = vperm.xlu0 %8897, %v6712_v48   ;;  %6891 = vperm.xlu2 %8895, %v6702_v51   ;;  %v17264_v48 = vld [vmem:[#allocation115_spill] sm:$0xff]  ;;  %v17265_v51 = vld [vmem:[#allocation93_spill] sm:$0xff] }
 0xc50   : > { %6906 = vperm.xlu1 %8896, %v6707_v1   ;;  %vm6569_vm0 = vcmp.eq.f32.partialorder %v17264_v48, %v15007_v59  ;;  %vm6559_vm11 = vcmp.eq.f32.partialorder %v17265_v51, %v6465_v18  ;;  %v17268_v18 = vld [vmem:[#allocation39_spill] sm:$0xff]  ;;  %v17272_v48 = vld [vmem:[#allocation166_spill] sm:$0xff] }
 0xc51   : > { %v6721_v6 = vsel %vm6569_vm0, %v14891_v11, 32  ;;  %v6711_v1 = vsel %vm6559_vm11, %v14903_v22, 32  ;;  %vm6562_vm14 = vcmp.eq.f32.partialorder %v17268_v18, %v6466_v41  ;;  %vm6570_vm12 = vcmp.eq.f32.partialorder %v17272_v48, %v15007_v59 }
 0xc52   : > { %v6714_v46 = vsel %vm6562_vm14, %v14910_v19, 32 }
 0xc57   : > { %6930 = vperm.xlu0 %8897, %v6715_v30   ;;  %6900 = vperm.xlu2 %8895, %v6705_v55   ;;  %v15017_v30 = vperm.slane %v14897_v23, 5  ;;  %v17267_v55 = vld [vmem:[#allocation55_spill] sm:$0xff] }
 0xc58   : > { %6915 = vperm.xlu1 %8896, %v6710_v43   ;;  %v6719_v43 = vsel %vm6567_vm15, %v14903_v22, 32 }
 0xc59   : > { %v6808_v58 = vpop.permute.xlu2 %6807  ;;  %vm6572_vm13 = vcmp.eq.f32.partialorder %v17267_v55, %v15017_v30 }
 0xc5a   : > { %v7187_v25 = vperm.slane %v6808_v58, %v11323_v0  ;;  %v6724_v5 = vsel %vm6572_vm13, %v14899_v14, 32 }
 0xc5c   : > { %v7188_v4 = vsel %vm3518_vm2, %v7187_v25, %v7186_v2  ;;  %v7192_v2 = vperm.slane %v6817_v61, %v11317_v39 }
 0xc5d   : > { %v7190_v3 = vsel %vm3522_vm3, %v7189_v38, %v7188_v4  ;;  %v17270_v4 = vld [vmem:[#allocation145_spill] sm:$0xff] }
 0xc5e   : > { %vm6565_vm0 = vcmp.eq.f32.partialorder %v17270_v4, %v6467_v47  ;;  %v6722_v47 = vsel %vm6570_vm12, %v14910_v19, 32 }
 0xc5f   : > { %6939 = vperm.xlu0 %8897, %v6718_v60   ;;  %6909 = vperm.xlu2 %8895, %v6708_v52   ;;  %v17271_v60 = vld [vmem:[#allocation144_spill] sm:$0xff] }
 0xc60   : > { %6924 = vperm.xlu1 %8896, %v6713_v28   ;;  %vm6575_vm11 = vcmp.eq.f32.partialorder %v17271_v60, %v15017_v30  ;;  %v17276_v60 = vld [vmem:[#allocation33_spill] sm:$0xff] }
 0xc61   : > { %v6814_v26 = vpop.permute.xlu2 %6813  ;;  %v6727_v28 = vsel %vm6575_vm11, %v14903_v22, 32 }
 0xc62   : > { %v7191_v63 = vperm.slane %v6814_v26, %v11313_v62  ;;  %v6717_v26 = vsel %vm6565_vm0, %v14891_v11, 32 }
 0xc64   : > { %v7193_v24 = vsel %vm3514_vm1, %v7192_v2, %v7191_v63  ;;  %v17275_v63 = vld [vmem:[#allocation59_spill] sm:$0xff] }
 0xc65   : > { %vm6568_vm15 = vcmp.eq.f32.partialorder %v17275_v63, %v15007_v59 }
 0xc67   : > { %6948 = vperm.xlu0 %8897, %v6721_v6   ;;  %6918 = vperm.xlu2 %8895, %v6711_v1  }
 0xc68   : > { %6933 = vperm.xlu1 %8896, %v6716_v12  }
 0xc69   : > { %v6823_v57 = vpop.permute.xlu2 %6822 }
 0xc6a   : > { %v7196_v54 = vperm.slane %v6823_v57, %v11320_v13 }
 0xc6f   : > { %6957 = vperm.xlu0 %8897, %v6724_v5   ;;  %6927 = vperm.xlu2 %8895, %v6714_v46  }
 0xc70   : > { %6942 = vperm.xlu1 %8896, %v6719_v43   ;;  %v17274_v43 = vld [vmem:[#allocation136_spill] sm:$0xff] }
 0xc71   : > { %v6832_v58 = vpop.permute.xlu0 %6831  ;;  %v6829_v25 = vpop.permute.xlu2 %6828  ;;  %vm6578_vm14 = vcmp.eq.f32.partialorder %v17274_v43, %v15043_v27 }
 0xc72   : > { %v6820_v38 = vpop.permute.xlu1 %6819  ;;  %v7199_v55 = vperm.slane %v6829_v25, %v11317_v39  ;;  %v7201_v5 = vperm.slane %v6832_v58, %v11323_v0  ;;  %v6730_v2 = vsel %vm6578_vm14, %v14910_v19, 32  ;;  %v6720_v25 = vsel %vm6568_vm15, %v14899_v14, 32 }
 0xc73   : > { %v7194_v41 = vperm.slane %v6820_v38, %v11323_v0 }
 0xc75   : > { %v7195_v33 = vsel %vm3518_vm2, %v7194_v41, %v7193_v24  ;;  %v15063_v41 = vperm.slane %v14897_v23, 7 }
 0xc76   : > { %v7197_v52 = vsel %vm3522_vm3, %v7196_v54, %v7195_v33 }
 0xc77   : > { %6966 = vperm.xlu0 %8897, %v6727_v28   ;;  %6936 = vperm.xlu2 %8895, %v6717_v26   ;;  %v7408_v51 = vsel %vm3741_vm4, %v7197_v52, %v7190_v3  ;;  %v17273_v3 = vld [vmem:[#allocation149_spill] sm:$0xff]  ;;  %vm6581_vm0 = vcmp.eq.f32.partialorder %v17276_v60, %v15063_v41 }
 0xc78   : > { %6951 = vperm.xlu1 %8896, %v6722_v47   ;;  %vm6573_vm13 = vcmp.eq.f32.partialorder %v17273_v3, %v15017_v30  ;;  %v17277_v28 = vld [vmem:[#allocation157_spill] sm:$0xff]  ;;  %v6733_v48 = vsel %vm6581_vm0, %v14891_v11, 32  ;;  %v17280_v3 = vld [vmem:[#allocation26_spill] sm:$0xff] }
 0xc79   : > { %v6841_v6 = vpop.permute.xlu0 %6840  ;;  %v6838_v1 = vpop.permute.xlu2 %6837  ;;  %v6725_v58 = vsel %vm6573_vm13, %v14891_v11, 32  ;;  %vm6571_vm11 = vcmp.eq.f32.partialorder %v17277_v28, %v15007_v59  ;;  %vm6574_vm14 = vcmp.eq.f32.partialorder %v17280_v3, %v15017_v30 }
 0xc7a   : > { %v7206_v12 = vperm.slane %v6841_v6, %v11317_v39  ;;  %v7205_v61 = vperm.slane %v6838_v1, %v11313_v62  ;;  %v6826_v57 = vpop.permute.xlu1 %6825  ;;  %v6723_v47 = vsel %vm6571_vm11, %v14903_v22, 32  ;;  %v17278_v6 = vld [vmem:[#allocation161_spill] sm:$0xff]  ;;  %v6726_v63 = vsel %vm6574_vm14, %v14910_v19, 32 }
 0xc7b   : > { %v7198_v18 = vperm.slane %v6826_v57, %v11313_v62  ;;  %vm6576_vm12 = vcmp.eq.f32.partialorder %v17278_v6, %v15043_v27  ;;  %v15078_v57 = vperm.slane %v14884_v49, 0  ;;  %v17284_v6 = vld [vmem:[#allocation168_spill] sm:$0xff] }
 0xc7c   : > { %v7207_v46 = vsel %vm3514_vm1, %v7206_v12, %v7205_v61  ;;  %v6728_v1 = vsel %vm6576_vm12, %v14899_v14, 32  ;;  %vm6582_vm12 = vcmp.eq.f32.partialorder %v17284_v6, %v15063_v41 }
 0xc7d   : > { %v7200_v29 = vsel %vm3514_vm1, %v7199_v55, %v7198_v18 }
 0xc7e   : > { %v7202_v38 = vsel %vm3518_vm2, %v7201_v5, %v7200_v29  ;;  %v17279_v5 = vld [vmem:[#allocation6_spill] sm:$0xff] }
 0xc7f   : > { %6975 = vperm.xlu0 %8897, %v6730_v2   ;;  %6945 = vperm.xlu2 %8895, %v6720_v25   ;;  %vm6584_vm13 = vcmp.eq.f32.partialorder %v17279_v5, %v15078_v57  ;;  %v17281_v2 = vld [vmem:[#allocation164_spill] sm:$0xff] }
 0xc80   : > { %6960 = vperm.xlu1 %8896, %v6725_v58   ;;  %v6736_v43 = vsel %vm6584_vm13, %v14899_v14, 32  ;;  %vm6579_vm15 = vcmp.eq.f32.partialorder %v17281_v2, %v15043_v27 }
 0xc81   : > { %v6850_v4 = vpop.permute.xlu0 %6849  ;;  %v6847_v24 = vpop.permute.xlu2 %6846 }
 0xc82   : > { %v6835_v54 = vpop.permute.xlu1 %6834  ;;  %v7210_v55 = vperm.slane %v6847_v24, %v11320_v13  ;;  %v7212_v30 = vperm.slane %v6850_v4, %v11313_v62 }
 0xc83   : > { %v7203_v33 = vperm.slane %v6835_v54, %v11320_v13 }
 0xc85   : > { %v7204_v52 = vsel %vm3522_vm3, %v7203_v33, %v7202_v38  ;;  %v17282_v33 = vld [vmem:[#allocation99_spill] sm:$0xff] }
 0xc86   : > { %v7409_v26 = vsel %vm3743_vm5, %v7204_v52, %v7408_v51  ;;  %vm6577_vm0 = vcmp.eq.f32.partialorder %v17282_v33, %v15043_v27 }
 0xc87   : > { %6984 = vperm.xlu0 %8897, %v6733_v48   ;;  %6954 = vperm.xlu2 %8895, %v6723_v47   ;;  %v6729_v4 = vsel %vm6577_vm0, %v14891_v11, 32 }
 0xc88   : > { %6969 = vperm.xlu1 %8896, %v6728_v1   ;;  %v6734_v1 = vsel %vm6582_vm12, %v14910_v19, 32 }
 0xc89   : > { %v6859_v12 = vpop.permute.xlu0 %6858  ;;  %v6856_v61 = vpop.permute.xlu2 %6855 }
 0xc8a   : > { %v6844_v59 = vpop.permute.xlu1 %6843  ;;  %v7215_v60 = vperm.slane %v6856_v61, %v11323_v0  ;;  %v7217_v52 = vperm.slane %v6859_v12, %v11320_v13 }
 0xc8b   : > { %v7208_v51 = vperm.slane %v6844_v59, %v11323_v0 }
 0xc8d   : > { %v7209_v18 = vsel %vm3518_vm2, %v7208_v51, %v7207_v46  ;;  %v6731_v46 = vsel %vm6579_vm15, %v14903_v22, 32  ;;  %v15112_v51 = vperm.slane %v14884_v49, 1 }
 0xc8e   : > { %v7211_v29 = vsel %vm3522_vm3, %v7210_v55, %v7209_v18 }
 0xc8f   : > { %v7410_v25 = vsel %vm3745_vm6, %v7211_v29, %v7409_v26  ;;  %6993 = vperm.xlu0 %8897, %v6736_v43   ;;  %6963 = vperm.xlu2 %8895, %v6726_v63   ;;  %v17283_v26 = vld [vmem:[#allocation63_spill] sm:$0xff] }
 0xc90   : > { %6978 = vperm.xlu1 %8896, %v6731_v46   ;;  %vm6587_vm11 = vcmp.eq.f32.partialorder %v17283_v26, %v15078_v57  ;;  %v17286_v46 = vld [vmem:[#allocation104_spill] sm:$0xff] }
 0xc91   : > { %v6868_v38 = vpop.permute.xlu0 %6867  ;;  %v6865_v58 = vpop.permute.xlu2 %6864  ;;  %v6739_v47 = vsel %vm6587_vm11, %v14903_v22, 32  ;;  %vm6580_vm14 = vcmp.eq.f32.partialorder %v17286_v46, %v15063_v41 }
 0xc92   : > { %v6853_v24 = vpop.permute.xlu1 %6852  ;;  %v7220_v3 = vperm.slane %v6865_v58, %v11317_v39  ;;  %v7222_v43 = vperm.slane %v6868_v38, %v11323_v0  ;;  %v17287_v58 = vld [vmem:[#allocation167_spill] sm:$0xff] }
 0xc93   : > { %v7213_v54 = vperm.slane %v6853_v24, %v11317_v39  ;;  %vm6585_vm15 = vcmp.eq.f32.partialorder %v17287_v58, %v15078_v57 }
 0xc94   : > { %v6737_v38 = vsel %vm6585_vm15, %v14891_v11, 32 }
 0xc95   : > { %v7214_v28 = vsel %vm3514_vm1, %v7213_v54, %v7212_v30  ;;  %v6732_v30 = vsel %vm6580_vm14, %v14899_v14, 32 }
 0xc96   : > { %v7216_v48 = vsel %vm3518_vm2, %v7215_v60, %v7214_v28 }
 0xc97   : > { %v7218_v27 = vsel %vm3522_vm3, %v7217_v52, %v7216_v48  ;;  %7002 = vperm.xlu0 %8897, %v6739_v47   ;;  %6972 = vperm.xlu2 %8895, %v6729_v4   ;;  %v15132_v52 = vperm.slane %v14884_v49, 2  ;;  %v17288_v47 = vld [vmem:[#allocation88_spill] sm:$0xff]  ;;  %v17289_v4 = vld [vmem:[#allocation62_spill] sm:$0xff] }
 0xc98   : > { %6987 = vperm.xlu1 %8896, %v6734_v1   ;;  %v7411_v12 = vsel %vm3747_vm7, %v7218_v27, %v7410_v25  ;;  %v17285_v25 = vld [vmem:[#allocation22_spill] sm:$0xff]  ;;  %vm6583_vm11 = vcmp.eq.f32.partialorder %v17289_v4, %v15063_v41 }
 0xc99   : > { %v6877_v61 = vpop.permute.xlu0 %6876  ;;  %v6874_v59 = vpop.permute.xlu2 %6873  ;;  %vm6590_vm13 = vcmp.eq.f32.partialorder %v17285_v25, %v15112_v51  ;;  %vm6593_vm0 = vcmp.eq.f32.partialorder %v17288_v47, %v15132_v52  ;;  %v6735_v1 = vsel %vm6583_vm11, %v14903_v22, 32  ;;  %vm6589_vm11 = vcmp.eq.f32.partialorder %v14268_v34, %v15112_v51 }
 0xc9a   : > { %v7227_v55 = vperm.slane %v6877_v61, %v11317_v39  ;;  %v7226_v18 = vperm.slane %v6874_v59, %v11313_v62  ;;  %v6862_v5 = vpop.permute.xlu1 %6861  ;;  %v6742_v24 = vsel %vm6590_vm13, %v14910_v19, 32  ;;  %v6745_v27 = vsel %vm6593_vm0, %v14891_v11, 32  ;;  %v17290_v61 = vld [vmem:[#allocation8_spill] sm:$0xff] }
 0xc9b   : > { %v7219_v29 = vperm.slane %v6862_v5, %v11313_v62  ;;  %vm6588_vm12 = vcmp.eq.f32.partialorder %v17290_v61, %v15112_v51  ;;  %v15147_v5 = vperm.slane %v14884_v49, 3  ;;  %v6741_v61 = vsel %vm6589_vm11, %v14891_v11, 32 }
 0xc9c   : > { %v7228_v63 = vsel %vm3514_vm1, %v7227_v55, %v7226_v18  ;;  %v6740_v59 = vsel %vm6588_vm12, %v14899_v14, 32  ;;  %vm6595_vm11 = vcmp.eq.f32.partialorder %v14425_v15, %v15132_v52 }
 0xc9d   : > { %v7221_v2 = vsel %vm3514_vm1, %v7220_v3, %v7219_v29 }
 0xc9e   : > { %v7223_v54 = vsel %vm3518_vm2, %v7222_v43, %v7221_v2  ;;  %v17291_v43 = vld [vmem:[#allocation27_spill] sm:$0xff] }
 0xc9f   : > { %7011 = vperm.xlu0 %8897, %v6742_v24   ;;  %6981 = vperm.xlu2 %8895, %v6732_v30   ;;  %vm6596_vm13 = vcmp.eq.f32.partialorder %v17291_v43, %v15147_v5  ;;  %v17292_v2 = vld [vmem:[#allocation67_spill] sm:$0xff] }
 0xca0   : > { %6996 = vperm.xlu1 %8896, %v6737_v38   ;;  %vm6586_vm14 = vcmp.eq.f32.partialorder %v17292_v2, %v15078_v57  ;;  %v6748_v46 = vsel %vm6596_vm13, %v14899_v14, 32  ;;  %v17293_v30 = vld [vmem:[#allocation107_spill] sm:$0xff]  ;;  %v6476_v57 = vperm.slane %v14884_v49, 4 }
 0xca1   : > { %v6886_v33 = vpop.permute.xlu0 %6885  ;;  %v6883_v60 = vpop.permute.xlu2 %6882  ;;  %v6738_v24 = vsel %vm6586_vm14, %v14910_v19, 32  ;;  %vm6591_vm15 = vcmp.eq.f32.partialorder %v17293_v30, %v15112_v51  ;;  %vm6592_vm14 = vcmp.eq.f32.partialorder %v14278_v40, %v15132_v52 }
 0xca2   : > { %v6871_v28 = vpop.permute.xlu1 %6870  ;;  %v7231_v3 = vperm.slane %v6883_v60, %v11320_v13  ;;  %v6743_v58 = vsel %vm6591_vm15, %v14903_v22, 32 }
 0xca3   : > { %v7224_v26 = vperm.slane %v6871_v28, %v11320_v13  ;;  %v7233_v28 = vperm.slane %v6886_v33, %v11313_v62  ;;  %v17295_v33 = vld [vmem:[#allocation119_spill] sm:$0xff] }
 0xca4   : > { %vm6594_vm12 = vcmp.eq.f32.partialorder %v17295_v33, %v15132_v52  ;;  %v15208_v33 = vperm.slane %v14884_v49, 6 }
 0xca5   : > { %v7225_v48 = vsel %vm3522_vm3, %v7224_v26, %v7223_v54 }
 0xca6   : > { %v7412_v6 = vsel %vm3749_vm8, %v7225_v48, %v7411_v12 }
 0xca7   : > { %7020 = vperm.xlu0 %8897, %v6745_v27   ;;  %6990 = vperm.xlu2 %8895, %v6735_v1   ;;  %v17294_v27 = vld [vmem:[#allocation31_spill] sm:$0xff] }
 0xca8   : > { %7005 = vperm.xlu1 %8896, %v6740_v59   ;;  %vm6600_vm0 = vcmp.eq.f32.partialorder %v17294_v27, %v6476_v57  ;;  %v6746_v59 = vsel %vm6594_vm12, %v14910_v19, 32  ;;  %v6747_v27 = vsel %vm6595_vm11, %v14903_v22, 32  ;;  %vm6601_vm12 = vcmp.eq.f32.partialorder %v14461_v50, %v6476_v57  ;;  %v17299_v50 = vld [vmem:[#allocation65_spill] sm:$0xff] }
 0xca9   : > { %v6895_v55 = vpop.permute.xlu0 %6894  ;;  %v6892_v18 = vpop.permute.xlu2 %6891  ;;  %v6752_v1 = vsel %vm6600_vm0, %v14899_v14, 32 }
 0xcaa   : > { %v6880_v41 = vpop.permute.xlu1 %6879  ;;  %v7236_v48 = vperm.slane %v6892_v18, %v11323_v0  ;;  %v7238_v47 = vperm.slane %v6895_v55, %v11320_v13 }
 0xcab   : > { %v7229_v12 = vperm.slane %v6880_v41, %v11323_v0 }
 0xcad   : > { %v7230_v29 = vsel %vm3518_vm2, %v7229_v12, %v7228_v63 }
 0xcae   : > { %v7232_v25 = vsel %vm3522_vm3, %v7231_v3, %v7230_v29 }
 0xcaf   : > { %7029 = vperm.xlu0 %8897, %v6748_v46   ;;  %6999 = vperm.xlu2 %8895, %v6738_v24   ;;  %v7413_v63 = vsel %vm3751_vm9, %v7232_v25, %v7412_v6  ;;  %v17296_v24 = vld [vmem:[#allocation141_spill] sm:$0xff] }
 0xcb0   : > { %7014 = vperm.xlu1 %8896, %v6743_v58   ;;  %vm6602_vm13 = vcmp.eq.f32.partialorder %v17296_v24, %v6476_v57  ;;  %v6744_v58 = vsel %vm6592_vm14, %v14899_v14, 32  ;;  %vm6598_vm14 = vcmp.eq.f32.partialorder %v14447_v9, %v15147_v5 }
 0xcb1   : > { %v6904_v54 = vpop.permute.xlu0 %6903  ;;  %v6901_v38 = vpop.permute.xlu2 %6900  ;;  %v6754_v30 = vsel %vm6602_vm13, %v14910_v19, 32  ;;  %vm6609_vm13 = vcmp.eq.f32.partialorder %v17299_v50, %v15208_v33  ;;  %v17304_v50 = vld [vmem:[#allocation47_spill] sm:$0xff] }
 0xcb2   : > { %v6889_v60 = vpop.permute.xlu1 %6888  ;;  %v7241_v29 = vperm.slane %v6901_v38, %v11317_v39  ;;  %v7243_v2 = vperm.slane %v6904_v54, %v11323_v0 }
 0xcb3   : > { %v7234_v26 = vperm.slane %v6889_v60, %v11317_v39 }
 0xcb5   : > { %v7235_v4 = vsel %vm3514_vm1, %v7234_v26, %v7233_v28 }
 0xcb6   : > { %v7237_v6 = vsel %vm3518_vm2, %v7236_v48, %v7235_v4 }
 0xcb7   : > { %7041 = vperm.xlu0 %8897, %v6752_v1   ;;  %7008 = vperm.xlu2 %8895, %v6741_v61   ;;  %v7239_v55 = vsel %vm3522_vm3, %v7238_v47, %v7237_v6  ;;  %v17298_v47 = vld [vmem:[#allocation148_spill] sm:$0xff]  ;;  %v6753_v6 = vsel %vm6601_vm12, %v14891_v11, 32 }
 0xcb8   : > { %7023 = vperm.xlu1 %8896, %v6746_v59   ;;  %v15180_v18 = vsel %vm3753_vm10, %v7239_v55, %v7413_v63  ;;  %v17297_v63 = vld [vmem:[#allocation109_spill] sm:$0xff]  ;;  %vm6603_vm0 = vcmp.eq.f32.partialorder %v17298_v47, %v6476_v57  ;;  %v6477_v55 = vperm.slane %v14884_v49, 5 }
 0xcb9   : > { %v6913_v34 = vpop.permute.xlu0 %6912  ;;  %v6910_v51 = vpop.permute.xlu2 %6909  ;;  %vm6597_vm15 = vcmp.eq.f32.partialorder %v17297_v63, %v15147_v5  ;;  %v6755_v4 = vsel %vm6603_vm0, %v14903_v22, 32  ;;  %v17301_v63 = vld [vmem:[#allocation37_spill] sm:$0xff] }
 0xcba   : > { %v7248_v41 = vperm.slane %v6913_v34, %v11317_v39  ;;  %v7247_v12 = vperm.slane %v6910_v51, %v11313_v62  ;;  %v6898_v3 = vpop.permute.xlu1 %6897  ;;  %v6749_v54 = vsel %vm6597_vm15, %v14891_v11, 32  ;;  %v6761_v51 = vsel %vm6609_vm13, %v14891_v11, 32 }
 0xcbb   : > { %v7240_v43 = vperm.slane %v6898_v3, %v11313_v62  ;;  %vm6604_vm15 = vcmp.eq.f32.partialorder %v14477_v53, %v6477_v55  ;;  %vm6599_vm11 = vcmp.eq.f32.partialorder %v17301_v63, %v15147_v5 }
 0xcbc   : > { %v7249_v25 = vsel %vm3514_vm1, %v7248_v41, %v7247_v12  ;;  %v6750_v41 = vsel %vm6598_vm14, %v14910_v19, 32  ;;  %v6756_v3 = vsel %vm6604_vm15, %v14899_v14, 32  ;;  %vm6605_vm14 = vcmp.eq.f32.partialorder %v17304_v50, %v6477_v55 }
 0xcbd   : > { %v7242_v46 = vsel %vm3514_vm1, %v7241_v29, %v7240_v43  ;;  %vm6607_vm15 = vcmp.eq.f32.partialorder %v14488_v8, %v6477_v55 }
 0xcbe   : > { %v7244_v38 = vsel %vm3518_vm2, %v7243_v2, %v7242_v46  ;;  %v15225_v2 = vperm.slane %v14884_v49, 7 }
 0xcbf   : > { %7047 = vperm.xlu0 %8897, %v6754_v30   ;;  %7017 = vperm.xlu2 %8895, %v6744_v58   ;;  %v17300_v58 = vld [vmem:[#allocation24_spill] sm:$0xff] }
 0xcc0   : > { %7032 = vperm.xlu1 %8896, %v6749_v54   ;;  %vm6612_vm0 = vcmp.eq.f32.partialorder %v17300_v58, %v15225_v2 }
 0xcc1   : > { %v6922_v60 = vpop.permute.xlu0 %6921  ;;  %v6919_v28 = vpop.permute.xlu2 %6918  ;;  %v6764_v54 = vsel %vm6612_vm0, %v14899_v14, 32 }
 0xcc2   : > { %v6907_v26 = vpop.permute.xlu1 %6906  ;;  %v7252_v52 = vperm.slane %v6919_v28, %v11320_v13  ;;  %v17302_v28 = vld [vmem:[#allocation128_spill] sm:$0xff] }
 0xcc3   : > { %v7245_v48 = vperm.slane %v6907_v26, %v11320_v13  ;;  %vm6606_vm12 = vcmp.eq.f32.partialorder %v17302_v28, %v6477_v55  ;;  %v17306_v55 = vld [vmem:[#allocation96_spill] sm:$0xff] }
 0xcc5   : > { %v7246_v40 = vsel %vm3522_vm3, %v7245_v48, %v7244_v38  ;;  %v6758_v48 = vsel %vm6606_vm12, %v14910_v19, 32  ;;  %vm6613_vm12 = vcmp.eq.f32.partialorder %v14504_v35, %v15225_v2 }
 0xcc6   : > { %v6765_v58 = vsel %vm6613_vm12, %v14891_v11, 32 }
 0xcc7   : > { %7050 = vperm.xlu0 %8897, %v6755_v4   ;;  %7026 = vperm.xlu2 %8895, %v6747_v27  }
 0xcc8   : > { %7044 = vperm.xlu1 %8896, %v6753_v6  }
 0xcc9   : > { %v6931_v1 = vpop.permute.xlu0 %6930  ;;  %v6928_v61 = vpop.permute.xlu2 %6927 }
 0xcca   : > { %v6916_v59 = vpop.permute.xlu1 %6915  ;;  %v7257_v24 = vperm.slane %v6928_v61, %v11323_v0  ;;  %v7259_v53 = vperm.slane %v6931_v1, %v11320_v13 }
 0xccb   : > { %v7250_v15 = vperm.slane %v6916_v59, %v11323_v0 }
 0xccd   : > { %v7251_v34 = vsel %vm3518_vm2, %v7250_v15, %v7249_v25  ;;  %v7254_v25 = vperm.slane %v6922_v60, %v11313_v62  ;;  %v6751_v60 = vsel %vm6599_vm11, %v14903_v22, 32  ;;  %vm6608_vm11 = vcmp.eq.f32.partialorder %v17306_v55, %v15208_v33 }
 0xcce   : > { %v7253_v57 = vsel %vm3522_vm3, %v7252_v52, %v7251_v34  ;;  %v17303_v34 = vld [vmem:[#allocation69_spill] sm:$0xff] }
 0xccf   : > { %v7415_v12 = vsel %vm3741_vm4, %v7253_v57, %v7246_v40  ;;  %7068 = vperm.xlu0 %8897, %v6761_v51   ;;  %7035 = vperm.xlu2 %8895, %v6750_v41   ;;  %vm6614_vm13 = vcmp.eq.f32.partialorder %v17303_v34, %v15225_v2  ;;  %v6757_v51 = vsel %vm6605_vm14, %v14891_v11, 32  ;;  %vm6610_vm14 = vcmp.eq.f32.partialorder %v14495_v7, %v15208_v33  ;;  %v17309_v34 = vld [vmem:[#allocation169_spill] sm:$0xff] }
 0xcd0   : > { %7053 = vperm.xlu1 %8896, %v6756_v3   ;;  %v6766_v57 = vsel %vm6614_vm13, %v14910_v19, 32  ;;  %v15259_v3 = vperm.slane %v14907_v56, 0  ;;  %v15291_v7 = vperm.slane %v14907_v56, 1 }
 0xcd1   : > { %v6940_v29 = vpop.permute.xlu0 %6939  ;;  %v6937_v43 = vpop.permute.xlu2 %6936 }
 0xcd2   : > { %v6925_v9 = vpop.permute.xlu1 %6924  ;;  %v7262_v1 = vperm.slane %v6937_v43, %v11317_v39  ;;  %v7264_v59 = vperm.slane %v6940_v29, %v11323_v0 }
 0xcd3   : > { %v7255_v46 = vperm.slane %v6925_v9, %v11317_v39 }
 0xcd5   : > { %v7256_v30 = vsel %vm3514_vm1, %v7255_v46, %v7254_v25  ;;  %v17305_v46 = vld [vmem:[#allocation150_spill] sm:$0xff] }
 0xcd6   : > { %v7258_v38 = vsel %vm3518_vm2, %v7257_v24, %v7256_v30  ;;  %vm6617_vm0 = vcmp.eq.f32.partialorder %v17305_v46, %v15259_v3  ;;  %v6760_v30 = vsel %vm6608_vm11, %v14899_v14, 32  ;;  %vm6620_vm11 = vcmp.eq.f32.partialorder %v17309_v34, %v15291_v7  ;;  %v17314_v34 = vld [vmem:[#allocation132_spill] sm:$0xff] }
 0xcd7   : > { %v7260_v26 = vsel %vm3522_vm3, %v7259_v53, %v7258_v38  ;;  %7077 = vperm.xlu0 %8897, %v6764_v54   ;;  %7038 = vperm.xlu2 %8895, %v6751_v60   ;;  %v6769_v53 = vsel %vm6617_vm0, %v14891_v11, 32 }
 0xcd8   : > { %7059 = vperm.xlu1 %8896, %v6758_v48   ;;  %v7416_v40 = vsel %vm3743_vm5, %v7260_v26, %v7415_v12  ;;  %v6759_v12 = vsel %vm6607_vm15, %v14903_v22, 32  ;;  %v17307_v48 = vld [vmem:[#allocation49_spill] sm:$0xff] }
 0xcd9   : > { %v6949_v47 = vpop.permute.xlu0 %6948  ;;  %v6946_v4 = vpop.permute.xlu2 %6945  ;;  %vm6618_vm13 = vcmp.eq.f32.partialorder %v17307_v48, %v15259_v3 }
 0xcda   : > { %v7269_v5 = vperm.slane %v6949_v47, %v11317_v39  ;;  %v7268_v27 = vperm.slane %v6946_v4, %v11313_v62  ;;  %v6934_v6 = vpop.permute.xlu1 %6933  ;;  %v6762_v47 = vsel %vm6610_vm14, %v14910_v19, 32  ;;  %v17308_v4 = vld [vmem:[#allocation98_spill] sm:$0xff] }
 0xcdb   : > { %v7261_v61 = vperm.slane %v6934_v6, %v11313_v62  ;;  %vm6615_vm15 = vcmp.eq.f32.partialorder %v17308_v4, %v15225_v2  ;;  %v15288_v6 = vperm.slane %v14907_v56, 2  ;;  %v17313_v4 = vld [vmem:[#allocation170_spill] sm:$0xff] }
 0xcdc   : > { %v7270_v15 = vsel %vm3514_vm1, %v7269_v5, %v7268_v27  ;;  %v6767_v27 = vsel %vm6615_vm15, %v14903_v22, 32  ;;  %vm6622_vm15 = vcmp.eq.f32.partialorder %v14555_v21, %v15291_v7 }
 0xcdd   : > { %v7263_v52 = vsel %vm3514_vm1, %v7262_v1, %v7261_v61  ;;  %vm6625_vm0 = vcmp.eq.f32.partialorder %v14604_v10, %v15288_v6 }
 0xcde   : > { %v7265_v41 = vsel %vm3518_vm2, %v7264_v59, %v7263_v52 }
 0xcdf   : > { %7083 = vperm.xlu0 %8897, %v6766_v57   ;;  %7056 = vperm.xlu2 %8895, %v6757_v51   ;;  %v17310_v51 = vld [vmem:[#allocation57_spill] sm:$0xff] }
 0xce0   : > { %7062 = vperm.xlu1 %8896, %v6759_v12   ;;  %vm6611_vm12 = vcmp.eq.f32.partialorder %v17310_v51, %v15208_v33  ;;  %v6777_v12 = vsel %vm6625_vm0, %v14891_v11, 32 }
 0xce1   : > { %v6958_v29 = vpop.permute.xlu0 %6957  ;;  %v6955_v43 = vpop.permute.xlu2 %6954 }
 0xce2   : > { %v6943_v9 = vpop.permute.xlu1 %6942  ;;  %v7273_v28 = vperm.slane %v6955_v43, %v11320_v13  ;;  %v6772_v43 = vsel %vm6620_vm11, %v14899_v14, 32  ;;  %vm6621_vm11 = vcmp.eq.f32.partialorder %v17313_v4, %v15291_v7 }
 0xce3   : > { %v7266_v25 = vperm.slane %v6943_v9, %v11320_v13 }
 0xce5   : > { %v7267_v8 = vsel %vm3522_vm3, %v7266_v25, %v7265_v41 }
 0xce6   : > { %v7417_v24 = vsel %vm3745_vm6, %v7267_v8, %v7416_v40  ;;  %v6770_v40 = vsel %vm6618_vm13, %v14910_v19, 32  ;;  %vm6616_vm13 = vcmp.eq.f32.partialorder %v14515_v44, %v15259_v3  ;;  %v6774_v44 = vsel %vm6622_vm15, %v14910_v19, 32 }
 0xce7   : > { %7092 = vperm.xlu0 %8897, %v6769_v53   ;;  %7065 = vperm.xlu2 %8895, %v6760_v30  }
 0xce8   : > { %7080 = vperm.xlu1 %8896, %v6765_v58  }
 0xce9   : > { %v6967_v63 = vpop.permute.xlu0 %6966  ;;  %v6964_v38 = vpop.permute.xlu2 %6963 }
 0xcea   : > { %v6952_v54 = vpop.permute.xlu1 %6951  ;;  %v7278_v52 = vperm.slane %v6964_v38, %v11323_v0  ;;  %v7280_v50 = vperm.slane %v6967_v63, %v11320_v13  ;;  %v17311_v38 = vld [vmem:[#allocation108_spill] sm:$0xff] }
 0xceb   : > { %v7271_v60 = vperm.slane %v6952_v54, %v11323_v0  ;;  %vm6626_vm14 = vcmp.eq.f32.partialorder %v17311_v38, %v15288_v6 }
 0xcec   : > { %v6778_v54 = vsel %vm6626_vm14, %v14910_v19, 32 }
 0xced   : > { %v7272_v26 = vsel %vm3518_vm2, %v7271_v60, %v7270_v15  ;;  %v7275_v15 = vperm.slane %v6958_v29, %v11313_v62  ;;  %v6763_v29 = vsel %vm6611_vm12, %v14903_v22, 32  ;;  %v6768_v60 = vsel %vm6616_vm13, %v14899_v14, 32 }
 0xcee   : > { %v7274_v35 = vsel %vm3522_vm3, %v7273_v28, %v7272_v26  ;;  %vm6619_vm12 = vcmp.eq.f32.partialorder %v14524_v45, %v15259_v3 }
 0xcef   : > { %v7418_v5 = vsel %vm3747_vm7, %v7274_v35, %v7417_v24  ;;  %7095 = vperm.xlu0 %8897, %v6770_v40   ;;  %7071 = vperm.xlu2 %8895, %v6762_v47   ;;  %v17312_v47 = vld [vmem:[#allocation87_spill] sm:$0xff] }
 0xcf0   : > { %7086 = vperm.xlu1 %8896, %v6767_v27   ;;  %vm6627_vm0 = vcmp.eq.f32.partialorder %v17312_v47, %v15288_v6 }
 0xcf1   : > { %v6976_v1 = vpop.permute.xlu0 %6975  ;;  %v6973_v61 = vpop.permute.xlu2 %6972  ;;  %v6779_v27 = vsel %vm6627_vm0, %v14903_v22, 32 }
 0xcf2   : > { %v6961_v59 = vpop.permute.xlu1 %6960  ;;  %v7283_v24 = vperm.slane %v6973_v61, %v11317_v39  ;;  %v7285_v30 = vperm.slane %v6976_v1, %v11323_v0  ;;  %v6773_v1 = vsel %vm6621_vm11, %v14891_v11, 32  ;;  %v6771_v61 = vsel %vm6619_vm12, %v14903_v22, 32 }
 0xcf3   : > { %v7276_v2 = vperm.slane %v6961_v59, %v11317_v39  ;;  %v15340_v59 = vperm.slane %v14907_v56, 4 }
 0xcf5   : > { %v7277_v57 = vsel %vm3514_vm1, %v7276_v2, %v7275_v15  ;;  %v6483_v15 = vperm.slane %v14907_v56, 3  ;;  %vm6633_vm13 = vcmp.eq.f32.partialorder %v17314_v34, %v15340_v59 }
 0xcf6   : > { %v7279_v41 = vsel %vm3518_vm2, %v7278_v52, %v7277_v57 }
 0xcf7   : > { %v7281_v10 = vsel %vm3522_vm3, %v7280_v50, %v7279_v41  ;;  %7116 = vperm.xlu0 %8897, %v6777_v12   ;;  %7074 = vperm.xlu2 %8895, %v6763_v29   ;;  %v17315_v50 = vld [vmem:[#allocation17_spill] sm:$0xff]  ;;  %vm6628_vm15 = vcmp.eq.f32.partialorder %v14634_v31, %v6483_v15  ;;  %v6785_v12 = vsel %vm6633_vm13, %v14891_v11, 32 }
 0xcf8   : > { %7101 = vperm.xlu1 %8896, %v6772_v43   ;;  %v7419_v9 = vsel %vm3749_vm8, %v7281_v10, %v7418_v5  ;;  %vm6624_vm14 = vcmp.eq.f32.partialorder %v17315_v50, %v15288_v6  ;;  %v6780_v10 = vsel %vm6628_vm15, %v14899_v14, 32  ;;  %v6485_v43 = vperm.slane %v14907_v56, 5 }
 0xcf9   : > { %v6985_v25 = vpop.permute.xlu0 %6984  ;;  %v6982_v46 = vpop.permute.xlu2 %6981  ;;  %v6776_v29 = vsel %vm6624_vm14, %v14899_v14, 32  ;;  %vm6631_vm14 = vcmp.eq.f32.partialorder %v14651_v20, %v6483_v15 }
 0xcfa   : > { %v7290_v8 = vperm.slane %v6985_v25, %v11317_v39  ;;  %v7289_v33 = vperm.slane %v6982_v46, %v11313_v62  ;;  %v6970_v55 = vpop.permute.xlu1 %6969 }
 0xcfb   : > { %v7282_v53 = vperm.slane %v6970_v55, %v11313_v62  ;;  %v17317_v55 = vld [vmem:[#allocation112_spill] sm:$0xff] }
 0xcfc   : > { %v7291_v58 = vsel %vm3514_vm1, %v7290_v8, %v7289_v33  ;;  %v17316_v33 = vld [vmem:[#allocation83_spill] sm:$0xff]  ;;  %vm6623_vm11 = vcmp.eq.f32.partialorder %v17317_v55, %v15291_v7 }
 0xcfd   : > { %v7284_v63 = vsel %vm3514_vm1, %v7283_v24, %v7282_v53  ;;  %vm6636_vm0 = vcmp.eq.f32.partialorder %v17316_v33, %v6485_v43  ;;  %v6775_v38 = vsel %vm6623_vm11, %v14903_v22, 32 }
 0xcfe   : > { %v7286_v28 = vsel %vm3518_vm2, %v7285_v30, %v7284_v63  ;;  %v6788_v63 = vsel %vm6636_vm0, %v14899_v14, 32 }
 0xcff   : > { %7119 = vperm.xlu0 %8897, %v6778_v54   ;;  %7089 = vperm.xlu2 %8895, %v6768_v60   ;;  %v17318_v54 = vld [vmem:[#allocation71_spill] sm:$0xff] }
 0xd00   : > { %7107 = vperm.xlu1 %8896, %v6774_v44   ;;  %vm6630_vm12 = vcmp.eq.f32.partialorder %v17318_v54, %v6483_v15 }
 0xd01   : > { %v6994_v26 = vpop.permute.xlu0 %6993  ;;  %v6991_v48 = vpop.permute.xlu2 %6990  ;;  %v6782_v60 = vsel %vm6630_vm12, %v14910_v19, 32  ;;  %vm6637_vm12 = vcmp.eq.f32.partialorder %v14667_v37, %v6485_v43 }
 0xd02   : > { %v6979_v35 = vpop.permute.xlu1 %6978  ;;  %v7294_v57 = vperm.slane %v6991_v48, %v11320_v13  ;;  %v7296_v46 = vperm.slane %v6994_v26, %v11313_v62 }
 0xd03   : > { %v7287_v40 = vperm.slane %v6979_v35, %v11320_v13 }
 0xd05   : > { %v7288_v21 = vsel %vm3522_vm3, %v7287_v40, %v7286_v28  ;;  %v17319_v40 = vld [vmem:[#allocation111_spill] sm:$0xff] }
 0xd06   : > { %v7420_v5 = vsel %vm3751_vm9, %v7288_v21, %v7419_v9  ;;  %vm6629_vm13 = vcmp.eq.f32.partialorder %v17319_v40, %v6483_v15  ;;  %v17320_v21 = vld [vmem:[#allocation117_spill] sm:$0xff] }
 0xd07   : > { %7122 = vperm.xlu0 %8897, %v6779_v27   ;;  %7104 = vperm.xlu2 %8895, %v6773_v1   ;;  %vm6638_vm15 = vcmp.eq.f32.partialorder %v17320_v21, %v6485_v43  ;;  %v6781_v27 = vsel %vm6629_vm13, %v14891_v11, 32  ;;  %v17328_v40 = vld [vmem:[#allocation13_spill] sm:$0xff] }
 0xd08   : > { %7098 = vperm.xlu1 %8896, %v6771_v61   ;;  %v6783_v61 = vsel %vm6631_vm14, %v14903_v22, 32 }
 0xd09   : > { %v7003_v2 = vpop.permute.xlu0 %7002  ;;  %v7000_v45 = vpop.permute.xlu2 %6999 }
 0xd0a   : > { %v6988_v3 = vpop.permute.xlu1 %6987  ;;  %v7299_v24 = vperm.slane %v7000_v45, %v11323_v0  ;;  %v7301_v53 = vperm.slane %v7003_v2, %v11320_v13 }
 0xd0b   : > { %v7292_v52 = vperm.slane %v6988_v3, %v11323_v0  ;;  %v17321_v3 = vld [vmem:[#allocation11_spill] sm:$0xff] }
 0xd0c   : > { %vm6639_vm0 = vcmp.eq.f32.partialorder %v17321_v3, %v6485_v43 }
 0xd0d   : > { %v7293_v51 = vsel %vm3518_vm2, %v7292_v52, %v7291_v58  ;;  %v17322_v52 = vld [vmem:[#allocation53_spill] sm:$0xff] }
 0xd0e   : > { %v7295_v41 = vsel %vm3522_vm3, %v7294_v57, %v7293_v51  ;;  %vm6632_vm11 = vcmp.eq.f32.partialorder %v17322_v52, %v15340_v59  ;;  %v6791_v57 = vsel %vm6639_vm0, %v14903_v22, 32 }
 0xd0f   : > { %7140 = vperm.xlu0 %8897, %v6785_v12   ;;  %7113 = vperm.xlu2 %8895, %v6776_v29   ;;  %v15357_v6 = vsel %vm3753_vm10, %v7295_v41, %v7420_v5  ;;  %v6790_v5 = vsel %vm6638_vm15, %v14910_v19, 32  ;;  %v6784_v51 = vsel %vm6632_vm11, %v14899_v14, 32  ;;  %v6789_v41 = vsel %vm6637_vm12, %v14891_v11, 32 }
 0xd10   : > { %7125 = vperm.xlu1 %8896, %v6780_v10   ;;  %v6487_v12 = vperm.slane %v14907_v56, 7  ;;  %v6486_v29 = vperm.slane %v14907_v56, 6  ;;  %vm6634_vm15 = vcmp.eq.f32.partialorder %v14658_v36, %v15340_v59 }
 0xd11   : > { %v7012_v9 = vpop.permute.xlu0 %7011  ;;  %v7009_v31 = vpop.permute.xlu2 %7008 }
 0xd12   : > { %v6997_v25 = vpop.permute.xlu1 %6996  ;;  %v7304_v48 = vperm.slane %v7009_v31, %v11317_v39  ;;  %v7306_v47 = vperm.slane %v7012_v9, %v11323_v0  ;;  %v17323_v9 = vld [vmem:[#allocation35_spill] sm:$0xff]  ;;  %vm6640_vm14 = vcmp.eq.f32.partialorder %v14674_v16, %v6486_v29  ;;  %v17325_v16 = vld [vmem:[#allocation116_spill] sm:$0xff] }
 0xd13   : > { %v7297_v8 = vperm.slane %v6997_v25, %v11317_v39  ;;  %vm6645_vm13 = vcmp.eq.f32.partialorder %v17323_v9, %v6487_v12  ;;  %v6786_v25 = vsel %vm6634_vm15, %v14910_v19, 32  ;;  %vm6635_vm11 = vcmp.eq.f32.partialorder %v17325_v16, %v15340_v59 }
 0xd14   : > { %v6797_v31 = vsel %vm6645_vm13, %v14891_v11, 32  ;;  %vm6644_vm15 = vcmp.eq.f32.partialorder %v17328_v40, %v6487_v12 }
 0xd15   : > { %v7298_v30 = vsel %vm3514_vm1, %v7297_v8, %v7296_v46  ;;  %v6792_v46 = vsel %vm6640_vm14, %v14899_v14, 32  ;;  %vm6643_vm14 = vcmp.eq.f32.partialorder %v14681_v17, %v6486_v29 }
 0xd16   : > { %v7300_v58 = vsel %vm3518_vm2, %v7299_v24, %v7298_v30  ;;  %v17324_v24 = vld [vmem:[#allocation140_spill] sm:$0xff]  ;;  %v17326_v30 = vld [vmem:[#allocation25_spill] sm:$0xff] }
 0xd17   : > { %7149 = vperm.xlu0 %8897, %v6788_v63   ;;  %7110 = vperm.xlu2 %8895, %v6775_v38   ;;  %v7302_v7 = vsel %vm3522_vm3, %v7301_v53, %v7300_v58  ;;  %vm6647_vm0 = vcmp.eq.f32.partialorder %v17324_v24, %v6487_v12  ;;  %v6787_v53 = vsel %vm6635_vm11, %v14903_v22, 32  ;;  %vm6642_vm12 = vcmp.eq.f32.partialorder %v17326_v30, %v6486_v29 }
 0xd18   : > { %7131 = vperm.xlu1 %8896, %v6782_v60   ;;  %v6799_v36 = vsel %vm6647_vm0, %v14903_v22, 32  ;;  %v6794_v58 = vsel %vm6642_vm12, %v14910_v19, 32  ;;  %v17327_v60 = vld [vmem:[#allocation45_spill] sm:$0xff]  ;;  %vm17330_vm11 = vcmask 261120  }
 0xd19   : > { %v15373_v28 = vpop.permute.xlu0 %7020  ;;  %v15375_v44 = vpop.permute.xlu2 %7017  ;;  %vm6641_vm13 = vcmp.eq.f32.partialorder %v17327_v60, %v6486_v29  ;;  %vm17331_vm12 = vmmov %vm17330_vm11 }
 0xd1a   : > { %v7006_v26 = vpop.permute.xlu1 %7005  ;;  %v6793_v59 = vsel %vm6641_vm13, %v14891_v11, 32  ;;  %v7311_v11 = vperm.slane %v15373_v28, %v11317_v39  ;;  %vm17332_vm13 = vmmov %vm17330_vm11 }
 0xd1b   : > { %v7303_v35 = vperm.slane %v7006_v26, %v11313_v62 }
 0xd1d   : > { %v7305_v4 = vsel %vm3514_vm1, %v7304_v48, %v7303_v35 }
 0xd1e   : > { %v7307_v1 = vsel %vm3518_vm2, %v7306_v47, %v7305_v4  ;;  %v6796_v47 = vsel %vm6644_vm15, %v14899_v14, 32 }
 0xd1f   : > { %7155 = vperm.xlu0 %8897, %v6790_v5   ;;  %7128 = vperm.xlu2 %8895, %v6781_v27   ;;  %v17329_v27 = vld [vmem:[#allocation127_spill] sm:$0xff] }
 0xd20   : > { %7134 = vperm.xlu1 %8896, %v6783_v61   ;;  %vm6646_vm0 = vcmp.eq.f32.partialorder %v17329_v27, %v6487_v12 }
 0xd21   : > { %v15388_v2 = vpop.permute.xlu0 %7029  ;;  %v15390_v45 = vpop.permute.xlu2 %7026  ;;  %v6798_v17 = vsel %vm6646_vm0, %v14910_v19, 32 }
 0xd22   : > { %v7015_v20 = vpop.permute.xlu1 %7014  ;;  %v7317_v19 = vperm.slane %v15388_v2, %v11313_v62 }
 0xd23   : > { %v7308_v15 = vperm.slane %v7015_v20, %v11320_v13 }
 0xd25   : > { %v7309_v34 = vsel %vm3522_vm3, %v7308_v15, %v7307_v1 }
 0xd26   : > { %v15399_v50 = vsel %vm3741_vm4, %v7309_v34, %v7302_v7  ;;  %v6795_v7 = vsel %vm6643_vm14, %v14903_v22, 32  ;;  %v7310_v22 = vperm.slane %v15375_v44, %v11313_v62  ;;  %v7315_v44 = vperm.slane %v15390_v45, %v11320_v13 }
 0xd27   : > { %7158 = vperm.xlu0 %8897, %v6791_v57   ;;  %7137 = vperm.xlu2 %8895, %v6784_v51  }
 0xd28   : > { %7152 = vperm.xlu1 %8896, %v6789_v41   ;;  %v7312_v52 = vsel %vm3514_vm1, %v7311_v11, %v7310_v22  ;;  %v15487_v11 = vsel %vm17330_vm11, %v15180_v18, 2147483647 }
 0xd29   : > { %v7042_v10 = vpop.permute.xlu0 %7041  ;;  %v15406_v37 = vpop.permute.xlu2 %7035 }
 0xd2a   : > { %v7024_v43 = vpop.permute.xlu1 %7023  ;;  %v7324_v34 = vperm.slane %v7042_v10, %v11313_v62  ;;  %v7320_v51 = vperm.slane %v15406_v37, %v11323_v0 }
 0xd2b   : > { %v7313_v20 = vperm.slane %v7024_v43, %v11323_v0 }
 0xd2d   : > { %v7314_v28 = vsel %vm3518_vm2, %v7313_v20, %v7312_v52  ;;  %v7438_v52 = vshra.s32 %v15487_v11, 16 }
 0xd2e   : > { %v7316_v12 = vsel %vm3522_vm3, %v7315_v44, %v7314_v28 }
 0xd2f   : > { %7176 = vperm.xlu0 %8897, %v6797_v31   ;;  %7143 = vperm.xlu2 %8895, %v6786_v25   ;;  %v15503_v28 = vcvt.s32.f32 %v7438_v52 }
 0xd30   : > { %7161 = vperm.xlu1 %8896, %v6792_v46  }
 0xd31   : > { %v15415_v8 = vpop.permute.xlu0 %7047  ;;  %v15417_v33 = vpop.permute.xlu2 %7038 }
 0xd32   : > { %v7033_v55 = vpop.permute.xlu1 %7032  ;;  %v7327_v29 = vperm.slane %v15415_v8, %v11323_v0  ;;  %v7322_v46 = vperm.slane %v15417_v33, %v11320_v13 }
 0xd33   : > { %v7318_v15 = vperm.slane %v7033_v55, %v11317_v39 }
 0xd35   : > { %v7319_v57 = vsel %vm3514_vm1, %v7318_v15, %v7317_v19 }
 0xd36   : > { %v7321_v9 = vsel %vm3518_vm2, %v7320_v51, %v7319_v57 }
 0xd37   : > { %7182 = vperm.xlu0 %8897, %v6799_v36   ;;  %7146 = vperm.xlu2 %8895, %v6787_v53  }
 0xd38   : > { %7167 = vperm.xlu1 %8896, %v6794_v58   ;;  %v7323_v58 = vsel %vm3522_vm3, %v7322_v46, %v7321_v9 }
 0xd39   : > { %v7051_v63 = vpop.permute.xlu0 %7050  ;;  %v7057_v38 = vpop.permute.xlu2 %7056 }
 0xd3a   : > { %v7045_v54 = vpop.permute.xlu1 %7044  ;;  %v7332_v55 = vperm.slane %v7057_v38, %v11317_v39  ;;  %v7329_v16 = vperm.slane %v7051_v63, %v11320_v13 }
 0xd3b   : > { %v7325_v3 = vperm.slane %v7045_v54, %v11317_v39 }
 0xd3d   : > { %v7326_v41 = vsel %vm3514_vm1, %v7325_v3, %v7324_v34 }
 0xd3e   : > { %v7328_v8 = vsel %vm3518_vm2, %v7327_v29, %v7326_v41 }
 0xd3f   : > { %7164 = vperm.xlu2 %8895, %v6793_v59   ;;  %v7330_v60 = vsel %vm3522_vm3, %v7329_v16, %v7328_v8 }
 0xd40   : > { %7170 = vperm.xlu1 %8896, %v6795_v7   ;;  %v7423_v7 = vsel %vm3743_vm5, %v7316_v12, %v15399_v50 }
 0xd41   : > { %v7069_v26 = vpop.permute.xlu0 %7068  ;;  %v7066_v48 = vpop.permute.xlu2 %7065  ;;  %v7424_v40 = vsel %vm3745_vm6, %v7323_v58, %v7423_v7 }
 0xd42   : > { %v7054_v35 = vpop.permute.xlu1 %7053  ;;  %v7339_v36 = vperm.slane %v7069_v26, %v11317_v39  ;;  %v7338_v53 = vperm.slane %v7066_v48, %v11313_v62 }
 0xd43   : > { %v7331_v2 = vperm.slane %v7054_v35, %v11313_v62 }
 0xd44   : > { %v7340_v35 = vsel %vm3514_vm1, %v7339_v36, %v7338_v53 }
 0xd45   : > { %v7333_v54 = vsel %vm3514_vm1, %v7332_v55, %v7331_v2 }
 0xd47   : > { %7173 = vperm.xlu2 %8895, %v6796_v47  }
 0xd49   : > { %v7078_v4 = vpop.permute.xlu0 %7077  ;;  %v7072_v21 = vpop.permute.xlu2 %7071 }
 0xd4a   : > { %v7060_v5 = vpop.permute.xlu1 %7059  ;;  %v7341_v33 = vperm.slane %v7072_v21, %v11323_v0  ;;  %v7345_v26 = vperm.slane %v7078_v4, %v11313_v62  ;;  %v7425_v21 = vsel %vm3747_vm7, %v7330_v60, %v7424_v40 }
 0xd4b   : > { %v7334_v45 = vperm.slane %v7060_v5, %v11323_v0 }
 0xd4c   : > { %v7342_v47 = vsel %vm3518_vm2, %v7341_v33, %v7340_v35 }
 0xd4d   : > { %v7335_v59 = vsel %vm3518_vm2, %v7334_v45, %v7333_v54  ;;  %v342_v54 = vld [vmem:[%s9551_s8 + $0xb8] sm:$0xff]  }
 0xd4e   : > { %v7627_v33 = vunpack.c.h.bf16 %v342_v54 }
 0xd4f   : > { %7179 = vperm.xlu2 %8895, %v6798_v17  }
 0xd50   : > { %7766 = vmatpush.msrb.mxu3 %v7627_v33 }
 0xd51   : > { %v7084_v1 = vpop.permute.xlu0 %7083  ;;  %v7075_v61 = vpop.permute.xlu2 %7074 }
 0xd52   : > { %v7063_v14 = vpop.permute.xlu1 %7062  ;;  %v7343_v63 = vperm.slane %v7075_v61, %v11320_v13  ;;  %v7348_v50 = vperm.slane %v7084_v1, %v11323_v0 }
 0xd53   : > { %v7336_v24 = vperm.slane %v7063_v14, %v11320_v13 }
 0xd54   : > { %v7344_v4 = vsel %vm3522_vm3, %v7343_v63, %v7342_v47  ;;  %v7626_v47 = vunpack.c.l.bf16 %v342_v54 }
 0xd55   : > { %v7337_v48 = vsel %vm3522_vm3, %v7336_v24, %v7335_v59 }
 0xd56   : > { %v7426_v22 = vsel %vm3749_vm8, %v7337_v48, %v7425_v21  ;;  %v15542_v21 = vld [vmem:[%s9551_s8 + $0x3c] sm:$0xff]   ;;  %7767 = vmatpush.msrb.mxu3 %v7626_v47 }
 0xd57   : > { %v7427_v19 = vsel %vm3751_vm9, %v7344_v4, %v7426_v22  ;;  %v340_v4 = vld [vmem:[%s9551_s8 + $0xb0] sm:$0xff]  }
 0xd58   : > { %v309_v22 = vld [vmem:[%s9551_s8 + $0x34] sm:$0xff]  }
 0xd59   : > { %v7093_v10 = vpop.permute.xlu0 %7092  ;;  %v7090_v43 = vpop.permute.xlu2 %7089 }
 0xd5a   : > { %v7353_v31 = vperm.slane %v7093_v10, %v11317_v39  ;;  %v7352_v25 = vperm.slane %v7090_v43, %v11313_v62  ;;  %v7081_v37 = vpop.permute.xlu1 %7080  ;;  %v15519_v43 = vsel %vm17332_vm13, %v15357_v6, 2147483647 }
 0xd5b   : > { %v7346_v38 = vperm.slane %v7081_v37, %v11317_v39 }
 0xd5c   : > { %v7354_v30 = vsel %vm3514_vm1, %v7353_v31, %v7352_v25  ;;  %v7453_v25 = vshra.s32 %v15519_v43, 16 }
 0xd5d   : > { %v7347_v5 = vsel %vm3514_vm1, %v7346_v38, %v7345_v26 }
 0xd5e   : > { %v7349_v3 = vsel %vm3518_vm2, %v7348_v50, %v7347_v5  ;;  %v15525_v46 = vcvt.s32.f32 %v7453_v25  ;;  %v7595_v5 = vunpack.c.l.bf16 %v15542_v21 }
 0xd60   : > { %7708 = vmatpush.msrb.mxu1 %v7595_v5 }
 0xd61   : > { %v7096_v27 = vpop.permute.xlu0 %7095  ;;  %v7105_v17 = vpop.permute.xlu2 %7104 }
 0xd62   : > { %v7355_v61 = vperm.slane %v7096_v27, %v11323_v0  ;;  %v7087_v20 = vpop.permute.xlu1 %7086  ;;  %v7360_v29 = vperm.slane %v7105_v17, %v11317_v39 }
 0xd63   : > { %v7350_v14 = vperm.slane %v7087_v20, %v11320_v13  ;;  %v7625_v20 = vunpack.c.h.bf16 %v340_v4 }
 0xd64   : > { %v7356_v15 = vsel %vm3518_vm2, %v7355_v61, %v7354_v30  ;;  %v15550_v61 = vld [vmem:[%s9551_s8 + $0x7c] sm:$0xff]  }
 0xd65   : > { %v7351_v18 = vsel %vm3522_vm3, %v7350_v14, %v7349_v3  ;;  %v7594_v14 = vunpack.c.h.bf16 %v309_v22  ;;  %v7593_v3 = vunpack.c.l.bf16 %v309_v22  ;;  %v7611_v52 = vunpack.c.l.bf16 %v15550_v61  ;;  %7768 = vmatpush.msrb.mxu3 %v7625_v20 }
 0xd66   : > { %v7428_v1 = vsel %vm3753_vm10, %v7351_v18, %v7427_v19 }
 0xd67   : > { %v15501_v34 = vsel %vm17331_vm12, %v7428_v1, 2147483647  ;;  %7709 = vmatpush.msrb.mxu1 %v7594_v14  ;;  %7737 = vmatpush.msrb.mxu2 %v7611_v52 }
 0xd68   : > { %v7468_v44 = vshra.s32 %v15501_v34, 16 }
 0xd69   : > { %v15506_v57 = vpop.permute.xlu0 %7116  ;;  %v15508_v51 = vpop.permute.xlu2 %7113  ;;  %7710 = vmatpush.msrb.mxu1 %v7593_v3 }
 0xd6a   : > { %7441 = vmin.xlane.f32.xlu1 %v15503_v28  ;;  %v7102_v41 = vpop.permute.xlu1 %7101  ;;  %v15511_v12 = vcvt.s32.f32 %v7468_v44  ;;  %v7367_v44 = vperm.slane %v15506_v57, %v11317_v39 }
 0xd6b   : > { %v7359_v2 = vperm.slane %v7102_v41, %v11313_v62  ;;  %v7366_v41 = vperm.slane %v15508_v51, %v11313_v62 }
 0xd6c   : > { %7471 = vmin.xlane.f32.xlu0 %v15511_v12 }
 0xd6d   : > { %v7361_v10 = vsel %vm3514_vm1, %v7360_v29, %v7359_v2  ;;  %v7368_v51 = vsel %vm3514_vm1, %v7367_v44, %v7366_v41 }
 0xd71   : > { %v15521_v9 = vpop.permute.xlu0 %7119  ;;  %v7111_v45 = vpop.permute.xlu2 %7110 }
 0xd72   : > { %v7108_v31 = vpop.permute.xlu1 %7107  ;;  %v7364_v55 = vperm.slane %v7111_v45, %v11320_v13  ;;  %v7369_v29 = vperm.slane %v15521_v9, %v11323_v0 }
 0xd73   : > { %v7362_v37 = vperm.slane %v7108_v31, %v11323_v0 }
 0xd75   : > { %v7363_v6 = vsel %vm3518_vm2, %v7362_v37, %v7361_v10 }
 0xd76   : > { %v7365_v53 = vsel %vm3522_vm3, %v7364_v55, %v7363_v6 }
 0xd78   : > { %7456 = vmin.xlane.f32.xlu2 %v15525_v46 }
 0xd79   : > { %v15529_v8 = vpop.permute.xlu0 %7122  ;;  %v7129_v24 = vpop.permute.xlu2 %7128 }
 0xd7a   : > { %v7099_v16 = vpop.permute.xlu1 %7098  ;;  %v7371_v45 = vperm.slane %v15529_v8, %v11320_v13  ;;  %v7374_v25 = vperm.slane %v7129_v24, %v11317_v39 }
 0xd7b   : > { %v7357_v36 = vperm.slane %v7099_v16, %v11320_v13  ;;  %v7370_v16 = vsel %vm3518_vm2, %v7369_v29, %v7368_v51 }
 0xd7d   : > { %v7358_v30 = vsel %vm3522_vm3, %v7357_v36, %v7356_v15  ;;  %v7624_v15 = vunpack.c.l.bf16 %v340_v4 }
 0xd7e   : > { %v15536_v58 = vsel %vm3741_vm4, %v7365_v53, %v7358_v30  ;;  %v7372_v30 = vsel %vm3522_vm3, %v7371_v45, %v7370_v16  ;;  %v325_v45 = vld [vmem:[%s9551_s8 + $0x74] sm:$0xff]   ;;  %v323_v16 = vld [vmem:[%s9551_s8 + $0x6c] sm:$0xff]  }
 0xd7f   : > { %7769 = vmatpush.msrb.mxu3 %v7624_v15  ;;  %v7609_v51 = vunpack.c.l.bf16 %v325_v45 }
 0xd81   : > { %v7141_v38 = vpop.permute.xlu0 %7140  ;;  %v7138_v60 = vpop.permute.xlu2 %7137 }
 0xd82   : > { %v7126_v59 = vpop.permute.xlu1 %7125  ;;  %v7381_v9 = vperm.slane %v7141_v38, %v11317_v39  ;;  %v7380_v6 = vperm.slane %v7138_v60, %v11313_v62 }
 0xd83   : > { %v7373_v2 = vperm.slane %v7126_v59, %v11313_v62 }
 0xd85   : > { %v7375_v36 = vsel %vm3514_vm1, %v7374_v25, %v7373_v2  ;;  %v338_v25 = vld [vmem:[%s9551_s8 + $0xa8] sm:$0xff]  }
 0xd89   : > { %v7150_v63 = vpop.permute.xlu0 %7149  ;;  %v7144_v7 = vpop.permute.xlu2 %7143 }
 0xd8a   : > { %v7132_v26 = vpop.permute.xlu1 %7131  ;;  %v7387_v37 = vperm.slane %v7150_v63, %v11313_v62  ;;  %v7383_v8 = vperm.slane %v7144_v7, %v11323_v0  ;;  %v7382_v7 = vsel %vm3514_vm1, %v7381_v9, %v7380_v6  ;;  %v7622_v6 = vunpack.c.l.bf16 %v338_v25 }
 0xd8b   : > { %v7376_v31 = vperm.slane %v7132_v26, %v11323_v0 }
 0xd8d   : > { %v7377_v54 = vsel %vm3518_vm2, %v7376_v31, %v7375_v36  ;;  %v307_v31 = vld [vmem:[%s9551_s8 + $0x2c] sm:$0xff]   ;;  %v305_v36 = vld [vmem:[%s9551_s8 + $0x24] sm:$0xff]  }
 0xd8e   : > { %v7591_v9 = vunpack.c.l.bf16 %v307_v31 }
 0xd91   : > { %v7156_v48 = vpop.permute.xlu0 %7155  ;;  %v15539_v35 = vpop.permute.xlu2 %7146 }
 0xd92   : > { %v7135_v40 = vpop.permute.xlu1 %7134  ;;  %v7390_v33 = vperm.slane %v7156_v48, %v11323_v0  ;;  %v7385_v38 = vperm.slane %v15539_v35, %v11320_v13  ;;  %v7384_v48 = vsel %vm3518_vm2, %v7383_v8, %v7382_v7  ;;  %v7430_v35 = vsel %vm3743_vm5, %v7372_v30, %v15536_v58  ;;  %v336_v8 = vld [vmem:[%s9551_s8 + $0xa0] sm:$0xff]  }
 0xd93   : > { %v7378_v57 = vperm.slane %v7135_v40, %v11320_v13  ;;  %v7621_v30 = vunpack.c.h.bf16 %v336_v8 }
 0xd94   : > { %v7386_v22 = vsel %vm3522_vm3, %v7385_v38, %v7384_v48  ;;  %v7607_v38 = vunpack.c.l.bf16 %v323_v16 }
 0xd95   : > { %v7379_v60 = vsel %vm3522_vm3, %v7378_v57, %v7377_v54  ;;  %v7592_v57 = vunpack.c.h.bf16 %v307_v31  ;;  %v321_v54 = vld [vmem:[%s9551_s8 + $0x64] sm:$0xff]  }
 0xd96   : > { %v7431_v20 = vsel %vm3745_vm6, %v7379_v60, %v7430_v35  ;;  %v7589_v60 = vunpack.c.l.bf16 %v305_v36  ;;  %v7606_v7 = vunpack.c.h.bf16 %v321_v54 }
 0xd97   : > { %7711 = vmatpush.msrb.mxu1 %v7592_v57 }
 0xd99   : > { %v15545_v27 = vpop.permute.xlu2 %7164  ;;  %v7159_v50 = vpop.permute.xlu0 %7158  ;;  %7712 = vmatpush.msrb.mxu1 %v7591_v9  ;;  %v330_v9 = vld [vmem:[%s9551_s8 + $0x88] sm:$0xff]  }
 0xd9a   : > { %v7153_v17 = vpop.permute.xlu1 %7152  ;;  %v7395_v14 = vperm.slane %v15545_v27, %v11317_v39 }
 0xd9b   : > { %v7388_v10 = vperm.slane %v7153_v17, %v11317_v39  ;;  %v7392_v17 = vperm.slane %v7159_v50, %v11320_v13 }
 0xd9d   : > { %v7389_v53 = vsel %vm3514_vm1, %v7388_v10, %v7387_v37  ;;  %v7610_v37 = vunpack.c.h.bf16 %v325_v45 }
 0xd9e   : > { %v7391_v26 = vsel %vm3518_vm2, %v7390_v33, %v7389_v53  ;;  %v7608_v53 = vunpack.c.h.bf16 %v323_v16  ;;  %v303_v33 = vld [vmem:[%s9551_s8 + $0x1c] sm:$0xff]   ;;  %v297_v16 = vld [vmem:[%s9551_s8 + $0x4] sm:$0xff]  }
 0xd9f   : > { %v7393_v15 = vsel %vm3522_vm3, %v7392_v17, %v7391_v26  ;;  %7738 = vmatpush.msrb.mxu2 %v7610_v37  ;;  %v7588_v26 = vunpack.c.h.bf16 %v303_v33  ;;  %v7587_v48 = vunpack.c.l.bf16 %v303_v33  ;;  %v7437_v17 = vand.u32 65535, %v15487_v11  ;;  %v295_v33 = vld [vmem:[%s9551_s8] sm:$0xf] }
 0xda1   : > { %v7174_v18 = vpop.permute.xlu2 %7173  ;;  %v7177_v1 = vpop.permute.xlu0 %7176  ;;  %7739 = vmatpush.msrb.mxu2 %v7609_v51 }
 0xda2   : > { %v7162_v19 = vpop.permute.xlu1 %7161  ;;  %v7402_v59 = vperm.slane %v7177_v1, %v11317_v39  ;;  %v7401_v63 = vperm.slane %v7174_v18, %v11313_v62 }
 0xda3   : > { %v7394_v40 = vperm.slane %v7162_v19, %v11313_v62  ;;  %v7432_v19 = vsel %vm3747_vm7, %v7386_v22, %v7431_v20  ;;  %7740 = vmatpush.msrb.mxu2 %v7608_v53  ;;  %v7439_v20 = vcvt.s32.f32 %v7437_v17  ;;  %v328_v53 = vld [vmem:[%s9551_s8 + $0x84] sm:$0xf] }
 0xda4   : > { %v7403_v3 = vsel %vm3514_vm1, %v7402_v59, %v7401_v63  ;;  %v7433_v27 = vsel %vm3749_vm8, %v7393_v15, %v7432_v19  ;;  %v334_v59 = vld [vmem:[%s9551_s8 + $0x98] sm:$0xff]   ;;  %v7620_v63 = vunpack.c.l.bf16 %v336_v8  ;;  %v7614_v8 = vunpack.c.l.bf16 %v330_v9 }
 0xda5   : > { %v7396_v58 = vsel %vm3514_vm1, %v7395_v14, %v7394_v40  ;;  %vm17333_vm1 = vmmov %vm17330_vm11  ;;  %v319_v40 = vld [vmem:[%s9551_s8 + $0x5c] sm:$0xff]   ;;  %7741 = vmatpush.msrb.mxu2 %v7607_v38  ;;  %v317_v19 = vld [vmem:[%s9551_s8 + $0x54] sm:$0xff]   ;;  %v7580_v38 = vunpack.c.l.bf16 %v295_v33 }
 0xda6   : > { %v7604_v35 = vunpack.c.h.bf16 %v319_v40 }
 0xda7   : > { %7742 = vmatpush.msrb.mxu2 %v7606_v7 }
 0xda9   : > { %v7180_v24 = vpop.permute.xlu2 %7179  ;;  %v7183_v47 = vpop.permute.xlu0 %7182 }
 0xdaa   : > { %v7168_v55 = vpop.permute.xlu1 %7167  ;;  %v7404_v5 = vperm.slane %v7180_v24, %v11323_v0  ;;  %v7406_v52 = vperm.slane %v7183_v47, %v11320_v13  ;;  %v7590_v24 = vunpack.c.h.bf16 %v305_v36  ;;  %v7619_v47 = vunpack.c.h.bf16 %v334_v59  ;;  %v313_v36 = vld [vmem:[%s9551_s8 + $0x44] sm:$0xff]  }
 0xdab   : > { %v7397_v4 = vperm.slane %v7168_v55, %v11323_v0  ;;  %v7623_v55 = vunpack.c.h.bf16 %v338_v25 }
 0xdac   : > { %v7405_v0 = vsel %vm3518_vm2, %v7404_v5, %v7403_v3  ;;  %7713 = vmatpush.msrb.mxu1 %v7590_v24  ;;  %v7605_v5 = vunpack.c.l.bf16 %v321_v54  ;;  %v7598_v24 = vunpack.c.h.bf16 %v313_v36  ;;  %v7597_v54 = vunpack.c.l.bf16 %v313_v36  ;;  %v351_v36 = vld [vmem:[%s9551_s8 + $0xdc] sm:$0xff]  }
 0xdad   : > { %v7398_v39 = vsel %vm3518_vm2, %v7397_v4, %v7396_v58  ;;  %v7407_v44 = vsel %vm3522_vm3, %v7406_v52, %v7405_v0  ;;  %7770 = vmatpush.msrb.mxu3 %v7623_v55  ;;  %v7467_v4 = vand.u32 65535, %v15501_v34  ;;  %v7452_v34 = vand.u32 65535, %v15519_v43  ;;  %v301_v0 = vld [vmem:[%s9551_s8 + $0x14] sm:$0xff]   ;;  %v315_v43 = vld [vmem:[%s9551_s8 + $0x4c] sm:$0xff]  }
 0xdae   : > { %7714 = vmatpush.msrb.mxu1 %v7589_v60  ;;  %7743 = vmatpush.msrb.mxu2 %v7605_v5  ;;  %v7603_v58 = vunpack.c.l.bf16 %v319_v40  ;;  %v7599_v51 = vunpack.c.l.bf16 %v315_v43  ;;  %v7596_v60 = vunpack.c.h.bf16 %v15542_v21  ;;  %v15662_v40 = vld [vmem:[%s9551_s8 + $0xfc] sm:$0xff]   ;;  %v7636_v33 = vunpack.c.h.bf16 %v351_v36 }
 0xdaf   : > { %7771 = vmatpush.msrb.mxu3 %v7622_v6  ;;  %v7469_v3 = vcvt.s32.f32 %v7467_v4  ;;  %v7615_v6 = vunpack.c.h.bf16 %v330_v9  ;;  %v390_v21 = vld [vmem:[%s9551_s8 + $0x178] sm:$0xff]  }
 0xdb0   : > { %7715 = vmatpush.msrb.mxu1 %v7588_v26  ;;  %7744 = vmatpush.msrb.mxu2 %v7604_v35  ;;  %v15659_v26 = vld [vmem:[%s9551_s8 + $0x13c] sm:$0xff]   ;;  %v7643_v35 = vunpack.c.l.bf16 %v15662_v40  ;;  %v7675_v17 = vunpack.c.h.bf16 %v390_v21  ;;  %v373_v4 = vld [vmem:[%s9551_s8 + $0x134] sm:$0xff]  }
 0xdb1   : > { %7772 = vmatpush.msrb.mxu3 %v7621_v30  ;;  %v7581_v30 = vunpack.c.l.bf16 %v297_v16  ;;  %v367_v9 = vld [vmem:[%s9551_s8 + $0x11c] sm:$0xff]  }
 0xdb2   : > { %v7171_v18 = vpop.permute.xlu1 %7170  ;;  %7716 = vmatpush.msrb.mxu1 %v7587_v48  ;;  %7745 = vmatpush.msrb.mxu2 %v7603_v58  ;;  %v7659_v48 = vunpack.c.l.bf16 %v15659_v26  ;;  %v371_v58 = vld [vmem:[%s9551_s8 + $0x12c] sm:$0xff]  }
 0xdb3   : > { %v7399_v50 = vperm.slane %v7171_v18, %v11320_v13  ;;  %7773 = vmatpush.msrb.mxu3 %v7620_v63  ;;  %v7454_v18 = vcvt.s32.f32 %v7452_v34  ;;  %v7674_v34 = vunpack.c.l.bf16 %v390_v21 }
 0xdb5   : > { %v7400_v1 = vsel %vm3522_vm3, %v7399_v50, %v7398_v39  ;;  %7774 = vmatpush.msrb.mxu3 %v7619_v47  ;;  %v7618_v50 = vunpack.c.l.bf16 %v334_v59  ;;  %v7586_v39 = vunpack.c.h.bf16 %v301_v0  ;;  %v7612_v59 = vunpack.c.h.bf16 %v15550_v61  ;;  %v17334_v47 = vld [vmem:[#allocation2_spill] sm:$0xff] }
 0xdb6   : > { %v7434_v41 = vsel %vm3751_vm9, %v7400_v1, %v7433_v27  ;;  %v7602_v27 = vunpack.c.h.bf16 %v317_v19  ;;  %v7585_v1 = vunpack.c.l.bf16 %v301_v0  ;;  %v7508_v5 = vmul.u32 32, %v17334_v47 }
 0xdb7   : > { %v7435_v29 = vsel %vm3753_vm10, %v7407_v44, %v7434_v41  ;;  %v299_v41 = vld [vmem:[%s9551_s8 + $0xc] sm:$0xff]   ;;  %7775 = vmatpush.msrb.mxu3 %v7618_v50  ;;  %7717 = vmatpush.msrb.mxu1 %v7586_v39  ;;  %v15673_v50 = vadd.s32 128, %v11313_v62 }
 0xdb8   : > { %v15609_v2 = vsel %vm17333_vm1, %v7435_v29, 2147483647  ;;  %v7601_v29 = vunpack.c.l.bf16 %v317_v19  ;;  %v7584_v45 = vunpack.c.h.bf16 %v299_v41  ;;  %7746 = vmatpush.msrb.mxu2 %v7602_v27  ;;  %v7583_v55 = vunpack.c.l.bf16 %v299_v41  ;;  %v355_v39 = vld [vmem:[%s9551_s8 + $0xec] sm:$0xff]  }
 0xdb9   : > { %v7483_v13 = vshra.s32 %v15609_v2, 16  ;;  %7718 = vmatpush.msrb.mxu1 %v7585_v1  ;;  %v7482_v31 = vand.u32 65535, %v15609_v2  ;;  %v7582_v2 = vunpack.c.h.bf16 %v297_v16  ;;  %v15676_v19 = vadd.s32 256, %v11313_v62 }
 0xdba   : > { %7747 = vmatpush.msrb.mxu2 %v7601_v29  ;;  %v7656_v1 = vunpack.c.h.bf16 %v371_v58  ;;  %v7640_v41 = vunpack.c.h.bf16 %v355_v39  ;;  %v369_v29 = vld [vmem:[%s9551_s8 + $0x124] sm:$0xff]  }
 0xdbb   : > { %v15612_v10 = vcvt.s32.f32 %v7483_v13  ;;  %7719 = vmatpush.msrb.mxu1 %v7584_v45  ;;  %v7484_v37 = vcvt.s32.f32 %v7482_v31  ;;  %v353_v45 = vld [vmem:[%s9551_s8 + $0xe4] sm:$0xff]   ;;  %v7653_v16 = vunpack.c.l.bf16 %v369_v29 }
 0xdbd   : > { %7486 = vmin.xlane.f32.xlu1 %v15612_v10  ;;  %7720 = vmatpush.msrb.mxu1 %v7583_v55  ;;  %v7638_v55 = vunpack.c.h.bf16 %v353_v45 }
 0xdbf   : > { %7721 = vmatpush.msrb.mxu1 %v7582_v2  ;;  %v7652_v2 = vunpack.c.h.bf16 %v367_v9 }
 0xdc1   : > { %7722 = vmatpush.msrb.mxu1 %v7581_v30 }
 0xdc3   : > { %7723 = vmatpush.msrb.mxu1 %v7580_v38 }
 0xdc5   : > { %7795 = vmatpush.msra.mxu1 %v7643_v35 }
 0xddd   : > { %v15627_v22 = vpop.xlane.xlu1 %7441 }
 0xdde   : > { %vm7443_vm2 = vcmp.eq.f32.partialorder %v15503_v28, %v15627_v22  ;;  %v7448_v63 = vcvt.f32.s32 %v15627_v22 }
 0xddf   : > { %v15631_v14 = vpop.xlane.xlu0 %7471  ;;  %v7444_v15 = vsel %vm7443_vm2, %v7439_v20, inf  ;;  %v357_v20 = vld [vmem:[%s9551_s8 + $0xf4] sm:$0xff]  }
 0xde0   : > { %vm7473_vm3 = vcmp.eq.f32.partialorder %v15511_v12, %v15631_v14  ;;  %7445 = vmin.xlane.f32.xlu2 %v7444_v15  ;;  %v332_v12 = vld [vmem:[%s9551_s8 + $0x90] sm:$0xff]   ;;  %v7449_v7 = vshll.u32 %v7448_v63, 16  ;;  %v7651_v63 = vunpack.c.l.bf16 %v367_v9 }
 0xde1   : > { %v7474_v11 = vsel %vm7473_vm3, %v7469_v3, inf  ;;  %v7617_v44 = vunpack.c.h.bf16 %v332_v12  ;;  %v7616_v13 = vunpack.c.l.bf16 %v332_v12  ;;  %v388_v15 = vld [vmem:[%s9551_s8 + $0x170] sm:$0xff]   ;;  %v7658_v3 = vunpack.c.h.bf16 %v373_v4 }
 0xde2   : > { %7475 = vmin.xlane.f32.xlu1 %v7474_v11  ;;  %v7642_v11 = vunpack.c.h.bf16 %v357_v20  ;;  %v7673_v12 = vunpack.c.h.bf16 %v388_v15 }
 0xde3   : > { %7776 = vmatpush.msrb.mxu3 %v7617_v44  ;;  %v386_v44 = vld [vmem:[%s9551_s8 + $0x168] sm:$0xff]  }
 0xde4   : > { %7796 = vmatpush.msra.mxu1 %v7642_v11  ;;  %v7671_v31 = vunpack.c.h.bf16 %v386_v44 }
 0xde5   : > { %7777 = vmatpush.msrb.mxu3 %v7616_v13  ;;  %v7655_v13 = vunpack.c.l.bf16 %v371_v58  ;;  %v347_v58 = vld [vmem:[%s9551_s8 + $0xcc] sm:$0xff]  }
 0xde7   : > { %7778 = vmatpush.msrb.mxu3 %v7615_v6 }
 0xde9   : > { %7779 = vmatpush.msrb.mxu3 %v7614_v8  ;;  %v7637_v8 = vunpack.c.l.bf16 %v353_v45  ;;  %v345_v45 = vld [vmem:[%s9551_s8 + $0xc4] sm:$0xff]  }
 0xdeb   : > { %v15636_v52 = vpop.xlane.xlu2 %7456 }
 0xdec   : > { %vm7458_vm4 = vcmp.eq.f32.partialorder %v15525_v46, %v15636_v52  ;;  %v7600_v46 = vunpack.c.h.bf16 %v315_v43  ;;  %v7672_v43 = vunpack.c.l.bf16 %v388_v15  ;;  %v7463_v6 = vcvt.f32.s32 %v15636_v52  ;;  %v349_v15 = vld [vmem:[%s9551_s8 + $0xd4] sm:$0xff]  }
 0xded   : > { %v7459_v28 = vsel %vm7458_vm4, %v7454_v18, inf  ;;  %v7657_v18 = vunpack.c.l.bf16 %v373_v4  ;;  %v382_v4 = vld [vmem:[%s9551_s8 + $0x158] sm:$0xff]   ;;  %v7634_v11 = vunpack.c.h.bf16 %v349_v15 }
 0xdee   : > { %7460 = vmin.xlane.f32.xlu0 %v7459_v28  ;;  %7748 = vmatpush.msrb.mxu2 %v7600_v46  ;;  %v7641_v28 = vunpack.c.l.bf16 %v357_v20  ;;  %v7639_v46 = vunpack.c.l.bf16 %v355_v39  ;;  %v7464_v38 = vshll.u32 %v7463_v6, 16  ;;  %v365_v20 = vld [vmem:[%s9551_s8 + $0x114] sm:$0xff]   ;;  %v343_v6 = vld [vmem:[%s9551_s8 + $0xc0] sm:$0xf] }
 0xdf0   : > { %7749 = vmatpush.msrb.mxu2 %v7599_v51  ;;  %7797 = vmatpush.msra.mxu1 %v7641_v28  ;;  %v7670_v51 = vunpack.c.l.bf16 %v386_v44  ;;  %v363_v28 = vld [vmem:[%s9551_s8 + $0x10c] sm:$0xff]   ;;  %v7632_v44 = vunpack.c.h.bf16 %v347_v58 }
 0xdf2   : > { %7750 = vmatpush.msrb.mxu2 %v7598_v24  ;;  %7798 = vmatpush.msra.mxu1 %v7640_v41  ;;  %v7478_v24 = vcvt.f32.s32 %v15631_v14  ;;  %v378_v41 = vld [vmem:[%s9551_s8 + $0x148] sm:$0xff]  }
 0xdf4   : > { %7751 = vmatpush.msrb.mxu2 %v7597_v54  ;;  %7799 = vmatpush.msra.mxu1 %v7639_v46  ;;  %v7479_v14 = vshll.u32 %v7478_v24, 16  ;;  %v7631_v46 = vunpack.c.l.bf16 %v347_v58  ;;  %v15736_v24 = vld [vmem:[%s9551_s8 + $0x1bc] sm:$0xff]   ;;  %v7511_v58 = vmul.u32 32, %v17220_v42 }
 0xdf6   : > { %7752 = vmatpush.msrb.mxu2 %v7596_v60  ;;  %7800 = vmatpush.msra.mxu1 %v7638_v55  ;;  %v17335_v60 = vld [vmem:[#allocation5_spill] sm:$0xff]  ;;  %v376_v55 = vld [vmem:[%s9551_s8 + $0x144] sm:$0xf] }
 0xdf7   : > { %v7509_v52 = vmul.u32 32, %v17335_v60 }
 0xdf8   : > { %7824 = vmatpush.msra.mxu2 %v7659_v48  ;;  %7801 = vmatpush.msra.mxu1 %v7637_v8  ;;  %v7644_v8 = vunpack.c.h.bf16 %v15662_v40 }
 0xdfa   : > { %7825 = vmatpush.msra.mxu2 %v7658_v3  ;;  %7802 = vmatpush.msra.mxu1 %v7636_v33  ;;  %v7650_v3 = vunpack.c.h.bf16 %v365_v20 }
 0xdfc   : > { %7826 = vmatpush.msra.mxu2 %v7657_v18  ;;  %v380_v18 = vld [vmem:[%s9551_s8 + $0x150] sm:$0xff]  }
 0xdfd   : > { %v7665_v39 = vunpack.c.h.bf16 %v380_v18 }
 0xdfe   : > { %7827 = vmatpush.msra.mxu2 %v7656_v1  ;;  %v7648_v1 = vunpack.c.h.bf16 %v363_v28 }
 0xe00   : > { %7828 = vmatpush.msra.mxu2 %v7655_v13  ;;  %v7647_v13 = vunpack.c.l.bf16 %v363_v28 }
 0xe30   : > { %v15646_v25 = vpop.xlane.xlu1 %7486 }
 0xe31   : > { %vm7488_vm5 = vcmp.eq.f32.partialorder %v15612_v10, %v15646_v25  ;;  %v7613_v10 = vunpack.c.l.bf16 %v328_v53 }
 0xe32   : > { %v7489_v57 = vsel %vm7488_vm5, %v7484_v37, inf  ;;  %v7654_v37 = vunpack.c.h.bf16 %v369_v29  ;;  %v7664_v29 = vunpack.c.l.bf16 %v380_v18 }
 0xe33   : > { %7490 = vmin.xlane.f32.xlu2 %v7489_v57  ;;  %7780 = vmatpush.msrb.mxu3 %v7613_v10  ;;  %v384_v57 = vld [vmem:[%s9551_s8 + $0x160] sm:$0xff]  }
 0xe34   : > { %v7669_v53 = vunpack.c.h.bf16 %v384_v57  ;;  %7829 = vmatpush.msra.mxu2 %v7654_v37  ;;  %v7668_v10 = vunpack.c.l.bf16 %v384_v57  ;;  %v7630_v57 = vunpack.c.h.bf16 %v345_v45 }
 0xe35   : > { %7781 = vmatpush.msrb.mxu3 %v7612_v59 }
 0xe36   : > { %7830 = vmatpush.msra.mxu2 %v7653_v16  ;;  %v7629_v16 = vunpack.c.l.bf16 %v345_v45  ;;  %v395_v45 = vld [vmem:[%s9551_s8 + $0x18c] sm:$0xff]  }
 0xe37   : > { %7853 = vmatpush.msra.mxu3 %v7675_v17  ;;  %v7635_v17 = vunpack.c.l.bf16 %v351_v36  ;;  %v7661_v36 = vunpack.c.l.bf16 %v376_v55 }
 0xe38   : > { %7831 = vmatpush.msra.mxu2 %v7652_v2  ;;  %v422_v2 = vld [vmem:[%s9551_s8 + $0x1f8] sm:$0xff]  }
 0xe39   : > { %7854 = vmatpush.msra.mxu3 %v7674_v34  ;;  %v7666_v34 = vunpack.c.l.bf16 %v382_v4  ;;  %7803 = vmatpush.msra.mxu1 %v7635_v17  ;;  %v7707_v33 = vunpack.c.h.bf16 %v422_v2  ;;  %v7706_v60 = vunpack.c.l.bf16 %v422_v2  ;;  %v391_v2 = vld [vmem:[%s9551_s8 + $0x180] sm:$0xf] }
 0xe3a   : > { %7832 = vmatpush.msra.mxu2 %v7651_v63 }
 0xe3b   : > { %7855 = vmatpush.msra.mxu3 %v7673_v12  ;;  %v7633_v12 = vunpack.c.l.bf16 %v349_v15  ;;  %7804 = vmatpush.msra.mxu1 %v7634_v11 }
 0xe3c   : > { %7833 = vmatpush.msra.mxu2 %v7650_v3 }
 0xe3d   : > { %7856 = vmatpush.msra.mxu3 %v7672_v43  ;;  %v361_v43 = vld [vmem:[%s9551_s8 + $0x104] sm:$0xff]   ;;  %7805 = vmatpush.msra.mxu1 %v7633_v12  ;;  %v414_v12 = vld [vmem:[%s9551_s8 + $0x1d8] sm:$0xff]  }
 0xe3e   : > { %v7646_v37 = vunpack.c.h.bf16 %v361_v43  ;;  %v7645_v9 = vunpack.c.l.bf16 %v361_v43  ;;  %v412_v43 = vld [vmem:[%s9551_s8 + $0x1d0] sm:$0xff]  }
 0xe3f   : > { %7857 = vmatpush.msra.mxu3 %v7671_v31  ;;  %v7663_v31 = vunpack.c.h.bf16 %v378_v41  ;;  %7806 = vmatpush.msra.mxu1 %v7632_v44  ;;  %v7697_v42 = vunpack.c.h.bf16 %v412_v43 }
 0xe41   : > { %7858 = vmatpush.msra.mxu3 %v7670_v51  ;;  %v7662_v51 = vunpack.c.l.bf16 %v378_v41  ;;  %7807 = vmatpush.msra.mxu1 %v7631_v46  ;;  %v7698_v41 = vunpack.c.l.bf16 %v414_v12 }
 0xe43   : > { %7859 = vmatpush.msra.mxu3 %v7669_v53  ;;  %7808 = vmatpush.msra.mxu1 %v7630_v57  ;;  %v7628_v53 = vunpack.c.l.bf16 %v343_v6  ;;  %v410_v57 = vld [vmem:[%s9551_s8 + $0x1c8] sm:$0xff]   ;;  %v7500_v6 = vadd.s32 640, %v11313_v62 }
 0xe44   : > { %v7695_v55 = vunpack.c.h.bf16 %v410_v57 }
 0xe45   : > { %7860 = vmatpush.msra.mxu3 %v7668_v10  ;;  %v7691_v10 = vunpack.c.l.bf16 %v15736_v24  ;;  %7809 = vmatpush.msra.mxu1 %v7629_v16  ;;  %v408_v16 = vld [vmem:[%s9551_s8 + $0x1c4] sm:$0xf] }
 0xe47   : > { %7810 = vmatpush.msra.mxu1 %v7628_v53  ;;  %v7693_v53 = vunpack.c.l.bf16 %v408_v16 }
 0xe53   : > { %v7446_v61 = vpop.xlane.xlu2 %7445 }
 0xe54   : > { %v7447_v22 = vcvt.f32.s32 %v7446_v61 }
 0xe55   : > { %v7476_v30 = vpop.xlane.xlu1 %7475 }
 0xe56   : > { %v7450_v0 = vadd.s32 %v7449_v7, %v7447_v22  ;;  %v7477_v7 = vcvt.f32.s32 %v7476_v30  ;;  %v7667_v22 = vunpack.c.h.bf16 %v382_v4  ;;  %v405_v30 = vld [vmem:[%s9551_s8 + $0x1b4] sm:$0xff]  }
 0xe57   : > { %v7690_v40 = vunpack.c.h.bf16 %v405_v30  ;;  %v7689_v63 = vunpack.c.l.bf16 %v405_v30 }
 0xe58   : > { %v15679_v27 = vadd.s32 %v7508_v5, %v7450_v0  ;;  %v17336_v5 = vld [vmem:[#allocation3_spill] sm:$0xff]  ;;  %v7480_v48 = vadd.s32 %v7479_v14, %v7477_v7  ;;  %v7649_v0 = vunpack.c.l.bf16 %v365_v20  ;;  %7861 = vmatpush.msra.mxu3 %v7667_v22  ;;  %v7493_v20 = vcvt.f32.s32 %v15646_v25  ;;  %v399_v22 = vld [vmem:[%s9551_s8 + $0x19c] sm:$0xff]  }
 0xe59   : > { %v7510_v61 = vmul.u32 32, %v17336_v5  ;;  %v401_v14 = vld [vmem:[%s9551_s8 + $0x1a4] sm:$0xff]   ;;  %v7684_v18 = vunpack.c.h.bf16 %v399_v22  ;;  %v7699_v25 = vunpack.c.h.bf16 %v414_v12 }
 0xe5a   : > { %vm7516_vm6 = vcmp.eq.s32.totalorder %v11313_v62, %v15679_v27  ;;  %vm7517_vm7 = vcmp.eq.s32.totalorder %v15673_v50, %v15679_v27  ;;  %vm7518_vm8 = vcmp.eq.s32.totalorder %v15676_v19, %v15679_v27  ;;  %7862 = vmatpush.msra.mxu3 %v7666_v34  ;;  %7834 = vmatpush.msra.mxu2 %v7649_v0  ;;  %v7686_v4 = vunpack.c.h.bf16 %v401_v14 }
 0xe5b   : > { %8388 = vmatmul.msk.f32.vlgmr.msrb.gmra.mxu1 %vm7516_vm6, %v14887_v32  ;;  %8392 = vmatmul.msk.f32.vlgmr.msrb.gmra.mxu2 %vm7517_vm7, %v14887_v32  ;;  %v15711_v35 = vadd.s32 %v7510_v61, %v7480_v48  ;;  %v416_v48 = vld [vmem:[%s9551_s8 + $0x1e0] sm:$0xff]   ;;  %v7685_v3 = vunpack.c.l.bf16 %v401_v14  ;;  %v7494_v28 = vshll.u32 %v7493_v20, 16  ;;  %vm7521_vm4 = vcmp.eq.s32.totalorder %v7500_v6, %v15679_v27 }
 0xe5c   : > { %8396 = vmatmul.msk.f32.vlgmr.msrb.gmra.mxu3 %vm7518_vm8, %v14887_v32  ;;  %7835 = vmatpush.msra.mxu2 %v7648_v1  ;;  %v7701_v15 = vunpack.c.h.bf16 %v416_v48  ;;  %v7700_v11 = vunpack.c.l.bf16 %v416_v48  ;;  %v397_v1 = vld [vmem:[%s9551_s8 + $0x194] sm:$0xff]  }
 0xe5d   : > { %vm7532_vm15 = vcmp.eq.s32.totalorder %v11313_v62, %v15711_v35  ;;  %vm7533_vm0 = vcmp.eq.s32.totalorder %v15673_v50, %v15711_v35  ;;  %vm7534_vm11 = vcmp.eq.s32.totalorder %v15676_v19, %v15711_v35  ;;  %7863 = vmatpush.msra.mxu3 %v7665_v39  ;;  %7882 = vmatpush.msrb.mxu1 %v7691_v10  ;;  %v7683_v39 = vunpack.c.l.bf16 %v399_v22 }
 0xe5e   : > { %7836 = vmatpush.msra.mxu2 %v7647_v13  ;;  %v7682_v13 = vunpack.c.h.bf16 %v397_v1  ;;  %v7681_v46 = vunpack.c.l.bf16 %v397_v1  ;;  %v7502_v10 = vadd.s32 896, %v11313_v62 }
 0xe5f   : > { %7864 = vmatpush.msra.mxu3 %v7664_v29  ;;  %7883 = vmatpush.msrb.mxu1 %v7690_v40 }
 0xe60   : > { %7837 = vmatpush.msra.mxu2 %v7646_v37  ;;  %v7680_v37 = vunpack.c.h.bf16 %v395_v45 }
 0xe61   : > { %v7461_v54 = vpop.xlane.xlu0 %7460  ;;  %7865 = vmatpush.msra.mxu3 %v7663_v31  ;;  %7884 = vmatpush.msrb.mxu1 %v7689_v63  ;;  %v7696_v31 = vunpack.c.l.bf16 %v412_v43 }
 0xe62   : > { %v7462_v59 = vcvt.f32.s32 %v7461_v54  ;;  %7838 = vmatpush.msra.mxu2 %v7645_v9  ;;  %v7660_v54 = vunpack.c.h.bf16 %v15659_v26  ;;  %v393_v9 = vld [vmem:[%s9551_s8 + $0x184] sm:$0xff]  }
 0xe63   : > { %7866 = vmatpush.msra.mxu3 %v7662_v51  ;;  %v7679_v51 = vunpack.c.l.bf16 %v395_v45  ;;  %v7677_v30 = vunpack.c.l.bf16 %v393_v9 }
 0xe64   : > { %v7465_v21 = vadd.s32 %v7464_v38, %v7462_v59  ;;  %v420_v38 = vld [vmem:[%s9551_s8 + $0x1f0] sm:$0xff]   ;;  %7839 = vmatpush.msra.mxu2 %v7644_v8  ;;  %v7678_v8 = vunpack.c.h.bf16 %v393_v9 }
 0xe65   : > { %7867 = vmatpush.msra.mxu3 %v7661_v36  ;;  %v403_v59 = vld [vmem:[%s9551_s8 + $0x1ac] sm:$0xff]   ;;  %v7704_v26 = vunpack.c.l.bf16 %v420_v38  ;;  %v7694_v36 = vunpack.c.l.bf16 %v410_v57 }
 0xe66   : > { %v15699_v47 = vadd.s32 %v7509_v52, %v7465_v21  ;;  %7911 = vmatpush.msrb.mxu2 %v7707_v33  ;;  %v7705_v52 = vunpack.c.h.bf16 %v420_v38  ;;  %v7688_v7 = vunpack.c.h.bf16 %v403_v59  ;;  %v418_v21 = vld [vmem:[%s9551_s8 + $0x1e8] sm:$0xff]   ;;  %v7687_v61 = vunpack.c.l.bf16 %v403_v59 }
 0xe67   : > { %7868 = vmatpush.msra.mxu3 %v7660_v54  ;;  %v7703_v5 = vunpack.c.h.bf16 %v418_v21  ;;  %v7702_v17 = vunpack.c.l.bf16 %v418_v21  ;;  %v7692_v54 = vunpack.c.h.bf16 %v15736_v24  ;;  %v7676_v33 = vunpack.c.l.bf16 %v391_v2 }
 0xe68   : > { %vm7524_vm9 = vcmp.eq.s32.totalorder %v11313_v62, %v15699_v47  ;;  %vm7525_vm10 = vcmp.eq.s32.totalorder %v15673_v50, %v15699_v47  ;;  %vm7526_vm14 = vcmp.eq.s32.totalorder %v15676_v19, %v15699_v47  ;;  %7912 = vmatpush.msrb.mxu2 %v7706_v60  ;;  %7885 = vmatpush.msrb.mxu1 %v7688_v7  ;;  %v7501_v24 = vadd.s32 768, %v11313_v62 }
 0xe69   : > { %8389 = vmatmul.msk.f32.gmra.mxu1 %vm7524_vm9, %v14897_v23  ;;  %8393 = vmatmul.msk.f32.gmra.mxu2 %vm7525_vm10, %v14897_v23  ;;  %vm7529_vm7 = vcmp.eq.s32.totalorder %v7500_v6, %v15699_v47  ;;  %vm7537_vm10 = vcmp.eq.s32.totalorder %v7500_v6, %v15711_v35 }
 0xe6a   : > { %8397 = vmatmul.msk.f32.gmra.mxu3 %vm7526_vm14, %v14897_v23  ;;  %7913 = vmatpush.msrb.mxu2 %v7705_v52 }
 0xe6b   : > { %7886 = vmatpush.msrb.mxu1 %v7687_v61 }
 0xe6c   : > { %7914 = vmatpush.msrb.mxu2 %v7704_v26 }
 0xe6d   : > { %7887 = vmatpush.msrb.mxu1 %v7686_v4 }
 0xe6e   : > { %7915 = vmatpush.msrb.mxu2 %v7703_v5 }
 0xe6f   : > { %7888 = vmatpush.msrb.mxu1 %v7685_v3 }
 0xe70   : > { %7916 = vmatpush.msrb.mxu2 %v7702_v17 }
 0xe71   : > { %8390 = vmatmul.msk.f32.gmra.mxu1 %vm7532_vm15, %v14884_v49  ;;  %8394 = vmatmul.msk.f32.gmra.mxu2 %vm7533_vm0, %v14884_v49 }
 0xe72   : > { %8398 = vmatmul.msk.f32.gmra.mxu3 %vm7534_vm11, %v14884_v49  ;;  %7917 = vmatpush.msrb.mxu2 %v7701_v15  ;;  %vm7522_vm11 = vcmp.eq.s32.totalorder %v7501_v24, %v15679_v27 }
 0xe73   : > { %7889 = vmatpush.msrb.mxu1 %v7684_v18 }
 0xe74   : > { %7918 = vmatpush.msrb.mxu2 %v7700_v11 }
 0xe75   : > { %7890 = vmatpush.msrb.mxu1 %v7683_v39 }
 0xe76   : > { %7919 = vmatpush.msrb.mxu2 %v7699_v25 }
 0xe77   : > { %7891 = vmatpush.msrb.mxu1 %v7682_v13 }
 0xe78   : > { %7920 = vmatpush.msrb.mxu2 %v7698_v41 }
 0xe79   : > { %7892 = vmatpush.msrb.mxu1 %v7681_v46 }
 0xe7a   : > { %7921 = vmatpush.msrb.mxu2 %v7697_v42 }
 0xe7b   : > { %7893 = vmatpush.msrb.mxu1 %v7680_v37 }
 0xe7c   : > { %7922 = vmatpush.msrb.mxu2 %v7696_v31 }
 0xe7d   : > { %7894 = vmatpush.msrb.mxu1 %v7679_v51 }
 0xe7e   : > { %7923 = vmatpush.msrb.mxu2 %v7695_v55 }
 0xe7f   : > { %7895 = vmatpush.msrb.mxu1 %v7678_v8 }
 0xe80   : > { %7924 = vmatpush.msrb.mxu2 %v7694_v36 }
 0xe81   : > { %7896 = vmatpush.msrb.mxu1 %v7677_v30 }
 0xe82   : > { %7925 = vmatpush.msrb.mxu2 %v7693_v53 }
 0xe83   : > { %7897 = vmatpush.msrb.mxu1 %v7676_v33 }
 0xe84   : > { %7926 = vmatpush.msrb.mxu2 %v7692_v54 }
 0xea6   : > { %v7491_v34 = vpop.xlane.xlu2 %7490 }
 0xea7   : > { %v7492_v0 = vcvt.f32.s32 %v7491_v34 }
 0xea9   : > { %v7495_v44 = vadd.s32 %v7494_v28, %v7492_v0 }
 0xeab   : > { %v15752_v29 = vadd.s32 %v7511_v58, %v7495_v44 }
 0xead   : > { %vm7540_vm12 = vcmp.eq.s32.totalorder %v11313_v62, %v15752_v29  ;;  %vm7541_vm13 = vcmp.eq.s32.totalorder %v15673_v50, %v15752_v29  ;;  %vm7542_vm1 = vcmp.eq.s32.totalorder %v15676_v19, %v15752_v29  ;;  %v7498_v50 = vadd.s32 384, %v11313_v62 }
 0xeae   : > { %8391 = vmatmul.msk.f32.gmra.mxu1 %vm7540_vm12, %v14907_v56  ;;  %8395 = vmatmul.msk.f32.gmra.mxu2 %vm7541_vm13, %v14907_v56  ;;  %v7499_v19 = vadd.s32 512, %v11313_v62  ;;  %vm7545_vm0 = vcmp.eq.s32.totalorder %v7500_v6, %v15752_v29  ;;  %vm7523_vm12 = vcmp.eq.s32.totalorder %v7502_v10, %v15679_v27  ;;  %vm7530_vm13 = vcmp.eq.s32.totalorder %v7501_v24, %v15699_v47 }
 0xeaf   : > { %8399 = vmatmul.msk.f32.gmra.mxu3 %vm7542_vm1, %v14907_v56  ;;  %vm7519_vm2 = vcmp.eq.s32.totalorder %v7498_v50, %v15679_v27  ;;  %vm7527_vm5 = vcmp.eq.s32.totalorder %v7498_v50, %v15699_v47  ;;  %vm7535_vm8 = vcmp.eq.s32.totalorder %v7498_v50, %v15711_v35  ;;  %vm7543_vm14 = vcmp.eq.s32.totalorder %v7498_v50, %v15752_v29 }
 0xeb0   : > { %vm7520_vm3 = vcmp.eq.s32.totalorder %v7499_v19, %v15679_v27  ;;  %vm7528_vm6 = vcmp.eq.s32.totalorder %v7499_v19, %v15699_v47  ;;  %vm7536_vm9 = vcmp.eq.s32.totalorder %v7499_v19, %v15711_v35  ;;  %vm7544_vm15 = vcmp.eq.s32.totalorder %v7499_v19, %v15752_v29 }
 0xeb1   : > { %vm7531_vm1 = vcmp.eq.s32.totalorder %v7502_v10, %v15699_v47 }
 0xeb6   : > { %8400 = vmatmul.msk.f32.vlgmr.msra.gmra.mxu1 %vm7519_vm2, %v14887_v32  ;;  %8404 = vmatmul.msk.f32.vlgmr.msra.gmra.mxu2 %vm7520_vm3, %v14887_v32  ;;  %vm7538_vm2 = vcmp.eq.s32.totalorder %v7501_v24, %v15711_v35  ;;  %vm7539_vm3 = vcmp.eq.s32.totalorder %v7502_v10, %v15711_v35 }
 0xeb7   : > { %8408 = vmatmul.msk.f32.vlgmr.msra.gmra.mxu3 %vm7521_vm4, %v14887_v32  ;;  %vm7546_vm4 = vcmp.eq.s32.totalorder %v7501_v24, %v15752_v29 }
 0xebe   : > { %8401 = vmatmul.msk.f32.gmra.mxu1 %vm7527_vm5, %v14897_v23  ;;  %8405 = vmatmul.msk.f32.gmra.mxu2 %vm7528_vm6, %v14897_v23  ;;  %vm7547_vm5 = vcmp.eq.s32.totalorder %v7502_v10, %v15752_v29  ;;  %vm17337_vm6 = vcmask 261120  }
 0xebf   : > { %8409 = vmatmul.msk.f32.gmra.mxu3 %vm7529_vm7, %v14897_v23  ;;  %vm17338_vm7 = vmmov %vm17337_vm6 }
 0xec6   : > { %8402 = vmatmul.msk.f32.gmra.mxu1 %vm7535_vm8, %v14884_v49  ;;  %8406 = vmatmul.msk.f32.gmra.mxu2 %vm7536_vm9, %v14884_v49  ;;  %vm17339_vm8 = vmmov %vm17337_vm6 }
 0xec7   : > { %8410 = vmatmul.msk.f32.gmra.mxu3 %vm7537_vm10, %v14884_v49  ;;  %vm17340_vm9 = vmmov %vm17337_vm6 }
 0xece   : > { %8403 = vmatmul.msk.f32.gmra.mxu1 %vm7543_vm14, %v14907_v56  ;;  %8407 = vmatmul.msk.f32.gmra.mxu2 %vm7544_vm15, %v14907_v56 }
 0xecf   : > { %8411 = vmatmul.msk.f32.gmra.mxu3 %vm7545_vm0, %v14907_v56 }
 0xed6   : > { %8412 = vmatmul.msk.f32.vlgmr.msrb.gmra.mxu1 %vm7522_vm11, %v14887_v32  ;;  %8416 = vmatmul.msk.f32.vlgmr.msrb.gmra.mxu2 %vm7523_vm12, %v14887_v32 }
 0xed8   : > { %v7725_v62 = vpop.f32.mrf.mxu1 }
 0xede   : > { %8413 = vmatmul.msk.f32.gmra.mxu1 %vm7530_vm13, %v14897_v23  ;;  %8417 = vmatmul.msk.f32.gmra.mxu2 %vm7531_vm1, %v14897_v23  ;;  %v7754_v32 = vpop.f32.mrf.mxu2 }
 0xedf   : > { %v7783_v60 = vpop.f32.mrf.mxu3 }
 0xee6   : > { %8414 = vmatmul.msk.f32.gmra.mxu1 %vm7538_vm2, %v14884_v49  ;;  %8418 = vmatmul.msk.f32.gmra.mxu2 %vm7539_vm3, %v14884_v49  ;;  %v7728_v27 = vpop.f32.mrf.mxu1 }
 0xeec   : > { %v7757_v23 = vpop.f32.mrf.mxu2 }
 0xeed   : > { %v7786_v52 = vpop.f32.mrf.mxu3  ;;  %v7758_v15 = vadd.f32 %v7757_v23, %v7728_v27 }
 0xeee   : > { %8415 = vmatmul.msk.f32.gmra.mxu1 %vm7546_vm4, %v14907_v56  ;;  %8419 = vmatmul.msk.f32.gmra.mxu2 %vm7547_vm5, %v14907_v56  ;;  %v7731_v47 = vpop.f32.mrf.mxu1  ;;  %v7755_v56 = vadd.f32 %v7754_v32, %v7725_v62 }
 0xeef   : > { %v7787_v11 = vadd.f32 %v7786_v52, %v7758_v15 }
 0xef0   : > { %v7784_v48 = vadd.f32 %v7783_v60, %v7755_v56 }
 0xef4   : > { %v7760_v38 = vpop.f32.mrf.mxu2 }
 0xef5   : > { %v7789_v26 = vpop.f32.mrf.mxu3  ;;  %v7761_v12 = vadd.f32 %v7760_v38, %v7731_v47 }
 0xef7   : > { %v7790_v44 = vadd.f32 %v7789_v26, %v7761_v12 }
 0xf2b   : > { %v7734_v35 = vpop.f32.mrf.mxu1 }
 0xf31   : > { %v7763_v40 = vpop.f32.mrf.mxu2 }
 0xf32   : > { %v7792_v14 = vpop.f32.mrf.mxu3  ;;  %v7764_v42 = vadd.f32 %v7763_v40, %v7734_v35 }
 0xf33   : > { %v7812_v59 = vpop.f32.mrf.mxu1 }
 0xf34   : > { %v7813_v4 = vadd.f32 %v7812_v59, %v7784_v48  ;;  %v7793_v57 = vadd.f32 %v7792_v14, %v7764_v42 }
 0xf39   : > { %v7841_v49 = vpop.f32.mrf.mxu2 }
 0xf3a   : > { %v7870_v17 = vpop.f32.mrf.mxu3  ;;  %v7842_v22 = vadd.f32 %v7841_v49, %v7813_v4 }
 0xf3b   : > { %v7815_v63 = vpop.f32.mrf.mxu1 }
 0xf3c   : > { %v7871_v34 = vadd.f32 %v7870_v17, %v7842_v22  ;;  %v7816_v18 = vadd.f32 %v7815_v63, %v7787_v11 }
 0xf41   : > { %v7844_v7 = vpop.f32.mrf.mxu2 }
 0xf42   : > { %v7873_v58 = vpop.f32.mrf.mxu3  ;;  %v7845_v25 = vadd.f32 %v7844_v7, %v7816_v18 }
 0xf43   : > { %v7818_v21 = vpop.f32.mrf.mxu1 }
 0xf44   : > { %v7874_v41 = vadd.f32 %v7873_v58, %v7845_v25  ;;  %v7819_v43 = vadd.f32 %v7818_v21, %v7790_v44 }
 0xf49   : > { %v7847_v5 = vpop.f32.mrf.mxu2 }
 0xf4a   : > { %v7848_v45 = vadd.f32 %v7847_v5, %v7819_v43  ;;  %v7876_v31 = vpop.f32.mrf.mxu3 }
 0xf4b   : > { %v7821_v61 = vpop.f32.mrf.mxu1 }
 0xf4c   : > { %v7877_v55 = vadd.f32 %v7876_v31, %v7848_v45  ;;  %v7822_v50 = vadd.f32 %v7821_v61, %v7793_v57 }
 0xf51   : > { %v7850_v20 = vpop.f32.mrf.mxu2 }
 0xf52   : > { %v7851_v9 = vadd.f32 %v7850_v20, %v7822_v50  ;;  %v7879_v16 = vpop.f32.mrf.mxu3 }
 0xf53   : > { %v7899_v3 = vpop.f32.mrf.mxu1 }
 0xf54   : > { %v7900_v28 = vadd.f32 %v7899_v3, %v7871_v34  ;;  %v7880_v8 = vadd.f32 %v7879_v16, %v7851_v9 }
 0xf59   : > { %v7928_v0 = vpop.f32.mrf.mxu2 }
 0xf5a   : > { %v7929_v39 = vadd.f32 %v7928_v0, %v7900_v28 }
 0xf5b   : > { %v7902_v1 = vpop.f32.mrf.mxu1 }
 0xf5c   : > { %7940 = vst.msk [vmem:[%s15819_s9] sm:$0xff] %vm17337_vm6, %v7929_v39  ;;  %v7903_v29 = vadd.f32 %v7902_v1, %v7874_v41 }
 0xf61   : > { %v7931_v13 = vpop.f32.mrf.mxu2 }
 0xf62   : > { %v7932_v46 = vadd.f32 %v7931_v13, %v7903_v29 }
 0xf63   : > { %v7905_v37 = vpop.f32.mrf.mxu1 }
 0xf64   : > { %7941 = vst.msk [vmem:[%s15819_s9 + $0x8] sm:$0xff] %vm17338_vm7, %v7932_v46  ;;  %v7906_v19 = vadd.f32 %v7905_v37, %v7877_v55 }
 0xf69   : > { %v7934_v51 = vpop.f32.mrf.mxu2 }
 0xf6a   : > { %v7935_v6 = vadd.f32 %v7934_v51, %v7906_v19 }
 0xf6b   : > { %v7908_v36 = vpop.f32.mrf.mxu1 }
 0xf6c   : > { %7942 = vst.msk [vmem:[%s15819_s9 + $0x10] sm:$0xff] %vm17339_vm8, %v7935_v6  ;;  %v7909_v53 = vadd.f32 %v7908_v36, %v7880_v8 }
 0xf71   : > { %v7937_v2 = vpop.f32.mrf.mxu2 }
 0xf72   : > { %v7938_v30 = vadd.f32 %v7937_v2, %v7909_v53 }
 0xf74   : > { %7943 = vst.msk [vmem:[%s15819_s9 + $0x18] sm:$0xff] %vm17340_vm9, %v7938_v30 }
 0xf75 PF: > { %s17_s21 = sadd.s32 1, %s9486_s21  }
 0xf76   : > { %p14_p5 = scmp.ge.s32.totalorder %s17_s21, 4  }
 0xf78   :  { %16 = sbr.rel (!%p14_p5) target bundleno = 1 (0x1), region = 85 }

</bundles_post_ra>
